<compile_context>
chip_gen: v5e
topology: v5e:2x2
jax: 0.10.0
libtpu: 0.0.40
codegen_flags: <defaults>
</compile_context>

<pallas_src>
import functools

import jax
import jax.numpy as jnp
from jax.experimental import pallas as pl
from jax.experimental.pallas import tpu as pltpu


def _sam_kernel(x_ref, ximg_ref, mask_ref, w12_ref, b12_ref, w3_ref, b3_ref,
                out_ref, pad_ref, slab_ref, *, H, W, P, C):
    """Fused SAM forward for one batch element.

    Layout: spatial (H*W) on sublanes, channels on lanes.  The padded bf16 scratch
    has P zero rows above and below the H*W interior; a 3x3 tap (dh, dw) window is
    pad[P + dh*W + dw : + HW, :Cin].  The 9 windows are packed into lane bands of
    the im2col slab so each conv is a single MXU matmul with f32 accumulation.
    """
    HW = H * W
    Cpad = pad_ref.shape[1]

    # Zero only the 2*P halo rows; the interior is fully overwritten below.
    zeros_halo = jnp.zeros((P, Cpad), pad_ref.dtype)
    pad_ref[0:P, :] = zeros_halo
    pad_ref[P + HW:P + HW + P, :] = zeros_halo

    # Cast activations to bf16 once when writing the scratch (not per tap).
    x_f32 = x_ref[0]                                     # (HW, C) f32
    pad_ref[P:P + HW, 0:C] = x_f32.astype(jnp.bfloat16)

    # Wrapper-precomputed 0/1 bf16 masks for the w-border taps.
    m_left = mask_ref[:, 0:1]                            # valid where w >= 1
    m_right = mask_ref[:, 1:2]                           # valid where w <= W-2

    def build_slab(cin):
        # im2col: 9 sublane-shifted windows -> lane bands [t*cin, (t+1)*cin).
        t = 0
        for dh in (-1, 0, 1):
            for dw in (-1, 0, 1):
                start = P + dh * W + dw                  # static, >= 0
                win = pad_ref[start:start + HW, 0:cin]   # (HW, cin) bf16
                if dw == -1:
                    win = win * m_left
                elif dw == 1:
                    win = win * m_right
                slab_ref[:, t * cin:(t + 1) * cin] = win
                t += 1

    # Phase 1: conv1(x) and conv2(x) fused into one (HW, 9C) @ (9C, C+3) matmul.
    build_slab(C)
    out12 = jnp.dot(slab_ref[:, 0:9 * C], w12_ref[...],
                    preferred_element_type=jnp.float32) + b12_ref[...]
    y1 = out12[:, 0:C]                                   # conv1(x) + b1
    img = out12[:, C:C + 3] + ximg_ref[0]                # conv2(x) + b2 + x_img

    # Phase 2: conv3(img) as one (HW, 27) @ (27, C) matmul (halo rows still zero).
    pad_ref[P:P + HW, 0:3] = img.astype(jnp.bfloat16)
    build_slab(3)
    y3 = jnp.dot(slab_ref[:, 0:27], w3_ref[...],
                 preferred_element_type=jnp.float32) + b3_ref[...]

    # Sigmoid gate (reciprocal goes to the EUP slot) + residual.
    x2 = pl.reciprocal(1.0 + jnp.exp(-y3), approx=True)
    x1 = y1 * x2 + x_f32

    # Single (HW, C+3) output slab: [x1 | img].
    out_ref[0, :, 0:C] = x1.astype(out_ref.dtype)
    out_ref[0, :, C:C + 3] = img.astype(out_ref.dtype)


def sam_forward(x, x_img, w1, b1, w2, b2, w3, b3):
    """Pallas equivalent of SAM.forward.

    x:      (B, n_feat, H, W)  float32 (NCHW, like the PyTorch module)
    x_img:  (B, 3, H, W)       float32
    w*/b*:  PyTorch Conv2d parameters (OIHW weights, 1-D biases).
    Returns (x1, img) in NCHW.
    """
    B, C, H, W = x.shape
    HW = H * W
    P = ((W + 1 + 15) // 16) * 16        # >= W+1 halo reach, 16-row aligned (bf16)
    Cpad = max(C, 3)
    K1 = 9 * C
    slab_w = max(K1, 27)

    # NCHW -> (B, HW, C): spatial on sublanes, channels on lanes.
    x_cl = jnp.transpose(x, (0, 2, 3, 1)).reshape(B, HW, C)
    ximg_cl = jnp.transpose(x_img, (0, 2, 3, 1)).reshape(B, HW, 3)

    def taps_flat(w):
        # OIHW -> (9*Cin, Cout) bf16; row index = (kh*3 + kw)*Cin + cin.
        co, ci = w.shape[0], w.shape[1]
        return jnp.transpose(w, (2, 3, 1, 0)).reshape(9 * ci, co).astype(jnp.bfloat16)

    w12 = jnp.concatenate([taps_flat(w1), taps_flat(w2)], axis=1)    # (9C, C+3)
    b12 = jnp.concatenate([b1, b2]).reshape(1, C + 3).astype(jnp.float32)
    w3f = taps_flat(w3)                                              # (27, C)
    b3r = b3.reshape(1, C).astype(jnp.float32)

    # 0/1 border masks for dw = -1 / +1 taps (exact integer arithmetic, wrapper-side).
    w_idx = jnp.arange(HW, dtype=jnp.int32) % W
    mask_lr = jnp.stack([w_idx >= 1, w_idx <= W - 2], axis=1).astype(jnp.bfloat16)

    kernel = functools.partial(_sam_kernel, H=H, W=W, P=P, C=C)

    # Rough VMEM budget (double-buffered blocks + weights + scratch), clipped so it
    # is safe on every generation (<= 64 MiB, v7x physical VMEM per TensorCore).
    est = 2 * (HW * C + HW * 3 + HW * (C + 3)) * 4
    est += (K1 * (C + 3) + 27 * C + HW * 2) * 2 + (2 * C + 3) * 4
    est += ((HW + 2 * P) * Cpad + HW * slab_w) * 2
    vmem_limit = int(min(max(4 * est, 32 * 1024 * 1024), 64 * 1024 * 1024))

    out = pl.pallas_call(
        kernel,
        out_shape=jax.ShapeDtypeStruct((B, HW, C + 3), x.dtype),
        grid_spec=pltpu.PrefetchScalarGridSpec(
            num_scalar_prefetch=0,
            grid=(B,),
            in_specs=[
                pl.BlockSpec((1, HW, C), lambda b: (b, 0, 0)),        # x
                pl.BlockSpec((1, HW, 3), lambda b: (b, 0, 0)),        # x_img
                pl.BlockSpec((HW, 2), lambda b: (0, 0)),              # border masks
                pl.BlockSpec((K1, C + 3), lambda b: (0, 0)),          # conv1|conv2 W
                pl.BlockSpec((1, C + 3), lambda b: (0, 0)),           # conv1|conv2 b
                pl.BlockSpec((27, C), lambda b: (0, 0)),              # conv3 W
                pl.BlockSpec((1, C), lambda b: (0, 0)),               # conv3 b
            ],
            out_specs=pl.BlockSpec((1, HW, C + 3), lambda b: (b, 0, 0)),
            scratch_shapes=[pltpu.VMEM((HW + 2 * P, Cpad), jnp.bfloat16),
                            pltpu.VMEM((HW, slab_w), jnp.bfloat16)],
        ),
        compiler_params=pltpu.CompilerParams(
            dimension_semantics=("parallel",),
            vmem_limit_bytes=vmem_limit),
    )(x_cl, ximg_cl, mask_lr, w12, b12, w3f, b3r)

    x1 = jnp.transpose(out[:, :, 0:C].reshape(B, H, W, C), (0, 3, 1, 2))
    img = jnp.transpose(out[:, :, C:C + 3].reshape(B, H, W, 3), (0, 3, 1, 2))
    return x1, img


def _reference(x, x_img, w1, b1, w2, b2, w3, b3):
    """Pure-JAX reference (float32) for verification."""
    def conv3x3(a, w, b):
        y = jax.lax.conv_general_dilated(
            a, w, window_strides=(1, 1), padding="SAME",
            dimension_numbers=("NCHW", "OIHW", "NCHW"))
        return y + b[None, :, None, None]

    x1 = conv3x3(x, w1, b1)
    img = conv3x3(x, w2, b2) + x_img
    x2 = jax.nn.sigmoid(conv3x3(img, w3, b3))
    return x1 * x2 + x, img


if __name__ == "__main__":
    key = jax.random.PRNGKey(0)
    ks = jax.random.split(key, 8)

    B, n_feat, H, W = 2, 4, 16, 16

    x = jax.random.normal(ks[0], (B, n_feat, H, W), dtype=jnp.float32)
    x_img = jax.random.normal(ks[1], (B, 3, H, W), dtype=jnp.float32)

    def conv_params(kw_key, kb_key, cout, cin):
        fan_in = cin * 9
        bound = 1.0 / (fan_in ** 0.5)
        w = jax.random.uniform(kw_key, (cout, cin, 3, 3), jnp.float32,
                               minval=-bound, maxval=bound)
        b = jax.random.uniform(kb_key, (cout,), jnp.float32,
                               minval=-bound, maxval=bound)
        return w, b

    w1, b1 = conv_params(ks[2], ks[3], n_feat, n_feat)   # conv(n_feat, n_feat)
    w2, b2 = conv_params(ks[4], ks[5], 3, n_feat)        # conv(n_feat, 3)
    w3, b3 = conv_params(ks[6], ks[7], n_feat, 3)        # conv(3, n_feat)

    x1_out, img_out = sam_forward(x, x_img, w1, b1, w2, b2, w3, b3)
    x1_out = jax.block_until_ready(x1_out)
    img_out = jax.block_until_ready(img_out)

    x1_exp, img_exp = _reference(x, x_img, w1, b1, w2, b2, w3, b3)

    assert x1_out.shape == (B, n_feat, H, W), x1_out.shape
    assert img_out.shape == (B, 3, H, W), img_out.shape
    # bf16 MXU operands with f32 accumulation (+ approx reciprocal in the gate)
    # -> ~1e-3 level error vs the f32 reference; use a loose tolerance.
    assert jnp.allclose(img_out, img_exp, atol=3e-2, rtol=3e-2), "img mismatch"
    assert jnp.allclose(x1_out, x1_exp, atol=3e-2, rtol=3e-2), "x1 mismatch"

    print("KERNEL_OK")
</pallas_src>

<mosaic_0001>
module attributes {stable_mosaic.version = 11 : i64} {
  func.func @_sam_kernel(%arg0: i32, %arg1: memref<1x256x4xf32, #tpu.memory_space<vmem>>, %arg2: memref<1x256x3xf32, #tpu.memory_space<vmem>>, %arg3: memref<256x2xbf16, #tpu.memory_space<vmem>>, %arg4: memref<36x7xbf16, #tpu.memory_space<vmem>>, %arg5: memref<1x7xf32, #tpu.memory_space<vmem>>, %arg6: memref<27x4xbf16, #tpu.memory_space<vmem>>, %arg7: memref<1x4xf32, #tpu.memory_space<vmem>>, %arg8: memref<1x256x7xf32, #tpu.memory_space<vmem>>, %arg9: memref<320x4xbf16, #tpu.memory_space<vmem>>, %arg10: memref<256x36xbf16, #tpu.memory_space<vmem>>) attributes {dimension_semantics = [#tpu.dimension_semantics<parallel>], iteration_bounds = array<i64: 2>, scalar_prefetch = 0 : i64, scratch_operands = 2 : i64, tpu.core_type = #tpu.core_type<tc>, window_params = [{transform_indices = @transform_0, window_bounds = array<i64: 1, 256, 4>}, {transform_indices = @transform_1, window_bounds = array<i64: 1, 256, 3>}, {pipeline_mode = #tpu.pipeline_mode<synchronous>, transform_indices = @transform_2, window_bounds = array<i64: 256, 2>}, {pipeline_mode = #tpu.pipeline_mode<synchronous>, transform_indices = @transform_3, window_bounds = array<i64: 36, 7>}, {pipeline_mode = #tpu.pipeline_mode<synchronous>, transform_indices = @transform_4, window_bounds = array<i64: 1, 7>}, {pipeline_mode = #tpu.pipeline_mode<synchronous>, transform_indices = @transform_5, window_bounds = array<i64: 27, 4>}, {pipeline_mode = #tpu.pipeline_mode<synchronous>, transform_indices = @transform_6, window_bounds = array<i64: 1, 4>}, {transform_indices = @transform_7, window_bounds = array<i64: 1, 256, 7>}]} {
    %cst = arith.constant 0.000000e+00 : bf16
    %0 = vector.broadcast %cst : bf16 to vector<32x4xbf16>
    %c0 = arith.constant 0 : index
    %c0_0 = arith.constant 0 : index
    %1 = vector.load %arg9[%c0, %c0_0] : memref<320x4xbf16, #tpu.memory_space<vmem>>, vector<32x4xbf16>
    tpu.vector_store %arg9[%c0, %c0_0], %0 {strides = array<i32>} : memref<320x4xbf16, #tpu.memory_space<vmem>>, vector<32x4xbf16>,
    %c288 = arith.constant 288 : index
    %c0_1 = arith.constant 0 : index
    %2 = vector.load %arg9[%c288, %c0_1] : memref<320x4xbf16, #tpu.memory_space<vmem>>, vector<32x4xbf16>
    tpu.vector_store %arg9[%c288, %c0_1], %0 {strides = array<i32>} : memref<320x4xbf16, #tpu.memory_space<vmem>>, vector<32x4xbf16>,
    %c0_2 = arith.constant 0 : index
    %c0_3 = arith.constant 0 : index
    %c0_4 = arith.constant 0 : index
    %3 = vector.load %arg1[%c0_2, %c0_3, %c0_4] : memref<1x256x4xf32, #tpu.memory_space<vmem>>, vector<1x256x4xf32>
    %4 = vector.shape_cast %3 : vector<1x256x4xf32> to vector<256x4xf32>
    %5 = arith.truncf %4 : vector<256x4xf32> to vector<256x4xbf16>
    %c32 = arith.constant 32 : index
    %c0_5 = arith.constant 0 : index
    %6 = vector.load %arg9[%c32, %c0_5] : memref<320x4xbf16, #tpu.memory_space<vmem>>, vector<256x4xbf16>
    tpu.vector_store %arg9[%c32, %c0_5], %5 {strides = array<i32>} : memref<320x4xbf16, #tpu.memory_space<vmem>>, vector<256x4xbf16>,
    %c0_6 = arith.constant 0 : index
    %c0_7 = arith.constant 0 : index
    %7 = vector.load %arg3[%c0_6, %c0_7] : memref<256x2xbf16, #tpu.memory_space<vmem>>, vector<256x1xbf16>
    %c0_8 = arith.constant 0 : index
    %c1 = arith.constant 1 : index
    %8 = vector.load %arg3[%c0_8, %c1] : memref<256x2xbf16, #tpu.memory_space<vmem>>, vector<256x1xbf16>
    %c15 = arith.constant 15 : index
    %c0_9 = arith.constant 0 : index
    %9 = vector.load %arg9[%c15, %c0_9] : memref<320x4xbf16, #tpu.memory_space<vmem>>, vector<256x4xbf16>
    %10 = vector.broadcast %7 : vector<256x1xbf16> to vector<256x4xbf16>
    %11 = arith.mulf %9, %10 : vector<256x4xbf16>
    %c0_10 = arith.constant 0 : index
    %c0_11 = arith.constant 0 : index
    %12 = vector.load %arg10[%c0_10, %c0_11] : memref<256x36xbf16, #tpu.memory_space<vmem>>, vector<256x4xbf16>
    tpu.vector_store %arg10[%c0_10, %c0_11], %11 {strides = array<i32>} : memref<256x36xbf16, #tpu.memory_space<vmem>>, vector<256x4xbf16>,
    %c16 = arith.constant 16 : index
    %c0_12 = arith.constant 0 : index
    %13 = vector.load %arg9[%c16, %c0_12] : memref<320x4xbf16, #tpu.memory_space<vmem>>, vector<256x4xbf16>
    %c0_13 = arith.constant 0 : index
    %c4 = arith.constant 4 : index
    %14 = vector.load %arg10[%c0_13, %c4] : memref<256x36xbf16, #tpu.memory_space<vmem>>, vector<256x4xbf16>
    tpu.vector_store %arg10[%c0_13, %c4], %13 {strides = array<i32>} : memref<256x36xbf16, #tpu.memory_space<vmem>>, vector<256x4xbf16>,
    %c17 = arith.constant 17 : index
    %c0_14 = arith.constant 0 : index
    %15 = vector.load %arg9[%c17, %c0_14] : memref<320x4xbf16, #tpu.memory_space<vmem>>, vector<256x4xbf16>
    %16 = vector.broadcast %8 : vector<256x1xbf16> to vector<256x4xbf16>
    %17 = arith.mulf %15, %16 : vector<256x4xbf16>
    %c0_15 = arith.constant 0 : index
    %c8 = arith.constant 8 : index
    %18 = vector.load %arg10[%c0_15, %c8] : memref<256x36xbf16, #tpu.memory_space<vmem>>, vector<256x4xbf16>
    tpu.vector_store %arg10[%c0_15, %c8], %17 {strides = array<i32>} : memref<256x36xbf16, #tpu.memory_space<vmem>>, vector<256x4xbf16>,
    %c31 = arith.constant 31 : index
    %c0_16 = arith.constant 0 : index
    %19 = vector.load %arg9[%c31, %c0_16] : memref<320x4xbf16, #tpu.memory_space<vmem>>, vector<256x4xbf16>
    %20 = vector.broadcast %7 : vector<256x1xbf16> to vector<256x4xbf16>
    %21 = arith.mulf %19, %20 : vector<256x4xbf16>
    %c0_17 = arith.constant 0 : index
    %c12 = arith.constant 12 : index
    %22 = vector.load %arg10[%c0_17, %c12] : memref<256x36xbf16, #tpu.memory_space<vmem>>, vector<256x4xbf16>
    tpu.vector_store %arg10[%c0_17, %c12], %21 {strides = array<i32>} : memref<256x36xbf16, #tpu.memory_space<vmem>>, vector<256x4xbf16>,
    %c32_18 = arith.constant 32 : index
    %c0_19 = arith.constant 0 : index
    %23 = vector.load %arg9[%c32_18, %c0_19] : memref<320x4xbf16, #tpu.memory_space<vmem>>, vector<256x4xbf16>
    %c0_20 = arith.constant 0 : index
    %c16_21 = arith.constant 16 : index
    %24 = vector.load %arg10[%c0_20, %c16_21] : memref<256x36xbf16, #tpu.memory_space<vmem>>, vector<256x4xbf16>
    tpu.vector_store %arg10[%c0_20, %c16_21], %23 {strides = array<i32>} : memref<256x36xbf16, #tpu.memory_space<vmem>>, vector<256x4xbf16>,
    %c33 = arith.constant 33 : index
    %c0_22 = arith.constant 0 : index
    %25 = vector.load %arg9[%c33, %c0_22] : memref<320x4xbf16, #tpu.memory_space<vmem>>, vector<256x4xbf16>
    %26 = vector.broadcast %8 : vector<256x1xbf16> to vector<256x4xbf16>
    %27 = arith.mulf %25, %26 : vector<256x4xbf16>
    %c0_23 = arith.constant 0 : index
    %c20 = arith.constant 20 : index
    %28 = vector.load %arg10[%c0_23, %c20] : memref<256x36xbf16, #tpu.memory_space<vmem>>, vector<256x4xbf16>
    tpu.vector_store %arg10[%c0_23, %c20], %27 {strides = array<i32>} : memref<256x36xbf16, #tpu.memory_space<vmem>>, vector<256x4xbf16>,
    %c47 = arith.constant 47 : index
    %c0_24 = arith.constant 0 : index
    %29 = vector.load %arg9[%c47, %c0_24] : memref<320x4xbf16, #tpu.memory_space<vmem>>, vector<256x4xbf16>
    %30 = vector.broadcast %7 : vector<256x1xbf16> to vector<256x4xbf16>
    %31 = arith.mulf %29, %30 : vector<256x4xbf16>
    %c0_25 = arith.constant 0 : index
    %c24 = arith.constant 24 : index
    %32 = vector.load %arg10[%c0_25, %c24] : memref<256x36xbf16, #tpu.memory_space<vmem>>, vector<256x4xbf16>
    tpu.vector_store %arg10[%c0_25, %c24], %31 {strides = array<i32>} : memref<256x36xbf16, #tpu.memory_space<vmem>>, vector<256x4xbf16>,
    %c48 = arith.constant 48 : index
    %c0_26 = arith.constant 0 : index
    %33 = vector.load %arg9[%c48, %c0_26] : memref<320x4xbf16, #tpu.memory_space<vmem>>, vector<256x4xbf16>
    %c0_27 = arith.constant 0 : index
    %c28 = arith.constant 28 : index
    %34 = vector.load %arg10[%c0_27, %c28] : memref<256x36xbf16, #tpu.memory_space<vmem>>, vector<256x4xbf16>
    tpu.vector_store %arg10[%c0_27, %c28], %33 {strides = array<i32>} : memref<256x36xbf16, #tpu.memory_space<vmem>>, vector<256x4xbf16>,
    %c49 = arith.constant 49 : index
    %c0_28 = arith.constant 0 : index
    %35 = vector.load %arg9[%c49, %c0_28] : memref<320x4xbf16, #tpu.memory_space<vmem>>, vector<256x4xbf16>
    %36 = vector.broadcast %8 : vector<256x1xbf16> to vector<256x4xbf16>
    %37 = arith.mulf %35, %36 : vector<256x4xbf16>
    %c0_29 = arith.constant 0 : index
    %c32_30 = arith.constant 32 : index
    %38 = vector.load %arg10[%c0_29, %c32_30] : memref<256x36xbf16, #tpu.memory_space<vmem>>, vector<256x4xbf16>
    tpu.vector_store %arg10[%c0_29, %c32_30], %37 {strides = array<i32>} : memref<256x36xbf16, #tpu.memory_space<vmem>>, vector<256x4xbf16>,
    %c0_31 = arith.constant 0 : index
    %c0_32 = arith.constant 0 : index
    %39 = vector.load %arg10[%c0_31, %c0_32] : memref<256x36xbf16, #tpu.memory_space<vmem>>, vector<256x36xbf16>
    %c0_33 = arith.constant 0 : index
    %c0_34 = arith.constant 0 : index
    %40 = vector.load %arg4[%c0_33, %c0_34] : memref<36x7xbf16, #tpu.memory_space<vmem>>, vector<36x7xbf16>
    %cst_35 = arith.constant dense<0.000000e+00> : vector<256x7xf32>
    %41 = tpu.matmul %39, %40, %cst_35 {dimension_numbers = #tpu.dot_dimension_numbers<[1], [0], [0], [1], [0, 0, 1, 1], [], []>} : vector<256x36xbf16>, vector<36x7xbf16>, vector<256x7xf32> -> vector<256x7xf32>
    %c0_36 = arith.constant 0 : index
    %c0_37 = arith.constant 0 : index
    %42 = vector.load %arg5[%c0_36, %c0_37] : memref<1x7xf32, #tpu.memory_space<vmem>>, vector<1x7xf32>
    %43 = vector.broadcast %42 : vector<1x7xf32> to vector<256x7xf32>
    %44 = arith.addf %41, %43 : vector<256x7xf32>
    %45 = vector.extract_strided_slice %44 {offsets = [0, 0], sizes = [256, 4], strides = [1, 1]} : vector<256x7xf32> to vector<256x4xf32>
    %46 = vector.extract_strided_slice %44 {offsets = [0, 4], sizes = [256, 3], strides = [1, 1]} : vector<256x7xf32> to vector<256x3xf32>
    %c0_38 = arith.constant 0 : index
    %c0_39 = arith.constant 0 : index
    %c0_40 = arith.constant 0 : index
    %47 = vector.load %arg2[%c0_38, %c0_39, %c0_40] : memref<1x256x3xf32, #tpu.memory_space<vmem>>, vector<1x256x3xf32>
    %48 = vector.shape_cast %47 : vector<1x256x3xf32> to vector<256x3xf32>
    %49 = arith.addf %46, %48 : vector<256x3xf32>
    %50 = arith.truncf %49 : vector<256x3xf32> to vector<256x3xbf16>
    %c32_41 = arith.constant 32 : index
    %c0_42 = arith.constant 0 : index
    %51 = vector.load %arg9[%c32_41, %c0_42] : memref<320x4xbf16, #tpu.memory_space<vmem>>, vector<256x3xbf16>
    tpu.vector_store %arg9[%c32_41, %c0_42], %50 {strides = array<i32>} : memref<320x4xbf16, #tpu.memory_space<vmem>>, vector<256x3xbf16>,
    %c15_43 = arith.constant 15 : index
    %c0_44 = arith.constant 0 : index
    %52 = vector.load %arg9[%c15_43, %c0_44] : memref<320x4xbf16, #tpu.memory_space<vmem>>, vector<256x3xbf16>
    %53 = vector.broadcast %7 : vector<256x1xbf16> to vector<256x3xbf16>
    %54 = arith.mulf %52, %53 : vector<256x3xbf16>
    %c0_45 = arith.constant 0 : index
    %c0_46 = arith.constant 0 : index
    %55 = vector.load %arg10[%c0_45, %c0_46] : memref<256x36xbf16, #tpu.memory_space<vmem>>, vector<256x3xbf16>
    tpu.vector_store %arg10[%c0_45, %c0_46], %54 {strides = array<i32>} : memref<256x36xbf16, #tpu.memory_space<vmem>>, vector<256x3xbf16>,
    %c16_47 = arith.constant 16 : index
    %c0_48 = arith.constant 0 : index
    %56 = vector.load %arg9[%c16_47, %c0_48] : memref<320x4xbf16, #tpu.memory_space<vmem>>, vector<256x3xbf16>
    %c0_49 = arith.constant 0 : index
    %c3 = arith.constant 3 : index
    %57 = vector.load %arg10[%c0_49, %c3] : memref<256x36xbf16, #tpu.memory_space<vmem>>, vector<256x3xbf16>
    tpu.vector_store %arg10[%c0_49, %c3], %56 {strides = array<i32>} : memref<256x36xbf16, #tpu.memory_space<vmem>>, vector<256x3xbf16>,
    %c17_50 = arith.constant 17 : index
    %c0_51 = arith.constant 0 : index
    %58 = vector.load %arg9[%c17_50, %c0_51] : memref<320x4xbf16, #tpu.memory_space<vmem>>, vector<256x3xbf16>
    %59 = vector.broadcast %8 : vector<256x1xbf16> to vector<256x3xbf16>
    %60 = arith.mulf %58, %59 : vector<256x3xbf16>
    %c0_52 = arith.constant 0 : index
    %c6 = arith.constant 6 : index
    %61 = vector.load %arg10[%c0_52, %c6] : memref<256x36xbf16, #tpu.memory_space<vmem>>, vector<256x3xbf16>
    tpu.vector_store %arg10[%c0_52, %c6], %60 {strides = array<i32>} : memref<256x36xbf16, #tpu.memory_space<vmem>>, vector<256x3xbf16>,
    %c31_53 = arith.constant 31 : index
    %c0_54 = arith.constant 0 : index
    %62 = vector.load %arg9[%c31_53, %c0_54] : memref<320x4xbf16, #tpu.memory_space<vmem>>, vector<256x3xbf16>
    %63 = vector.broadcast %7 : vector<256x1xbf16> to vector<256x3xbf16>
    %64 = arith.mulf %62, %63 : vector<256x3xbf16>
    %c0_55 = arith.constant 0 : index
    %c9 = arith.constant 9 : index
    %65 = vector.load %arg10[%c0_55, %c9] : memref<256x36xbf16, #tpu.memory_space<vmem>>, vector<256x3xbf16>
    tpu.vector_store %arg10[%c0_55, %c9], %64 {strides = array<i32>} : memref<256x36xbf16, #tpu.memory_space<vmem>>, vector<256x3xbf16>,
    %c32_56 = arith.constant 32 : index
    %c0_57 = arith.constant 0 : index
    %66 = vector.load %arg9[%c32_56, %c0_57] : memref<320x4xbf16, #tpu.memory_space<vmem>>, vector<256x3xbf16>
    %c0_58 = arith.constant 0 : index
    %c12_59 = arith.constant 12 : index
    %67 = vector.load %arg10[%c0_58, %c12_59] : memref<256x36xbf16, #tpu.memory_space<vmem>>, vector<256x3xbf16>
    tpu.vector_store %arg10[%c0_58, %c12_59], %66 {strides = array<i32>} : memref<256x36xbf16, #tpu.memory_space<vmem>>, vector<256x3xbf16>,
    %c33_60 = arith.constant 33 : index
    %c0_61 = arith.constant 0 : index
    %68 = vector.load %arg9[%c33_60, %c0_61] : memref<320x4xbf16, #tpu.memory_space<vmem>>, vector<256x3xbf16>
    %69 = vector.broadcast %8 : vector<256x1xbf16> to vector<256x3xbf16>
    %70 = arith.mulf %68, %69 : vector<256x3xbf16>
    %c0_62 = arith.constant 0 : index
    %c15_63 = arith.constant 15 : index
    %71 = vector.load %arg10[%c0_62, %c15_63] : memref<256x36xbf16, #tpu.memory_space<vmem>>, vector<256x3xbf16>
    tpu.vector_store %arg10[%c0_62, %c15_63], %70 {strides = array<i32>} : memref<256x36xbf16, #tpu.memory_space<vmem>>, vector<256x3xbf16>,
    %c47_64 = arith.constant 47 : index
    %c0_65 = arith.constant 0 : index
    %72 = vector.load %arg9[%c47_64, %c0_65] : memref<320x4xbf16, #tpu.memory_space<vmem>>, vector<256x3xbf16>
    %73 = vector.broadcast %7 : vector<256x1xbf16> to vector<256x3xbf16>
    %74 = arith.mulf %72, %73 : vector<256x3xbf16>
    %c0_66 = arith.constant 0 : index
    %c18 = arith.constant 18 : index
    %75 = vector.load %arg10[%c0_66, %c18] : memref<256x36xbf16, #tpu.memory_space<vmem>>, vector<256x3xbf16>
    tpu.vector_store %arg10[%c0_66, %c18], %74 {strides = array<i32>} : memref<256x36xbf16, #tpu.memory_space<vmem>>, vector<256x3xbf16>,
    %c48_67 = arith.constant 48 : index
    %c0_68 = arith.constant 0 : index
    %76 = vector.load %arg9[%c48_67, %c0_68] : memref<320x4xbf16, #tpu.memory_space<vmem>>, vector<256x3xbf16>
    %c0_69 = arith.constant 0 : index
    %c21 = arith.constant 21 : index
    %77 = vector.load %arg10[%c0_69, %c21] : memref<256x36xbf16, #tpu.memory_space<vmem>>, vector<256x3xbf16>
    tpu.vector_store %arg10[%c0_69, %c21], %76 {strides = array<i32>} : memref<256x36xbf16, #tpu.memory_space<vmem>>, vector<256x3xbf16>,
    %c49_70 = arith.constant 49 : index
    %c0_71 = arith.constant 0 : index
    %78 = vector.load %arg9[%c49_70, %c0_71] : memref<320x4xbf16, #tpu.memory_space<vmem>>, vector<256x3xbf16>
    %79 = vector.broadcast %8 : vector<256x1xbf16> to vector<256x3xbf16>
    %80 = arith.mulf %78, %79 : vector<256x3xbf16>
    %c0_72 = arith.constant 0 : index
    %c24_73 = arith.constant 24 : index
    %81 = vector.load %arg10[%c0_72, %c24_73] : memref<256x36xbf16, #tpu.memory_space<vmem>>, vector<256x3xbf16>
    tpu.vector_store %arg10[%c0_72, %c24_73], %80 {strides = array<i32>} : memref<256x36xbf16, #tpu.memory_space<vmem>>, vector<256x3xbf16>,
    %c0_74 = arith.constant 0 : index
    %c0_75 = arith.constant 0 : index
    %82 = vector.load %arg10[%c0_74, %c0_75] : memref<256x36xbf16, #tpu.memory_space<vmem>>, vector<256x27xbf16>
    %c0_76 = arith.constant 0 : index
    %c0_77 = arith.constant 0 : index
    %83 = vector.load %arg6[%c0_76, %c0_77] : memref<27x4xbf16, #tpu.memory_space<vmem>>, vector<27x4xbf16>
    %cst_78 = arith.constant dense<0.000000e+00> : vector<256x4xf32>
    %84 = tpu.matmul %82, %83, %cst_78 {dimension_numbers = #tpu.dot_dimension_numbers<[1], [0], [0], [1], [0, 0, 1, 1], [], []>} : vector<256x27xbf16>, vector<27x4xbf16>, vector<256x4xf32> -> vector<256x4xf32>
    %c0_79 = arith.constant 0 : index
    %c0_80 = arith.constant 0 : index
    %85 = vector.load %arg7[%c0_79, %c0_80] : memref<1x4xf32, #tpu.memory_space<vmem>>, vector<1x4xf32>
    %86 = vector.broadcast %85 : vector<1x4xf32> to vector<256x4xf32>
    %87 = arith.addf %84, %86 : vector<256x4xf32>
    %cst_81 = arith.constant 0.000000e+00 : f32
    %88 = vector.broadcast %cst_81 : f32 to vector<256x4xf32>
    %89 = arith.subf %88, %87 : vector<256x4xf32>
    %90 = math.exp %89 : vector<256x4xf32>
    %cst_82 = arith.constant 1.000000e+00 : f32
    %91 = vector.broadcast %cst_82 : f32 to vector<256x4xf32>
    %92 = arith.addf %91, %90 : vector<256x4xf32>
    %93 = tpu.reciprocal %92 {approx = true} : vector<256x4xf32> -> vector<256x4xf32>
    %94 = arith.mulf %45, %93 : vector<256x4xf32>
    %95 = arith.addf %94, %4 : vector<256x4xf32>
    %c0_83 = arith.constant 0 : index
    %c0_84 = arith.constant 0 : index
    %c0_85 = arith.constant 0 : index
    %96 = vector.load %arg8[%c0_83, %c0_84, %c0_85] : memref<1x256x7xf32, #tpu.memory_space<vmem>>, vector<1x256x4xf32>
    %97 = vector.shape_cast %96 : vector<1x256x4xf32> to vector<256x4xf32>
    %98 = vector.shape_cast %95 : vector<256x4xf32> to vector<1x256x4xf32>
    tpu.vector_store %arg8[%c0_83, %c0_84, %c0_85], %98 {strides = array<i32>} : memref<1x256x7xf32, #tpu.memory_space<vmem>>, vector<1x256x4xf32>,
    %c0_86 = arith.constant 0 : index
    %c0_87 = arith.constant 0 : index
    %c4_88 = arith.constant 4 : index
    %99 = vector.load %arg8[%c0_86, %c0_87, %c4_88] : memref<1x256x7xf32, #tpu.memory_space<vmem>>, vector<1x256x3xf32>
    %100 = vector.shape_cast %99 : vector<1x256x3xf32> to vector<256x3xf32>
    %101 = vector.shape_cast %49 : vector<256x3xf32> to vector<1x256x3xf32>
    tpu.vector_store %arg8[%c0_86, %c0_87, %c4_88], %101 {strides = array<i32>} : memref<1x256x7xf32, #tpu.memory_space<vmem>>, vector<1x256x3xf32>,
    return
  }
  func.func @transform_0(%arg0: i32) -> (i32, i32, i32) {
    %c0_i32 = arith.constant 0 : i32
    %c0_i32_0 = arith.constant 0 : i32
    %c0_i32_1 = arith.constant 0 : i32
    return %arg0, %c0_i32, %c0_i32_0 : i32, i32, i32
  }
  func.func @transform_1(%arg0: i32) -> (i32, i32, i32) {
    %c0_i32 = arith.constant 0 : i32
    %c0_i32_0 = arith.constant 0 : i32
    %c0_i32_1 = arith.constant 0 : i32
    return %arg0, %c0_i32, %c0_i32_0 : i32, i32, i32
  }
  func.func @transform_2(%arg0: i32) -> (i32, i32) {
    %c0_i32 = arith.constant 0 : i32
    %c0_i32_0 = arith.constant 0 : i32
    %c0_i32_1 = arith.constant 0 : i32
    return %c0_i32, %c0_i32_0 : i32, i32
  }
  func.func @transform_3(%arg0: i32) -> (i32, i32) {
    %c0_i32 = arith.constant 0 : i32
    %c0_i32_0 = arith.constant 0 : i32
    %c0_i32_1 = arith.constant 0 : i32
    return %c0_i32, %c0_i32_0 : i32, i32
  }
  func.func @transform_4(%arg0: i32) -> (i32, i32) {
    %c0_i32 = arith.constant 0 : i32
    %c0_i32_0 = arith.constant 0 : i32
    %c0_i32_1 = arith.constant 0 : i32
    return %c0_i32, %c0_i32_0 : i32, i32
  }
  func.func @transform_5(%arg0: i32) -> (i32, i32) {
    %c0_i32 = arith.constant 0 : i32
    %c0_i32_0 = arith.constant 0 : i32
    %c0_i32_1 = arith.constant 0 : i32
    return %c0_i32, %c0_i32_0 : i32, i32
  }
  func.func @transform_6(%arg0: i32) -> (i32, i32) {
    %c0_i32 = arith.constant 0 : i32
    %c0_i32_0 = arith.constant 0 : i32
    %c0_i32_1 = arith.constant 0 : i32
    return %c0_i32, %c0_i32_0 : i32, i32
  }
  func.func @transform_7(%arg0: i32) -> (i32, i32, i32) {
    %c0_i32 = arith.constant 0 : i32
    %c0_i32_0 = arith.constant 0 : i32
    %c0_i32_1 = arith.constant 0 : i32
    return %arg0, %c0_i32, %c0_i32_0 : i32, i32, i32
  }
}

</mosaic_0001>

<bundles_post_ra>
// kernel: tpu_custom_call.1
= control target key start
LH: loop header
LB: loop body
LE: loop exit
PB: predicated region body
PF: predicated region fallthrough
CT: control target
= control target key end

     0   :  { %s11956_s24 = smov 0   ;;  %s17711_s0 = inlined_call_operand.vmem [shape: f32[2,256,4], index: 0, kind: input, shape index: {}]   ;;  %s17712_s1 = inlined_call_operand.vmem [shape: f32[2,256,3], index: 1, kind: input, shape index: {}]   ;;  %s17713_s2 = inlined_call_operand.vmem [shape: bf16[256,2], index: 2, kind: input, shape index: {}]   ;;  %s17714_s3 = inlined_call_operand.vmem [shape: bf16[36,7], index: 3, kind: input, shape index: {}]   ;;  %s17715_s4 = inlined_call_operand.vmem [shape: f32[1,7], index: 4, kind: input, shape index: {}]   ;;  %s17716_s5 = inlined_call_operand.vmem [shape: bf16[27,4], index: 5, kind: input, shape index: {}]   ;;  %s17717_s6 = inlined_call_operand.vmem [shape: f32[1,4], index: 6, kind: input, shape index: {}]   ;;  %s17718_s7 = inlined_call_operand.vmem [shape: f32[2,256,7], index: 7, kind: output, shape index: {}]  }
   0x1 LB: > { %s10461_s25 = sadd.s32 4294967295, %s11895_s24   ;;  %p10465_p0 = scmp.ge.s32.totalorder %s11895_s24, 1  ;;  %s11895_s24 = sphi %s11956_s24, %s17_s24  }
   0x2   : > { %p247_p1 = scmp.lt.s32.totalorder %s11895_s24, 3 }
   0x4   : > { %p248_p2 = pnand %p10465_p0, %p247_p1 }
   0x6   : > { %251 = sbr.rel (%p248_p2) target bundleno = 2301 (0x8fd), region = 48 }
   0xb   : > { %vm300_vm0 = vcmask 27648   ;;  %v409_v0 = vld [vmem:[%s17713_s2 + $0x10] sm:$0xf]  ;;  %v407_v1 = vld [vmem:[%s17713_s2 + $0x8] sm:$0xf]  ;;  %v11897_v2 = vmov 0  }
   0xc   : > { %11689 = vset.pattern.permute.xlu2 %v11897_v2  ;;  %11688 = vset.pattern.permute.xlu1 %v11897_v2  ;;  %v11973_v3 = vld [vmem:[%s17713_s2] sm:$0xf]  ;;  %302 = vst.msk [vmem:[#allocation2 + $0x4] sm:$0xf] %vm300_vm0, %v11897_v2  ;;  %v410_v4 = vld [vmem:[%s17713_s2 + $0x14] sm:$0xf] }
   0xd   : > { %11687 = vset.pattern.permute.xlu0 %v11897_v2  ;;  %508 = vperm.xlu2 %11689, %v409_v0   ;;  %303 = vst.msk [vmem:[#allocation2 + $0x8] sm:$0xf] %vm300_vm0, %v11897_v2  ;;  %v408_v5 = vld [vmem:[%s17713_s2 + $0xc] sm:$0xf]  ;;  %v11991_v6 = vld [vmem:[%s17713_s2 + $0x4] sm:$0xf] }
   0xe   : > { %490 = vperm.xlu1 %11688, %v407_v1   ;;  %472 = vperm.xlu0 %11687, %v11973_v3   ;;  %304 = vst.msk [vmem:[#allocation2 + $0xc] sm:$0xf] %vm300_vm0, %v11897_v2  ;;  %v413_v7 = vld [vmem:[%s17713_s2 + $0x20] sm:$0xf]  ;;  %v412_v8 = vld [vmem:[%s17713_s2 + $0x1c] sm:$0xf] }
   0xf   : > { %305 = vst.msk [vmem:[#allocation2 + $0x90] sm:$0xf] %vm300_vm0, %v11897_v2  ;;  %v411_v9 = vld [vmem:[%s17713_s2 + $0x18] sm:$0xf]  ;;  %v416_v10 = vld [vmem:[%s17713_s2 + $0x2c] sm:$0xf] }
  0x10   : > { %306 = vst.msk [vmem:[#allocation2 + $0x94] sm:$0xf] %vm300_vm0, %v11897_v2  ;;  %v415_v11 = vld [vmem:[%s17713_s2 + $0x28] sm:$0xf]  ;;  %v414_v12 = vld [vmem:[%s17713_s2 + $0x24] sm:$0xf] }
  0x11   : > { %307 = vst.msk [vmem:[#allocation2 + $0x98] sm:$0xf] %vm300_vm0, %v11897_v2  ;;  %v419_v13 = vld [vmem:[%s17713_s2 + $0x38] sm:$0xf]  ;;  %v418_v14 = vld [vmem:[%s17713_s2 + $0x34] sm:$0xf] }
  0x12   : > { %v417_v15 = vld [vmem:[%s17713_s2 + $0x30] sm:$0xf]  ;;  %p284_p3 = scmp.lt.s32.totalorder %s10461_s25, 1  ;;  %v422_v16 = vld [vmem:[%s17713_s2 + $0x44] sm:$0xf]  ;;  %s11898_s8 = smov 4  }
  0x13   : > { %v421_v17 = vld [vmem:[%s17713_s2 + $0x40] sm:$0xf]  ;;  %v420_v18 = vld [vmem:[%s17713_s2 + $0x3c] sm:$0xf]  ;;  %v425_v19 = vld [vmem:[%s17713_s2 + $0x50] sm:$0xf] }
  0x14   : > { %s18550_s25 = smov (!%p284_p3, %s10461_s25), 1  ;;  %v424_v20 = vld [vmem:[%s17713_s2 + $0x4c] sm:$0xf]  ;;  %v423_v21 = vld [vmem:[%s17713_s2 + $0x48] sm:$0xf]  ;;  %vm855_vm1 = vcmask 1046528  }
  0x15   : > { %517 = vperm.xlu2 %11689, %v410_v4   ;;  %s12034_s18 = sshll.u32 %s18550_s25, 8  ;;  %v428_v26 = vld [vmem:[%s17713_s2 + $0x5c] sm:$0xf]  ;;  %v427_v27 = vld [vmem:[%s17713_s2 + $0x58] sm:$0xf]  ;;  %vm1537_vm5 = vcmask 60448  }
  0x16   : > { %499 = vperm.xlu1 %11688, %v408_v5   ;;  %481 = vperm.xlu0 %11687, %v11991_v6   ;;  %s12040_s21 = scalar_lea.vmem %s17711_s0, %s12034_s18  ;;  %v426_v28 = vld [vmem:[%s17713_s2 + $0x54] sm:$0xf]  ;;  %v431_v35 = vld [vmem:[%s17713_s2 + $0x68] sm:$0xf]  ;;  %v430_v36 = vld [vmem:[%s17713_s2 + $0x64] sm:$0xf]  ;;  %s14469_s30 = scalar_lea.vmem %s17712_s1, %s12034_s18 }
  0x17   : > { %v310_v22 = vld [vmem:[%s12040_s21 + $0x8] sm:$0xff]  ;;  %v309_v23 = vld [vmem:[%s12040_s21] sm:$0xff]  ;;  %v311_v29 = vld [vmem:[%s12040_s21 + $0x10] sm:$0xff]  ;;  %vm1018_vm2 = vsmask.f32 256  ;;  %vm1956_vm6 = vcmask 1040384   ;;  %s17384_s9 = scalar_lea.vmem %s17718_s7, %s12034_s18 }
  0x18   : > { %v342_v24 = vpack.c.bf16 %v310_v22, %v310_v22  ;;  %v341_v25 = vpack.c.bf16 %v309_v23, %v309_v23  ;;  %v313_v30 = vld [vmem:[%s12040_s21 + $0x20] sm:$0xff]  ;;  %v312_v31 = vld [vmem:[%s12040_s21 + $0x18] sm:$0xff]  ;;  %v343_v32 = vpack.c.bf16 %v311_v29, %v311_v29  ;;  %v314_v38 = vld [vmem:[%s12040_s21 + $0x28] sm:$0xff]  ;;  %vm1019_vm3 = vsmask.f32 4368  ;;  %s11901_s12 = smov 8  }
  0x19   : > { %v345_v33 = vpack.c.bf16 %v313_v30, %v313_v30  ;;  %v344_v34 = vpack.c.bf16 %v312_v31, %v312_v31  ;;  %v429_v37 = vld [vmem:[%s17713_s2 + $0x60] sm:$0xf]  ;;  %v316_v39 = vld [vmem:[%s12040_s21 + $0x38] sm:$0xff]  ;;  %v315_v40 = vld [vmem:[%s12040_s21 + $0x30] sm:$0xff]  ;;  %v346_v41 = vpack.c.bf16 %v314_v38, %v314_v38  ;;  %vm2119_vm7 = vsmask.f32 3328 }
  0x1a   : > { %374 = vst.msk [vmem:[#allocation2 + $0x14] sm:$0xf] %vm300_vm0, %v342_v24  ;;  %v348_v42 = vpack.c.bf16 %v316_v39, %v316_v39  ;;  %v347_v43 = vpack.c.bf16 %v315_v40, %v315_v40  ;;  %v434_v44 = vld [vmem:[%s17713_s2 + $0x74] sm:$0xf]  ;;  %v433_v45 = vld [vmem:[%s17713_s2 + $0x70] sm:$0xf]  ;;  %vm12283_vm4 = vmor %vm1018_vm2, %vm1019_vm3 }
  0x1b   : > { %373 = vst.msk [vmem:[#allocation2 + $0x10] sm:$0xf] %vm300_vm0, %v341_v25  ;;  %v432_v46 = vld [vmem:[%s17713_s2 + $0x6c] sm:$0xf]  ;;  %v317_v47 = vld [vmem:[%s12040_s21 + $0x40] sm:$0xff]  ;;  %v319_v48 = vld [vmem:[%s12040_s21 + $0x50] sm:$0xff] }
  0x1c   : > { %375 = vst.msk [vmem:[#allocation2 + $0x18] sm:$0xf] %vm300_vm0, %v343_v32  ;;  %v318_v49 = vld [vmem:[%s12040_s21 + $0x48] sm:$0xff]  ;;  %v349_v50 = vpack.c.bf16 %v317_v47, %v317_v47  ;;  %v351_v51 = vpack.c.bf16 %v319_v48, %v319_v48  ;;  %v436_v53 = vld [vmem:[%s17713_s2 + $0x7c] sm:$0xf]  ;;  %v321_v58 = vld [vmem:[%s12040_s21 + $0x60] sm:$0xff] }
  0x1d   : > { %544 = vperm.xlu2 %11689, %v413_v7   ;;  %377 = vst.msk [vmem:[#allocation2 + $0x20] sm:$0xf] %vm300_vm0, %v345_v33  ;;  %v350_v52 = vpack.c.bf16 %v318_v49, %v318_v49  ;;  %v435_v54 = vld [vmem:[%s17713_s2 + $0x78] sm:$0xf]  ;;  %v1377_v55 = vld [vmem:[#allocation2 + $0x8] sm:$0xf]  ;;  %v353_v61 = vpack.c.bf16 %v321_v58, %v321_v58 }
  0x1e   : > { %535 = vperm.xlu1 %11688, %v412_v8   ;;  %526 = vperm.xlu0 %11687, %v411_v9   ;;  %376 = vst.msk [vmem:[#allocation2 + $0x1c] sm:$0xf] %vm300_vm0, %v344_v34  ;;  %v320_v56 = vld [vmem:[%s12040_s21 + $0x58] sm:$0xff]  ;;  %v322_v57 = vld [vmem:[%s12040_s21 + $0x68] sm:$0xff]  ;;  %v323_v1 = vld [vmem:[%s12040_s21 + $0x70] sm:$0xff]  ;;  %vm2542_vm10 = vcmask 93248  }
  0x1f   : > { %378 = vst.msk [vmem:[#allocation2 + $0x24] sm:$0xf] %vm300_vm0, %v346_v41  ;;  %v352_v59 = vpack.c.bf16 %v320_v56, %v320_v56  ;;  %v354_v60 = vpack.c.bf16 %v322_v57, %v322_v57  ;;  %v1378_v62 = vld [vmem:[#allocation2 + $0xc] sm:$0xf]  ;;  %v325_v2 = vld [vmem:[%s12040_s21 + $0x80] sm:$0xff]  ;;  %v324_v4 = vld [vmem:[%s12040_s21 + $0x78] sm:$0xff]  ;;  %v355_v5 = vpack.c.bf16 %v323_v1, %v323_v1 }
  0x20   : > { %380 = vst.msk [vmem:[#allocation2 + $0x2c] sm:$0xf] %vm300_vm0, %v348_v42  ;;  %v357_v7 = vpack.c.bf16 %v325_v2, %v325_v2  ;;  %v356_v8 = vpack.c.bf16 %v324_v4, %v324_v4  ;;  %v11899_v9 = vmov 839922192   ;;  %v329_v30 = vld [vmem:[%s12040_s21 + $0xa0] sm:$0xff]  ;;  %v331_v31 = vld [vmem:[%s12040_s21 + $0xb0] sm:$0xff] }
  0x21   : > { %379 = vst.msk [vmem:[#allocation2 + $0x28] sm:$0xf] %vm300_vm0, %v347_v43  ;;  %v1380_v63 = vld [vmem:[#allocation2 + $0x14] sm:$0xf]  ;;  %v330_v32 = vld [vmem:[%s12040_s21 + $0xa8] sm:$0xff]  ;;  %v361_v33 = vpack.c.bf16 %v329_v30, %v329_v30  ;;  %v363_v34 = vpack.c.bf16 %v331_v31, %v331_v31  ;;  %v333_v47 = vld [vmem:[%s12040_s21 + $0xc0] sm:$0xff] }
  0x22   : > { %381 = vst.msk [vmem:[#allocation2 + $0x30] sm:$0xf] %vm300_vm0, %v349_v50  ;;  %v1379_v0 = vld [vmem:[#allocation2 + $0x10] sm:$0xf]  ;;  %v365_v50 = vpack.c.bf16 %v333_v47, %v333_v47  ;;  %v336_v1 = vld [vmem:[%s12040_s21 + $0xd8] sm:$0xff]  ;;  %v12179_v4 = vld [vmem:[#allocation2 + $0x8] sm:$0xff]  }
  0x23   : > { %383 = vst.msk [vmem:[#allocation2 + $0x38] sm:$0xf] %vm300_vm0, %v351_v51  ;;  %vm2120_vm8 = vsmask.f32 7440  ;;  %s11902_s13 = smov 12   ;;  %s11903_s14 = smov 16  }
  0x24   : > { %382 = vst.msk [vmem:[#allocation2 + $0x34] sm:$0xf] %vm300_vm0, %v350_v52  ;;  %vm13013_vm9 = vmor %vm2119_vm7, %vm2120_vm8  ;;  %vm3095_vm11 = vcmask 126048   ;;  %s11904_s15 = smov 20   ;;  %vm3288_vm12 = vcmask 158848   ;;  %s11905_s16 = smov 24  }
  0x25   : > { %571 = vperm.xlu2 %11689, %v416_v10   ;;  %384 = vst.msk [vmem:[#allocation2 + $0x3c] sm:$0xf] %vm300_vm0, %v352_v59  ;;  %v476_v10 = vunpack.c.l.s4 %v11899_v9  ;;  %v12145_v38 = vld [vmem:[#allocation2 + $0x18] sm:$0xff]   ;;  %vm3873_vm13 = vcmask 191648   ;;  %s11906_s17 = smov 28   ;;  %vm4426_vm14 = vcmask 224448  }
  0x26   : > { %562 = vperm.xlu1 %11688, %v415_v11   ;;  %553 = vperm.xlu0 %11687, %v414_v12   ;;  %386 = vst.msk [vmem:[#allocation2 + $0x44] sm:$0xf] %vm300_vm0, %v354_v60  ;;  %v1381_v12 = vld [vmem:[#allocation2 + $0x18] sm:$0xf]  ;;  %v17719_v40 = vunpack.c.l.bf16 %v12145_v38  ;;  %s11907_s19 = smov 32   ;;  %vm4619_vm15 = vcmask 257248  }
  0x27   : > { %385 = vst.msk [vmem:[#allocation2 + $0x40] sm:$0xf] %vm300_vm0, %v353_v61  ;;  %vm5867_vm2 = vcmask 19456   ;;  %vm5373_vm3 = vcmask 293888   ;;  %s11909_s11 = smov 3   ;;  %vm7686_vm7 = vcmask 93256  }
  0x28   : > { %387 = vst.msk [vmem:[#allocation2 + $0x48] sm:$0xf] %vm300_vm0, %v355_v5  ;;  %v1385_v29 = vld [vmem:[#allocation2 + $0x28] sm:$0xf]  ;;  %vm7879_vm8 = vcmask 117856  }
  0x29   : > { %389 = vst.msk [vmem:[#allocation2 + $0x50] sm:$0xf] %vm300_vm0, %v357_v7  ;;  %v1387_v42 = vld [vmem:[#allocation2 + $0x30] sm:$0xf]  ;;  %v12203_v30 = vld [vmem:[#allocation2 + $0x28] sm:$0xff]  }
  0x2a   : > { %388 = vst.msk [vmem:[#allocation2 + $0x4c] sm:$0xf] %vm300_vm0, %v356_v8  ;;  %v1389_v43 = vld [vmem:[#allocation2 + $0x38] sm:$0xf]  ;;  %v368_v8 = vpack.c.bf16 %v336_v1, %v336_v1 }
  0x2b   : > { %393 = vst.msk [vmem:[#allocation2 + $0x60] sm:$0xf] %vm300_vm0, %v361_v33 }
  0x2c   : > { %395 = vst.msk [vmem:[#allocation2 + $0x68] sm:$0xf] %vm300_vm0, %v363_v34  ;;  %v1390_v58 = vld [vmem:[#allocation2 + $0x3c] sm:$0xf] }
  0x2d   : > { %598 = vperm.xlu2 %11689, %v419_v13   ;;  %v1383_v13 = vld [vmem:[#allocation2 + $0x20] sm:$0xf]  ;;  %397 = vst.msk [vmem:[#allocation2 + $0x70] sm:$0xf] %vm300_vm0, %v365_v50  ;;  %v1392_v59 = vld [vmem:[#allocation2 + $0x44] sm:$0xf]  ;;  %v10713_v50 = vunpack.c.l.bf16 %v12203_v30 }
  0x2e   : > { %589 = vperm.xlu1 %11688, %v418_v14   ;;  %580 = vperm.xlu0 %11687, %v417_v15   ;;  %v1382_v14 = vld [vmem:[#allocation2 + $0x1c] sm:$0xf]  ;;  %v12122_v15 = vunpack.c.0.s8 %v476_v10  ;;  %v1391_v60 = vld [vmem:[#allocation2 + $0x40] sm:$0xf]  ;;  %400 = vst.msk [vmem:[#allocation2 + $0x7c] sm:$0xf] %vm300_vm0, %v368_v8 }
  0x35   : > { %625 = vperm.xlu2 %11689, %v422_v16   ;;  %v326_v16 = vld [vmem:[%s12040_s21 + $0x88] sm:$0xff] }
  0x36   : > { %616 = vperm.xlu1 %11688, %v421_v17   ;;  %607 = vperm.xlu0 %11687, %v420_v18   ;;  %v328_v17 = vld [vmem:[%s12040_s21 + $0x98] sm:$0xff]  ;;  %v327_v18 = vld [vmem:[%s12040_s21 + $0x90] sm:$0xff] }
  0x3d   : > { %652 = vperm.xlu2 %11689, %v425_v19   ;;  %v358_v19 = vpack.c.bf16 %v326_v16, %v326_v16  ;;  %v11464_v16 = vld [vmem:[#allocation2 + $0x10] sm:$0xff]  }
  0x3e   : > { %643 = vperm.xlu1 %11688, %v424_v20   ;;  %634 = vperm.xlu0 %11687, %v423_v21   ;;  %v360_v20 = vpack.c.bf16 %v328_v17, %v328_v17  ;;  %v359_v21 = vpack.c.bf16 %v327_v18, %v327_v18  ;;  %v10701_v34 = vunpack.c.l.bf16 %v11464_v16 }
  0x3f   : > { %390 = vst.msk [vmem:[#allocation2 + $0x54] sm:$0xf] %vm300_vm0, %v358_v19 }
  0x40   : > { %392 = vst.msk [vmem:[#allocation2 + $0x5c] sm:$0xf] %vm300_vm0, %v360_v20  ;;  %v11082_v20 = vunpack.c.h.bf16 %v12179_v4 }
  0x41   : > { %391 = vst.msk [vmem:[#allocation2 + $0x58] sm:$0xf] %vm300_vm0, %v359_v21  ;;  %v12195_v21 = vld [vmem:[#allocation2 + $0x20] sm:$0xff]  }
  0x42   : > { %v10709_v47 = vunpack.c.l.bf16 %v12195_v21 }
  0x45   : > { %679 = vperm.xlu2 %11689, %v428_v26  }
  0x46   : > { %670 = vperm.xlu1 %11688, %v427_v27   ;;  %661 = vperm.xlu0 %11687, %v426_v28   ;;  %v1384_v27 = vld [vmem:[#allocation2 + $0x24] sm:$0xf]  ;;  %v1386_v28 = vld [vmem:[#allocation2 + $0x2c] sm:$0xf] }
  0x4d   : > { %706 = vperm.xlu2 %11689, %v431_v35   ;;  %v362_v35 = vpack.c.bf16 %v330_v32, %v330_v32  ;;  %v1395_v32 = vld [vmem:[#allocation2 + $0x50] sm:$0xf] }
  0x4e   : > { %697 = vperm.xlu1 %11688, %v430_v36   ;;  %688 = vperm.xlu0 %11687, %v429_v37  }
  0x4f   : > { %394 = vst.msk [vmem:[#allocation2 + $0x64] sm:$0xf] %vm300_vm0, %v362_v35  ;;  %v10702_v35 = vunpack.c.h.bf16 %v11464_v16  ;;  %v1396_v16 = vld [vmem:[#allocation2 + $0x54] sm:$0xf] }
  0x55   : > { %733 = vperm.xlu2 %11689, %v434_v44   ;;  %v1388_v44 = vld [vmem:[#allocation2 + $0x34] sm:$0xf] }
  0x56   : > { %724 = vperm.xlu1 %11688, %v433_v45   ;;  %715 = vperm.xlu0 %11687, %v432_v46   ;;  %v332_v45 = vld [vmem:[%s12040_s21 + $0xb8] sm:$0xff]  ;;  %v334_v46 = vld [vmem:[%s12040_s21 + $0xc8] sm:$0xff] }
  0x57   : > { %v364_v48 = vpack.c.bf16 %v332_v45, %v332_v45  ;;  %v366_v49 = vpack.c.bf16 %v334_v46, %v334_v46  ;;  %v338_v45 = vld [vmem:[%s12040_s21 + $0xe8] sm:$0xff]  ;;  %v10706_v46 = vunpack.c.h.bf16 %v12145_v38 }
  0x59   : > { %396 = vst.msk [vmem:[#allocation2 + $0x6c] sm:$0xf] %vm300_vm0, %v364_v48 }
  0x5a   : > { %398 = vst.msk [vmem:[#allocation2 + $0x74] sm:$0xf] %vm300_vm0, %v366_v49  ;;  %v370_v49 = vpack.c.bf16 %v338_v45, %v338_v45 }
  0x5c   : > { %402 = vst.msk [vmem:[#allocation2 + $0x84] sm:$0xf] %vm300_vm0, %v370_v49 }
  0x5d   : > { %1441 = vrot.lane.b32.xlu2 %v1377_v55, %s11898_s8  ;;  %v437_v55 = vld [vmem:[#allocation2 + $0x4] sm:$0x8] }
  0x5e   : > { %751 = vperm.xlu1 %11688, %v436_v53   ;;  %742 = vperm.xlu0 %11687, %v435_v54   ;;  %v758_v2 = vunpack.c.l.bf16 %v437_v55 }
  0x65   : > { %1447 = vrot.lane.b32.xlu2 %v1380_v63, %s11898_s8  ;;  %v335_v63 = vld [vmem:[%s12040_s21 + $0xd0] sm:$0xff] }
  0x66   : > { %1443 = vrot.lane.b32.xlu0 %v1378_v62, %s11898_s8  ;;  %1445 = vrot.lane.b32.xlu1 %v1379_v0, %s11898_s8  ;;  %v337_v0 = vld [vmem:[%s12040_s21 + $0xe0] sm:$0xff]  ;;  %v367_v5 = vpack.c.bf16 %v335_v63, %v335_v63 }
  0x67   : > { %v509_v11 = vpop.permute.xlu2 %508  ;;  %v369_v7 = vpack.c.bf16 %v337_v0, %v337_v0 }
  0x68   : > { %v514_v22 = vperm.slane %v509_v11, %v12122_v15  ;;  %399 = vst.msk [vmem:[#allocation2 + $0x78] sm:$0xf] %vm300_vm0, %v367_v5 }
  0x69   : > { %401 = vst.msk [vmem:[#allocation2 + $0x80] sm:$0xf] %vm300_vm0, %v369_v7 }
  0x6a   : > { %v12135_v25 = vunpack.c.l.bf16 %v514_v22 }
  0x6c   : > { %v863_v36 = vrot.slane %v12135_v25, 1  ;;  %v10710_v25 = vunpack.c.h.bf16 %v12195_v21 }
  0x6d   : > { %1453 = vrot.lane.b32.xlu2 %v1383_v13, %s11898_s8  ;;  %v11081_v13 = vunpack.c.l.bf16 %v12179_v4 }
  0x6e   : > { %1449 = vrot.lane.b32.xlu0 %v1381_v12, %s11898_s8  ;;  %1451 = vrot.lane.b32.xlu1 %v1382_v14, %s11898_s8 }
  0x6f   : > { %v518_v23 = vpop.permute.xlu2 %517 }
  0x70   : > { %v523_v24 = vperm.slane %v518_v23, %v12122_v15 }
  0x72   : > { %v12137_v26 = vunpack.c.l.bf16 %v523_v24 }
  0x74   : > { %v865_v37 = vrot.slane %v12137_v26, 1 }
  0x75   : > { %1459 = vrot.lane.b32.xlu2 %v1386_v28, %s11898_s8 }
  0x76   : > { %1455 = vrot.lane.b32.xlu0 %v1384_v27, %s11898_s8  ;;  %1457 = vrot.lane.b32.xlu1 %v1385_v29, %s11898_s8  ;;  %v12158_v41 = vsel %vm855_vm1, %v863_v36, %v865_v37 }
  0x77   : > { %v545_v39 = vpop.permute.xlu2 %544  ;;  %17984 = vst [vmem:[#allocation4_spill] sm:$0xff] %v12158_v41  ;;  %v957_v51 = vmul.f32 %v17719_v40, %v12158_v41 }
  0x78   : > { %v550_v61 = vperm.slane %v545_v39, %v12122_v15 }
  0x79   : > { %v990_v56 = vpack.c.bf16 %v957_v51, %v957_v51 }
  0x7a   : > { %v12191_v17 = vunpack.c.l.bf16 %v550_v61 }
  0x7b   : > { %v1063_v9 = vshrl.u32 %v990_v56, 16  ;;  %v1066_v23 = vshll.u32 %v990_v56, 16 }
  0x7c   : > { %v871_v48 = vrot.slane %v12191_v17, 1 }
  0x7d   : > { %1465 = vrot.lane.b32.xlu2 %v1389_v43, %s11898_s8  ;;  %v12197_v22 = vrot.slane %v1063_v9, 7  ;;  %v1393_v43 = vld [vmem:[#allocation2 + $0x48] sm:$0xf] }
  0x7e   : > { %1461 = vrot.lane.b32.xlu0 %v1387_v42, %s11898_s8  ;;  %1463 = vrot.lane.b32.xlu1 %v1388_v44, %s11898_s8  ;;  %v1394_v44 = vld [vmem:[#allocation2 + $0x4c] sm:$0xf] }
  0x7f   : > { %v12170_v52 = vpop.permute.xlu2 %571  ;;  %v12212_v51 = vor.u32 %v1066_v23, %v12197_v22 }
  0x80   : > { %v491_v53 = vpop.permute.xlu1 %490  ;;  %v473_v54 = vpop.permute.xlu0 %472  ;;  %v577_v24 = vperm.slane %v12170_v52, %v12122_v15 }
  0x81   : > { %v478_v57 = vperm.slane %v473_v54, %v12122_v15  ;;  %v496_v10 = vperm.slane %v491_v53, %v12122_v15 }
  0x82   : > { %v12214_v52 = vunpack.c.l.bf16 %v577_v24  ;;  %v1397_v24 = vld [vmem:[#allocation2 + $0x58] sm:$0xf] }
  0x83   : > { %v791_v62 = vunpack.c.l.bf16 %v478_v57  ;;  %v793_v27 = vunpack.c.l.bf16 %v496_v10 }
  0x85   : > { %v12182_v11 = vrot.slane %v791_v62, 1  ;;  %1471 = vrot.lane.b32.xlu2 %v1392_v59, %s11898_s8  ;;  %v859_v53 = vrot.slane %v793_v27, 1  ;;  %v1070_v59 = vrot.slane %v12197_v22, 4 }
  0x86   : > { %1467 = vrot.lane.b32.xlu0 %v1390_v58, %s11898_s8  ;;  %1469 = vrot.lane.b32.xlu1 %v1391_v60, %s11898_s8  ;;  %v10714_v58 = vunpack.c.h.bf16 %v12203_v30  ;;  %v1402_v30 = vld [vmem:[#allocation2 + $0x6c] sm:$0xf] }
  0x87   : > { %17985 = vst [vmem:[#allocation5_spill] sm:$0xff] %v12182_v11  ;;  %v599_v12 = vpop.permute.xlu2 %598  ;;  %v952_v14 = vmul.f32 %v12182_v11, %v758_v2 }
  0x88   : > { %v500_v18 = vpop.permute.xlu1 %499  ;;  %v482_v19 = vpop.permute.xlu0 %481  ;;  %v604_v31 = vperm.slane %v599_v12, %v12122_v15 }
  0x89   : > { %v505_v28 = vperm.slane %v500_v18, %v12122_v15  ;;  %v487_v29 = vperm.slane %v482_v19, %v12122_v15  ;;  %v985_v33 = vpack.c.bf16 %v952_v14, %v952_v14  ;;  %v1398_v18 = vld [vmem:[#allocation2 + $0x5c] sm:$0xf] }
  0x8a   : > { %v12217_v56 = vunpack.c.l.bf16 %v604_v31  ;;  %v12258_v31 = vld [vmem:[#allocation2 + $0x38] sm:$0xff]  }
  0x8b   : > { %v794_v39 = vunpack.c.l.bf16 %v505_v28  ;;  %v792_v42 = vunpack.c.l.bf16 %v487_v29  ;;  %v12222_v57 = vshrl.u32 %v985_v33, 16  ;;  %v12256_v29 = vld [vmem:[#allocation2 + $0x30] sm:$0xff]  }
  0x8c   : > { %v883_v12 = vrot.slane %v12217_v56, 1 }
  0x8d   : > { %v861_v54 = vrot.slane %v794_v39, 1  ;;  %v857_v55 = vrot.slane %v792_v42, 1  ;;  %1477 = vrot.lane.b32.xlu2 %v1395_v32, %s11898_s8  ;;  %v10472_v27 = vrot.slane %v12222_v57, 11  ;;  %v11900_v42 = vmov 1  }
  0x8e   : > { %1473 = vrot.lane.b32.xlu0 %v1393_v43, %s11898_s8  ;;  %1475 = vrot.lane.b32.xlu1 %v1394_v44, %s11898_s8 }
  0x8f   : > { %v12227_v60 = vsel %vm855_vm1, %v859_v53, %v861_v54  ;;  %v12232_v61 = vsel %vm855_vm1, %v861_v54, %v863_v36  ;;  %v12236_v62 = vsel %vm855_vm1, %v12182_v11, %v857_v55  ;;  %v12239_v63 = vsel %vm855_vm1, %v857_v55, %v859_v53  ;;  %v626_v0 = vpop.permute.xlu2 %625  ;;  %11690 = vset.pattern.permute.xlu1 %v11900_v42 }
  0x90   : > { %17986 = vst [vmem:[#allocation6_spill] sm:$0xff] %v12232_v61  ;;  %v5967_v1 = vmul.f32 %v11081_v13, %v12236_v62  ;;  %v5968_v2 = vmul.f32 %v11082_v20, %v12239_v63  ;;  %v536_v4 = vpop.permute.xlu1 %535  ;;  %v527_v5 = vpop.permute.xlu0 %526  ;;  %v955_v7 = vmul.f32 %v10701_v34, %v12227_v60  ;;  %v877_v36 = vrot.slane %v12214_v52, 1  ;;  %11691 = vset.pattern.permute.xlu2 %v11900_v42 }
  0x91   : > { %17987 = vst [vmem:[#allocation7_spill] sm:$0xff] %v12236_v62  ;;  %v541_v8 = vperm.slane %v536_v4, %v12122_v15  ;;  %v532_v9 = vperm.slane %v527_v5, %v12122_v15  ;;  %v956_v10 = vmul.f32 %v10702_v35, %v12232_v61  ;;  %v631_v13 = vperm.slane %v626_v0, %v12122_v15 }
  0x92   : > { %17988 = vst [vmem:[#allocation8_spill] sm:$0xff] %v12239_v63  ;;  %v6000_v14 = vpack.c.bf16 %v5967_v1, %v5967_v1  ;;  %v12251_v19 = vpack.c.bf16 %v955_v7, %v955_v7  ;;  %v6001_v32 = vpack.c.bf16 %v5968_v2, %v5968_v2  ;;  %v10718_v34 = vunpack.c.h.bf16 %v12256_v29  ;;  %11692 = vset.pattern.permute.xlu0 %v11900_v42 }
  0x93   : > { %v12253_v20 = vunpack.c.l.bf16 %v541_v8  ;;  %v797_v23 = vunpack.c.l.bf16 %v532_v9  ;;  %v989_v28 = vpack.c.bf16 %v956_v10, %v956_v10  ;;  %v12264_v45 = vunpack.c.l.bf16 %v631_v13 }
  0x94   : > { %v1027_v33 = vshrl.u32 %v6000_v14, 16  ;;  %v1045_v43 = vshrl.u32 %v12251_v19, 16  ;;  %v1030_v53 = vshll.u32 %v6000_v14, 16  ;;  %v10721_v54 = vunpack.c.l.bf16 %v12258_v31 }
  0x95   : > { %v869_v35 = vrot.slane %v12253_v20, 1  ;;  %v867_v39 = vrot.slane %v797_v23, 1  ;;  %1483 = vrot.lane.b32.xlu2 %v1398_v18, %s11898_s8  ;;  %v1054_v44 = vshrl.u32 %v989_v28, 16  ;;  %v1057_v4 = vshll.u32 %v989_v28, 16  ;;  %v1399_v23 = vld [vmem:[#allocation2 + $0x60] sm:$0xf] }
  0x96   : > { %1479 = vrot.lane.b32.xlu0 %v1396_v16, %s11898_s8  ;;  %1481 = vrot.lane.b32.xlu1 %v1397_v24, %s11898_s8  ;;  %v12268_v49 = vrot.slane %v1027_v33, 7  ;;  %v1047_v2 = vrot.slane %v1045_v43, 7  ;;  %v1036_v9 = vshrl.u32 %v6001_v32, 16  ;;  %v1401_v24 = vld [vmem:[#allocation2 + $0x68] sm:$0xf] }
  0x97   : > { %v12274_v55 = vsel %vm855_vm1, %v865_v37, %v867_v39  ;;  %v12279_v57 = vsel %vm855_vm1, %v867_v39, %v869_v35  ;;  %v653_v0 = vpop.permute.xlu2 %652  ;;  %v12290_v7 = vrot.slane %v1054_v44, 7  ;;  %v1400_v44 = vld [vmem:[#allocation2 + $0x64] sm:$0xf] }
  0x98   : > { %v563_v26 = vpop.permute.xlu1 %562  ;;  %v554_v5 = vpop.permute.xlu0 %553  ;;  %v12288_v37 = vor.u32 %v1030_v53, %v12268_v49  ;;  %v958_v8 = vmul.f32 %v10706_v46, %v12274_v55  ;;  %v1052_v13 = vrot.slane %v1047_v2, 4  ;;  %v959_v16 = vmul.f32 %v10709_v47, %v12279_v57 }
  0x99   : > { %v568_v10 = vperm.slane %v563_v26, %v12122_v15  ;;  %v559_v14 = vperm.slane %v554_v5, %v12122_v15  ;;  %v658_v18 = vperm.slane %v653_v0, %v12122_v15  ;;  %v1059_v46 = vor.u32 %v1057_v4, %v12290_v7 }
  0x9a   : > { %17991 = vst [vmem:[#allocation9_spill] sm:$0xff] %v12288_v37  ;;  %v1033_v28 = vsel %vm12283_vm4, %v10472_v27, %v12288_v37  ;;  %v12305_v33 = vpack.c.bf16 %v958_v8, %v958_v8  ;;  %v992_v47 = vpack.c.bf16 %v959_v16, %v959_v16  ;;  %v12312_v26 = vrot.slane %v1036_v9, 7 }
  0x9b   : > { %v801_v42 = vunpack.c.l.bf16 %v568_v10  ;;  %v800_v43 = vunpack.c.l.bf16 %v559_v14  ;;  %1345 = vst.msk [vmem:[#allocation3] sm:$0xf] %vm300_vm0, %v1033_v28  ;;  %v1060_v53 = vsel %vm12283_vm4, %v1052_v13, %v1059_v46  ;;  %v1039_v27 = vshll.u32 %v6001_v32, 16 }
  0x9c   : > { %v1072_v0 = vshrl.u32 %v12305_v33, 16  ;;  %17992 = vst [vmem:[#allocation10_spill] sm:$0xff] %v12312_v26  ;;  %v1081_v8 = vshrl.u32 %v992_v47, 16  ;;  %v1034_v10 = vrot.slane %v12268_v49, 4  ;;  %v12317_v14 = vunpack.c.l.bf16 %v658_v18 }
  0x9d   : > { %v875_v5 = vrot.slane %v801_v42, 1  ;;  %v873_v4 = vrot.slane %v800_v43, 1  ;;  %1489 = vrot.lane.b32.xlu2 %v1401_v24, %s11898_s8  ;;  %1348 = vst.msk [vmem:[#allocation3 + $0xc] sm:$0xf] %vm300_vm0, %v1060_v53  ;;  %v1084_v9 = vshll.u32 %v992_v47, 16  ;;  %v1041_v32 = vor.u32 %v1039_v27, %v12312_v26 }
  0x9e   : > { %1485 = vrot.lane.b32.xlu0 %v1399_v23, %s11898_s8  ;;  %1487 = vrot.lane.b32.xlu1 %v1400_v44, %s11898_s8  ;;  %v12321_v13 = vrot.slane %v1072_v0, 7  ;;  %v17720_v18 = vrot.slane %v12312_v26, 4  ;;  %v1048_v23 = vshll.u32 %v12251_v19, 16  ;;  %v12336_v44 = vrot.slane %v1081_v8, 7  ;;  %v1404_v8 = vld [vmem:[#allocation2 + $0x74] sm:$0xf] }
  0x9f   : > { %v12327_v16 = vsel %vm855_vm1, %v871_v48, %v873_v4  ;;  %v12330_v24 = vsel %vm855_vm1, %v873_v4, %v875_v5  ;;  %v680_v49 = vpop.permute.xlu2 %679  ;;  %v12348_v27 = vsel %vm12283_vm4, %v1034_v10, %v1041_v32  ;;  %v1061_v10 = vrot.slane %v12290_v7, 4 }
  0xa0   : > { %17993 = vst [vmem:[#allocation11_spill] sm:$0xff] %v12327_v16  ;;  %v685_v28 = vperm.slane %v680_v49, %v12122_v15  ;;  %v590_v46 = vpop.permute.xlu1 %589  ;;  %v581_v42 = vpop.permute.xlu0 %580  ;;  %v1079_v43 = vrot.slane %v12321_v13, 4  ;;  %v961_v47 = vmul.f32 %v10713_v50, %v12327_v16  ;;  %v962_v19 = vmul.f32 %v10714_v58, %v12330_v24  ;;  %v1403_v58 = vld [vmem:[#allocation2 + $0x70] sm:$0xf] }
  0xa1   : > { %17994 = vst [vmem:[#allocation12_spill] sm:$0xff] %v12330_v24  ;;  %v595_v53 = vperm.slane %v590_v46, %v12122_v15  ;;  %v586_v0 = vperm.slane %v581_v42, %v12122_v15  ;;  %v1086_v49 = vor.u32 %v1084_v9, %v12336_v44  ;;  %v1050_v50 = vor.u32 %v1048_v23, %v1047_v2 }
  0xa2   : > { %17995 = vst [vmem:[#allocation13_spill] sm:$0xff] %v12348_v27  ;;  %v12350_v4 = vunpack.c.l.bf16 %v685_v28  ;;  %v12353_v40 = vpack.c.bf16 %v961_v47, %v961_v47  ;;  %v995_v39 = vpack.c.bf16 %v962_v19, %v962_v19  ;;  %v12365_v9 = vsel %vm855_vm1, %v869_v35, %v871_v48 }
  0xa3   : > { %1346 = vst.msk [vmem:[#allocation3 + $0x4] sm:$0xf] %vm300_vm0, %v12348_v27  ;;  %v12357_v46 = vunpack.c.l.bf16 %v595_v53  ;;  %v803_v42 = vunpack.c.l.bf16 %v586_v0  ;;  %v1087_v32 = vsel %vm12283_vm4, %v1079_v43, %v1086_v49  ;;  %v1051_v23 = vsel %vm12283_vm4, %v17720_v18, %v1050_v50 }
  0xa4   : > { %v1099_v2 = vshrl.u32 %v12353_v40, 16  ;;  %v17722_v28 = vrot.slane %v12317_v14, 1  ;;  %1351 = vst.msk [vmem:[#allocation3 + $0x18] sm:$0xf] %vm300_vm0, %v1087_v32  ;;  %v1108_v48 = vshrl.u32 %v995_v39, 16  ;;  %v12381_v20 = vsel %vm855_vm1, %v875_v5, %v877_v36 }
  0xa5   : > { %v881_v7 = vrot.slane %v12357_v46, 1  ;;  %v879_v17 = vrot.slane %v803_v42, 1  ;;  %1495 = vrot.lane.b32.xlu2 %v1404_v8, %s11898_s8  ;;  %17996 = vst [vmem:[#allocation14_spill] sm:$0xff] %v12381_v20  ;;  %v1069_v47 = vsel %vm12283_vm4, %v1061_v10, %v12212_v51  ;;  %v1111_v8 = vshll.u32 %v995_v39, 16 }
  0xa6   : > { %1491 = vrot.lane.b32.xlu0 %v1402_v30, %s11898_s8  ;;  %1493 = vrot.lane.b32.xlu1 %v1403_v58, %s11898_s8  ;;  %v12386_v43 = vrot.slane %v1099_v2, 7  ;;  %1347 = vst.msk [vmem:[#allocation3 + $0x8] sm:$0xf] %vm300_vm0, %v1051_v23  ;;  %v12400_v19 = vrot.slane %v1108_v48, 7  ;;  %v11470_v58 = vld [vmem:[#allocation2 + $0x40] sm:$0xff]   ;;  %v1075_v10 = vshll.u32 %v12305_v33, 16 }
  0xa7   : > { %v12395_v53 = vsel %vm855_vm1, %v877_v36, %v879_v17  ;;  %v12398_v5 = vsel %vm855_vm1, %v879_v17, %v881_v7  ;;  %v707_v0 = vpop.permute.xlu2 %706  ;;  %1349 = vst.msk [vmem:[#allocation3 + $0x10] sm:$0xf] %vm300_vm0, %v1069_v47  ;;  %v1407_v2 = vld [vmem:[#allocation2 + $0x80] sm:$0xf]  ;;  %v1405_v47 = vld [vmem:[#allocation2 + $0x78] sm:$0xf] }
  0xa8   : > { %17997 = vst [vmem:[#allocation15_spill] sm:$0xff] %v12395_v53  ;;  %v712_v49 = vperm.slane %v707_v0, %v12122_v15  ;;  %v617_v50 = vpop.permute.xlu1 %616  ;;  %v608_v46 = vpop.permute.xlu0 %607  ;;  %v1106_v51 = vrot.slane %v12386_v43, 4  ;;  %v964_v52 = vmul.f32 %v10718_v34, %v12395_v53  ;;  %v965_v36 = vmul.f32 %v10721_v54, %v12398_v5  ;;  %v1406_v0 = vld [vmem:[#allocation2 + $0x7c] sm:$0xf] }
  0xa9   : > { %17998 = vst [vmem:[#allocation16_spill] sm:$0xff] %v12398_v5  ;;  %v622_v42 = vperm.slane %v617_v50, %v12122_v15  ;;  %v613_v39 = vperm.slane %v608_v46, %v12122_v15  ;;  %v1113_v30 = vor.u32 %v1111_v8, %v12400_v19  ;;  %v960_v34 = vmul.f32 %v10710_v25, %v12365_v9 }
  0xaa   : > { %v12415_v32 = vunpack.c.l.bf16 %v712_v49  ;;  %v12417_v23 = vpack.c.bf16 %v964_v52, %v964_v52  ;;  %v998_v17 = vpack.c.bf16 %v965_v36, %v965_v36  ;;  %v1077_v50 = vor.u32 %v1075_v10, %v12321_v13 }
  0xab   : > { %v807_v54 = vunpack.c.l.bf16 %v622_v42  ;;  %v806_v48 = vunpack.c.l.bf16 %v613_v39  ;;  %v1114_v8 = vsel %vm12283_vm4, %v1106_v51, %v1113_v30  ;;  %v10725_v46 = vunpack.c.l.bf16 %v11470_v58 }
  0xac   : > { %1354 = vst.msk [vmem:[#allocation3 + $0x24] sm:$0xf] %vm300_vm0, %v1114_v8  ;;  %v1126_v33 = vshrl.u32 %v12417_v23, 16  ;;  %v1135_v49 = vshrl.u32 %v998_v17, 16  ;;  %v10726_v52 = vunpack.c.h.bf16 %v11470_v58  ;;  %v1078_v21 = vsel %vm12283_vm4, %v1070_v59, %v1077_v50  ;;  %v12462_v8 = vld [vmem:[#allocation2 + $0x50] sm:$0xff]  }
  0xad   : > { %v887_v36 = vrot.slane %v807_v54, 1  ;;  %v885_v18 = vrot.slane %v806_v48, 1  ;;  %1501 = vrot.lane.b32.xlu2 %v1407_v2, %s11898_s8  ;;  %v993_v25 = vpack.c.bf16 %v960_v34, %v960_v34  ;;  %v12435_v13 = vsel %vm855_vm1, %v881_v7, %v883_v12  ;;  %1350 = vst.msk [vmem:[#allocation3 + $0x14] sm:$0xf] %vm300_vm0, %v1078_v21 }
  0xae   : > { %17999 = vst [vmem:[#allocation17_spill] sm:$0xff] %v12435_v13  ;;  %1497 = vrot.lane.b32.xlu0 %v1405_v47, %s11898_s8  ;;  %1499 = vrot.lane.b32.xlu1 %v1406_v0, %s11898_s8  ;;  %v12439_v51 = vrot.slane %v1126_v33, 7  ;;  %v12441_v42 = vrot.slane %v1135_v49, 7  ;;  %v1138_v39 = vshll.u32 %v998_v17, 16  ;;  %v1088_v48 = vrot.slane %v12336_v44, 4  ;;  %v12460_v0 = vld [vmem:[#allocation2 + $0x48] sm:$0xff]  }
  0xaf   : > { %v12448_v59 = vsel %vm855_vm1, %v883_v12, %v885_v18  ;;  %v12451_v7 = vsel %vm855_vm1, %v885_v18, %v887_v36  ;;  %v734_v30 = vpop.permute.xlu2 %733  ;;  %v1090_v58 = vshrl.u32 %v993_v25, 16  ;;  %v1093_v49 = vshll.u32 %v993_v25, 16 }
  0xb0   : > { %18000 = vst [vmem:[#allocation18_spill] sm:$0xff] %v12448_v59  ;;  %v644_v10 = vpop.permute.xlu1 %643  ;;  %v635_v2 = vpop.permute.xlu0 %634  ;;  %v1133_v34 = vrot.slane %v12439_v51, 4  ;;  %v1140_v17 = vor.u32 %v1138_v39, %v12441_v42  ;;  %v967_v54 = vmul.f32 %v10725_v46, %v12448_v59  ;;  %v968_v47 = vmul.f32 %v10726_v52, %v12451_v7 }
  0xb1   : > { %18001 = vst [vmem:[#allocation19_spill] sm:$0xff] %v12451_v7  ;;  %v649_v56 = vperm.slane %v644_v10, %v12122_v15  ;;  %v640_v12 = vperm.slane %v635_v2, %v12122_v15  ;;  %v1092_v18 = vrot.slane %v1090_v58, 7  ;;  %v10730_v46 = vunpack.c.h.bf16 %v12460_v0  ;;  %v1408_v58 = vld [vmem:[#allocation2 + $0x84] sm:$0xf] }
  0xb2   : > { %v1141_v50 = vsel %vm12283_vm4, %v1133_v34, %v1140_v17  ;;  %v12466_v33 = vpack.c.bf16 %v967_v54, %v967_v54  ;;  %v18002_v44 = vrot.slane %v12264_v45, 1  ;;  %v1001_v10 = vpack.c.bf16 %v968_v47, %v968_v47 }
  0xb3   : > { %v12474_v39 = vunpack.c.l.bf16 %v649_v56  ;;  %v809_v52 = vunpack.c.l.bf16 %v640_v12  ;;  %1357 = vst.msk [vmem:[#allocation3 + $0x30] sm:$0xf] %vm300_vm0, %v1141_v50  ;;  %v739_v2 = vperm.slane %v734_v30, %v12122_v15  ;;  %v1095_v17 = vor.u32 %v1093_v49, %v1092_v18 }
  0xb4   : > { %v12472_v21 = vsel %vm855_vm1, %v887_v36, %v18002_v44  ;;  %v1153_v34 = vshrl.u32 %v12466_v33, 16  ;;  %v10733_v25 = vunpack.c.l.bf16 %v12462_v8  ;;  %v1162_v36 = vshrl.u32 %v1001_v10, 16 }
  0xb5   : > { %18003 = vst [vmem:[#allocation20_spill] sm:$0xff] %v12472_v21  ;;  %v17721_v54 = vrot.slane %v12474_v39, 1  ;;  %v891_v22 = vrot.slane %v809_v52, 1  ;;  %1612 = vperm.xlu2 %11691, %v11991_v6   ;;  %v1097_v56 = vrot.slane %v1092_v18, 4  ;;  %v1096_v30 = vsel %vm12283_vm4, %v1088_v48, %v1095_v17 }
  0xb6   : > { %1503 = vrot.lane.b32.xlu0 %v1408_v58, %s11898_s8  ;;  %1604 = vperm.xlu1 %11690, %v11973_v3   ;;  %v12484_v12 = vrot.slane %v1153_v34, 7  ;;  %v1102_v47 = vshll.u32 %v12353_v40, 16  ;;  %v10717_v50 = vunpack.c.l.bf16 %v12256_v29  ;;  %v18004_v49 = vmov %v18002_v44  ;;  %1352 = vst.msk [vmem:[#allocation3 + $0x1c] sm:$0xf] %vm300_vm0, %v1096_v30  ;;  %v11473_v30 = vld [vmem:[#allocation2 + $0x58] sm:$0xff]  }
  0xb7   : > { %v12493_v44 = vsel %vm855_vm1, %v18004_v49, %v891_v22  ;;  %v12498_v6 = vsel %vm855_vm1, %v891_v22, %v17721_v54  ;;  %v1442_v3 = vpop.permute.xlu2 %1441  ;;  %v12500_v18 = vrot.slane %v1162_v36, 7  ;;  %v1165_v52 = vshll.u32 %v1001_v10, 16 }
  0xb8   : > { %18005 = vst [vmem:[#allocation21_spill] sm:$0xff] %v12493_v44  ;;  %v671_v48 = vpop.permute.xlu1 %670  ;;  %v662_v40 = vpop.permute.xlu0 %661  ;;  %v1160_v29 = vrot.slane %v12484_v12, 4  ;;  %v970_v45 = vmul.f32 %v10730_v46, %v12493_v44  ;;  %v971_v58 = vmul.f32 %v10733_v25, %v12498_v6  ;;  %v1104_v34 = vor.u32 %v1102_v47, %v12386_v43 }
  0xb9   : > { %18006 = vst [vmem:[#allocation22_spill] sm:$0xff] %v12498_v6  ;;  %v676_v22 = vperm.slane %v671_v48, %v12122_v15  ;;  %v667_v17 = vperm.slane %v662_v40, %v12122_v15  ;;  %v1167_v10 = vor.u32 %v1165_v52, %v12500_v18  ;;  %v963_v36 = vmul.f32 %v10717_v50, %v12381_v20 }
  0xba   : > { %1538 = vst.msk [vmem:[#allocation3] sm:$0xf] %vm1537_vm5, %v1442_v3  ;;  %v12512_v49 = vunpack.c.l.bf16 %v739_v2  ;;  %v12514_v3 = vpack.c.bf16 %v970_v45, %v970_v45  ;;  %v1004_v54 = vpack.c.bf16 %v971_v58, %v971_v58  ;;  %v1105_v46 = vsel %vm12283_vm4, %v1097_v56, %v1104_v34  ;;  %v11823_v58 = vld [vmem:[%s17713_s2 + $0x10] sm:$0xf] }
  0xbb   : > { %v12518_v25 = vunpack.c.l.bf16 %v676_v22  ;;  %v812_v43 = vunpack.c.l.bf16 %v667_v17  ;;  %v1168_v47 = vsel %vm12283_vm4, %v1160_v29, %v1167_v10  ;;  %1353 = vst.msk [vmem:[#allocation3 + $0x20] sm:$0xf] %vm300_vm0, %v1105_v46  ;;  %v996_v52 = vpack.c.bf16 %v963_v36, %v963_v36  ;;  %v11824_v22 = vld [vmem:[%s17713_s2 + $0x8] sm:$0xf] }
  0xbc   : > { %1360 = vst.msk [vmem:[#allocation3 + $0x3c] sm:$0xf] %vm300_vm0, %v1168_v47  ;;  %v1180_v2 = vshrl.u32 %v12514_v3, 16  ;;  %v1189_v50 = vshrl.u32 %v1004_v54, 16  ;;  %v1115_v48 = vrot.slane %v12400_v19, 4  ;;  %v10737_v40 = vunpack.c.l.bf16 %v11473_v30 }
  0xbd   : > { %v17723_v45 = vrot.slane %v12518_v25, 1  ;;  %v897_v56 = vrot.slane %v812_v43, 1  ;;  %1636 = vperm.xlu2 %11691, %v11823_v58   ;;  %v1192_v29 = vshll.u32 %v1004_v54, 16  ;;  %v1117_v34 = vshrl.u32 %v996_v52, 16  ;;  %v11825_v19 = vld [vmem:[%s17713_s2 + $0xc] sm:$0xf] }
  0xbe   : > { %1620 = vperm.xlu0 %11692, %v11824_v22   ;;  %1628 = vperm.xlu1 %11690, %v11825_v19   ;;  %v12536_v17 = vrot.slane %v1180_v2, 7  ;;  %v12538_v10 = vrot.slane %v1189_v50, 7  ;;  %v1120_v36 = vshll.u32 %v996_v52, 16  ;;  %v10738_v46 = vunpack.c.h.bf16 %v11473_v30 }
  0xbf   : > { %v12543_v54 = vsel %vm855_vm1, %v17722_v28, %v897_v56  ;;  %v12548_v43 = vsel %vm855_vm1, %v897_v56, %v17723_v45  ;;  %v1448_v47 = vpop.permute.xlu2 %1447  ;;  %v1119_v58 = vrot.slane %v1117_v34, 7  ;;  %v1129_v22 = vshll.u32 %v12417_v23, 16 }
  0xc0   : > { %18007 = vst [vmem:[#allocation23_spill] sm:$0xff] %v12543_v54  ;;  %v698_v2 = vpop.permute.xlu1 %697  ;;  %v689_v19 = vpop.permute.xlu0 %688  ;;  %v1187_v30 = vrot.slane %v12536_v17, 4  ;;  %v1194_v52 = vor.u32 %v1192_v29, %v12538_v10  ;;  %v973_v50 = vmul.f32 %v10737_v40, %v12543_v54  ;;  %v974_v28 = vmul.f32 %v10738_v46, %v12548_v43 }
  0xc1   : > { %18008 = vst [vmem:[#allocation24_spill] sm:$0xff] %v12548_v43  ;;  %v703_v35 = vperm.slane %v698_v2, %v12122_v15  ;;  %v694_v56 = vperm.slane %v689_v19, %v12122_v15  ;;  %v1122_v45 = vor.u32 %v1120_v36, %v1119_v58  ;;  %v1124_v34 = vrot.slane %v1119_v58, 4  ;;  %v12569_v36 = vld [vmem:[#allocation2 + $0x68] sm:$0xff]   ;;  %v12582_v19 = vld [vmem:[#allocation2 + $0x60] sm:$0xff]  }
  0xc2   : > { %1541 = vst.msk [vmem:[#allocation3 + $0xc] sm:$0xf] %vm1537_vm5, %v1448_v47  ;;  %v1195_v23 = vsel %vm12283_vm4, %v1187_v30, %v1194_v52  ;;  %v12560_v26 = vpack.c.bf16 %v973_v50, %v973_v50  ;;  %v1007_v47 = vpack.c.bf16 %v974_v28, %v974_v28  ;;  %v1131_v37 = vor.u32 %v1129_v22, %v12439_v51  ;;  %v11827_v30 = vld [vmem:[%s17713_s2 + $0x1c] sm:$0xf] }
  0xc3   : > { %v12563_v27 = vunpack.c.l.bf16 %v703_v35  ;;  %v815_v29 = vunpack.c.l.bf16 %v694_v56  ;;  %1363 = vst.msk [vmem:[#allocation3 + $0x48] sm:$0xf] %vm300_vm0, %v1195_v23  ;;  %v1123_v40 = vsel %vm12283_vm4, %v1115_v48, %v1122_v45  ;;  %v10722_v46 = vunpack.c.h.bf16 %v12258_v31  ;;  %v11826_v48 = vld [vmem:[%s17713_s2 + $0x18] sm:$0xf] }
  0xc4   : > { %1355 = vst.msk [vmem:[#allocation3 + $0x28] sm:$0xf] %vm300_vm0, %v1123_v40  ;;  %v1207_v28 = vshrl.u32 %v12560_v26, 16  ;;  %v1216_v2 = vshrl.u32 %v1007_v47, 16  ;;  %v1132_v35 = vsel %vm12283_vm4, %v1124_v34, %v1131_v37  ;;  %v1219_v31 = vshll.u32 %v1007_v47, 16 }
  0xc5   : > { %v17727_v51 = vrot.slane %v12563_v27, 1  ;;  %v903_v22 = vrot.slane %v815_v29, 1  ;;  %1652 = vperm.xlu2 %11691, %v11826_v48   ;;  %1356 = vst.msk [vmem:[#allocation3 + $0x2c] sm:$0xf] %vm300_vm0, %v1132_v35  ;;  %v966_v45 = vmul.f32 %v10722_v46, %v12435_v13  ;;  %v11828_v37 = vld [vmem:[%s17713_s2 + $0x14] sm:$0xf]  ;;  %v10742_v56 = vunpack.c.h.bf16 %v12582_v19 }
  0xc6   : > { %1660 = vperm.xlu0 %11692, %v11827_v30   ;;  %1644 = vperm.xlu1 %11690, %v11828_v37   ;;  %v12590_v52 = vrot.slane %v1207_v28, 7  ;;  %v12592_v50 = vrot.slane %v1216_v2, 7  ;;  %v10745_v34 = vunpack.c.l.bf16 %v12569_v36  ;;  %v18009_v23 = vrot.slane %v12350_v4, 1 }
  0xc7   : > { %v12604_v29 = vsel %vm855_vm1, %v903_v22, %v17727_v51  ;;  %v1454_v40 = vpop.permute.xlu2 %1453  ;;  %v999_v46 = vpack.c.bf16 %v966_v45, %v966_v45  ;;  %v1142_v28 = vrot.slane %v12441_v42, 4  ;;  %v1156_v54 = vshll.u32 %v12466_v33, 16 }
  0xc8   : > { %v12599_v47 = vsel %vm855_vm1, %v18009_v23, %v903_v22  ;;  %18011 = vst [vmem:[#allocation26_spill] sm:$0xff] %v12604_v29  ;;  %v725_v2 = vpop.permute.xlu1 %724  ;;  %v716_v35 = vpop.permute.xlu0 %715  ;;  %v1214_v48 = vrot.slane %v12590_v52, 4  ;;  %v1221_v30 = vor.u32 %v1219_v31, %v12592_v50  ;;  %v977_v23 = vmul.f32 %v10745_v34, %v12604_v29 }
  0xc9   : > { %18010 = vst [vmem:[#allocation25_spill] sm:$0xff] %v12599_v47  ;;  %v976_v37 = vmul.f32 %v10742_v56, %v12599_v47  ;;  %v730_v58 = vperm.slane %v725_v2, %v12122_v15  ;;  %v721_v22 = vperm.slane %v716_v35, %v12122_v15  ;;  %v1144_v51 = vshrl.u32 %v999_v46, 16 }
  0xca   : > { %1544 = vst.msk [vmem:[#allocation3 + $0x18] sm:$0xf] %vm1537_vm5, %v1454_v40  ;;  %v1147_v45 = vshll.u32 %v999_v46, 16  ;;  %v1222_v42 = vsel %vm12283_vm4, %v1214_v48, %v1221_v30  ;;  %v1010_v40 = vpack.c.bf16 %v977_v23, %v977_v23  ;;  %v10729_v34 = vunpack.c.l.bf16 %v12460_v0  ;;  %v11831_v23 = vld [vmem:[%s17713_s2 + $0x20] sm:$0xf] }
  0xcb   : > { %v12616_v43 = vpack.c.bf16 %v976_v37, %v976_v37  ;;  %v12619_v6 = vunpack.c.l.bf16 %v730_v58  ;;  %v818_v31 = vunpack.c.l.bf16 %v721_v22  ;;  %1366 = vst.msk [vmem:[#allocation3 + $0x54] sm:$0xf] %vm300_vm0, %v1222_v42  ;;  %v1146_v56 = vrot.slane %v1144_v51, 7  ;;  %v11829_v51 = vld [vmem:[%s17713_s2 + $0x24] sm:$0xf] }
  0xcc   : > { %v18012_v2 = vrot.slane %v12317_v14, 1  ;;  %v18013_v46 = vrot.slane %v12474_v39, 1  ;;  %v1243_v30 = vshrl.u32 %v1010_v40, 16  ;;  %v1158_v33 = vor.u32 %v1156_v54, %v12484_v12  ;;  %v11830_v39 = vld [vmem:[%s17713_s2 + $0x28] sm:$0xf] }
  0xcd   : > { %v1234_v48 = vshrl.u32 %v12616_v43, 16  ;;  %v17734_v58 = vrot.slane %v12619_v6, 1  ;;  %v909_v37 = vrot.slane %v818_v31, 1  ;;  %1676 = vperm.xlu2 %11691, %v11829_v51   ;;  %v1149_v0 = vor.u32 %v1147_v45, %v1146_v56  ;;  %v11476_v31 = vld [vmem:[#allocation2 + $0x70] sm:$0xff]  }
  0xce   : > { %v12628_v35 = vsel %vm855_vm1, %v18013_v46, %v18012_v2  ;;  %v1246_v14 = vshll.u32 %v1010_v40, 16  ;;  %1684 = vperm.xlu0 %11692, %v11830_v39   ;;  %1668 = vperm.xlu1 %11690, %v11831_v23   ;;  %v12644_v54 = vrot.slane %v1243_v30, 7  ;;  %v1151_v22 = vrot.slane %v1146_v56, 4 }
  0xcf   : > { %18014 = vst [vmem:[#allocation27_spill] sm:$0xff] %v12628_v35  ;;  %v12642_v12 = vrot.slane %v1234_v48, 7  ;;  %v969_v42 = vmul.f32 %v10729_v34, %v12472_v21  ;;  %v18015_v45 = vrot.slane %v12350_v4, 1  ;;  %v18016_v40 = vrot.slane %v12518_v25, 1  ;;  %v1460_v56 = vpop.permute.xlu2 %1459 }
  0xd0   : > { %v18018_v46 = vrot.slane %v12415_v32, 1  ;;  %v12662_v48 = vsel %vm855_vm1, %v909_v37, %v17734_v58  ;;  %v1150_v34 = vsel %vm12283_vm4, %v1142_v28, %v1149_v0  ;;  %v752_v4 = vpop.permute.xlu1 %751  ;;  %v743_v30 = vpop.permute.xlu0 %742  ;;  %1547 = vst.msk [vmem:[#allocation3 + $0x24] sm:$0xf] %vm1537_vm5, %v1460_v56  ;;  %v1248_v39 = vor.u32 %v1246_v14, %v12644_v54 }
  0xd1   : > { %v12652_v2 = vsel %vm855_vm1, %v18016_v40, %v18015_v45  ;;  %18020 = vst [vmem:[#allocation30_spill] sm:$0xff] %v12662_v48  ;;  %v1241_v25 = vrot.slane %v12642_v12, 4  ;;  %v1159_v23 = vsel %vm12283_vm4, %v1151_v22, %v1158_v33  ;;  %v1002_v45 = vpack.c.bf16 %v969_v42, %v969_v42 }
  0xd2   : > { %18017 = vst [vmem:[#allocation28_spill] sm:$0xff] %v12652_v2  ;;  %v12657_v51 = vsel %vm855_vm1, %v18018_v46, %v909_v37  ;;  %v757_v40 = vperm.slane %v752_v4, %v12122_v15  ;;  %v748_v37 = vperm.slane %v743_v30, %v12122_v15  ;;  %v10749_v46 = vunpack.c.l.bf16 %v11476_v31 }
  0xd3   : > { %18019 = vst [vmem:[#allocation29_spill] sm:$0xff] %v12657_v51  ;;  %v10750_v28 = vunpack.c.h.bf16 %v11476_v31  ;;  %v1249_v0 = vsel %vm12283_vm4, %v1241_v25, %v1248_v39  ;;  %v1169_v56 = vrot.slane %v12500_v18, 4  ;;  %v1171_v14 = vshrl.u32 %v1002_v45, 16 }
  0xd4   : > { %1358 = vst.msk [vmem:[#allocation3 + $0x34] sm:$0xf] %vm300_vm0, %v1150_v34  ;;  %v1183_v58 = vshll.u32 %v12514_v3, 16  ;;  %v822_v33 = vunpack.c.l.bf16 %v757_v40  ;;  %v821_v22 = vunpack.c.l.bf16 %v748_v37  ;;  %v979_v42 = vmul.f32 %v10749_v46, %v12657_v51  ;;  %v11832_v3 = vld [vmem:[%s17713_s2 + $0x30] sm:$0xf]  ;;  %v12691_v37 = vld [vmem:[#allocation2 + $0x78] sm:$0xff]  }
  0xd5   : > { %1359 = vst.msk [vmem:[#allocation3 + $0x38] sm:$0xf] %vm300_vm0, %v1159_v23  ;;  %v980_v34 = vmul.f32 %v10750_v28, %v12662_v48  ;;  %v1173_v4 = vrot.slane %v1171_v14, 7  ;;  %v1174_v31 = vshll.u32 %v1002_v45, 16  ;;  %v10734_v25 = vunpack.c.h.bf16 %v12462_v8  ;;  %1700 = vperm.xlu2 %11691, %v11832_v3   ;;  %v11833_v45 = vld [vmem:[%s17713_s2 + $0x34] sm:$0xf] }
  0xd6   : > { %1369 = vst.msk [vmem:[#allocation3 + $0x60] sm:$0xf] %vm300_vm0, %v1249_v0  ;;  %v1185_v30 = vor.u32 %v1183_v58, %v12536_v17  ;;  %v12684_v39 = vrot.slane %v822_v33, 1  ;;  %v915_v18 = vrot.slane %v821_v22, 1  ;;  %v12689_v23 = vpack.c.bf16 %v979_v42, %v979_v42  ;;  %1708 = vperm.xlu0 %11692, %v11833_v45   ;;  %v11834_v8 = vld [vmem:[%s17713_s2 + $0x2c] sm:$0xf] }
  0xd7   : > { %v1013_v40 = vpack.c.bf16 %v980_v34, %v980_v34  ;;  %1692 = vperm.xlu1 %11690, %v11834_v8   ;;  %v1176_v17 = vor.u32 %v1174_v31, %v1173_v4  ;;  %v1178_v58 = vrot.slane %v1173_v4, 4  ;;  %v972_v46 = vmul.f32 %v10734_v25, %v12628_v35  ;;  %v12701_v0 = vld [vmem:[#allocation2 + $0x80] sm:$0xff]   ;;  %v1466_v42 = vpop.permute.xlu2 %1465 }
  0xd8   : > { %18021 = vst [vmem:[#allocation31_spill] sm:$0xff] %v12684_v39  ;;  %v10754_v28 = vunpack.c.h.bf16 %v12691_v37  ;;  %v18022_v14 = vrot.slane %v12512_v49, 1  ;;  %v12710_v22 = vsel %vm855_vm1, %v915_v18, %v12684_v39  ;;  %v1261_v34 = vshrl.u32 %v12689_v23, 16  ;;  %v1444_v4 = vpop.permute.xlu0 %1443  ;;  %v1446_v25 = vpop.permute.xlu1 %1445 }
  0xd9   : > { %18024 = vst [vmem:[#allocation33_spill] sm:$0xff] %v12710_v22  ;;  %v1270_v31 = vshrl.u32 %v1013_v40, 16  ;;  %v1177_v3 = vsel %vm12283_vm4, %v1169_v56, %v1176_v17  ;;  %v1273_v45 = vshll.u32 %v1013_v40, 16  ;;  %v1186_v8 = vsel %vm12283_vm4, %v1178_v58, %v1185_v30 }
  0xda   : > { %v12706_v33 = vsel %vm855_vm1, %v18022_v14, %v915_v18  ;;  %1550 = vst.msk [vmem:[#allocation3 + $0x30] sm:$0xf] %vm1537_vm5, %v1466_v42  ;;  %v1005_v14 = vpack.c.bf16 %v972_v46, %v972_v46  ;;  %v12719_v18 = vrot.slane %v1261_v34, 7  ;;  %v10757_v51 = vunpack.c.l.bf16 %v12701_v0 }
  0xdb   : > { %18023 = vst [vmem:[#allocation32_spill] sm:$0xff] %v12706_v33  ;;  %v12721_v48 = vrot.slane %v1270_v31, 7  ;;  %v982_v29 = vmul.f32 %v10754_v28, %v12706_v33  ;;  %v18025_v42 = vrot.slane %v12415_v32, 1  ;;  %v18026_v47 = vrot.slane %v12563_v27, 1 }
  0xdc   : > { %1539 = vst.msk [vmem:[#allocation3 + $0x4] sm:$0xf] %vm1537_vm5, %v1444_v4  ;;  %v1198_v30 = vshrl.u32 %v1005_v14, 16  ;;  %v1210_v40 = vshll.u32 %v12560_v26, 16  ;;  %v10741_v17 = vunpack.c.l.bf16 %v12582_v19  ;;  %v1268_v58 = vrot.slane %v12719_v18, 4 }
  0xdd   : > { %v12730_v56 = vsel %vm855_vm1, %v18026_v47, %v18025_v42  ;;  %1540 = vst.msk [vmem:[#allocation3 + $0x8] sm:$0xf] %vm1537_vm5, %v1446_v25  ;;  %v1275_v46 = vor.u32 %v1273_v45, %v12721_v48  ;;  %v983_v32 = vmul.f32 %v10757_v51, %v12710_v22  ;;  %v12739_v28 = vpack.c.bf16 %v982_v29, %v982_v29  ;;  %v11835_v19 = vld [vmem:[%s17713_s2 + $0x3c] sm:$0xf]  ;;  %v11837_v25 = vld [vmem:[%s17713_s2 + $0x38] sm:$0xf] }
  0xde   : > { %18027 = vst [vmem:[#allocation34_spill] sm:$0xff] %v12730_v56  ;;  %v1196_v27 = vrot.slane %v12538_v10, 4  ;;  %v1200_v47 = vrot.slane %v1198_v30, 7  ;;  %v1201_v34 = vshll.u32 %v1005_v14, 16  ;;  %v975_v26 = vmul.f32 %v10741_v17, %v12652_v2  ;;  %1724 = vperm.xlu2 %11691, %v11835_v19   ;;  %v11836_v10 = vld [vmem:[%s17713_s2 + $0x40] sm:$0xf] }
  0xdf   : > { %1361 = vst.msk [vmem:[#allocation3 + $0x40] sm:$0xf] %vm300_vm0, %v1177_v3  ;;  %v1276_v31 = vsel %vm12283_vm4, %v1268_v58, %v1275_v46  ;;  %v1016_v4 = vpack.c.bf16 %v983_v32, %v983_v32  ;;  %v1288_v29 = vshrl.u32 %v12739_v28, 16  ;;  %v1212_v51 = vor.u32 %v1210_v40, %v12590_v52  ;;  %1732 = vperm.xlu0 %11692, %v11836_v10   ;;  %v1472_v30 = vpop.permute.xlu2 %1471  ;;  %v11853_v2 = vld [vmem:[#allocation2 + $0x18] sm:$0xff]  }
  0xe0   : > { %1362 = vst.msk [vmem:[#allocation3 + $0x44] sm:$0xf] %vm300_vm0, %v1186_v8  ;;  %1716 = vperm.xlu1 %11690, %v11837_v25   ;;  %v1203_v3 = vor.u32 %v1201_v34, %v1200_v47  ;;  %v1008_v45 = vpack.c.bf16 %v975_v26, %v975_v26  ;;  %v10746_v8 = vunpack.c.h.bf16 %v12569_v36  ;;  %v18028_v14 = vrot.slane %v12512_v49, 1  ;;  %v1450_v46 = vpop.permute.xlu0 %1449  ;;  %v1452_v32 = vpop.permute.xlu1 %1451 }
  0xe1   : > { %1372 = vst.msk [vmem:[#allocation3 + $0x6c] sm:$0xf] %vm300_vm0, %v1276_v31  ;;  %v18029_v52 = vrot.slane %v12619_v6, 1  ;;  %v12766_v40 = vrot.slane %v1288_v29, 7  ;;  %v1297_v17 = vshrl.u32 %v1016_v4, 16  ;;  %v1205_v58 = vrot.slane %v1200_v47, 4 }
  0xe2   : > { %1553 = vst.msk [vmem:[#allocation3 + $0x3c] sm:$0xf] %vm1537_vm5, %v1472_v30  ;;  %v1204_v34 = vsel %vm12283_vm4, %v1196_v27, %v1203_v3  ;;  %v1300_v36 = vshll.u32 %v1016_v4, 16  ;;  %v1223_v49 = vrot.slane %v12592_v50, 4  ;;  %v1225_v26 = vshrl.u32 %v1008_v45, 16 }
  0xe3   : > { %v12764_v42 = vsel %vm855_vm1, %v18029_v52, %v18028_v14  ;;  %1542 = vst.msk [vmem:[#allocation3 + $0x10] sm:$0xf] %vm1537_vm5, %v1450_v46  ;;  %v1295_v6 = vrot.slane %v12766_v40, 4  ;;  %v12774_v19 = vrot.slane %v1297_v17, 7  ;;  %v1213_v47 = vsel %vm12283_vm4, %v1205_v58, %v1212_v51 }
  0xe4   : > { %18030 = vst [vmem:[#allocation35_spill] sm:$0xff] %v12764_v42  ;;  %v978_v31 = vmul.f32 %v10746_v8, %v12730_v56  ;;  %v1227_v29 = vrot.slane %v1225_v26, 7  ;;  %v1228_v10 = vshll.u32 %v1008_v45, 16  ;;  %v1237_v27 = vshll.u32 %v12616_v43, 16  ;;  %v11838_v43 = vld [vmem:[%s17713_s2 + $0x48] sm:$0xf] }
  0xe5   : > { %1543 = vst.msk [vmem:[#allocation3 + $0x14] sm:$0xf] %vm1537_vm5, %v1452_v32  ;;  %v10753_v50 = vunpack.c.l.bf16 %v12691_v37  ;;  %v1302_v4 = vor.u32 %v1300_v36, %v12774_v19  ;;  %v10758_v3 = vunpack.c.h.bf16 %v12701_v0  ;;  %v1264_v52 = vshll.u32 %v12689_v23, 16  ;;  %v11839_v0 = vld [vmem:[%s17713_s2 + $0x4c] sm:$0xf] }
  0xe6   : > { %1364 = vst.msk [vmem:[#allocation3 + $0x4c] sm:$0xf] %vm300_vm0, %v1204_v34  ;;  %v1011_v25 = vpack.c.bf16 %v978_v31, %v978_v31  ;;  %v1230_v51 = vor.u32 %v1228_v10, %v1227_v29  ;;  %v1239_v8 = vor.u32 %v1237_v27, %v12642_v12  ;;  %1748 = vperm.xlu2 %11691, %v11838_v43   ;;  %v11840_v12 = vld [vmem:[%s17713_s2 + $0x44] sm:$0xf]  ;;  %v1232_v17 = vrot.slane %v1227_v29, 4 }
  0xe7   : > { %1365 = vst.msk [vmem:[#allocation3 + $0x50] sm:$0xf] %vm300_vm0, %v1213_v47  ;;  %v981_v14 = vmul.f32 %v10753_v50, %v12764_v42  ;;  %v1303_v37 = vsel %vm12283_vm4, %v1295_v6, %v1302_v4  ;;  %1756 = vperm.xlu0 %11692, %v11839_v0   ;;  %v1250_v58 = vrot.slane %v12644_v54, 4  ;;  %v1478_v23 = vpop.permute.xlu2 %1477  ;;  %v1266_v36 = vor.u32 %v1264_v52, %v12719_v18 }
  0xe8   : > { %v1252_v45 = vshrl.u32 %v1011_v25, 16  ;;  %1740 = vperm.xlu1 %11690, %v11840_v12   ;;  %1375 = vst.msk [vmem:[#allocation3 + $0x78] sm:$0xf] %vm300_vm0, %v1303_v37  ;;  %v1231_v30 = vsel %vm12283_vm4, %v1223_v49, %v1230_v51  ;;  %v1255_v34 = vshll.u32 %v1011_v25, 16  ;;  %v984_v26 = vmul.f32 %v10758_v3, %v12684_v39  ;;  %v1456_v6 = vpop.permute.xlu0 %1455  ;;  %v1458_v47 = vpop.permute.xlu1 %1457 }
  0xe9   : > { %v1014_v46 = vpack.c.bf16 %v981_v14, %v981_v14  ;;  %1367 = vst.msk [vmem:[#allocation3 + $0x58] sm:$0xf] %vm300_vm0, %v1231_v30  ;;  %v1240_v49 = vsel %vm12283_vm4, %v1232_v17, %v1239_v8  ;;  %v1277_v27 = vrot.slane %v12721_v48, 4  ;;  %v1291_v4 = vshll.u32 %v12739_v28, 16  ;;  %v11841_v48 = vld [vmem:[%s17713_s2 + $0x54] sm:$0xf] }
  0xea   : > { %v1254_v32 = vrot.slane %v1252_v45, 7  ;;  %1556 = vst.msk [vmem:[#allocation3 + $0x48] sm:$0xf] %vm1537_vm5, %v1478_v23  ;;  %v1017_v10 = vpack.c.bf16 %v984_v26, %v984_v26  ;;  %v1304_v28 = vrot.slane %v12774_v19, 4  ;;  %v11842_v45 = vld [vmem:[%s17713_s2 + $0x58] sm:$0xf]  ;;  %v10770_v35 = vunpack.c.h.bf16 %v11853_v2 }
  0xeb   : > { %v1279_v31 = vshrl.u32 %v1014_v46, 16  ;;  %1545 = vst.msk [vmem:[#allocation3 + $0x1c] sm:$0xf] %vm1537_vm5, %v1456_v6  ;;  %v1282_v50 = vshll.u32 %v1014_v46, 16  ;;  %v1293_v14 = vor.u32 %v1291_v4, %v12766_v40  ;;  %v11843_v40 = vld [vmem:[%s17713_s2 + $0x50] sm:$0xf] }
  0xec   : > { %v1257_v54 = vor.u32 %v1255_v34, %v1254_v32  ;;  %v1259_v29 = vrot.slane %v1254_v32, 4  ;;  %1546 = vst.msk [vmem:[#allocation3 + $0x20] sm:$0xf] %vm1537_vm5, %v1458_v47  ;;  %v1306_v51 = vshrl.u32 %v1017_v10, 16  ;;  %v1309_v37 = vshll.u32 %v1017_v10, 16  ;;  %v339_v32 = vld [vmem:[%s12040_s21 + $0xf0] sm:$0xff] }
  0xed   : > { %v1281_v18 = vrot.slane %v1279_v31, 7  ;;  %1368 = vst.msk [vmem:[#allocation3 + $0x5c] sm:$0xf] %vm300_vm0, %v1240_v49  ;;  %v11844_v23 = vld [vmem:[%s17713_s2 + $0x60] sm:$0xf]  ;;  %v371_v6 = vpack.c.bf16 %v339_v32, %v339_v32  ;;  %vm5204_vm1 = vcmask 290048  }
  0xee   : > { %v1258_v25 = vsel %vm12283_vm4, %v1250_v58, %v1257_v54  ;;  %v1267_v3 = vsel %vm12283_vm4, %v1259_v29, %v1266_v36  ;;  %1772 = vperm.xlu2 %11691, %v11841_v48   ;;  %v1308_v43 = vrot.slane %v1306_v51, 7  ;;  %v11845_v34 = vld [vmem:[%s17713_s2 + $0x64] sm:$0xf]  ;;  %v11846_v36 = vld [vmem:[%s17713_s2 + $0x5c] sm:$0xf] }
  0xef   : > { %1370 = vst.msk [vmem:[#allocation3 + $0x64] sm:$0xf] %vm300_vm0, %v1258_v25  ;;  %v1284_v8 = vor.u32 %v1282_v50, %v1281_v18  ;;  %1780 = vperm.xlu0 %11692, %v11842_v45   ;;  %v1286_v0 = vrot.slane %v1281_v18, 4  ;;  %v1484_v12 = vpop.permute.xlu2 %1483  ;;  %v11847_v31 = vld [vmem:[%s17713_s2 + $0x6c] sm:$0xf] }
  0xf0   : > { %1371 = vst.msk [vmem:[#allocation3 + $0x68] sm:$0xf] %vm300_vm0, %v1267_v3  ;;  %1764 = vperm.xlu1 %11690, %v11843_v40   ;;  %v1311_v19 = vor.u32 %v1309_v37, %v1308_v43  ;;  %v1462_v30 = vpop.permute.xlu0 %1461  ;;  %v1464_v17 = vpop.permute.xlu1 %1463  ;;  %v11848_v54 = vld [vmem:[%s17713_s2 + $0x70] sm:$0xf]  ;;  %v11849_v29 = vld [vmem:[%s17713_s2 + $0x68] sm:$0xf] }
  0xf1   : > { %v1285_v52 = vsel %vm12283_vm4, %v1277_v27, %v1284_v8  ;;  %1559 = vst.msk [vmem:[#allocation3 + $0x54] sm:$0xf] %vm1537_vm5, %v1484_v12  ;;  %v1294_v58 = vsel %vm12283_vm4, %v1286_v0, %v1293_v14  ;;  %v11850_v50 = vld [vmem:[%s17713_s2 + $0x78] sm:$0xf]  ;;  %v11851_v4 = vld [vmem:[%s17713_s2 + $0x7c] sm:$0xf] }
  0xf2   : > { %1373 = vst.msk [vmem:[#allocation3 + $0x70] sm:$0xf] %vm300_vm0, %v1285_v52  ;;  %v1312_v46 = vsel %vm12283_vm4, %v1304_v28, %v1311_v19  ;;  %v11852_v25 = vld [vmem:[%s17713_s2 + $0x74] sm:$0xf]  ;;  %v12893_v19 = vld [vmem:[#allocation2 + $0x20] sm:$0xff]  }
  0xf3   : > { %1548 = vst.msk [vmem:[#allocation3 + $0x28] sm:$0xf] %vm1537_vm5, %v1462_v30  ;;  %v12890_v52 = vld [vmem:[#allocation2 + $0x10] sm:$0xff]   ;;  %v12895_v30 = vld [vmem:[#allocation2 + $0x28] sm:$0xff]  }
  0xf4   : > { %1549 = vst.msk [vmem:[#allocation3 + $0x2c] sm:$0xf] %vm1537_vm5, %v1464_v17  ;;  %v17744_v17 = vunpack.c.l.bf16 %v12890_v52  ;;  %v18039_v2 = vunpack.c.l.bf16 %v12890_v52 }
  0xf5   : > { %1374 = vst.msk [vmem:[#allocation3 + $0x74] sm:$0xf] %vm300_vm0, %v1294_v58  ;;  %v17743_v58 = vunpack.c.h.bf16 %v12890_v52 }
  0xf6   : > { %1376 = vst.msk [vmem:[#allocation3 + $0x7c] sm:$0xf] %vm300_vm0, %v1312_v46  ;;  %1796 = vperm.xlu2 %11691, %v11844_v23   ;;  %v12900_v46 = vld [vmem:[#allocation2 + $0x30] sm:$0xff]   ;;  %v12902_v23 = vld [vmem:[#allocation2 + $0x38] sm:$0xff]  }
  0xf7   : > { %1804 = vperm.xlu0 %11692, %v11845_v34   ;;  %v1490_v26 = vpop.permute.xlu2 %1489  ;;  %403 = vst.msk [vmem:[#allocation2 + $0x88] sm:$0xf] %vm300_vm0, %v371_v6  ;;  %v12905_v34 = vld [vmem:[#allocation2 + $0x40] sm:$0xff]  }
  0xf8   : > { %1788 = vperm.xlu1 %11690, %v11846_v36   ;;  %v1468_v47 = vpop.permute.xlu0 %1467  ;;  %1562 = vst.msk [vmem:[#allocation3 + $0x60] sm:$0xf] %vm1537_vm5, %v1490_v26  ;;  %v1470_v49 = vpop.permute.xlu1 %1469  ;;  %v12958_v36 = vld [vmem:[#allocation2 + $0x70] sm:$0xff]  }
  0xf9   : > { %1551 = vst.msk [vmem:[#allocation3 + $0x34] sm:$0xf] %vm1537_vm5, %v1468_v47  ;;  %v12910_v47 = vld [vmem:[#allocation2 + $0x48] sm:$0xff]  }
  0xfa   : > { %1552 = vst.msk [vmem:[#allocation3 + $0x38] sm:$0xf] %vm1537_vm5, %v1470_v49 }
  0xfe   : > { %1820 = vperm.xlu2 %11691, %v11847_v31  }
  0xff   : > { %1828 = vperm.xlu0 %11692, %v11848_v54   ;;  %v1496_v10 = vpop.permute.xlu2 %1495 }
 0x100   : > { %1812 = vperm.xlu1 %11690, %v11849_v29   ;;  %v1474_v27 = vpop.permute.xlu0 %1473  ;;  %1565 = vst.msk [vmem:[#allocation3 + $0x6c] sm:$0xf] %vm1537_vm5, %v1496_v10  ;;  %v1476_v18 = vpop.permute.xlu1 %1475  ;;  %v12916_v10 = vld [vmem:[#allocation2 + $0x50] sm:$0xff]  }
 0x101   : > { %1554 = vst.msk [vmem:[#allocation3 + $0x40] sm:$0xf] %vm1537_vm5, %v1474_v27  ;;  %v12918_v27 = vld [vmem:[#allocation2 + $0x58] sm:$0xff]  }
 0x102   : > { %1555 = vst.msk [vmem:[#allocation3 + $0x44] sm:$0xf] %vm1537_vm5, %v1476_v18  ;;  %v12966_v18 = vld [vmem:[#allocation2 + $0x80] sm:$0xff]  }
 0x106   : > { %1844 = vperm.xlu2 %11691, %v11850_v50   ;;  %v11479_v50 = vld [vmem:[#allocation2 + $0x8] sm:$0xff]  }
 0x107   : > { %1852 = vperm.xlu0 %11692, %v11851_v4   ;;  %v1502_v3 = vpop.permute.xlu2 %1501  ;;  %v12922_v4 = vld [vmem:[#allocation2 + $0x60] sm:$0xff]  }
 0x108   : > { %1836 = vperm.xlu1 %11690, %v11852_v25   ;;  %v1480_v51 = vpop.permute.xlu0 %1479  ;;  %1568 = vst.msk [vmem:[#allocation3 + $0x78] sm:$0xf] %vm1537_vm5, %v1502_v3  ;;  %v1482_v8 = vpop.permute.xlu1 %1481  ;;  %v2642_v25 = vmul.f32 %v17744_v17, %v12236_v62  ;;  %v2643_v3 = vmul.f32 %v17743_v58, %v12239_v63 }
 0x109   : > { %1557 = vst.msk [vmem:[#allocation3 + $0x4c] sm:$0xf] %vm1537_vm5, %v1480_v51 }
 0x10a   : > { %1558 = vst.msk [vmem:[#allocation3 + $0x50] sm:$0xf] %vm1537_vm5, %v1482_v8  ;;  %v12952_v29 = vpack.c.bf16 %v2642_v25, %v2642_v25 }
 0x10f   : > { %v1613_v14 = vpop.permute.xlu2 %1612 }
 0x110   : > { %v1486_v48 = vpop.permute.xlu0 %1485  ;;  %v1488_v28 = vpop.permute.xlu1 %1487  ;;  %v1618_v32 = vperm.slane %v1613_v14, %v12122_v15  ;;  %v12943_v14 = vld [vmem:[#allocation2 + $0x18] sm:$0xff]  }
 0x111   : > { %1560 = vst.msk [vmem:[#allocation3 + $0x58] sm:$0xf] %vm1537_vm5, %v1486_v48 }
 0x112   : > { %1561 = vst.msk [vmem:[#allocation3 + $0x5c] sm:$0xf] %vm1537_vm5, %v1488_v28  ;;  %v12930_v51 = vunpack.c.l.bf16 %v1618_v32  ;;  %v12954_v32 = vpack.c.bf16 %v2643_v3, %v2643_v3  ;;  %v10762_v3 = vunpack.c.h.bf16 %v11479_v50 }
 0x114   : > { %v1958_v6 = vrot.slane %v12930_v51, 7 }
 0x117   : > { %v12884_v43 = vpop.permute.xlu2 %1636 }
 0x118   : > { %v1492_v37 = vpop.permute.xlu0 %1491  ;;  %v1494_v45 = vpop.permute.xlu1 %1493  ;;  %v1642_v28 = vperm.slane %v12884_v43, %v12122_v15  ;;  %v10761_v43 = vunpack.c.l.bf16 %v11479_v50 }
 0x119   : > { %1563 = vst.msk [vmem:[#allocation3 + $0x64] sm:$0xf] %vm1537_vm5, %v1492_v37  ;;  %v12935_v37 = vld [vmem:[#allocation2 + $0x68] sm:$0xff]  }
 0x11a   : > { %1564 = vst.msk [vmem:[#allocation3 + $0x68] sm:$0xf] %vm1537_vm5, %v1494_v45  ;;  %v12937_v45 = vld [vmem:[#allocation2 + $0xc] sm:$0x8]  ;;  %v12968_v54 = vunpack.c.l.bf16 %v1642_v28 }
 0x11f   : > { %v12888_v40 = vpop.permute.xlu2 %1652 }
 0x120   : > { %v1498_v0 = vpop.permute.xlu0 %1497  ;;  %v1500_v12 = vpop.permute.xlu1 %1499  ;;  %v1658_v49 = vperm.slane %v12888_v40, %v12122_v15 }
 0x121   : > { %1566 = vst.msk [vmem:[#allocation3 + $0x70] sm:$0xf] %vm1537_vm5, %v1498_v0 }
 0x122   : > { %1567 = vst.msk [vmem:[#allocation3 + $0x74] sm:$0xf] %vm1537_vm5, %v1500_v12  ;;  %v12985_v31 = vunpack.c.l.bf16 %v1658_v49 }
 0x127   : > { %v1677_v8 = vpop.permute.xlu2 %1676 }
 0x128   : > { %v1504_v0 = vpop.permute.xlu0 %1503  ;;  %v1605_v12 = vpop.permute.xlu1 %1604  ;;  %v1682_v25 = vperm.slane %v1677_v8, %v12122_v15 }
 0x129   : > { %1569 = vst.msk [vmem:[#allocation3 + $0x7c] sm:$0xf] %vm1537_vm5, %v1504_v0  ;;  %v1610_v48 = vperm.slane %v1605_v12, %v12122_v15  ;;  %v12960_v0 = vld [vmem:[#allocation2 + $0x78] sm:$0xff]   ;;  %vm6548_vm5 = vcmask 44056  }
 0x12a   : > { %v12987_v58 = vunpack.c.l.bf16 %v1682_v25 }
 0x12b   : > { %v1892_v26 = vunpack.c.l.bf16 %v1610_v48 }
 0x12d   : > { %v12970_v51 = vrot.slane %v1892_v26, 7 }
 0x12f   : > { %18031 = vst [vmem:[#allocation36_spill] sm:$0xff] %v12970_v51  ;;  %v1701_v17 = vpop.permute.xlu2 %1700  ;;  %v12980_v50 = vsel %vm1956_vm6, %v12970_v51, %v1958_v6  ;;  %v2053_v26 = vmul.f32 %v10761_v43, %v12970_v51 }
 0x130   : > { %18032 = vst [vmem:[#allocation37_spill] sm:$0xff] %v12980_v50  ;;  %v1621_v12 = vpop.permute.xlu0 %1620  ;;  %v1706_v40 = vperm.slane %v1701_v17, %v12122_v15  ;;  %v1629_v63 = vpop.permute.xlu1 %1628  ;;  %v2054_v8 = vmul.f32 %v10762_v3, %v12980_v50  ;;  %v1968_v17 = vrot.slane %v12985_v31, 7  ;;  %v18035_v31 = vrot.slane %v12968_v54, 7 }
 0x131   : > { %v1626_v39 = vperm.slane %v1621_v12, %v12122_v15  ;;  %v1634_v43 = vperm.slane %v1629_v63, %v12122_v15  ;;  %v2086_v51 = vpack.c.bf16 %v2053_v26, %v2053_v26 }
 0x132   : > { %v12994_v28 = vunpack.c.l.bf16 %v1706_v40  ;;  %v2087_v48 = vpack.c.bf16 %v2054_v8, %v2054_v8 }
 0x133   : > { %v1894_v49 = vunpack.c.l.bf16 %v1626_v39  ;;  %v1895_v25 = vunpack.c.l.bf16 %v1634_v43  ;;  %v2123_v22 = vshrl.u32 %v2086_v51, 16  ;;  %v2126_v33 = vshll.u32 %v2086_v51, 16 }
 0x134   : > { %v2132_v50 = vshll.u32 %v2087_v48, 16  ;;  %v2136_v62 = vshrl.u32 %v2087_v48, 16 }
 0x135   : > { %v1960_v42 = vrot.slane %v1894_v49, 7  ;;  %v1962_v12 = vrot.slane %v1895_v25, 7  ;;  %v2125_v56 = vrot.slane %v2123_v22, 4  ;;  %v2128_v63 = vrot.slane %v2126_v33, 5 }
 0x136   : > { %v2134_v26 = vrot.slane %v2132_v50, 5  ;;  %v2138_v8 = vrot.slane %v2136_v62, 4  ;;  %v18040_v25 = vunpack.c.h.bf16 %v12890_v52 }
 0x137   : > { %v13000_v39 = vsel %vm1956_vm6, %v1958_v6, %v1960_v42  ;;  %v13003_v51 = vsel %vm1956_vm6, %v1960_v42, %v1962_v12  ;;  %v13008_v48 = vsel %vm1956_vm6, %v1962_v12, %v18035_v31  ;;  %v2129_v22 = vor.u32 %v2128_v63, %v2125_v56 }
 0x138   : > { %18033 = vst [vmem:[#allocation38_spill] sm:$0xff] %v13000_v39  ;;  %v1725_v43 = vpop.permute.xlu2 %1724  ;;  %v1661_v33 = vpop.permute.xlu0 %1660  ;;  %v2055_v42 = vmul.f32 %v18039_v2, %v13000_v39  ;;  %v2139_v6 = vor.u32 %v2138_v8, %v2134_v26  ;;  %v2056_v12 = vmul.f32 %v18040_v25, %v13003_v51 }
 0x139   : > { %18034 = vst [vmem:[#allocation39_spill] sm:$0xff] %v13003_v51  ;;  %v1730_v49 = vperm.slane %v1725_v43, %v12122_v15  ;;  %v1645_v50 = vpop.permute.xlu1 %1644  ;;  %v1666_v56 = vperm.slane %v1661_v33, %v12122_v15  ;;  %v2130_v31 = vrot.slane %v2129_v22, 4  ;;  %v18041_v43 = vunpack.c.l.bf16 %v12145_v38 }
 0x13a   : > { %18036 = vst [vmem:[#allocation40_spill] sm:$0xff] %v13008_v48  ;;  %v1650_v63 = vperm.slane %v1645_v50, %v12122_v15  ;;  %v2088_v44 = vpack.c.bf16 %v2055_v42, %v2055_v42  ;;  %v2140_v21 = vrot.slane %v2139_v6, 4  ;;  %v2089_v7 = vpack.c.bf16 %v2056_v12, %v2056_v12 }
 0x13b   : > { %v2057_v40 = vmul.f32 %v18041_v43, %v13008_v48  ;;  %v13028_v3 = vunpack.c.l.bf16 %v1730_v49  ;;  %v1899_v2 = vunpack.c.l.bf16 %v1666_v56  ;;  %v2135_v52 = vsel %vm13013_vm9, %v2130_v31, %v2134_v26 }
 0x13c   : > { %v1897_v8 = vunpack.c.l.bf16 %v1650_v63  ;;  %2446 = vrot.lane.b32.xlu1 %v2135_v52, %s11901_s12  ;;  %v2142_v22 = vshll.u32 %v2088_v44, 16  ;;  %v2152_v50 = vshll.u32 %v2089_v7, 16  ;;  %v2156_v38 = vshrl.u32 %v2089_v7, 16 }
 0x13d   : > { %v2090_v25 = vpack.c.bf16 %v2057_v40, %v2057_v40  ;;  %v1970_v43 = vrot.slane %v1899_v2, 7  ;;  %v2146_v42 = vshrl.u32 %v2088_v44, 16  ;;  %v18043_v40 = vrot.slane %v12968_v54, 7 }
 0x13e   : > { %v1966_v49 = vrot.slane %v1897_v8, 7  ;;  %v2144_v6 = vrot.slane %v2142_v22, 5  ;;  %v2154_v12 = vrot.slane %v2152_v50, 5  ;;  %v2158_v56 = vrot.slane %v2156_v38, 4 }
 0x13f   : > { %v2162_v48 = vshll.u32 %v2090_v25, 16  ;;  %v2166_v63 = vshrl.u32 %v2090_v25, 16  ;;  %v13035_v39 = vsel %vm1956_vm6, %v1968_v17, %v1970_v43  ;;  %v2148_v50 = vrot.slane %v2146_v42, 4 }
 0x140   : > { %18042 = vst [vmem:[#allocation41_spill] sm:$0xff] %v13035_v39  ;;  %v13040_v26 = vsel %vm1956_vm6, %v18043_v40, %v1966_v49  ;;  %v13043_v31 = vsel %vm1956_vm6, %v1966_v49, %v1968_v17  ;;  %v1749_v7 = vpop.permute.xlu2 %1748  ;;  %v1685_v8 = vpop.permute.xlu0 %1684  ;;  %v2145_v25 = vsel %vm13013_vm9, %v2140_v21, %v2144_v6  ;;  %v2159_v22 = vor.u32 %v2158_v56, %v2154_v12 }
 0x141   : > { %18044 = vst [vmem:[#allocation42_spill] sm:$0xff] %v13040_v26  ;;  %v2164_v2 = vrot.slane %v2162_v48, 5  ;;  %v1754_v44 = vperm.slane %v1749_v7, %v12122_v15  ;;  %v1669_v52 = vpop.permute.xlu1 %1668  ;;  %v1690_v38 = vperm.slane %v1685_v8, %v12122_v15  ;;  %2448 = vrot.lane.b32.xlu2 %v2145_v25, %s11901_s12  ;;  %v2058_v17 = vmul.f32 %v10770_v35, %v13040_v26 }
 0x142   : > { %18045 = vst [vmem:[#allocation43_spill] sm:$0xff] %v13043_v31  ;;  %v1674_v54 = vperm.slane %v1669_v52, %v12122_v15  ;;  %v2168_v49 = vrot.slane %v2166_v63, 4  ;;  %v2160_v48 = vrot.slane %v2159_v22, 4  ;;  %v2149_v33 = vor.u32 %v2148_v50, %v2144_v6 }
 0x143   : > { %v13052_v40 = vunpack.c.l.bf16 %v1754_v44  ;;  %v18046_v7 = vunpack.c.l.bf16 %v12893_v19  ;;  %v1902_v21 = vunpack.c.l.bf16 %v1690_v38  ;;  %v2091_v42 = vpack.c.bf16 %v2058_v17, %v2058_v17 }
 0x144   : > { %v1900_v56 = vunpack.c.l.bf16 %v1674_v54  ;;  %v2169_v59 = vor.u32 %v2168_v49, %v2164_v2  ;;  %v2165_v52 = vsel %vm13013_vm9, %v2160_v48, %v2164_v2  ;;  %v2150_v25 = vrot.slane %v2149_v33, 4 }
 0x145   : > { %v2059_v51 = vmul.f32 %v18046_v7, %v13043_v31  ;;  %v18047_v35 = vunpack.c.h.bf16 %v12893_v19  ;;  %v1976_v44 = vrot.slane %v1902_v21, 7  ;;  %2452 = vrot.lane.b32.xlu1 %v2165_v52, %s11901_s12  ;;  %v2172_v50 = vshll.u32 %v2091_v42, 16 }
 0x146   : > { %v1972_v6 = vrot.slane %v1900_v56, 7  ;;  %v2170_v22 = vrot.slane %v2169_v59, 4  ;;  %v2155_v38 = vsel %vm13013_vm9, %v2150_v25, %v2154_v12  ;;  %v2176_v49 = vshrl.u32 %v2091_v42, 16 }
 0x147   : > { %v2060_v63 = vmul.f32 %v18047_v35, %v13035_v39  ;;  %v2092_v54 = vpack.c.bf16 %v2059_v51, %v2059_v51  ;;  %v18048_v7 = vrot.slane %v12987_v58, 7  ;;  %2450 = vrot.lane.b32.xlu0 %v2155_v38, %s11901_s12  ;;  %v2174_v12 = vrot.slane %v2172_v50, 5 }
 0x148   : > { %v13072_v2 = vsel %vm1956_vm6, %v1970_v43, %v1972_v6  ;;  %v1773_v59 = vpop.permute.xlu2 %1772  ;;  %v1709_v51 = vpop.permute.xlu0 %1708 }
 0x149   : > { %v2093_v17 = vpack.c.bf16 %v2060_v63, %v2060_v63  ;;  %v13069_v33 = vsel %vm1956_vm6, %v18048_v7, %v1976_v44  ;;  %18050 = vst [vmem:[#allocation45_spill] sm:$0xff] %v13072_v2  ;;  %v18051_v48 = vmov %v18048_v7  ;;  %v1778_v56 = vperm.slane %v1773_v59, %v12122_v15  ;;  %v1693_v42 = vpop.permute.xlu1 %1692 }
 0x14a   : > { %18049 = vst [vmem:[#allocation44_spill] sm:$0xff] %v13069_v33  ;;  %v13077_v21 = vsel %vm1956_vm6, %v1972_v6, %v18051_v48  ;;  %v2182_v52 = vshll.u32 %v2092_v54, 16  ;;  %v2186_v25 = vshrl.u32 %v2092_v54, 16  ;;  %v1714_v63 = vperm.slane %v1709_v51, %v12122_v15 }
 0x14b   : > { %18052 = vst [vmem:[#allocation46_spill] sm:$0xff] %v13077_v21  ;;  %v2192_v35 = vshll.u32 %v2093_v17, 16  ;;  %v1698_v43 = vperm.slane %v1693_v42, %v12122_v15  ;;  %v2175_v58 = vsel %vm13013_vm9, %v2170_v22, %v2174_v12  ;;  %v2178_v6 = vrot.slane %v2176_v49, 4 }
 0x14c   : > { %v13085_v7 = vunpack.c.l.bf16 %v1778_v56  ;;  %2454 = vrot.lane.b32.xlu2 %v2175_v58, %s11901_s12  ;;  %v2184_v50 = vrot.slane %v2182_v52, 5  ;;  %v2188_v38 = vrot.slane %v2186_v25, 4  ;;  %v1905_v59 = vunpack.c.l.bf16 %v1714_v63 }
 0x14d   : > { %v2194_v48 = vrot.slane %v2192_v35, 5  ;;  %v1903_v8 = vunpack.c.l.bf16 %v1698_v43  ;;  %v2179_v39 = vor.u32 %v2178_v6, %v2174_v12  ;;  %v18053_v54 = vunpack.c.l.bf16 %v12895_v30 }
 0x14e   : > { %v2189_v26 = vor.u32 %v2188_v38, %v2184_v50  ;;  %v2196_v31 = vshrl.u32 %v2093_v17, 16  ;;  %v18054_v22 = vunpack.c.h.bf16 %v12895_v30  ;;  %v1982_v56 = vrot.slane %v1905_v59, 7 }
 0x14f   : > { %v2061_v51 = vmul.f32 %v18053_v54, %v13072_v2  ;;  %v1978_v58 = vrot.slane %v1903_v8, 7  ;;  %v2180_v52 = vrot.slane %v2179_v39, 4  ;;  %v18055_v12 = vunpack.c.l.bf16 %v12900_v46 }
 0x150   : > { %v2062_v49 = vmul.f32 %v18054_v22, %v13077_v21  ;;  %v2190_v35 = vrot.slane %v2189_v26, 4  ;;  %v2198_v63 = vrot.slane %v2196_v31, 4  ;;  %v18056_v54 = vrot.slane %v12994_v28, 7  ;;  %v1797_v31 = vpop.permute.xlu2 %1796 }
 0x151   : > { %v2094_v25 = vpack.c.bf16 %v2061_v51, %v2061_v51  ;;  %v2063_v43 = vmul.f32 %v18055_v12, %v13069_v33  ;;  %v13104_v17 = vsel %vm1956_vm6, %v1976_v44, %v1978_v58  ;;  %v2185_v26 = vsel %vm13013_vm9, %v2180_v52, %v2184_v50  ;;  %v1733_v51 = vpop.permute.xlu0 %1732 }
 0x152   : > { %v2095_v6 = vpack.c.bf16 %v2062_v49, %v2062_v49  ;;  %v13101_v38 = vsel %vm1956_vm6, %v18056_v54, %v1982_v56  ;;  %18058 = vst [vmem:[#allocation48_spill] sm:$0xff] %v13104_v17  ;;  %v18059_v59 = vmov %v18056_v54  ;;  %v2195_v8 = vsel %vm13013_vm9, %v2190_v35, %v2194_v48  ;;  %2456 = vrot.lane.b32.xlu0 %v2185_v26, %s11901_s12  ;;  %v1717_v49 = vpop.permute.xlu1 %1716 }
 0x153   : > { %18057 = vst [vmem:[#allocation47_spill] sm:$0xff] %v13101_v38  ;;  %v13109_v39 = vsel %vm1956_vm6, %v1978_v58, %v18059_v59  ;;  %v1802_v22 = vperm.slane %v1797_v31, %v12122_v15  ;;  %v2199_v44 = vor.u32 %v2198_v63, %v2194_v48  ;;  %v2202_v12 = vshll.u32 %v2094_v25, 16  ;;  %2458 = vrot.lane.b32.xlu1 %v2195_v8, %s11901_s12 }
 0x154   : > { %18060 = vst [vmem:[#allocation49_spill] sm:$0xff] %v13109_v39  ;;  %v1738_v28 = vperm.slane %v1733_v51, %v12122_v15  ;;  %v1722_v58 = vperm.slane %v1717_v49, %v12122_v15  ;;  %v2096_v54 = vpack.c.bf16 %v2063_v43, %v2063_v43  ;;  %v2212_v50 = vshll.u32 %v2095_v6, 16 }
 0x155   : > { %v13120_v52 = vunpack.c.l.bf16 %v1802_v22  ;;  %v2200_v59 = vrot.slane %v2199_v44, 4  ;;  %v2204_v35 = vrot.slane %v2202_v12, 5  ;;  %v2216_v42 = vshrl.u32 %v2095_v6, 16 }
 0x156   : > { %v1908_v26 = vunpack.c.l.bf16 %v1738_v28  ;;  %v1906_v33 = vunpack.c.l.bf16 %v1722_v58  ;;  %v2214_v2 = vrot.slane %v2212_v50, 5  ;;  %v2222_v31 = vshll.u32 %v2096_v54, 16 }
 0x157   : > { %v2205_v63 = vsel %vm13013_vm9, %v2200_v59, %v2204_v35  ;;  %v2218_v8 = vrot.slane %v2216_v42, 4  ;;  %v2206_v51 = vshrl.u32 %v2094_v25, 16  ;;  %v18061_v22 = vunpack.c.h.bf16 %v12900_v46 }
 0x158   : > { %v1988_v21 = vrot.slane %v1908_v26, 7  ;;  %v1984_v49 = vrot.slane %v1906_v33, 7  ;;  %2460 = vrot.lane.b32.xlu2 %v2205_v63, %s11901_s12  ;;  %v2224_v43 = vrot.slane %v2222_v31, 5  ;;  %v2226_v28 = vshrl.u32 %v2096_v54, 16  ;;  %v1821_v31 = vpop.permute.xlu2 %1820 }
 0x159   : > { %v2064_v6 = vmul.f32 %v18061_v22, %v13104_v17  ;;  %v2219_v44 = vor.u32 %v2218_v8, %v2214_v2  ;;  %v2208_v12 = vrot.slane %v2206_v51, 4  ;;  %v18062_v58 = vunpack.c.l.bf16 %v12902_v23  ;;  %v1757_v51 = vpop.permute.xlu0 %1756 }
 0x15a   : > { %v18063_v59 = vrot.slane %v13028_v3, 7  ;;  %v13138_v33 = vsel %vm1956_vm6, %v1982_v56, %v1984_v49  ;;  %v1826_v22 = vperm.slane %v1821_v31, %v12122_v15  ;;  %v2228_v48 = vrot.slane %v2226_v28, 4 }
 0x15b   : > { %v2065_v50 = vmul.f32 %v18062_v58, %v13109_v39  ;;  %18065 = vst [vmem:[#allocation51_spill] sm:$0xff] %v13138_v33  ;;  %v2097_v63 = vpack.c.bf16 %v2064_v6, %v2064_v6  ;;  %v2220_v54 = vrot.slane %v2219_v44, 4  ;;  %v2209_v8 = vor.u32 %v2208_v12, %v2204_v35  ;;  %v1741_v58 = vpop.permute.xlu1 %1740 }
 0x15c   : > { %v13135_v42 = vsel %vm1956_vm6, %v18063_v59, %v1988_v21  ;;  %v18066_v25 = vmov %v18063_v59  ;;  %v1762_v59 = vperm.slane %v1757_v51, %v12122_v15  ;;  %v1746_v17 = vperm.slane %v1741_v58, %v12122_v15 }
 0x15d   : > { %18064 = vst [vmem:[#allocation50_spill] sm:$0xff] %v13135_v42  ;;  %v13143_v26 = vsel %vm1956_vm6, %v1984_v49, %v18066_v25  ;;  %v2232_v56 = vshll.u32 %v2097_v63, 16  ;;  %v18068_v3 = vunpack.c.h.bf16 %v12902_v23  ;;  %v2225_v49 = vsel %vm13013_vm9, %v2220_v54, %v2224_v43 }
 0x15e   : > { %18067 = vst [vmem:[#allocation52_spill] sm:$0xff] %v13143_v26  ;;  %v2210_v6 = vrot.slane %v2209_v8, 4  ;;  %v13153_v44 = vunpack.c.l.bf16 %v1826_v22  ;;  %v2229_v35 = vor.u32 %v2228_v48, %v2224_v43  ;;  %2464 = vrot.lane.b32.xlu1 %v2225_v49, %s11901_s12  ;;  %v1911_v12 = vunpack.c.l.bf16 %v1762_v59 }
 0x15f   : > { %v2066_v39 = vmul.f32 %v18068_v3, %v13101_v38  ;;  %v1909_v28 = vunpack.c.l.bf16 %v1746_v17  ;;  %v2234_v25 = vrot.slane %v2232_v56, 5  ;;  %v2098_v31 = vpack.c.bf16 %v2065_v50, %v2065_v50 }
 0x160   : > { %v2215_v51 = vsel %vm13013_vm9, %v2210_v6, %v2214_v2  ;;  %v2230_v13 = vrot.slane %v2229_v35, 4  ;;  %v1994_v54 = vrot.slane %v1911_v12, 7  ;;  %v2236_v17 = vshrl.u32 %v2097_v63, 16  ;;  %v1845_v63 = vpop.permute.xlu2 %1844 }
 0x161   : > { %v2099_v3 = vpack.c.bf16 %v2066_v39, %v2066_v39  ;;  %2462 = vrot.lane.b32.xlu0 %v2215_v51, %s11901_s12  ;;  %v1990_v8 = vrot.slane %v1909_v28, 7  ;;  %v2242_v22 = vshll.u32 %v2098_v31, 16  ;;  %v2246_v38 = vshrl.u32 %v2098_v31, 16  ;;  %v1781_v31 = vpop.permute.xlu0 %1780 }
 0x162   : > { %v2235_v48 = vsel %vm13013_vm9, %v2230_v13, %v2234_v25  ;;  %v18069_v50 = vunpack.c.l.bf16 %v12905_v34  ;;  %v18070_v2 = vrot.slane %v13052_v40, 7  ;;  %v2238_v28 = vrot.slane %v2236_v17, 4 }
 0x163   : > { %v2252_v43 = vshll.u32 %v2099_v3, 16  ;;  %v13171_v39 = vsel %vm1956_vm6, %v1988_v21, %v1990_v8  ;;  %2466 = vrot.lane.b32.xlu2 %v2235_v48, %s11901_s12  ;;  %v2244_v13 = vrot.slane %v2242_v22, 5  ;;  %v2248_v35 = vrot.slane %v2246_v38, 4 }
 0x164   : > { %v2067_v59 = vmul.f32 %v18069_v50, %v13138_v33  ;;  %v13168_v56 = vsel %vm1956_vm6, %v18070_v2, %v1994_v54  ;;  %18072 = vst [vmem:[#allocation54_spill] sm:$0xff] %v13171_v39  ;;  %v18073_v49 = vmov %v18070_v2  ;;  %v1850_v51 = vperm.slane %v1845_v63, %v12122_v15  ;;  %v1765_v50 = vpop.permute.xlu1 %1764 }
 0x165   : > { %18071 = vst [vmem:[#allocation53_spill] sm:$0xff] %v13168_v56  ;;  %v13176_v6 = vsel %vm1956_vm6, %v1990_v8, %v18073_v49  ;;  %v2254_v12 = vrot.slane %v2252_v43, 5  ;;  %v1786_v2 = vperm.slane %v1781_v31, %v12122_v15  ;;  %v1770_v21 = vperm.slane %v1765_v50, %v12122_v15 }
 0x166   : > { %18074 = vst [vmem:[#allocation55_spill] sm:$0xff] %v13176_v6  ;;  %v2100_v58 = vpack.c.bf16 %v2067_v59, %v2067_v59  ;;  %v2256_v40 = vshrl.u32 %v2099_v3, 16  ;;  %v2249_v33 = vor.u32 %v2248_v35, %v2244_v13  ;;  %v2239_v8 = vor.u32 %v2238_v28, %v2234_v25 }
 0x167   : > { %v13182_v49 = vunpack.c.l.bf16 %v1850_v51  ;;  %v18075_v22 = vunpack.c.h.bf16 %v12905_v34  ;;  %v1914_v48 = vunpack.c.l.bf16 %v1786_v2  ;;  %v1912_v43 = vunpack.c.l.bf16 %v1770_v21 }
 0x168   : > { %v2258_v17 = vrot.slane %v2256_v40, 4  ;;  %v2262_v5 = vshll.u32 %v2100_v58, 16  ;;  %v2250_v63 = vrot.slane %v2249_v33, 4  ;;  %v2240_v53 = vrot.slane %v2239_v8, 4 }
 0x169   : > { %v2068_v38 = vmul.f32 %v18075_v22, %v13143_v26  ;;  %v18076_v59 = vunpack.c.l.bf16 %v12910_v47  ;;  %v2000_v35 = vrot.slane %v1914_v48, 7  ;;  %v1996_v25 = vrot.slane %v1912_v43, 7 }
 0x16a   : > { %v2259_v28 = vor.u32 %v2258_v17, %v2254_v12  ;;  %v2264_v51 = vrot.slane %v2262_v5, 5  ;;  %v2255_v50 = vsel %vm13013_vm9, %v2250_v63, %v2254_v12  ;;  %v2245_v2 = vsel %vm13013_vm9, %v2240_v53, %v2244_v13  ;;  %v1805_v17 = vpop.permute.xlu0 %1804 }
 0x16b   : > { %v2069_v3 = vmul.f32 %v18076_v59, %v13135_v42  ;;  %v2101_v21 = vpack.c.bf16 %v2068_v38, %v2068_v38  ;;  %2470 = vrot.lane.b32.xlu1 %v2255_v50, %s11901_s12  ;;  %2468 = vrot.lane.b32.xlu0 %v2245_v2, %s11901_s12  ;;  %v18077_v33 = vrot.slane %v13085_v7, 7  ;;  %v13203_v22 = vsel %vm1956_vm6, %v1994_v54, %v1996_v25 }
 0x16c   : > { %18079 = vst [vmem:[#allocation57_spill] sm:$0xff] %v13203_v22  ;;  %v2260_v53 = vrot.slane %v2259_v28, 4  ;;  %v2266_v43 = vshrl.u32 %v2100_v58, 16  ;;  %v1789_v63 = vpop.permute.xlu1 %1788  ;;  %v18082_v7 = vunpack.c.h.bf16 %v12910_v47  ;;  %v18084_v26 = vunpack.c.h.bf16 %v12916_v10 }
 0x16d   : > { %v2102_v40 = vpack.c.bf16 %v2069_v3, %v2069_v3  ;;  %v13200_v8 = vsel %vm1956_vm6, %v18077_v33, %v2000_v35  ;;  %v18080_v5 = vmov %v18077_v33  ;;  %v2272_v13 = vshll.u32 %v2101_v21, 16 }
 0x16e   : > { %18078 = vst [vmem:[#allocation56_spill] sm:$0xff] %v13200_v8  ;;  %v13208_v12 = vsel %vm1956_vm6, %v1996_v25, %v18080_v5  ;;  %v2276_v38 = vshrl.u32 %v2101_v21, 16  ;;  %v2265_v59 = vsel %vm13013_vm9, %v2260_v53, %v2264_v51  ;;  %v1810_v3 = vperm.slane %v1805_v17, %v12122_v15 }
 0x16f   : > { %18081 = vst [vmem:[#allocation58_spill] sm:$0xff] %v13208_v12  ;;  %v2282_v48 = vshll.u32 %v2102_v40, 16  ;;  %v1794_v54 = vperm.slane %v1789_v63, %v12122_v15  ;;  %v2070_v50 = vmul.f32 %v18082_v7, %v13171_v39  ;;  %2472 = vrot.lane.b32.xlu2 %v2265_v59, %s11901_s12  ;;  %v2274_v25 = vrot.slane %v2272_v13, 5 }
 0x170   : > { %v2278_v28 = vrot.slane %v2276_v38, 4  ;;  %v2268_v21 = vrot.slane %v2266_v43, 4  ;;  %v1917_v58 = vunpack.c.l.bf16 %v1810_v3  ;;  %v2286_v31 = vshrl.u32 %v2102_v40, 16 }
 0x171   : > { %v2284_v2 = vrot.slane %v2282_v48, 5  ;;  %v1915_v33 = vunpack.c.l.bf16 %v1794_v54  ;;  %v2103_v5 = vpack.c.bf16 %v2070_v50, %v2070_v50  ;;  %v18083_v17 = vunpack.c.l.bf16 %v12916_v10 }
 0x172   : > { %v2279_v42 = vor.u32 %v2278_v28, %v2274_v25  ;;  %v2269_v53 = vor.u32 %v2268_v21, %v2264_v51  ;;  %v2072_v7 = vmul.f32 %v18084_v26, %v13168_v56  ;;  %v2006_v39 = vrot.slane %v1917_v58, 7 }
 0x173   : > { %v2071_v63 = vmul.f32 %v18083_v17, %v13176_v6  ;;  %v2002_v59 = vrot.slane %v1915_v33, 7  ;;  %v2288_v13 = vrot.slane %v2286_v31, 4  ;;  %v2292_v38 = vshll.u32 %v2103_v5, 16 }
 0x174   : > { %v2280_v48 = vrot.slane %v2279_v42, 4  ;;  %v2270_v43 = vrot.slane %v2269_v53, 4  ;;  %v2105_v54 = vpack.c.bf16 %v2072_v7, %v2072_v7  ;;  %v18085_v40 = vrot.slane %v13120_v52, 7  ;;  %v1829_v53 = vpop.permute.xlu0 %1828  ;;  %v1813_v17 = vpop.permute.xlu1 %1812 }
 0x175   : > { %v2104_v3 = vpack.c.bf16 %v2071_v63, %v2071_v63  ;;  %v13230_v50 = vsel %vm1956_vm6, %v2000_v35, %v2002_v59  ;;  %v2289_v21 = vor.u32 %v2288_v13, %v2284_v2  ;;  %v2294_v58 = vrot.slane %v2292_v38, 5 }
 0x176   : > { %v13227_v51 = vsel %vm1956_vm6, %v18085_v40, %v2006_v39  ;;  %18087 = vst [vmem:[#allocation60_spill] sm:$0xff] %v13230_v50  ;;  %v18088_v28 = vmov %v18085_v40  ;;  %v2285_v42 = vsel %vm13013_vm9, %v2280_v48, %v2284_v2  ;;  %v2275_v31 = vsel %vm13013_vm9, %v2270_v43, %v2274_v25 }
 0x177   : > { %18086 = vst [vmem:[#allocation59_spill] sm:$0xff] %v13227_v51  ;;  %v13235_v26 = vsel %vm1956_vm6, %v2002_v59, %v18088_v28  ;;  %v2302_v33 = vshll.u32 %v2104_v3, 16  ;;  %2476 = vrot.lane.b32.xlu1 %v2285_v42, %s11901_s12  ;;  %2474 = vrot.lane.b32.xlu0 %v2275_v31, %s11901_s12  ;;  %v2290_v35 = vrot.slane %v2289_v21, 4  ;;  %v2306_v52 = vshrl.u32 %v2104_v3, 16 }
 0x178   : > { %18089 = vst [vmem:[#allocation61_spill] sm:$0xff] %v13235_v26  ;;  %v2312_v63 = vshll.u32 %v2105_v54, 16  ;;  %v2296_v7 = vshrl.u32 %v2103_v5, 16  ;;  %v1834_v13 = vperm.slane %v1829_v53, %v12122_v15  ;;  %v1818_v2 = vperm.slane %v1813_v17, %v12122_v15 }
 0x179   : > { %v2304_v59 = vrot.slane %v2302_v33, 5  ;;  %v18090_v25 = vunpack.c.l.bf16 %v12918_v27  ;;  %v2295_v48 = vsel %vm13013_vm9, %v2290_v35, %v2294_v58  ;;  %v2308_v43 = vrot.slane %v2306_v52, 4 }
 0x17a   : > { %v2314_v40 = vrot.slane %v2312_v63, 5  ;;  %v2298_v28 = vrot.slane %v2296_v7, 4  ;;  %2478 = vrot.lane.b32.xlu2 %v2295_v48, %s11901_s12  ;;  %v1920_v3 = vunpack.c.l.bf16 %v1834_v13  ;;  %v1918_v21 = vunpack.c.l.bf16 %v1818_v2 }
 0x17b   : > { %v2073_v38 = vmul.f32 %v18090_v25, %v13203_v22  ;;  %v2316_v42 = vshrl.u32 %v2105_v54, 16  ;;  %v2309_v31 = vor.u32 %v2308_v43, %v2304_v59  ;;  %v18091_v53 = vunpack.c.h.bf16 %v12918_v27 }
 0x17c   : > { %v2299_v33 = vor.u32 %v2298_v28, %v2294_v58  ;;  %v18092_v25 = vunpack.c.l.bf16 %v12922_v4  ;;  %v2012_v35 = vrot.slane %v1920_v3, 7  ;;  %v2008_v52 = vrot.slane %v1918_v21, 7  ;;  %v1853_v21 = vpop.permute.xlu0 %1852 }
 0x17d   : > { %v2106_v5 = vpack.c.bf16 %v2073_v38, %v2073_v38  ;;  %v2074_v17 = vmul.f32 %v18091_v53, %v13208_v12  ;;  %v2318_v63 = vrot.slane %v2316_v42, 4  ;;  %v2310_v56 = vrot.slane %v2309_v31, 4  ;;  %v1837_v42 = vpop.permute.xlu1 %1836 }
 0x17e   : > { %v2075_v22 = vmul.f32 %v18092_v25, %v13200_v8  ;;  %v2300_v48 = vrot.slane %v2299_v33, 4  ;;  %v18093_v54 = vrot.slane %v13153_v44, 7  ;;  %v13263_v38 = vsel %vm1956_vm6, %v2006_v39, %v2008_v52 }
 0x17f   : > { %v2322_v7 = vshll.u32 %v2106_v5, 16  ;;  %v2107_v13 = vpack.c.bf16 %v2074_v17, %v2074_v17  ;;  %18095 = vst [vmem:[#allocation63_spill] sm:$0xff] %v13263_v38  ;;  %v2319_v3 = vor.u32 %v2318_v63, %v2314_v40  ;;  %v2315_v31 = vsel %vm13013_vm9, %v2310_v56, %v2314_v40 }
 0x180   : > { %v2108_v2 = vpack.c.bf16 %v2075_v22, %v2075_v22  ;;  %v13260_v58 = vsel %vm1956_vm6, %v18093_v54, %v2012_v35  ;;  %v18096_v43 = vmov %v18093_v54  ;;  %v2305_v22 = vsel %vm13013_vm9, %v2300_v48, %v2304_v59  ;;  %2482 = vrot.lane.b32.xlu1 %v2315_v31, %s11901_s12 }
 0x181   : > { %18094 = vst [vmem:[#allocation62_spill] sm:$0xff] %v13260_v58  ;;  %v13268_v28 = vsel %vm1956_vm6, %v2008_v52, %v18096_v43  ;;  %v2324_v33 = vrot.slane %v2322_v7, 5  ;;  %v2332_v53 = vshll.u32 %v2107_v13, 16  ;;  %2480 = vrot.lane.b32.xlu0 %v2305_v22, %s11901_s12  ;;  %v2320_v39 = vrot.slane %v2319_v3, 4 }
 0x182   : > { %18097 = vst [vmem:[#allocation64_spill] sm:$0xff] %v13268_v28  ;;  %v2336_v44 = vshrl.u32 %v2107_v13, 16  ;;  %v2342_v17 = vshll.u32 %v2108_v2, 16  ;;  %v2326_v25 = vshrl.u32 %v2106_v5, 16  ;;  %v1858_v63 = vperm.slane %v1853_v21, %v12122_v15 }
 0x183   : > { %v2334_v52 = vrot.slane %v2332_v53, 5  ;;  %v1842_v54 = vperm.slane %v1837_v42, %v12122_v15  ;;  %v18098_v56 = vunpack.c.h.bf16 %v12922_v4  ;;  %v2325_v59 = vsel %vm13013_vm9, %v2320_v39, %v2324_v33 }
 0x184   : > { %v2338_v7 = vrot.slane %v2336_v44, 4  ;;  %v2344_v48 = vrot.slane %v2342_v17, 5  ;;  %v2328_v43 = vrot.slane %v2326_v25, 4  ;;  %2484 = vrot.lane.b32.xlu2 %v2325_v59, %s11901_s12  ;;  %v1923_v13 = vunpack.c.l.bf16 %v1858_v63 }
 0x185   : > { %v2076_v40 = vmul.f32 %v18098_v56, %v13230_v50  ;;  %v1921_v3 = vunpack.c.l.bf16 %v1842_v54  ;;  %v2346_v31 = vshrl.u32 %v2108_v2, 16  ;;  %v18099_v15 = vunpack.c.l.bf16 %v12935_v37 }
 0x186   : > { %v2339_v22 = vor.u32 %v2338_v7, %v2334_v52  ;;  %v2329_v21 = vor.u32 %v2328_v43, %v2324_v33  ;;  %v18100_v53 = vunpack.c.h.bf16 %v12935_v37  ;;  %v13290_v39 = vrot.slane %v1923_v13, 7 }
 0x187   : > { %v2109_v5 = vpack.c.bf16 %v2076_v40, %v2076_v40  ;;  %v2077_v42 = vmul.f32 %v18099_v15, %v13235_v26  ;;  %v2014_v44 = vrot.slane %v1921_v3, 7  ;;  %v2348_v17 = vrot.slane %v2346_v31, 4 }
 0x188   : > { %v2078_v56 = vmul.f32 %v18100_v53, %v13227_v51  ;;  %18101 = vst [vmem:[#allocation65_spill] sm:$0xff] %v13290_v39  ;;  %v2340_v59 = vrot.slane %v2339_v22, 4  ;;  %v2330_v63 = vrot.slane %v2329_v21, 4  ;;  %v18103_v33 = vrot.slane %v13182_v49, 7 }
 0x189   : > { %v2352_v25 = vshll.u32 %v2109_v5, 16  ;;  %v2110_v54 = vpack.c.bf16 %v2077_v42, %v2077_v42  ;;  %v13293_v2 = vsel %vm1956_vm6, %v2012_v35, %v2014_v44  ;;  %v2349_v43 = vor.u32 %v2348_v17, %v2344_v48 }
 0x18a   : > { %v2111_v40 = vpack.c.bf16 %v2078_v56, %v2078_v56  ;;  %18102 = vst [vmem:[#allocation66_spill] sm:$0xff] %v13293_v2  ;;  %v13298_v7 = vsel %vm1956_vm6, %v2014_v44, %v18103_v33  ;;  %v2345_v13 = vsel %vm13013_vm9, %v2340_v59, %v2344_v48  ;;  %v2335_v3 = vsel %vm13013_vm9, %v2330_v63, %v2334_v52 }
 0x18b   : > { %18104 = vst [vmem:[#allocation67_spill] sm:$0xff] %v13298_v7  ;;  %v2354_v15 = vrot.slane %v2352_v25, 5  ;;  %v2362_v31 = vshll.u32 %v2110_v54, 16  ;;  %v2366_v22 = vshrl.u32 %v2110_v54, 16  ;;  %2488 = vrot.lane.b32.xlu1 %v2345_v13, %s11901_s12  ;;  %2486 = vrot.lane.b32.xlu0 %v2335_v3, %s11901_s12  ;;  %v2350_v35 = vrot.slane %v2349_v43, 4 }
 0x18c   : > { %v2372_v21 = vshll.u32 %v2111_v40, 16  ;;  %v2356_v42 = vshrl.u32 %v2109_v5, 16  ;;  %v18105_v53 = vunpack.c.l.bf16 %v12958_v36  ;;  %v2376_v25 = vshrl.u32 %v2111_v40, 16 }
 0x18d   : > { %v2364_v44 = vrot.slane %v2362_v31, 5  ;;  %v2368_v17 = vrot.slane %v2366_v22, 4  ;;  %v18106_v48 = vunpack.c.h.bf16 %v12958_v36  ;;  %v2355_v59 = vsel %vm13013_vm9, %v2350_v35, %v2354_v15 }
 0x18e   : > { %v2079_v56 = vmul.f32 %v18105_v53, %v13263_v38  ;;  %v2374_v63 = vrot.slane %v2372_v21, 5  ;;  %v2358_v54 = vrot.slane %v2356_v42, 4  ;;  %2490 = vrot.lane.b32.xlu2 %v2355_v59, %s11901_s12  ;;  %v2378_v43 = vrot.slane %v2376_v25, 4 }
 0x18f   : > { %v2080_v52 = vmul.f32 %v18106_v48, %v13268_v28  ;;  %v2369_v5 = vor.u32 %v2368_v17, %v2364_v44  ;;  %v18107_v13 = vunpack.c.l.bf16 %v12960_v0  ;;  %v18108_v48 = vunpack.c.h.bf16 %v12960_v0 }
 0x190   : > { %v2112_v33 = vpack.c.bf16 %v2079_v56, %v2079_v56  ;;  %v2359_v40 = vor.u32 %v2358_v54, %v2354_v15  ;;  %v2379_v21 = vor.u32 %v2378_v43, %v2374_v63 }
 0x191   : > { %v2081_v3 = vmul.f32 %v18107_v13, %v13260_v58  ;;  %v2113_v31 = vpack.c.bf16 %v2080_v52, %v2080_v52  ;;  %v2082_v38 = vmul.f32 %v18108_v48, %v13293_v2  ;;  %v2370_v35 = vrot.slane %v2369_v5, 4 }
 0x192   : > { %v2382_v22 = vshll.u32 %v2112_v33, 16  ;;  %v2386_v53 = vshrl.u32 %v2112_v33, 16  ;;  %v2360_v28 = vrot.slane %v2359_v40, 4  ;;  %v2380_v13 = vrot.slane %v2379_v21, 4 }
 0x193   : > { %v2114_v42 = vpack.c.bf16 %v2081_v3, %v2081_v3  ;;  %v2392_v56 = vshll.u32 %v2113_v31, 16  ;;  %v2396_v17 = vshrl.u32 %v2113_v31, 16  ;;  %v2375_v51 = vsel %vm13013_vm9, %v2370_v35, %v2374_v63  ;;  %v1602_v3 = vld [vmem:[#allocation2 + $0x88] sm:$0x1] }
 0x194   : > { %v2384_v59 = vrot.slane %v2382_v22, 5  ;;  %v2388_v25 = vrot.slane %v2386_v53, 4  ;;  %2494 = vrot.lane.b32.xlu1 %v2375_v51, %s11901_s12  ;;  %v2365_v54 = vsel %vm13013_vm9, %v2360_v28, %v2364_v44  ;;  %v2115_v43 = vpack.c.bf16 %v2082_v38, %v2082_v38 }
 0x195   : > { %v2394_v52 = vrot.slane %v2392_v56, 5  ;;  %v2402_v15 = vshll.u32 %v2114_v42, 16  ;;  %v2398_v33 = vrot.slane %v2396_v17, 4  ;;  %2492 = vrot.lane.b32.xlu0 %v2365_v54, %s11901_s12  ;;  %v2406_v22 = vshrl.u32 %v2114_v42, 16 }
 0x196   : > { %v2389_v5 = vor.u32 %v2388_v25, %v2384_v59  ;;  %v2385_v31 = vsel %vm13013_vm9, %v2380_v13, %v2384_v59  ;;  %v18109_v63 = vrot.slane %v13182_v49, 7  ;;  %v2412_v28 = vshll.u32 %v2115_v43, 16 }
 0x197   : > { %v2404_v40 = vrot.slane %v2402_v15, 5  ;;  %v2399_v51 = vor.u32 %v2398_v33, %v2394_v52  ;;  %v18111_v38 = vunpack.c.l.bf16 %v12966_v18  ;;  %2496 = vrot.lane.b32.xlu2 %v2385_v31, %s11901_s12  ;;  %v2408_v35 = vrot.slane %v2406_v22, 4 }
 0x198   : > { %v13333_v53 = vsel %vm1956_vm6, %v18109_v63, %v13290_v39  ;;  %v2390_v48 = vrot.slane %v2389_v5, 4  ;;  %v18112_v21 = vunpack.c.h.bf16 %v12966_v18  ;;  %v2416_v56 = vshrl.u32 %v2115_v43, 16 }
 0x199   : > { %18110 = vst [vmem:[#allocation68_spill] sm:$0xff] %v13333_v53  ;;  %v2083_v44 = vmul.f32 %v18111_v38, %v13298_v7  ;;  %v1891_v59 = vunpack.c.l.bf16 %v1602_v3  ;;  %v2400_v49 = vrot.slane %v2399_v51, 4  ;;  %v2414_v17 = vrot.slane %v2412_v28, 5 }
 0x19a   : > { %v2084_v42 = vmul.f32 %v18112_v21, %v13333_v53  ;;  %v18113_v13 = vunpack.c.l.bf16 %v12943_v14  ;;  %v2409_v54 = vor.u32 %v2408_v35, %v2404_v40  ;;  %v2418_v5 = vrot.slane %v2416_v56, 4 }
 0x19b   : > { %v2116_v25 = vpack.c.bf16 %v2083_v44, %v2083_v44  ;;  %v2085_v63 = vmul.f32 %v13290_v39, %v1891_v59  ;;  %v2405_v31 = vsel %vm13013_vm9, %v2400_v49, %v2404_v40  ;;  %v2395_v22 = vsel %vm13013_vm9, %v2390_v48, %v2394_v52 }
 0x19c   : > { %v2644_v15 = vmul.f32 %v18113_v13, %v12227_v60  ;;  %v2117_v33 = vpack.c.bf16 %v2084_v42, %v2084_v42  ;;  %v2410_v51 = vrot.slane %v2409_v54, 4  ;;  %v2419_v38 = vor.u32 %v2418_v5, %v2414_v17  ;;  %2500 = vrot.lane.b32.xlu1 %v2405_v31, %s11901_s12  ;;  %v340_v5 = vld [vmem:[%s12040_s21 + $0xf8] sm:$0xff] }
 0x19d   : > { %v2422_v43 = vshll.u32 %v2116_v25, 16  ;;  %v2426_v3 = vshrl.u32 %v2116_v25, 16  ;;  %v18114_v44 = vunpack.c.l.bf16 %v12937_v45  ;;  %v2118_v56 = vpack.c.bf16 %v2085_v63, %v2085_v63  ;;  %2498 = vrot.lane.b32.xlu0 %v2395_v22, %s11901_s12 }
 0x19e   : > { %v2432_v28 = vshll.u32 %v2117_v33, 16  ;;  %v2436_v59 = vshrl.u32 %v2117_v33, 16  ;;  %v2415_v52 = vsel %vm13013_vm9, %v2410_v51, %v2414_v17  ;;  %v2677_v48 = vpack.c.bf16 %v2644_v15, %v2644_v15 }
 0x19f   : > { %v2641_v35 = vmul.f32 %v18114_v44, %v12182_v11  ;;  %v2424_v21 = vrot.slane %v2422_v43, 5  ;;  %v2428_v42 = vrot.slane %v2426_v3, 4  ;;  %v18115_v49 = vunpack.c.h.bf16 %v12943_v14  ;;  %2502 = vrot.lane.b32.xlu2 %v2415_v52, %s11901_s12 }
 0x1a0   : > { %v2434_v40 = vrot.slane %v2432_v28, 5  ;;  %v2420_v45 = vrot.slane %v2419_v38, 4  ;;  %v2438_v54 = vrot.slane %v2436_v59, 4  ;;  %v2713_v63 = vshrl.u32 %v12952_v29, 16 }
 0x1a1   : > { %v2645_v25 = vmul.f32 %v18115_v49, %v12232_v61  ;;  %v2429_v13 = vor.u32 %v2428_v42, %v2424_v21  ;;  %v2722_v33 = vshrl.u32 %v12954_v32, 16  ;;  %v18116_v31 = vunpack.c.l.bf16 %v12893_v19 }
 0x1a2   : > { %v2439_v15 = vor.u32 %v2438_v54, %v2434_v40  ;;  %v2442_v43 = vshll.u32 %v2118_v56, 16  ;;  %v18117_v14 = vunpack.c.h.bf16 %v12893_v19  ;;  %v2674_v51 = vpack.c.bf16 %v2641_v35, %v2641_v35  ;;  %v2449_v56 = vpop.permute.xlu2 %2448 }
 0x1a3   : > { %v2646_v17 = vmul.f32 %v18116_v31, %v12158_v41  ;;  %v2430_v22 = vrot.slane %v2429_v13, 4  ;;  %v2731_v28 = vshrl.u32 %v2677_v48, 16  ;;  %v2678_v38 = vpack.c.bf16 %v2645_v25, %v2645_v25  ;;  %2544 = vst.msk [vmem:[#allocation3 + $0x4] sm:$0xf] %vm2542_vm10, %v2449_v56 }
 0x1a4   : > { %v2647_v3 = vmul.f32 %v18117_v14, %v12274_v55  ;;  %v372_v44 = vpack.c.bf16 %v340_v5, %v340_v5  ;;  %v2425_v59 = vsel %vm13013_vm9, %v2420_v45, %v2424_v21  ;;  %v2440_v52 = vrot.slane %v2439_v15, 4 }
 0x1a5   : > { %v2435_v42 = vsel %vm13013_vm9, %v2430_v22, %v2434_v40  ;;  %v2715_v49 = vrot.slane %v2713_v63, 7  ;;  %v2724_v13 = vrot.slane %v2722_v33, 7  ;;  %v2444_v19 = vrot.slane %v2442_v43, 5  ;;  %2504 = vrot.lane.b32.xlu0 %v2425_v59, %s11901_s12 }
 0x1a6   : > { %404 = vst.msk [vmem:[#allocation2 + $0x8c] sm:$0xf] %vm300_vm0, %v372_v44  ;;  %2506 = vrot.lane.b32.xlu1 %v2435_v42, %s11901_s12  ;;  %v2679_v35 = vpack.c.bf16 %v2646_v17, %v2646_v17  ;;  %v2725_v25 = vshll.u32 %v12954_v32, 16  ;;  %v2708_v54 = vshrl.u32 %v2674_v51, 16  ;;  %v2716_v40 = vshll.u32 %v12952_v29, 16 }
 0x1a7   : > { %v2445_v21 = vsel %vm13013_vm9, %v2440_v52, %v2444_v19  ;;  %v2733_v45 = vrot.slane %v2731_v28, 7  ;;  %v2740_v5 = vshrl.u32 %v2678_v38, 16  ;;  %v2680_v63 = vpack.c.bf16 %v2647_v3, %v2647_v3 }
 0x1a8   : > { %2508 = vrot.lane.b32.xlu2 %v2445_v21, %s11901_s12  ;;  %v2720_v33 = vrot.slane %v2715_v49, 4  ;;  %v2727_v31 = vor.u32 %v2725_v25, %v2724_v13  ;;  %v18118_v17 = vunpack.c.l.bf16 %v12895_v30  ;;  %v18119_v32 = vunpack.c.h.bf16 %v12895_v30  ;;  %s11910_s12 = smov 6  }
 0x1a9   : > { %v2718_v15 = vor.u32 %v2716_v40, %v2715_v49  ;;  %v2734_v43 = vshll.u32 %v2677_v48, 16  ;;  %v2749_v14 = vshrl.u32 %v2679_v35, 16  ;;  %v10473_v51 = vrot.slane %v2708_v54, 11 }
 0x1aa   : > { %v2648_v22 = vmul.f32 %v18118_v17, %v12279_v57  ;;  %v2649_v29 = vmul.f32 %v18119_v32, %v12365_v9  ;;  %v2729_v44 = vrot.slane %v2724_v13, 4  ;;  %v2742_v42 = vrot.slane %v2740_v5, 7  ;;  %v2455_v54 = vpop.permute.xlu2 %2454 }
 0x1ab   : > { %v2736_v28 = vor.u32 %v2734_v43, %v2733_v45  ;;  %v2758_v3 = vshrl.u32 %v2680_v63, 16  ;;  %v18120_v59 = vunpack.c.l.bf16 %v12900_v46  ;;  %v2728_v19 = vsel %vm12283_vm4, %v2720_v33, %v2727_v31  ;;  %2547 = vst.msk [vmem:[#allocation3 + $0x10] sm:$0xf] %vm2542_vm10, %v2455_v54 }
 0x1ac   : > { %v2681_v56 = vpack.c.bf16 %v2648_v22, %v2648_v22  ;;  %v2682_v25 = vpack.c.bf16 %v2649_v29, %v2649_v29  ;;  %v2719_v30 = vsel %vm12283_vm4, %v10473_v51, %v2718_v15  ;;  %v2751_v48 = vrot.slane %v2749_v14, 7  ;;  %v18123_v51 = vld [vmem:[#allocation15_spill] sm:$0xff] }
 0x1ad   : > { %v2650_v52 = vmul.f32 %v18120_v59, %v12327_v16  ;;  %v2752_v49 = vshll.u32 %v2679_v35, 16  ;;  %2999 = vrot.lane.b32.xlu0 %v2719_v30, %s11902_s13  ;;  %v2743_v13 = vshll.u32 %v2678_v38, 16  ;;  %v2737_v40 = vsel %vm12283_vm4, %v2729_v44, %v2736_v28 }
 0x1ae   : > { %3001 = vrot.lane.b32.xlu1 %v2728_v19, %s11902_s13  ;;  %v2747_v21 = vrot.slane %v2742_v42, 4  ;;  %v2760_v5 = vrot.slane %v2758_v3, 7  ;;  %v2767_v31 = vshrl.u32 %v2681_v56, 16  ;;  %v2776_v17 = vshrl.u32 %v2682_v25, 16 }
 0x1af   : > { %v2683_v33 = vpack.c.bf16 %v2650_v52, %v2650_v52  ;;  %v18121_v22 = vunpack.c.h.bf16 %v12900_v46  ;;  %v18122_v38 = vunpack.c.l.bf16 %v12902_v23  ;;  %v2754_v29 = vor.u32 %v2752_v49, %v2751_v48 }
 0x1b0   : > { %3003 = vrot.lane.b32.xlu2 %v2737_v40, %s11902_s13  ;;  %v2738_v15 = vrot.slane %v2733_v45, 4  ;;  %v2745_v43 = vor.u32 %v2743_v13, %v2742_v42  ;;  %v2761_v14 = vshll.u32 %v2680_v63, 16  ;;  %v18124_v44 = vunpack.c.h.bf16 %v12902_v23 }
 0x1b1   : > { %v2651_v35 = vmul.f32 %v18121_v22, %v12330_v24  ;;  %v2652_v32 = vmul.f32 %v18122_v38, %v12381_v20  ;;  %v2755_v3 = vsel %vm12283_vm4, %v2747_v21, %v2754_v29  ;;  %v2785_v52 = vshrl.u32 %v2683_v33, 16  ;;  %v18125_v21 = vld [vmem:[#allocation16_spill] sm:$0xff]  ;;  %v18127_v22 = vld [vmem:[#allocation17_spill] sm:$0xff] }
 0x1b2   : > { %v2653_v28 = vmul.f32 %v18124_v44, %v18123_v51  ;;  %v2763_v59 = vor.u32 %v2761_v14, %v2760_v5  ;;  %v2769_v19 = vrot.slane %v2767_v31, 7  ;;  %v2778_v46 = vrot.slane %v2776_v17, 7  ;;  %v2461_v44 = vpop.permute.xlu2 %2460 }
 0x1b3   : > { %v2684_v30 = vpack.c.bf16 %v2651_v35, %v2651_v35  ;;  %v2685_v54 = vpack.c.bf16 %v2652_v32, %v2652_v32  ;;  %v2746_v45 = vsel %vm12283_vm4, %v2738_v15, %v2745_v43  ;;  %v2756_v42 = vrot.slane %v2751_v48, 4  ;;  %2550 = vst.msk [vmem:[#allocation3 + $0x1c] sm:$0xf] %vm2542_vm10, %v2461_v44 }
 0x1b4   : > { %v2779_v63 = vshll.u32 %v2682_v25, 16  ;;  %v2770_v23 = vshll.u32 %v2681_v56, 16  ;;  %v2686_v49 = vpack.c.bf16 %v2653_v28, %v2653_v28  ;;  %v2787_v40 = vrot.slane %v2785_v52, 7  ;;  %v2447_v56 = vpop.permute.xlu1 %2446  ;;  %v18129_v52 = vld [vmem:[#allocation18_spill] sm:$0xff] }
 0x1b5   : > { %3005 = vrot.lane.b32.xlu0 %v2746_v45, %s11902_s13  ;;  %v2764_v13 = vsel %vm12283_vm4, %v2756_v42, %v2763_v59  ;;  %v18126_v31 = vunpack.c.l.bf16 %v12905_v34  ;;  %v18128_v35 = vunpack.c.h.bf16 %v12905_v34  ;;  %v2774_v48 = vrot.slane %v2769_v19, 4  ;;  %2543 = vst.msk [vmem:[#allocation3] sm:$0xf] %vm2542_vm10, %v2447_v56 }
 0x1b6   : > { %3007 = vrot.lane.b32.xlu1 %v2755_v3, %s11902_s13  ;;  %v2781_v32 = vor.u32 %v2779_v63, %v2778_v46  ;;  %v2794_v29 = vshrl.u32 %v2684_v30, 16  ;;  %v2803_v25 = vshrl.u32 %v2685_v54, 16  ;;  %v2765_v15 = vrot.slane %v2760_v5, 4 }
 0x1b7   : > { %v2654_v17 = vmul.f32 %v18126_v31, %v18125_v21  ;;  %v2655_v38 = vmul.f32 %v18128_v35, %v18127_v22  ;;  %v2772_v43 = vor.u32 %v2770_v23, %v2769_v19  ;;  %v2788_v14 = vshll.u32 %v2683_v33, 16 }
 0x1b8   : > { %3009 = vrot.lane.b32.xlu2 %v2764_v13, %s11902_s13  ;;  %v2812_v28 = vshrl.u32 %v2686_v49, 16  ;;  %v18130_v45 = vunpack.c.l.bf16 %v12910_v47  ;;  %v2782_v63 = vsel %vm12283_vm4, %v2774_v48, %v2781_v32  ;;  %v2796_v13 = vrot.slane %v2794_v29, 7 }
 0x1b9   : > { %v2790_v3 = vor.u32 %v2788_v14, %v2787_v40  ;;  %v2687_v59 = vpack.c.bf16 %v2654_v17, %v2654_v17  ;;  %v2688_v34 = vpack.c.bf16 %v2655_v38, %v2655_v38  ;;  %v2805_v5 = vrot.slane %v2803_v25, 7  ;;  %v18131_v25 = vld [vmem:[#allocation19_spill] sm:$0xff] }
 0x1ba   : > { %v2656_v42 = vmul.f32 %v18130_v45, %v18129_v52  ;;  %v2773_v33 = vsel %vm12283_vm4, %v2765_v15, %v2772_v43  ;;  %v2783_v19 = vrot.slane %v2778_v46, 4  ;;  %v2806_v23 = vshll.u32 %v2685_v54, 16  ;;  %v18133_v43 = vld [vmem:[#allocation20_spill] sm:$0xff] }
 0x1bb   : > { %v2797_v31 = vshll.u32 %v2684_v30, 16  ;;  %v2814_v17 = vrot.slane %v2812_v28, 7  ;;  %v2815_v35 = vshll.u32 %v2686_v49, 16  ;;  %v2821_v56 = vshrl.u32 %v2687_v59, 16 }
 0x1bc   : > { %v2791_v38 = vsel %vm12283_vm4, %v2783_v19, %v2790_v3  ;;  %v2830_v14 = vshrl.u32 %v2688_v34, 16  ;;  %v2689_v48 = vpack.c.bf16 %v2656_v42, %v2656_v42  ;;  %v2801_v32 = vrot.slane %v2796_v13, 4  ;;  %v2453_v28 = vpop.permute.xlu1 %2452 }
 0x1bd   : > { %3011 = vrot.lane.b32.xlu0 %v2773_v33, %s11902_s13  ;;  %v2808_v29 = vor.u32 %v2806_v23, %v2805_v5  ;;  %v18132_v15 = vunpack.c.h.bf16 %v12910_v47  ;;  %v18134_v54 = vunpack.c.l.bf16 %v12916_v10  ;;  %v2792_v44 = vrot.slane %v2787_v40, 4  ;;  %2546 = vst.msk [vmem:[#allocation3 + $0xc] sm:$0xf] %vm2542_vm10, %v2453_v28  ;;  %v2467_v3 = vpop.permute.xlu2 %2466  ;;  %v2451_v33 = vpop.permute.xlu0 %2450  ;;  %v18135_v23 = vld [vmem:[#allocation21_spill] sm:$0xff] }
 0x1be   : > { %3013 = vrot.lane.b32.xlu1 %v2782_v63, %s11902_s13  ;;  %v2799_v49 = vor.u32 %v2797_v31, %v2796_v13  ;;  %v2817_v45 = vor.u32 %v2815_v35, %v2814_v17  ;;  %v2823_v42 = vrot.slane %v2821_v56, 7  ;;  %v2832_v63 = vrot.slane %v2830_v14, 7  ;;  %2553 = vst.msk [vmem:[#allocation3 + $0x28] sm:$0xf] %vm2542_vm10, %v2467_v3 }
 0x1bf   : > { %v2657_v46 = vmul.f32 %v18132_v15, %v18131_v25  ;;  %v2658_v30 = vmul.f32 %v18134_v54, %v18133_v43  ;;  %v2839_v19 = vshrl.u32 %v2689_v48, 16  ;;  %v2809_v15 = vsel %vm12283_vm4, %v2801_v32, %v2808_v29  ;;  %2545 = vst.msk [vmem:[#allocation3 + $0x8] sm:$0xf] %vm2542_vm10, %v2451_v33 }
 0x1c0   : > { %3015 = vrot.lane.b32.xlu2 %v2791_v38, %s11902_s13  ;;  %v18136_v38 = vunpack.c.h.bf16 %v12916_v10  ;;  %v2810_v25 = vrot.slane %v2805_v5, 4  ;;  %v2800_v31 = vsel %vm12283_vm4, %v2792_v44, %v2799_v49  ;;  %v2833_v35 = vshll.u32 %v2688_v34, 16  ;;  %v18139_v49 = vld [vmem:[#allocation27_spill] sm:$0xff] }
 0x1c1   : > { %v2690_v40 = vpack.c.bf16 %v2657_v46, %v2657_v46  ;;  %v2691_v13 = vpack.c.bf16 %v2658_v30, %v2658_v30  ;;  %v2824_v56 = vshll.u32 %v2687_v59, 16  ;;  %v2828_v14 = vrot.slane %v2823_v42, 4  ;;  %v18137_v30 = vld [vmem:[#allocation22_spill] sm:$0xff] }
 0x1c2   : > { %v2659_v47 = vmul.f32 %v18136_v38, %v18135_v23  ;;  %v2818_v10 = vsel %vm12283_vm4, %v2810_v25, %v2817_v45  ;;  %v2835_v5 = vor.u32 %v2833_v35, %v2832_v63  ;;  %v2841_v32 = vrot.slane %v2839_v19, 7 }
 0x1c3   : > { %v2848_v46 = vshrl.u32 %v2690_v40, 16  ;;  %v2857_v54 = vshrl.u32 %v2691_v13, 16  ;;  %v18138_v44 = vunpack.c.l.bf16 %v12918_v27  ;;  %v18140_v28 = vunpack.c.h.bf16 %v12918_v27 }
 0x1c4   : > { %v2692_v29 = vpack.c.bf16 %v2659_v47, %v2659_v47  ;;  %v2819_v33 = vrot.slane %v2814_v17, 4  ;;  %v2826_v38 = vor.u32 %v2824_v56, %v2823_v42  ;;  %v2842_v25 = vshll.u32 %v2689_v48, 16  ;;  %v18141_v47 = vld [vmem:[#allocation23_spill] sm:$0xff] }
 0x1c5   : > { %3017 = vrot.lane.b32.xlu0 %v2800_v31, %s11902_s13  ;;  %v2660_v34 = vmul.f32 %v18138_v44, %v18137_v30  ;;  %v2661_v3 = vmul.f32 %v18140_v28, %v18139_v49  ;;  %v2836_v59 = vsel %vm12283_vm4, %v2828_v14, %v2835_v5  ;;  %v2850_v35 = vrot.slane %v2848_v46, 7  ;;  %v2457_v23 = vpop.permute.xlu0 %2456  ;;  %v2459_v48 = vpop.permute.xlu1 %2458  ;;  %v18143_v14 = vld [vmem:[#allocation24_spill] sm:$0xff] }
 0x1c6   : > { %3019 = vrot.lane.b32.xlu1 %v2809_v15, %s11902_s13  ;;  %v2844_v45 = vor.u32 %v2842_v25, %v2841_v32  ;;  %v2866_v19 = vshrl.u32 %v2692_v29, 16  ;;  %v18142_v15 = vunpack.c.l.bf16 %v12922_v4  ;;  %v2827_v27 = vsel %vm12283_vm4, %v2819_v33, %v2826_v38  ;;  %2548 = vst.msk [vmem:[#allocation3 + $0x14] sm:$0xf] %vm2542_vm10, %v2457_v23 }
 0x1c7   : > { %v2693_v44 = vpack.c.bf16 %v2660_v34, %v2660_v34  ;;  %v2694_v30 = vpack.c.bf16 %v2661_v3, %v2661_v3  ;;  %v2837_v17 = vrot.slane %v2832_v63, 4  ;;  %v2860_v56 = vshll.u32 %v2691_v13, 16  ;;  %2549 = vst.msk [vmem:[#allocation3 + $0x18] sm:$0xf] %vm2542_vm10, %v2459_v48 }
 0x1c8   : > { %3021 = vrot.lane.b32.xlu2 %v2818_v10, %s11902_s13  ;;  %v2662_v31 = vmul.f32 %v18142_v15, %v18141_v47  ;;  %v2859_v10 = vrot.slane %v2857_v54, 7  ;;  %v18144_v5 = vunpack.c.h.bf16 %v12922_v4  ;;  %v18145_v54 = vld [vmem:[#allocation28_spill] sm:$0xff]  ;;  %v18146_v34 = vunpack.c.l.bf16 %v12935_v37 }
 0x1c9   : > { %v2473_v42 = vpop.permute.xlu2 %2472  ;;  %v2845_v63 = vsel %vm12283_vm4, %v2837_v17, %v2844_v45  ;;  %v2851_v23 = vshll.u32 %v2690_v40, 16  ;;  %v2868_v3 = vrot.slane %v2866_v19, 7  ;;  %v2855_v13 = vrot.slane %v2850_v35, 4  ;;  %v18178_v47 = vld [vmem:[#allocation48_spill] sm:$0xff] }
 0x1ca   : > { %v2663_v46 = vmul.f32 %v18144_v5, %v18143_v14  ;;  %v2664_v28 = vmul.f32 %v18146_v34, %v18145_v54  ;;  %2556 = vst.msk [vmem:[#allocation3 + $0x34] sm:$0xf] %vm2542_vm10, %v2473_v42  ;;  %v2695_v33 = vpack.c.bf16 %v2662_v31, %v2662_v31  ;;  %v2862_v38 = vor.u32 %v2860_v56, %v2859_v10  ;;  %v18147_v34 = vld [vmem:[#allocation25_spill] sm:$0xff] }
 0x1cb   : > { %v2875_v25 = vshrl.u32 %v2693_v44, 16  ;;  %v2846_v4 = vrot.slane %v2841_v32, 4  ;;  %v2853_v15 = vor.u32 %v2851_v23, %v2850_v35  ;;  %v18148_v54 = vunpack.c.h.bf16 %v12935_v37 }
 0x1cc   : > { %v2696_v48 = vpack.c.bf16 %v2663_v46, %v2663_v46  ;;  %v2697_v5 = vpack.c.bf16 %v2664_v28, %v2664_v28  ;;  %v2893_v42 = vshrl.u32 %v2695_v33, 16  ;;  %v2863_v40 = vsel %vm12283_vm4, %v2855_v13, %v2862_v38  ;;  %v18149_v13 = vld [vmem:[#allocation26_spill] sm:$0xff] }
 0x1cd   : > { %3023 = vrot.lane.b32.xlu0 %v2827_v27, %s11902_s13  ;;  %v2869_v27 = vshll.u32 %v2692_v29, 16  ;;  %v2665_v45 = vmul.f32 %v18148_v54, %v18147_v34  ;;  %v2877_v19 = vrot.slane %v2875_v25, 7  ;;  %v2854_v32 = vsel %vm12283_vm4, %v2846_v4, %v2853_v15 }
 0x1ce   : > { %3025 = vrot.lane.b32.xlu1 %v2836_v59, %s11902_s13  ;;  %v2884_v59 = vshrl.u32 %v2694_v30, 16  ;;  %v2864_v35 = vrot.slane %v2859_v10, 4  ;;  %v2878_v29 = vshll.u32 %v2693_v44, 16  ;;  %v2887_v56 = vshll.u32 %v2694_v30, 16 }
 0x1cf   : > { %v2871_v17 = vor.u32 %v2869_v27, %v2868_v3  ;;  %v2902_v46 = vshrl.u32 %v2696_v48, 16  ;;  %v2911_v37 = vshrl.u32 %v2697_v5, 16  ;;  %v2698_v54 = vpack.c.bf16 %v2665_v45, %v2665_v45 }
 0x1d0   : > { %3027 = vrot.lane.b32.xlu2 %v2845_v63, %s11902_s13  ;;  %v2886_v31 = vrot.slane %v2884_v59, 7  ;;  %v2465_v63 = vpop.permute.xlu1 %2464  ;;  %v2895_v23 = vrot.slane %v2893_v42, 7  ;;  %v18150_v38 = vunpack.c.l.bf16 %v12958_v36  ;;  %v18151_v59 = vld [vmem:[#allocation34_spill] sm:$0xff]  ;;  %v18152_v4 = vunpack.c.h.bf16 %v12958_v36 }
 0x1d1   : > { %v2872_v28 = vsel %vm12283_vm4, %v2864_v35, %v2871_v17  ;;  %v2882_v30 = vrot.slane %v2877_v19, 4  ;;  %2552 = vst.msk [vmem:[#allocation3 + $0x24] sm:$0xf] %vm2542_vm10, %v2465_v63  ;;  %v2873_v27 = vrot.slane %v2868_v3, 4  ;;  %v2880_v45 = vor.u32 %v2878_v29, %v2877_v19 }
 0x1d2   : > { %v2666_v25 = vmul.f32 %v18150_v38, %v18149_v13  ;;  %v2667_v10 = vmul.f32 %v18152_v4, %v18151_v59  ;;  %v2889_v15 = vor.u32 %v2887_v56, %v2886_v31  ;;  %v2896_v42 = vshll.u32 %v2695_v33, 16  ;;  %v18172_v13 = vld [vmem:[#allocation45_spill] sm:$0xff] }
 0x1d3   : > { %v2463_v17 = vpop.permute.xlu0 %2462  ;;  %v2920_v35 = vshrl.u32 %v2698_v54, 16  ;;  %v18154_v59 = vunpack.c.l.bf16 %v12960_v0  ;;  %v2881_v3 = vsel %vm12283_vm4, %v2873_v27, %v2880_v45  ;;  %v2891_v33 = vrot.slane %v2886_v31, 4  ;;  %v18157_v31 = vld [vmem:[#allocation35_spill] sm:$0xff] }
 0x1d4   : > { %v2479_v44 = vpop.permute.xlu2 %2478  ;;  %2551 = vst.msk [vmem:[#allocation3 + $0x20] sm:$0xf] %vm2542_vm10, %v2463_v17  ;;  %v2898_v36 = vor.u32 %v2896_v42, %v2895_v23  ;;  %v2699_v38 = vpack.c.bf16 %v2666_v25, %v2666_v25  ;;  %v2700_v4 = vpack.c.bf16 %v2667_v10, %v2667_v10  ;;  %v2890_v63 = vsel %vm12283_vm4, %v2882_v30, %v2889_v15  ;;  %v18155_v30 = vld [vmem:[#allocation30_spill] sm:$0xff] }
 0x1d5   : > { %3029 = vrot.lane.b32.xlu0 %v2854_v32, %s11902_s13  ;;  %2559 = vst.msk [vmem:[#allocation3 + $0x40] sm:$0xf] %vm2542_vm10, %v2479_v44  ;;  %v2913_v32 = vrot.slane %v2911_v37, 7  ;;  %v2914_v44 = vshll.u32 %v2697_v5, 16  ;;  %v2922_v37 = vrot.slane %v2920_v35, 7  ;;  %v2923_v5 = vshll.u32 %v2698_v54, 16 }
 0x1d6   : > { %3031 = vrot.lane.b32.xlu1 %v2863_v40, %s11902_s13  ;;  %v2904_v40 = vrot.slane %v2902_v46, 7  ;;  %v2905_v46 = vshll.u32 %v2696_v48, 16  ;;  %v2899_v25 = vsel %vm12283_vm4, %v2891_v33, %v2898_v36  ;;  %v2938_v10 = vshrl.u32 %v2700_v4, 16 }
 0x1d7   : > { %v2916_v29 = vor.u32 %v2914_v44, %v2913_v32  ;;  %v18156_v15 = vunpack.c.h.bf16 %v12960_v0  ;;  %v18158_v45 = vunpack.c.l.bf16 %v12966_v18  ;;  %v2900_v48 = vrot.slane %v2895_v23, 4  ;;  %v11510_v44 = vld [vmem:[#allocation2 + $0x88] sm:$0xff]  }
 0x1d8   : > { %3033 = vrot.lane.b32.xlu2 %v2872_v28, %s11902_s13  ;;  %v18153_v28 = vld [vmem:[#allocation29_spill] sm:$0xff]  ;;  %v2909_v19 = vrot.slane %v2904_v40, 4  ;;  %v2907_v35 = vor.u32 %v2905_v46, %v2904_v40  ;;  %v2940_v0 = vrot.slane %v2938_v10, 7  ;;  %v10885_v46 = vunpack.c.l.bf16 %v11510_v44 }
 0x1d9   : > { %v2668_v56 = vmul.f32 %v18154_v59, %v18153_v28  ;;  %v2929_v59 = vshrl.u32 %v2699_v38, 16  ;;  %v2669_v27 = vmul.f32 %v18156_v15, %v18155_v30  ;;  %v2670_v42 = vmul.f32 %v18158_v45, %v18157_v31  ;;  %v18159_v30 = vld [vmem:[#allocation32_spill] sm:$0xff] }
 0x1da   : > { %v2917_v36 = vsel %vm12283_vm4, %v2909_v19, %v2916_v29  ;;  %v18160_v28 = vunpack.c.h.bf16 %v12966_v18  ;;  %v2941_v19 = vshll.u32 %v2700_v4, 16  ;;  %vm5422_vm0 = vcmask 1041408  }
 0x1db   : > { %v2701_v17 = vpack.c.bf16 %v2668_v56, %v2668_v56  ;;  %v2918_v56 = vrot.slane %v2913_v32, 4  ;;  %v2702_v23 = vpack.c.bf16 %v2669_v27, %v2669_v27  ;;  %v2703_v40 = vpack.c.bf16 %v2670_v42, %v2670_v42 }
 0x1dc   : > { %v2671_v45 = vmul.f32 %v18160_v28, %v18159_v30  ;;  %v2908_v32 = vsel %vm12283_vm4, %v2900_v48, %v2907_v35  ;;  %v2932_v28 = vshll.u32 %v2699_v38, 16  ;;  %v18162_v48 = vld [vmem:[#allocation31_spill] sm:$0xff]  ;;  %v13679_v30 = vld [vmem:[#allocation2 + $0x40] sm:$0xff]   ;;  %vm7133_vm6 = vcmask 68656  }
 0x1dd   : > { %3035 = vrot.lane.b32.xlu0 %v2881_v3, %s11902_s13  ;;  %v2925_v3 = vor.u32 %v2923_v5, %v2922_v37  ;;  %v2469_v54 = vpop.permute.xlu0 %2468  ;;  %v2471_v33 = vpop.permute.xlu1 %2470  ;;  %v2947_v15 = vshrl.u32 %v2701_v17, 16  ;;  %v2956_v27 = vshrl.u32 %v2702_v23, 16  ;;  %v2965_v42 = vshrl.u32 %v2703_v40, 16 }
 0x1de   : > { %3037 = vrot.lane.b32.xlu1 %v2890_v63, %s11902_s13  ;;  %v2485_v63 = vpop.permute.xlu2 %2484  ;;  %2554 = vst.msk [vmem:[#allocation3 + $0x2c] sm:$0xf] %vm2542_vm10, %v2469_v54  ;;  %v2704_v5 = vpack.c.bf16 %v2671_v45, %v2671_v45  ;;  %v2927_v54 = vrot.slane %v2922_v37, 4 }
 0x1df   : > { %2562 = vst.msk [vmem:[#allocation3 + $0x4c] sm:$0xf] %vm2542_vm10, %v2485_v63  ;;  %v10886_v63 = vunpack.c.h.bf16 %v11510_v44  ;;  %v2926_v18 = vsel %vm12283_vm4, %v2918_v56, %v2925_v3  ;;  %v2949_v10 = vrot.slane %v2947_v15, 7  ;;  %v18161_v44 = vld [vmem:[#allocation33_spill] sm:$0xff]  ;;  %v2958_v15 = vrot.slane %v2956_v27, 7 }
 0x1e0   : > { %3039 = vrot.lane.b32.xlu2 %v2899_v25, %s11902_s13  ;;  %v2931_v25 = vrot.slane %v2929_v59, 7  ;;  %2555 = vst.msk [vmem:[#allocation3 + $0x30] sm:$0xf] %vm2542_vm10, %v2471_v33  ;;  %v2943_v59 = vor.u32 %v2941_v19, %v2940_v0  ;;  %v2950_v33 = vshll.u32 %v2701_v17, 16  ;;  %v2974_v3 = vshrl.u32 %v2704_v5, 16 }
 0x1e1   : > { %v2673_v35 = vmul.f32 %v10886_v63, %v18162_v48  ;;  %v2967_v45 = vrot.slane %v2965_v42, 7  ;;  %v2945_v17 = vrot.slane %v2940_v0, 4  ;;  %v2968_v63 = vshll.u32 %v2703_v40, 16 }
 0x1e2   : > { %v2936_v29 = vrot.slane %v2931_v25, 4  ;;  %v2934_v4 = vor.u32 %v2932_v28, %v2931_v25  ;;  %v2952_v56 = vor.u32 %v2950_v33, %v2949_v10  ;;  %v2963_v27 = vrot.slane %v2958_v15, 4 }
 0x1e3   : > { %v2970_v42 = vor.u32 %v2968_v63, %v2967_v45 }
 0x1e4   : > { %v2944_v38 = vsel %vm12283_vm4, %v2936_v29, %v2943_v59  ;;  %v2953_v28 = vsel %vm12283_vm4, %v2945_v17, %v2952_v56  ;;  %v2959_v29 = vshll.u32 %v2702_v23, 16  ;;  %v2976_v59 = vrot.slane %v2974_v3, 7 }
 0x1e5   : > { %3041 = vrot.lane.b32.xlu0 %v2908_v32, %s11902_s13  ;;  %v2972_v3 = vrot.slane %v2967_v45, 4 }
 0x1e6   : > { %3043 = vrot.lane.b32.xlu1 %v2917_v36, %s11902_s13  ;;  %v2672_v36 = vmul.f32 %v10885_v46, %v18161_v44  ;;  %v2935_v46 = vsel %vm12283_vm4, %v2927_v54, %v2934_v4  ;;  %v2954_v54 = vrot.slane %v2949_v10, 4  ;;  %v2961_v0 = vor.u32 %v2959_v29, %v2958_v15 }
 0x1e7   : > { %v2977_v4 = vshll.u32 %v2704_v5, 16  ;;  %v2981_v63 = vrot.slane %v2976_v59, 4 }
 0x1e8   : > { %3045 = vrot.lane.b32.xlu2 %v2926_v18, %s11902_s13  ;;  %v2491_v32 = vpop.permute.xlu2 %2490  ;;  %v2705_v19 = vpack.c.bf16 %v2672_v36, %v2672_v36  ;;  %v2706_v18 = vpack.c.bf16 %v2673_v35, %v2673_v35  ;;  %v2962_v23 = vsel %vm12283_vm4, %v2954_v54, %v2961_v0  ;;  %v3131_v54 = vld [vmem:[#allocation2 + $0x1c] sm:$0xf] }
 0x1e9   : > { %2565 = vst.msk [vmem:[#allocation3 + $0x58] sm:$0xf] %vm2542_vm10, %v2491_v32  ;;  %v2475_v37 = vpop.permute.xlu0 %2474  ;;  %v2477_v25 = vpop.permute.xlu1 %2476  ;;  %v2979_v40 = vor.u32 %v2977_v4, %v2976_v59  ;;  %v2971_v32 = vsel %vm12283_vm4, %v2963_v27, %v2970_v42 }
 0x1ea   : > { %2557 = vst.msk [vmem:[#allocation3 + $0x38] sm:$0xf] %vm2542_vm10, %v2475_v37  ;;  %v2983_v36 = vshrl.u32 %v2705_v19, 16  ;;  %v2992_v35 = vshrl.u32 %v2706_v18, 16  ;;  %v2995_v5 = vshll.u32 %v2706_v18, 16  ;;  %v2986_v37 = vshll.u32 %v2705_v19, 16 }
 0x1eb   : > { %2558 = vst.msk [vmem:[#allocation3 + $0x3c] sm:$0xf] %vm2542_vm10, %v2477_v25  ;;  %v3128_v19 = vld [vmem:[#allocation2 + $0x10] sm:$0xf] }
 0x1ec   : > { %v2994_v56 = vrot.slane %v2992_v35, 7  ;;  %v3129_v35 = vld [vmem:[#allocation2 + $0x14] sm:$0xf] }
 0x1ed   : > { %3047 = vrot.lane.b32.xlu0 %v2935_v46, %s11902_s13  ;;  %v2980_v46 = vsel %vm12283_vm4, %v2972_v3, %v2979_v40  ;;  %v3133_v40 = vld [vmem:[#allocation2 + $0x24] sm:$0xf] }
 0x1ee   : > { %3049 = vrot.lane.b32.xlu1 %v2944_v38, %s11902_s13  ;;  %v2985_v38 = vrot.slane %v2983_v36, 7  ;;  %v2997_v17 = vor.u32 %v2995_v5, %v2994_v56  ;;  %v3130_v36 = vld [vmem:[#allocation2 + $0x18] sm:$0xf]  ;;  %v3137_v5 = vld [vmem:[#allocation2 + $0x34] sm:$0xf] }
 0x1f0   : > { %3051 = vrot.lane.b32.xlu2 %v2953_v28, %s11902_s13  ;;  %v2990_v25 = vrot.slane %v2985_v38, 4  ;;  %v2988_v28 = vor.u32 %v2986_v37, %v2985_v38  ;;  %v3134_v38 = vld [vmem:[#allocation2 + $0x28] sm:$0xf] }
 0x1f1   : > { %v2497_v33 = vpop.permute.xlu2 %2496 }
 0x1f2   : > { %2568 = vst.msk [vmem:[#allocation3 + $0x64] sm:$0xf] %vm2542_vm10, %v2497_v33  ;;  %v2483_v15 = vpop.permute.xlu1 %2482  ;;  %v2998_v18 = vsel %vm12283_vm4, %v2990_v25, %v2997_v17  ;;  %v2989_v29 = vsel %vm12283_vm4, %v2981_v63, %v2988_v28  ;;  %v3139_v17 = vld [vmem:[#allocation2 + $0x3c] sm:$0xf]  ;;  %v3138_v63 = vld [vmem:[#allocation2 + $0x38] sm:$0xf] }
 0x1f3   : > { %v2481_v10 = vpop.permute.xlu0 %2480  ;;  %2561 = vst.msk [vmem:[#allocation3 + $0x48] sm:$0xf] %vm2542_vm10, %v2483_v15  ;;  %v3135_v15 = vld [vmem:[#allocation2 + $0x2c] sm:$0xf]  ;;  %v3140_v28 = vld [vmem:[#allocation2 + $0x40] sm:$0xf] }
 0x1f4   : > { %2560 = vst.msk [vmem:[#allocation3 + $0x44] sm:$0xf] %vm2542_vm10, %v2481_v10  ;;  %v3136_v10 = vld [vmem:[#allocation2 + $0x30] sm:$0xf] }
 0x1f5   : > { %3053 = vrot.lane.b32.xlu0 %v2962_v23, %s11902_s13 }
 0x1f6   : > { %3055 = vrot.lane.b32.xlu1 %v2971_v32, %s11902_s13  ;;  %v3132_v32 = vld [vmem:[#allocation2 + $0x20] sm:$0xf] }
 0x1f8   : > { %3057 = vrot.lane.b32.xlu2 %v2980_v46, %s11902_s13 }
 0x1f9   : > { %v2503_v45 = vpop.permute.xlu2 %2502 }
 0x1fa   : > { %2571 = vst.msk [vmem:[#allocation3 + $0x70] sm:$0xf] %vm2542_vm10, %v2503_v45 }
 0x1fd   : > { %3059 = vrot.lane.b32.xlu0 %v2989_v29, %s11902_s13  ;;  %v2487_v27 = vpop.permute.xlu0 %2486  ;;  %v2489_v42 = vpop.permute.xlu1 %2488 }
 0x1fe   : > { %3061 = vrot.lane.b32.xlu1 %v2998_v18, %s11902_s13  ;;  %2563 = vst.msk [vmem:[#allocation3 + $0x50] sm:$0xf] %vm2542_vm10, %v2487_v27  ;;  %v3141_v27 = vld [vmem:[#allocation2 + $0x44] sm:$0xf] }
 0x1ff   : > { %2564 = vst.msk [vmem:[#allocation3 + $0x54] sm:$0xf] %vm2542_vm10, %v2489_v42  ;;  %v3143_v42 = vld [vmem:[#allocation2 + $0x4c] sm:$0xf] }
 0x200   : > { %3192 = vrot.lane.b32.xlu2 %v3128_v19, %s11903_s14  ;;  %v3142_v19 = vld [vmem:[#allocation2 + $0x48] sm:$0xf] }
 0x202   : > { %v2509_v59 = vpop.permute.xlu2 %2508 }
 0x203   : > { %2574 = vst.msk [vmem:[#allocation3 + $0x7c] sm:$0xf] %vm2542_vm10, %v2509_v59 }
 0x205   : > { %3194 = vrot.lane.b32.xlu0 %v3129_v35, %s11903_s14 }
 0x206   : > { %3196 = vrot.lane.b32.xlu1 %v3130_v36, %s11903_s14  ;;  %v2495_v0 = vpop.permute.xlu1 %2494 }
 0x207   : > { %v2493_v4 = vpop.permute.xlu0 %2492  ;;  %2567 = vst.msk [vmem:[#allocation3 + $0x60] sm:$0xf] %vm2542_vm10, %v2495_v0  ;;  %v3144_v0 = vld [vmem:[#allocation2 + $0x50] sm:$0xf] }
 0x208   : > { %3198 = vrot.lane.b32.xlu2 %v3131_v54, %s11903_s14  ;;  %2566 = vst.msk [vmem:[#allocation3 + $0x5c] sm:$0xf] %vm2542_vm10, %v2493_v4  ;;  %v3145_v54 = vld [vmem:[#allocation2 + $0x54] sm:$0xf]  ;;  %v3146_v4 = vld [vmem:[#allocation2 + $0x58] sm:$0xf] }
 0x20a   : > { %v3004_v33 = vpop.permute.xlu2 %3003 }
 0x20b   : > { %3098 = vst.msk [vmem:[#allocation3 + $0x8] sm:$0xf] %vm3095_vm11, %v3004_v33 }
 0x20d   : > { %3200 = vrot.lane.b32.xlu0 %v3132_v32, %s11903_s14 }
 0x20e   : > { %3202 = vrot.lane.b32.xlu1 %v3133_v40, %s11903_s14  ;;  %v2501_v56 = vpop.permute.xlu1 %2500 }
 0x20f   : > { %v2499_v23 = vpop.permute.xlu0 %2498  ;;  %2570 = vst.msk [vmem:[#allocation3 + $0x6c] sm:$0xf] %vm2542_vm10, %v2501_v56  ;;  %v3147_v56 = vld [vmem:[#allocation2 + $0x5c] sm:$0xf] }
 0x210   : > { %3204 = vrot.lane.b32.xlu2 %v3134_v38, %s11903_s14  ;;  %2569 = vst.msk [vmem:[#allocation3 + $0x68] sm:$0xf] %vm2542_vm10, %v2499_v23  ;;  %v3148_v38 = vld [vmem:[#allocation2 + $0x60] sm:$0xf]  ;;  %v11511_v23 = vld [vmem:[#allocation2 + $0x10] sm:$0xff]  }
 0x212   : > { %v3010_v3 = vpop.permute.xlu2 %3009 }
 0x213   : > { %3101 = vst.msk [vmem:[#allocation3 + $0x14] sm:$0xf] %vm3095_vm11, %v3010_v3  ;;  %v3149_v3 = vld [vmem:[#allocation2 + $0x64] sm:$0xf] }
 0x215   : > { %3206 = vrot.lane.b32.xlu0 %v3135_v15, %s11903_s14 }
 0x216   : > { %3208 = vrot.lane.b32.xlu1 %v3136_v10, %s11903_s14  ;;  %v10889_v10 = vunpack.c.l.bf16 %v11511_v23 }
 0x217   : > { %v2505_v37 = vpop.permute.xlu0 %2504 }
 0x218   : > { %v2507_v46 = vpop.permute.xlu1 %2506  ;;  %3210 = vrot.lane.b32.xlu2 %v3137_v5, %s11903_s14  ;;  %2572 = vst.msk [vmem:[#allocation3 + $0x74] sm:$0xf] %vm2542_vm10, %v2505_v37  ;;  %v3151_v37 = vld [vmem:[#allocation2 + $0x6c] sm:$0xf] }
 0x219   : > { %2573 = vst.msk [vmem:[#allocation3 + $0x78] sm:$0xf] %vm2542_vm10, %v2507_v46  ;;  %vm8464_vm10 = vcmask 142456  }
 0x21a   : > { %v3016_v25 = vpop.permute.xlu2 %3015 }
 0x21b   : > { %3104 = vst.msk [vmem:[#allocation3 + $0x20] sm:$0xf] %vm3095_vm11, %v3016_v25  ;;  %v18163_v25 = vld [vmem:[#allocation36_spill] sm:$0xff] }
 0x21d   : > { %3212 = vrot.lane.b32.xlu0 %v3138_v63, %s11903_s14  ;;  %v3150_v63 = vld [vmem:[#allocation2 + $0x68] sm:$0xf] }
 0x21e   : > { %3214 = vrot.lane.b32.xlu1 %v3139_v17, %s11903_s14  ;;  %v3387_v17 = vmul.f32 %v10889_v10, %v18163_v25  ;;  %v18166_v10 = vld [vmem:[#allocation38_spill] sm:$0xff] }
 0x21f   : > { %v3000_v18 = vpop.permute.xlu0 %2999  ;;  %v13669_v25 = vld [vmem:[#allocation2 + $0x30] sm:$0xff]  }
 0x220   : > { %v3002_v45 = vpop.permute.xlu1 %3001  ;;  %3216 = vrot.lane.b32.xlu2 %v3140_v28, %s11903_s14  ;;  %3096 = vst.msk [vmem:[#allocation3] sm:$0xf] %vm3095_vm11, %v3000_v18  ;;  %v10890_v28 = vunpack.c.h.bf16 %v11511_v23  ;;  %v3420_v18 = vpack.c.bf16 %v3387_v17, %v3387_v17 }
 0x221   : > { %3097 = vst.msk [vmem:[#allocation3 + $0x4] sm:$0xf] %vm3095_vm11, %v3002_v45  ;;  %v3152_v45 = vld [vmem:[#allocation2 + $0x70] sm:$0xf] }
 0x222   : > { %v3022_v29 = vpop.permute.xlu2 %3021 }
 0x223   : > { %3107 = vst.msk [vmem:[#allocation3 + $0x2c] sm:$0xf] %vm3095_vm11, %v3022_v29  ;;  %v13624_v29 = vld [vmem:[#allocation2 + $0x18] sm:$0xff]  }
 0x225   : > { %3218 = vrot.lane.b32.xlu0 %v3141_v27, %s11903_s14 }
 0x226   : > { %3220 = vrot.lane.b32.xlu1 %v3142_v19, %s11903_s14 }
 0x227   : > { %v3006_v36 = vpop.permute.xlu0 %3005 }
 0x228   : > { %v3008_v59 = vpop.permute.xlu1 %3007  ;;  %3222 = vrot.lane.b32.xlu2 %v3143_v42, %s11903_s14  ;;  %3099 = vst.msk [vmem:[#allocation3 + $0xc] sm:$0xf] %vm3095_vm11, %v3006_v36  ;;  %v18164_v42 = vld [vmem:[#allocation37_spill] sm:$0xff]  ;;  %v17824_v36 = vunpack.c.h.bf16 %v13624_v29 }
 0x229   : > { %3100 = vst.msk [vmem:[#allocation3 + $0x10] sm:$0xf] %vm3095_vm11, %v3008_v59  ;;  %v3388_v59 = vmul.f32 %v10890_v28, %v18164_v42 }
 0x22a   : > { %v3028_v35 = vpop.permute.xlu2 %3027 }
 0x22b   : > { %3110 = vst.msk [vmem:[#allocation3 + $0x38] sm:$0xf] %vm3095_vm11, %v3028_v35  ;;  %v3421_v23 = vpack.c.bf16 %v3388_v59, %v3388_v59 }
 0x22d   : > { %3224 = vrot.lane.b32.xlu0 %v3144_v0, %s11903_s14  ;;  %v3454_v0 = vshrl.u32 %v3420_v18, 16  ;;  %v3467_v59 = vshrl.u32 %v3421_v23, 16 }
 0x22e   : > { %3226 = vrot.lane.b32.xlu1 %v3145_v54, %s11903_s14  ;;  %v3154_v54 = vld [vmem:[#allocation2 + $0x78] sm:$0xf] }
 0x22f   : > { %v3012_v40 = vpop.permute.xlu0 %3011 }
 0x230   : > { %v3014_v33 = vpop.permute.xlu1 %3013  ;;  %3228 = vrot.lane.b32.xlu2 %v3146_v4, %s11903_s14  ;;  %3102 = vst.msk [vmem:[#allocation3 + $0x18] sm:$0xf] %vm3095_vm11, %v3012_v40  ;;  %v3457_v4 = vshll.u32 %v3420_v18, 16  ;;  %v3153_v40 = vld [vmem:[#allocation2 + $0x74] sm:$0xf]  ;;  %v13647_v18 = vld [vmem:[#allocation2 + $0x28] sm:$0xff]  }
 0x231   : > { %3103 = vst.msk [vmem:[#allocation3 + $0x1c] sm:$0xf] %vm3095_vm11, %v3014_v33  ;;  %v13631_v33 = vld [vmem:[#allocation2 + $0x20] sm:$0xff]  }
 0x232   : > { %v3034_v32 = vpop.permute.xlu2 %3033 }
 0x233   : > { %3113 = vst.msk [vmem:[#allocation3 + $0x44] sm:$0xf] %vm3095_vm11, %v3034_v32  ;;  %v17825_v32 = vunpack.c.l.bf16 %v13624_v29 }
 0x235   : > { %3230 = vrot.lane.b32.xlu0 %v3147_v56, %s11903_s14 }
 0x236   : > { %3232 = vrot.lane.b32.xlu1 %v3148_v38, %s11903_s14  ;;  %v18165_v38 = vld [vmem:[#allocation39_spill] sm:$0xff] }
 0x237   : > { %v3018_v5 = vpop.permute.xlu0 %3017  ;;  %v3390_v56 = vmul.f32 %v17824_v36, %v18165_v38  ;;  %v18168_v38 = vld [vmem:[#allocation43_spill] sm:$0xff] }
 0x238   : > { %v3020_v15 = vpop.permute.xlu1 %3019  ;;  %3234 = vrot.lane.b32.xlu2 %v3149_v3, %s11903_s14  ;;  %3105 = vst.msk [vmem:[#allocation3 + $0x24] sm:$0xf] %vm3095_vm11, %v3018_v5  ;;  %v3155_v3 = vld [vmem:[#allocation2 + $0x7c] sm:$0xf]  ;;  %v17823_v5 = vunpack.c.l.bf16 %v13631_v33 }
 0x239   : > { %3106 = vst.msk [vmem:[#allocation3 + $0x28] sm:$0xf] %vm3095_vm11, %v3020_v15  ;;  %v3389_v15 = vmul.f32 %v17825_v32, %v18166_v10 }
 0x23a   : > { %v3040_v46 = vpop.permute.xlu2 %3039 }
 0x23b   : > { %3116 = vst.msk [vmem:[#allocation3 + $0x50] sm:$0xf] %vm3095_vm11, %v3040_v46  ;;  %v3456_v46 = vrot.slane %v3454_v0, 4  ;;  %v3157_v0 = vld [vmem:[#allocation2 + $0x84] sm:$0xf] }
 0x23d   : > { %3236 = vrot.lane.b32.xlu0 %v3150_v63, %s11903_s14  ;;  %v18167_v63 = vld [vmem:[#allocation40_spill] sm:$0xff] }
 0x23e   : > { %3238 = vrot.lane.b32.xlu1 %v3151_v37, %s11903_s14  ;;  %v3459_v37 = vrot.slane %v3457_v4, 5  ;;  %v3391_v28 = vmul.f32 %v17823_v5, %v18167_v63 }
 0x23f   : > { %v3024_v27 = vpop.permute.xlu0 %3023 }
 0x240   : > { %v3026_v19 = vpop.permute.xlu1 %3025  ;;  %3240 = vrot.lane.b32.xlu2 %v3152_v45, %s11903_s14  ;;  %3108 = vst.msk [vmem:[#allocation3 + $0x30] sm:$0xf] %vm3095_vm11, %v3024_v27  ;;  %v3423_v45 = vpack.c.bf16 %v3390_v56, %v3390_v56  ;;  %v3463_v27 = vshll.u32 %v3421_v23, 16  ;;  %v3460_v4 = vor.u32 %v3459_v37, %v3456_v46  ;;  %v3156_v56 = vld [vmem:[#allocation2 + $0x80] sm:$0xf]  ;;  %v3424_v5 = vpack.c.bf16 %v3391_v28, %v3391_v28 }
 0x241   : > { %3109 = vst.msk [vmem:[#allocation3 + $0x34] sm:$0xf] %vm3095_vm11, %v3026_v19  ;;  %v17827_v23 = vunpack.c.h.bf16 %v13647_v18  ;;  %v3158_v46 = vld [vmem:[#allocation2 + $0x88] sm:$0xf] }
 0x242   : > { %v3046_v35 = vpop.permute.xlu2 %3045  ;;  %v3483_v36 = vshll.u32 %v3423_v45, 16  ;;  %v3487_v32 = vshrl.u32 %v3423_v45, 16  ;;  %v3465_v63 = vrot.slane %v3463_v27, 5  ;;  %v3461_v45 = vrot.slane %v3460_v4, 4  ;;  %v18170_v27 = vld [vmem:[#allocation41_spill] sm:$0xff] }
 0x243   : > { %3119 = vst.msk [vmem:[#allocation3 + $0x5c] sm:$0xf] %vm3095_vm11, %v3046_v35  ;;  %v3422_v35 = vpack.c.bf16 %v3389_v15, %v3389_v15 }
 0x244   : > { %v13667_v42 = vrot.slane %v3483_v36, 5 }
 0x245   : > { %3242 = vrot.lane.b32.xlu0 %v3153_v40, %s11903_s14  ;;  %v17826_v40 = vunpack.c.l.bf16 %v13647_v18  ;;  %v3473_v37 = vshll.u32 %v3422_v35, 16 }
 0x246   : > { %3244 = vrot.lane.b32.xlu1 %v3154_v54, %s11903_s14 }
 0x247   : > { %v3030_v19 = vpop.permute.xlu0 %3029  ;;  %v3393_v15 = vmul.f32 %v17826_v40, %v18168_v38  ;;  %v3489_v40 = vrot.slane %v3487_v32, 4  ;;  %v3493_v38 = vshll.u32 %v3424_v5, 16 }
 0x248   : > { %v3032_v17 = vpop.permute.xlu1 %3031  ;;  %3246 = vrot.lane.b32.xlu2 %v3155_v3, %s11903_s14  ;;  %3111 = vst.msk [vmem:[#allocation3 + $0x3c] sm:$0xf] %vm3095_vm11, %v3030_v19  ;;  %v3469_v3 = vrot.slane %v3467_v59, 4  ;;  %v3477_v19 = vshrl.u32 %v3422_v35, 16  ;;  %v3394_v59 = vmul.f32 %v17827_v23, %v18170_v27  ;;  %v13671_v35 = vld [vmem:[#allocation2 + $0x38] sm:$0xff]   ;;  %v3475_v23 = vrot.slane %v3473_v37, 5 }
 0x249   : > { %3112 = vst.msk [vmem:[#allocation3 + $0x40] sm:$0xf] %vm3095_vm11, %v3032_v17  ;;  %v17828_v17 = vunpack.c.h.bf16 %v13631_v33 }
 0x24a   : > { %v3052_v54 = vpop.permute.xlu2 %3051  ;;  %v3470_v4 = vor.u32 %v3469_v3, %v3465_v63  ;;  %v3427_v32 = vpack.c.bf16 %v3394_v59, %v3394_v59  ;;  %v3159_v3 = vld [vmem:[#allocation2 + $0x8c] sm:$0xf]  ;;  %v18171_v59 = vld [vmem:[#allocation46_spill] sm:$0xff] }
 0x24b   : > { %3122 = vst.msk [vmem:[#allocation3 + $0x68] sm:$0xf] %vm3095_vm11, %v3052_v54  ;;  %v18169_v54 = vld [vmem:[#allocation42_spill] sm:$0xff] }
 0x24c   : > { %v3392_v28 = vmul.f32 %v17828_v17, %v18169_v54  ;;  %v3479_v17 = vrot.slane %v3477_v19, 4  ;;  %v17829_v54 = vunpack.c.h.bf16 %v13669_v25  ;;  %v3471_v37 = vrot.slane %v3470_v4, 4 }
 0x24d   : > { %3248 = vrot.lane.b32.xlu0 %v3156_v56, %s11903_s14  ;;  %v3426_v56 = vpack.c.bf16 %v3393_v15, %v3393_v15  ;;  %v3495_v15 = vrot.slane %v3493_v38, 5  ;;  %v3523_v38 = vshll.u32 %v3427_v32, 16 }
 0x24e   : > { %3250 = vrot.lane.b32.xlu1 %v3157_v0, %s11903_s14  ;;  %v3497_v0 = vshrl.u32 %v3424_v5, 16  ;;  %v3425_v36 = vpack.c.bf16 %v3392_v28, %v3392_v28  ;;  %v3396_v5 = vmul.f32 %v17829_v54, %v18171_v59  ;;  %v3480_v44 = vor.u32 %v3479_v17, %v3475_v23  ;;  %v18174_v59 = vld [vmem:[#allocation44_spill] sm:$0xff] }
 0x24f   : > { %v3036_v48 = vpop.permute.xlu0 %3035  ;;  %v3513_v19 = vshll.u32 %v3426_v56, 16  ;;  %v3517_v28 = vshrl.u32 %v3426_v56, 16  ;;  %v3476_v54 = vsel %vm13013_vm9, %v3471_v37, %v3475_v23  ;;  %v3525_v4 = vrot.slane %v3523_v38, 5 }
 0x250   : > { %v3038_v10 = vpop.permute.xlu1 %3037  ;;  %3252 = vrot.lane.b32.xlu2 %v3158_v46, %s11903_s14  ;;  %3114 = vst.msk [vmem:[#allocation3 + $0x48] sm:$0xf] %vm3095_vm11, %v3036_v48  ;;  %v3490_v48 = vor.u32 %v3489_v40, %v13667_v42  ;;  %v3499_v46 = vrot.slane %v3497_v0, 4  ;;  %v3507_v31 = vshrl.u32 %v3425_v36, 16  ;;  %v3527_v40 = vshrl.u32 %v3427_v32, 16 }
 0x251   : > { %3115 = vst.msk [vmem:[#allocation3 + $0x4c] sm:$0xf] %vm3095_vm11, %v3038_v10  ;;  %v3466_v10 = vsel %vm13013_vm9, %v3461_v45, %v3465_v63  ;;  %v18173_v63 = vunpack.c.l.bf16 %v13669_v25  ;;  %v13702_v32 = vrot.slane %v3513_v19, 5  ;;  %v3481_v0 = vrot.slane %v3480_v44, 4 }
 0x252   : > { %v3058_v27 = vpop.permute.xlu2 %3057  ;;  %v3500_v17 = vor.u32 %v3499_v46, %v3495_v15 }
 0x253   : > { %3125 = vst.msk [vmem:[#allocation3 + $0x74] sm:$0xf] %vm3095_vm11, %v3058_v27  ;;  %v3503_v27 = vshll.u32 %v3425_v36, 16  ;;  %v3395_v45 = vmul.f32 %v18173_v63, %v18172_v13  ;;  %v18175_v36 = vunpack.c.l.bf16 %v13671_v35  ;;  %v3429_v63 = vpack.c.bf16 %v3396_v5, %v3396_v5 }
 0x254   : > { %v3529_v13 = vrot.slane %v3527_v40, 4  ;;  %v18179_v5 = vunpack.c.h.bf16 %v13671_v35 }
 0x255   : > { %3254 = vrot.lane.b32.xlu0 %v3159_v3, %s11903_s14  ;;  %v3397_v34 = vmul.f32 %v18175_v36, %v18174_v59  ;;  %v3519_v3 = vrot.slane %v3517_v28, 4  ;;  %v3505_v23 = vrot.slane %v3503_v27, 5  ;;  %v3428_v46 = vpack.c.bf16 %v3395_v45, %v3395_v45  ;;  %v18176_v36 = vld [vmem:[#allocation49_spill] sm:$0xff]  ;;  %s11911_s14 = smov 9  }
 0x256   : > { %3777 = vrot.lane.b32.xlu1 %v3466_v10, %s11904_s15  ;;  %v3491_v10 = vrot.slane %v3490_v48, 4  ;;  %v3509_v48 = vrot.slane %v3507_v31, 4  ;;  %v18177_v59 = vunpack.c.l.bf16 %v13679_v30  ;;  %v3398_v28 = vmul.f32 %v18179_v5, %v18178_v47  ;;  %v18180_v5 = vld [vmem:[#allocation47_spill] sm:$0xff] }
 0x257   : > { %v3042_v14 = vpop.permute.xlu0 %3041  ;;  %v3430_v19 = vpack.c.bf16 %v3397_v34, %v3397_v34  ;;  %v3520_v44 = vor.u32 %v3519_v3, %v13702_v32  ;;  %v3543_v27 = vshll.u32 %v3429_v63, 16  ;;  %v3547_v45 = vshrl.u32 %v3429_v63, 16 }
 0x258   : > { %v3044_v56 = vpop.permute.xlu1 %3043  ;;  %3779 = vrot.lane.b32.xlu2 %v3476_v54, %s11904_s15  ;;  %3117 = vst.msk [vmem:[#allocation3 + $0x54] sm:$0xf] %vm3095_vm11, %v3042_v14  ;;  %v3501_v54 = vrot.slane %v3500_v17, 4  ;;  %v17830_v14 = vunpack.c.h.bf16 %v13679_v30  ;;  %v3496_v31 = vsel %vm13013_vm9, %v3491_v10, %v3495_v15  ;;  %v3510_v34 = vor.u32 %v3509_v48, %v3505_v23  ;;  %v13720_v17 = vld [vmem:[#allocation2 + $0x48] sm:$0xff]  }
 0x259   : > { %3118 = vst.msk [vmem:[#allocation3 + $0x58] sm:$0xf] %vm3095_vm11, %v3044_v56  ;;  %v3399_v56 = vmul.f32 %v18177_v59, %v18176_v36  ;;  %v3486_v59 = vsel %vm13013_vm9, %v3481_v0, %v13667_v42  ;;  %v3533_v38 = vshll.u32 %v3428_v46, 16  ;;  %v3537_v40 = vshrl.u32 %v3428_v46, 16 }
 0x25a   : > { %v3193_v37 = vpop.permute.xlu2 %3192  ;;  %v3400_v15 = vmul.f32 %v17830_v14, %v18180_v5  ;;  %v3506_v63 = vsel %vm13013_vm9, %v3501_v54, %v3505_v23  ;;  %v3431_v36 = vpack.c.bf16 %v3398_v28, %v3398_v28  ;;  %v3557_v42 = vshrl.u32 %v3430_v19, 16  ;;  %v13735_v54 = vld [vmem:[#allocation2 + $0x50] sm:$0xff]  }
 0x25b   : > { %3289 = vst.msk [vmem:[#allocation3] sm:$0xf] %vm3288_vm12, %v3193_v37  ;;  %v3530_v37 = vor.u32 %v3529_v13, %v3525_v4  ;;  %v3432_v10 = vpack.c.bf16 %v3399_v56, %v3399_v56  ;;  %v3521_v48 = vrot.slane %v3520_v44, 4  ;;  %v13730_v46 = vrot.slane %v3543_v27, 5 }
 0x25c   : > { %v3549_v13 = vrot.slane %v3547_v45, 4  ;;  %v3511_v56 = vrot.slane %v3510_v34, 4  ;;  %v3535_v14 = vrot.slane %v3533_v38, 5  ;;  %v3539_v5 = vrot.slane %v3537_v40, 4 }
 0x25d   : > { %3781 = vrot.lane.b32.xlu0 %v3486_v59, %s11904_s15  ;;  %v17831_v23 = vunpack.c.h.bf16 %v13720_v17  ;;  %v3531_v28 = vrot.slane %v3530_v37, 4  ;;  %v3573_v47 = vshll.u32 %v3432_v10, 16  ;;  %v3559_v27 = vrot.slane %v3557_v42, 4 }
 0x25e   : > { %3783 = vrot.lane.b32.xlu1 %v3496_v31, %s11904_s15  ;;  %v3553_v31 = vshll.u32 %v3430_v19, 16  ;;  %v3563_v45 = vshll.u32 %v3431_v36, 16  ;;  %v3567_v59 = vshrl.u32 %v3431_v36, 16  ;;  %v3526_v34 = vsel %vm13013_vm9, %v3521_v48, %v3525_v4 }
 0x25f   : > { %v3048_v0 = vpop.permute.xlu0 %3047  ;;  %v3550_v38 = vor.u32 %v3549_v13, %v13730_v46  ;;  %v3536_v36 = vsel %vm13013_vm9, %v3531_v28, %v3535_v14  ;;  %v18183_v4 = vunpack.c.l.bf16 %v13720_v17  ;;  %v13755_v48 = vrot.slane %v3573_v47, 5 }
 0x260   : > { %v3050_v3 = vpop.permute.xlu1 %3049  ;;  %3785 = vrot.lane.b32.xlu2 %v3506_v63, %s11904_s15  ;;  %3120 = vst.msk [vmem:[#allocation3 + $0x60] sm:$0xf] %vm3095_vm11, %v3048_v0  ;;  %v3577_v63 = vshrl.u32 %v3432_v10, 16  ;;  %v3555_v44 = vrot.slane %v3553_v31, 5  ;;  %v18181_v0 = vld [vmem:[#allocation52_spill] sm:$0xff]  ;;  %v3540_v10 = vor.u32 %v3539_v5, %v3535_v14  ;;  %v18182_v31 = vld [vmem:[#allocation51_spill] sm:$0xff] }
 0x261   : > { %3121 = vst.msk [vmem:[#allocation3 + $0x64] sm:$0xf] %vm3095_vm11, %v3050_v3  ;;  %v3433_v3 = vpack.c.bf16 %v3400_v15, %v3400_v15  ;;  %v3402_v37 = vmul.f32 %v17831_v23, %v18181_v0  ;;  %v3516_v15 = vsel %vm13013_vm9, %v3511_v56, %v13702_v32  ;;  %v3401_v42 = vmul.f32 %v18183_v4, %v18182_v31  ;;  %v18184_v32 = vld [vmem:[#allocation50_spill] sm:$0xff]  ;;  %v13760_v14 = vld [vmem:[#allocation2 + $0x58] sm:$0xff]  }
 0x262   : > { %v3199_v19 = vpop.permute.xlu2 %3198  ;;  %v3579_v13 = vrot.slane %v3577_v63, 4  ;;  %v3560_v40 = vor.u32 %v3559_v27, %v3555_v44  ;;  %v3565_v0 = vrot.slane %v3563_v45, 5  ;;  %v3569_v49 = vrot.slane %v3567_v59, 4 }
 0x263   : > { %3292 = vst.msk [vmem:[#allocation3 + $0xc] sm:$0xf] %vm3288_vm12, %v3199_v19  ;;  %v3583_v19 = vshll.u32 %v3433_v3, 16  ;;  %v3587_v23 = vshrl.u32 %v3433_v3, 16  ;;  %v18185_v56 = vunpack.c.l.bf16 %v13735_v54  ;;  %v3551_v47 = vrot.slane %v3550_v38, 4 }
 0x264   : > { %v3541_v3 = vrot.slane %v3540_v10, 4  ;;  %v3434_v63 = vpack.c.bf16 %v3401_v42, %v3401_v42  ;;  %v17835_v27 = vunpack.c.h.bf16 %v13735_v54  ;;  %v3580_v45 = vor.u32 %v3579_v13, %v13755_v48 }
 0x265   : > { %3787 = vrot.lane.b32.xlu0 %v3516_v15, %s11904_s15  ;;  %v3403_v28 = vmul.f32 %v18185_v56, %v18184_v32  ;;  %v3435_v15 = vpack.c.bf16 %v3402_v37, %v3402_v37  ;;  %v3585_v4 = vrot.slane %v3583_v19, 5  ;;  %v3589_v56 = vrot.slane %v3587_v23, 4  ;;  %v18186_v19 = vld [vmem:[#allocation54_spill] sm:$0xff] }
 0x266   : > { %3789 = vrot.lane.b32.xlu1 %v3526_v34, %s11904_s15  ;;  %v17832_v32 = vunpack.c.l.bf16 %v13760_v14  ;;  %v3570_v31 = vor.u32 %v3569_v49, %v3565_v0  ;;  %v3556_v37 = vsel %vm13013_vm9, %v3551_v47, %v3555_v44  ;;  %v3546_v23 = vsel %vm13013_vm9, %v3541_v3, %v13730_v46  ;;  %v18188_v46 = vld [vmem:[#allocation53_spill] sm:$0xff] }
 0x267   : > { %v3054_v5 = vpop.permute.xlu0 %3053  ;;  %v3603_v10 = vshll.u32 %v3435_v15, 16  ;;  %v3607_v42 = vshrl.u32 %v3435_v15, 16  ;;  %v3597_v49 = vshrl.u32 %v3434_v63, 16  ;;  %v3590_v47 = vor.u32 %v3589_v56, %v3585_v4  ;;  %v13785_v15 = vld [vmem:[#allocation2 + $0x60] sm:$0xff]  }
 0x268   : > { %v3056_v34 = vpop.permute.xlu1 %3055  ;;  %3791 = vrot.lane.b32.xlu2 %v3536_v36, %s11904_s15  ;;  %3123 = vst.msk [vmem:[#allocation3 + $0x6c] sm:$0xf] %vm3095_vm11, %v3054_v5  ;;  %v3436_v36 = vpack.c.bf16 %v3403_v28, %v3403_v28  ;;  %v3405_v13 = vmul.f32 %v17832_v32, %v13176_v6  ;;  %v3404_v28 = vmul.f32 %v17835_v27, %v18186_v19  ;;  %v3581_v5 = vrot.slane %v3580_v45, 4  ;;  %v13790_v6 = vld [vmem:[#allocation2 + $0x68] sm:$0xff]  }
 0x269   : > { %3124 = vst.msk [vmem:[#allocation3 + $0x70] sm:$0xf] %vm3095_vm11, %v3056_v34  ;;  %v3561_v34 = vrot.slane %v3560_v40, 4  ;;  %v3593_v40 = vshll.u32 %v3434_v63, 16  ;;  %v18189_v3 = vunpack.c.h.bf16 %v13760_v14  ;;  %v3609_v45 = vrot.slane %v3607_v42, 4 }
 0x26a   : > { %v3205_v59 = vpop.permute.xlu2 %3204  ;;  %18187 = vst [vmem:[#allocation69_spill] sm:$0xff] %v13785_v15  ;;  %v3613_v32 = vshll.u32 %v3436_v36, 16  ;;  %v3617_v38 = vshrl.u32 %v3436_v36, 16  ;;  %v3438_v56 = vpack.c.bf16 %v3405_v13, %v3405_v13  ;;  %v3437_v36 = vpack.c.bf16 %v3404_v28, %v3404_v28 }
 0x26b   : > { %3295 = vst.msk [vmem:[#allocation3 + $0x18] sm:$0xf] %vm3288_vm12, %v3205_v59  ;;  %v3566_v44 = vsel %vm13013_vm9, %v3561_v34, %v3565_v0  ;;  %v3406_v63 = vmul.f32 %v18189_v3, %v18188_v46  ;;  %v13794_v0 = vrot.slane %v3603_v10, 5  ;;  %v3599_v34 = vrot.slane %v3597_v49, 4 }
 0x26c   : > { %v3586_v3 = vsel %vm13013_vm9, %v3581_v5, %v3585_v4  ;;  %v3591_v46 = vrot.slane %v3590_v47, 4  ;;  %v3615_v10 = vrot.slane %v3613_v32, 5  ;;  %v3619_v42 = vrot.slane %v3617_v38, 4 }
 0x26d   : > { %3793 = vrot.lane.b32.xlu0 %v3546_v23, %s11904_s15  ;;  %v3439_v13 = vpack.c.bf16 %v3406_v63, %v3406_v63  ;;  %v3610_v49 = vor.u32 %v3609_v45, %v13794_v0  ;;  %v3633_v28 = vshll.u32 %v3438_v56, 16  ;;  %v3637_v4 = vshrl.u32 %v3438_v56, 16  ;;  %v18190_v23 = vld [vmem:[#allocation57_spill] sm:$0xff] }
 0x26e   : > { %3795 = vrot.lane.b32.xlu1 %v3556_v37, %s11904_s15  ;;  %v3571_v37 = vrot.slane %v3570_v31, 4  ;;  %v3595_v31 = vrot.slane %v3593_v40, 5  ;;  %v13806_v40 = vld [vmem:[#allocation2 + $0x70] sm:$0xff]   ;;  %v3623_v47 = vshll.u32 %v3437_v36, 16  ;;  %v18192_v38 = vunpack.c.l.bf16 %v13790_v6 }
 0x26f   : > { %v3060_v27 = vpop.permute.xlu0 %3059 }
 0x270   : > { %v3062_v59 = vpop.permute.xlu1 %3061  ;;  %3797 = vrot.lane.b32.xlu2 %v3566_v44, %s11904_s15  ;;  %3126 = vst.msk [vmem:[#allocation3 + $0x78] sm:$0xf] %vm3095_vm11, %v3060_v27  ;;  %v3576_v27 = vsel %vm13013_vm9, %v3571_v37, %v13755_v48  ;;  %v3627_v44 = vshrl.u32 %v3437_v36, 16  ;;  %v18191_v48 = vunpack.c.l.bf16 %v13785_v15  ;;  %v3409_v37 = vmul.f32 %v18192_v38, %v13200_v8 }
 0x271   : > { %3127 = vst.msk [vmem:[#allocation3 + $0x7c] sm:$0xf] %vm3095_vm11, %v3062_v59  ;;  %v17836_v59 = vunpack.c.h.bf16 %v13785_v15  ;;  %v3643_v36 = vshll.u32 %v3439_v13, 16  ;;  %v3639_v38 = vrot.slane %v3637_v4, 4  ;;  %v3625_v63 = vrot.slane %v3623_v47, 5 }
 0x272   : > { %v3211_v19 = vpop.permute.xlu2 %3210  ;;  %v3407_v32 = vmul.f32 %v18191_v48, %v18190_v23  ;;  %v13826_v48 = vrot.slane %v3633_v28, 5  ;;  %v3629_v23 = vrot.slane %v3627_v44, 4  ;;  %vm9017_vm11 = vcmask 167056  }
 0x273   : > { %3298 = vst.msk [vmem:[#allocation3 + $0x24] sm:$0xf] %vm3288_vm12, %v3211_v19  ;;  %v3408_v5 = vmul.f32 %v17836_v59, %v13208_v12  ;;  %v3600_v19 = vor.u32 %v3599_v34, %v3595_v31  ;;  %v3596_v34 = vsel %vm13013_vm9, %v3591_v46, %v3595_v31  ;;  %v3647_v59 = vshrl.u32 %v3439_v13, 16 }
 0x274   : > { %v3440_v15 = vpack.c.bf16 %v3407_v32, %v3407_v32  ;;  %v3442_v31 = vpack.c.bf16 %v3409_v37, %v3409_v37  ;;  %v3645_v28 = vrot.slane %v3643_v36, 5  ;;  %v13844_v36 = vld [vmem:[#allocation2 + $0x78] sm:$0xff]  }
 0x275   : > { %3799 = vrot.lane.b32.xlu0 %v3576_v27, %s11904_s15  ;;  %v3611_v27 = vrot.slane %v3610_v49, 4  ;;  %v3441_v8 = vpack.c.bf16 %v3408_v5, %v3408_v5  ;;  %v3601_v45 = vrot.slane %v3600_v19, 4  ;;  %v3649_v4 = vrot.slane %v3647_v59, 4 }
 0x276   : > { %3801 = vrot.lane.b32.xlu1 %v3586_v3, %s11904_s15  ;;  %v3620_v3 = vor.u32 %v3619_v42, %v3615_v10  ;;  %v18193_v42 = vunpack.c.h.bf16 %v13790_v6  ;;  %v3640_v19 = vor.u32 %v3639_v38, %v13826_v48  ;;  %v3657_v59 = vshrl.u32 %v3440_v15, 16 }
 0x277   : > { %v3195_v12 = vpop.permute.xlu0 %3194  ;;  %v3616_v44 = vsel %vm13013_vm9, %v3611_v27, %v3615_v10  ;;  %v3663_v47 = vshll.u32 %v3441_v8, 16  ;;  %v3667_v32 = vshrl.u32 %v3441_v8, 16  ;;  %v3606_v37 = vsel %vm13013_vm9, %v3601_v45, %v13794_v0  ;;  %v18195_v27 = vld [vmem:[#allocation59_spill] sm:$0xff] }
 0x278   : > { %v3197_v56 = vpop.permute.xlu1 %3196  ;;  %3803 = vrot.lane.b32.xlu2 %v3596_v34, %s11904_s15  ;;  %3290 = vst.msk [vmem:[#allocation3 + $0x4] sm:$0xf] %vm3288_vm12, %v3195_v12  ;;  %v3410_v13 = vmul.f32 %v18193_v42, %v13230_v50  ;;  %v3621_v49 = vrot.slane %v3620_v3, 4  ;;  %v18194_v12 = vunpack.c.l.bf16 %v13806_v40  ;;  %v3630_v34 = vor.u32 %v3629_v23, %v3625_v63 }
 0x279   : > { %3291 = vst.msk [vmem:[#allocation3 + $0x8] sm:$0xf] %vm3288_vm12, %v3197_v56  ;;  %v17843_v56 = vunpack.c.h.bf16 %v13806_v40  ;;  %v3653_v3 = vshll.u32 %v3440_v15, 16  ;;  %v3677_v10 = vshrl.u32 %v3442_v31, 16  ;;  %v3641_v15 = vrot.slane %v3640_v19, 4 }
 0x27a   : > { %v3217_v46 = vpop.permute.xlu2 %3216  ;;  %v3411_v5 = vmul.f32 %v18194_v12, %v13235_v26  ;;  %v3443_v42 = vpack.c.bf16 %v3410_v13, %v3410_v13  ;;  %v3626_v12 = vsel %vm13013_vm9, %v3621_v49, %v3625_v63  ;;  %v13854_v45 = vrot.slane %v3663_v47, 5  ;;  %v13859_v49 = vld [vmem:[#allocation2 + $0x80] sm:$0xff]  }
 0x27b   : > { %3301 = vst.msk [vmem:[#allocation3 + $0x30] sm:$0xf] %vm3288_vm12, %v3217_v46  ;;  %v3673_v46 = vshll.u32 %v3442_v31, 16  ;;  %v3412_v8 = vmul.f32 %v17843_v56, %v18195_v27  ;;  %v3669_v13 = vrot.slane %v3667_v32, 4  ;;  %v3655_v56 = vrot.slane %v3653_v3, 5 }
 0x27c   : > { %v3444_v0 = vpack.c.bf16 %v3411_v5, %v3411_v5  ;;  %v3659_v27 = vrot.slane %v3657_v59, 4  ;;  %v17846_v63 = vunpack.c.h.bf16 %v13844_v36  ;;  %v3683_v26 = vshll.u32 %v3443_v42, 16 }
 0x27d   : > { %3805 = vrot.lane.b32.xlu0 %v3606_v37, %s11904_s15  ;;  %v3631_v37 = vrot.slane %v3630_v34, 4  ;;  %v3675_v5 = vrot.slane %v3673_v46, 5  ;;  %v3687_v31 = vshrl.u32 %v3443_v42, 16  ;;  %v3646_v34 = vsel %vm13013_vm9, %v3641_v15, %v3645_v28 }
 0x27e   : > { %3807 = vrot.lane.b32.xlu1 %v3616_v44, %s11904_s15  ;;  %v3650_v44 = vor.u32 %v3649_v4, %v3645_v28  ;;  %v3693_v47 = vshll.u32 %v3444_v0, 16  ;;  %v3697_v32 = vshrl.u32 %v3444_v0, 16  ;;  %v3670_v3 = vor.u32 %v3669_v13, %v13854_v45 }
 0x27f   : > { %v3201_v23 = vpop.permute.xlu0 %3200  ;;  %v18198_v28 = vunpack.c.l.bf16 %v13844_v36  ;;  %v3685_v13 = vrot.slane %v3683_v26, 5  ;;  %v3689_v50 = vrot.slane %v3687_v31, 4 }
 0x280   : > { %v3203_v38 = vpop.permute.xlu1 %3202  ;;  %3809 = vrot.lane.b32.xlu2 %v3626_v12, %s11904_s15  ;;  %3293 = vst.msk [vmem:[#allocation3 + $0x10] sm:$0xf] %vm3288_vm12, %v3201_v23  ;;  %v3445_v12 = vpack.c.bf16 %v3412_v8, %v3412_v8  ;;  %v3651_v19 = vrot.slane %v3650_v44, 4  ;;  %v18196_v23 = vld [vmem:[#allocation64_spill] sm:$0xff]  ;;  %v3660_v8 = vor.u32 %v3659_v27, %v3655_v56  ;;  %v18197_v44 = vld [vmem:[#allocation63_spill] sm:$0xff] }
 0x281   : > { %3294 = vst.msk [vmem:[#allocation3 + $0x14] sm:$0xf] %vm3288_vm12, %v3203_v38  ;;  %v3679_v38 = vrot.slane %v3677_v10, 4  ;;  %v3414_v46 = vmul.f32 %v17846_v63, %v18196_v23  ;;  %v3636_v10 = vsel %vm13013_vm9, %v3631_v37, %v13826_v48  ;;  %v3413_v0 = vmul.f32 %v18198_v28, %v18197_v44 }
 0x282   : > { %v3223_v4 = vpop.permute.xlu2 %3222  ;;  %v3656_v42 = vsel %vm13013_vm9, %v3651_v19, %v3655_v56  ;;  %v3707_v63 = vshrl.u32 %v3445_v12, 16  ;;  %v3699_v23 = vrot.slane %v3697_v32, 4  ;;  %v18199_v48 = vunpack.c.l.bf16 %v13859_v49  ;;  %v13884_v56 = vld [vmem:[#allocation2 + $0x88] sm:$0xff]  }
 0x283   : > { %3304 = vst.msk [vmem:[#allocation3 + $0x3c] sm:$0xf] %vm3288_vm12, %v3223_v4  ;;  %v3680_v15 = vor.u32 %v3679_v38, %v3675_v5  ;;  %v3703_v4 = vshll.u32 %v3445_v12, 16  ;;  %v3671_v38 = vrot.slane %v3670_v3, 4  ;;  %v3447_v26 = vpack.c.bf16 %v3414_v46, %v3414_v46 }
 0x284   : > { %v3415_v37 = vmul.f32 %v18199_v48, %v13260_v58  ;;  %v3661_v12 = vrot.slane %v3660_v8, 4  ;;  %v3446_v19 = vpack.c.bf16 %v3413_v0, %v3413_v0  ;;  %v17849_v28 = vunpack.c.l.bf16 %v13884_v56 }
 0x285   : > { %3811 = vrot.lane.b32.xlu0 %v3636_v10, %s11904_s15  ;;  %v3705_v32 = vrot.slane %v3703_v4, 5  ;;  %v3709_v10 = vrot.slane %v3707_v63, 4  ;;  %v17853_v48 = vunpack.c.h.bf16 %v13884_v56  ;;  %v3690_v3 = vor.u32 %v3689_v50, %v3685_v13 }
 0x286   : > { %3813 = vrot.lane.b32.xlu1 %v3646_v34, %s11904_s15  ;;  %v13879_v34 = vrot.slane %v3693_v47, 5  ;;  %v17850_v47 = vunpack.c.h.bf16 %v13859_v49  ;;  %v3448_v46 = vpack.c.bf16 %v3415_v37, %v3415_v37  ;;  %v3676_v8 = vsel %vm13013_vm9, %v3671_v38, %v3675_v5 }
 0x287   : > { %v3207_v27 = vpop.permute.xlu0 %3206  ;;  %v3723_v0 = vshll.u32 %v3447_v26, 16  ;;  %v3417_v63 = vmul.f32 %v17849_v28, %v13298_v7  ;;  %v3666_v4 = vsel %vm13013_vm9, %v3661_v12, %v13854_v45  ;;  %v3418_v45 = vmul.f32 %v17853_v48, %v13333_v53  ;;  %v3353_v7 = vld [vmem:[#allocation2 + $0x90] sm:$0x1] }
 0x288   : > { %v3209_v59 = vpop.permute.xlu1 %3208  ;;  %3815 = vrot.lane.b32.xlu2 %v3656_v42, %s11904_s15  ;;  %3296 = vst.msk [vmem:[#allocation3 + $0x1c] sm:$0xf] %vm3288_vm12, %v3207_v27  ;;  %v3700_v42 = vor.u32 %v3699_v23, %v13879_v34  ;;  %v3727_v27 = vshrl.u32 %v3447_v26, 16  ;;  %v3416_v50 = vmul.f32 %v17850_v47, %v13293_v2  ;;  %v3710_v23 = vor.u32 %v3709_v10, %v3705_v32 }
 0x289   : > { %3297 = vst.msk [vmem:[#allocation3 + $0x20] sm:$0xf] %vm3288_vm12, %v3209_v59  ;;  %v3681_v59 = vrot.slane %v3680_v15, 4  ;;  %v3713_v15 = vshll.u32 %v3446_v19, 16  ;;  %v3691_v26 = vrot.slane %v3690_v3, 4  ;;  %v3450_v47 = vpack.c.bf16 %v3417_v63, %v3417_v63 }
 0x28a   : > { %v3229_v31 = vpop.permute.xlu2 %3228  ;;  %v3701_v38 = vrot.slane %v3700_v42, 4  ;;  %v3729_v28 = vrot.slane %v3727_v27, 4  ;;  %v3711_v3 = vrot.slane %v3710_v23, 4 }
 0x28b   : > { %3307 = vst.msk [vmem:[#allocation3 + $0x48] sm:$0xf] %vm3288_vm12, %v3229_v31  ;;  %v3717_v31 = vshrl.u32 %v3446_v19, 16  ;;  %v3686_v5 = vsel %vm13013_vm9, %v3681_v59, %v3685_v13  ;;  %v3725_v19 = vrot.slane %v3723_v0, 5  ;;  %v3715_v13 = vrot.slane %v3713_v15, 5 }
 0x28c   : > { %v3449_v59 = vpack.c.bf16 %v3416_v50, %v3416_v50  ;;  %v3706_v48 = vsel %vm13013_vm9, %v3701_v38, %v3705_v32  ;;  %v3696_v0 = vsel %vm13013_vm9, %v3691_v26, %v13879_v34  ;;  %v3757_v15 = vshrl.u32 %v3450_v47, 16 }
 0x28d   : > { %3817 = vrot.lane.b32.xlu0 %v3666_v4, %s11904_s15  ;;  %v3737_v4 = vshrl.u32 %v3448_v46, 16  ;;  %v3719_v10 = vrot.slane %v3717_v31, 4  ;;  %v3730_v63 = vor.u32 %v3729_v28, %v3725_v19  ;;  %v18201_v32 = vunpack.c.l.bf16 %v13624_v29 }
 0x28e   : > { %3819 = vrot.lane.b32.xlu1 %v3676_v8, %s11904_s15  ;;  %v3733_v8 = vshll.u32 %v3448_v46, 16  ;;  %v3451_v46 = vpack.c.bf16 %v3418_v45, %v3418_v45  ;;  %v3743_v50 = vshll.u32 %v3449_v59, 16  ;;  %v3747_v23 = vshrl.u32 %v3449_v59, 16  ;;  %v3906_v45 = vld [vmem:[#allocation2 + $0x14] sm:$0x8] }
 0x28f   : > { %v3213_v12 = vpop.permute.xlu0 %3212  ;;  %v3720_v31 = vor.u32 %v3719_v10, %v3715_v13  ;;  %v3716_v34 = vsel %vm13013_vm9, %v3711_v3, %v3715_v13 }
 0x290   : > { %v3215_v37 = vpop.permute.xlu1 %3214  ;;  %3821 = vrot.lane.b32.xlu2 %v3686_v5, %s11904_s15  ;;  %3299 = vst.msk [vmem:[#allocation3 + $0x28] sm:$0xf] %vm3288_vm12, %v3213_v12  ;;  %v3735_v27 = vrot.slane %v3733_v8, 5  ;;  %v3739_v5 = vrot.slane %v3737_v4, 4  ;;  %v3386_v12 = vunpack.c.l.bf16 %v3353_v7  ;;  %v3763_v28 = vshll.u32 %v3451_v46, 16  ;;  %v18202_v8 = vld [vmem:[#allocation8_spill] sm:$0xff] }
 0x291   : > { %3300 = vst.msk [vmem:[#allocation3 + $0x2c] sm:$0xf] %vm3288_vm12, %v3215_v37  ;;  %v3753_v37 = vshll.u32 %v3450_v47, 16  ;;  %v3767_v26 = vshrl.u32 %v3451_v46, 16  ;;  %v18203_v47 = vunpack.c.h.bf16 %v13624_v29  ;;  %v3731_v7 = vrot.slane %v3730_v63, 4 }
 0x292   : > { %v3235_v42 = vpop.permute.xlu2 %3234  ;;  %v3740_v10 = vor.u32 %v3739_v5, %v3735_v27  ;;  %v3745_v13 = vrot.slane %v3743_v50, 5  ;;  %v3749_v3 = vrot.slane %v3747_v23, 4  ;;  %v3419_v46 = vmul.f32 %v3386_v12, %v13290_v39 }
 0x293   : > { %3310 = vst.msk [vmem:[#allocation3 + $0x54] sm:$0xf] %vm3288_vm12, %v3235_v42  ;;  %v18200_v42 = vld [vmem:[#allocation7_spill] sm:$0xff]  ;;  %v3755_v59 = vrot.slane %v3753_v37, 5  ;;  %v3939_v29 = vunpack.c.l.bf16 %v3906_v45  ;;  %v3736_v5 = vsel %vm13013_vm9, %v3731_v7, %v3735_v27  ;;  %v18205_v7 = vunpack.c.h.bf16 %v13631_v33 }
 0x294   : > { %v3973_v38 = vmul.f32 %v18201_v32, %v18200_v42  ;;  %v3721_v32 = vrot.slane %v3720_v31, 4  ;;  %v3741_v23 = vrot.slane %v3740_v10, 4  ;;  %v3750_v12 = vor.u32 %v3749_v3, %v3745_v13 }
 0x295   : > { %3823 = vrot.lane.b32.xlu0 %v3696_v0, %s11904_s15  ;;  %v3759_v0 = vrot.slane %v3757_v15, 4  ;;  %v3976_v10 = vmul.f32 %v18205_v7, %v12232_v61 }
 0x296   : > { %3825 = vrot.lane.b32.xlu1 %v3706_v48, %s11904_s15  ;;  %v3974_v48 = vmul.f32 %v18203_v47, %v18202_v8  ;;  %v3765_v47 = vrot.slane %v3763_v28, 5  ;;  %v3769_v8 = vrot.slane %v3767_v26, 4  ;;  %v4006_v15 = vpack.c.bf16 %v3973_v38, %v3973_v38 }
 0x297   : > { %v3219_v4 = vpop.permute.xlu0 %3218  ;;  %v3760_v37 = vor.u32 %v3759_v0, %v3755_v59  ;;  %v3726_v50 = vsel %vm13013_vm9, %v3721_v32, %v3725_v19  ;;  %v3746_v26 = vsel %vm13013_vm9, %v3741_v23, %v3745_v13  ;;  %v3751_v0 = vrot.slane %v3750_v12, 4 }
 0x298   : > { %v3221_v53 = vpop.permute.xlu1 %3220  ;;  %3827 = vrot.lane.b32.xlu2 %v3716_v34, %s11904_s15  ;;  %3302 = vst.msk [vmem:[#allocation3 + $0x34] sm:$0xf] %vm3288_vm12, %v3219_v4  ;;  %v4007_v31 = vpack.c.bf16 %v3974_v48, %v3974_v48  ;;  %v3972_v34 = vmul.f32 %v3939_v29, %v12182_v11  ;;  %v3770_v27 = vor.u32 %v3769_v8, %v3765_v47  ;;  %v4044_v19 = vshrl.u32 %v4006_v15, 16 }
 0x299   : > { %3303 = vst.msk [vmem:[#allocation3 + $0x38] sm:$0xf] %vm3288_vm12, %v3221_v53  ;;  %v18204_v53 = vunpack.c.l.bf16 %v13631_v33  ;;  %v3761_v48 = vrot.slane %v3760_v37, 4  ;;  %v18206_v8 = vunpack.c.l.bf16 %v13647_v18  ;;  %v4009_v23 = vpack.c.bf16 %v3976_v10, %v3976_v10 }
 0x29a   : > { %v3241_v42 = vpop.permute.xlu2 %3240  ;;  %v4053_v4 = vshrl.u32 %v4007_v31, 16  ;;  %v4005_v13 = vpack.c.bf16 %v3972_v34, %v3972_v34  ;;  %v3771_v29 = vrot.slane %v3770_v27, 4  ;;  %v4046_v37 = vrot.slane %v4044_v19, 7 }
 0x29b   : > { %3313 = vst.msk [vmem:[#allocation3 + $0x60] sm:$0xf] %vm3288_vm12, %v3241_v42  ;;  %v3975_v63 = vmul.f32 %v18204_v53, %v12227_v60  ;;  %v3452_v42 = vpack.c.bf16 %v3419_v46, %v3419_v46  ;;  %v3977_v46 = vmul.f32 %v18206_v8, %v12158_v41  ;;  %v3766_v33 = vsel %vm13013_vm9, %v3761_v48, %v3765_v47 }
 0x29c   : > { %v3756_v12 = vsel %vm13013_vm9, %v3751_v0, %v3755_v59  ;;  %v4056_v34 = vshll.u32 %v4007_v31, 16  ;;  %v18208_v19 = vunpack.c.l.bf16 %v13669_v25  ;;  %v4051_v59 = vrot.slane %v4046_v37, 4 }
 0x29d   : > { %3829 = vrot.lane.b32.xlu0 %v3726_v50, %s11904_s15  ;;  %v4008_v45 = vpack.c.bf16 %v3975_v63, %v3975_v63  ;;  %v3773_v32 = vshll.u32 %v3452_v42, 16  ;;  %v18207_v63 = vunpack.c.h.bf16 %v13647_v18  ;;  %v4055_v50 = vrot.slane %v4053_v4, 7 }
 0x29e   : > { %3831 = vrot.lane.b32.xlu1 %v3736_v5, %s11904_s15  ;;  %v4010_v27 = vpack.c.bf16 %v3977_v46, %v3977_v46  ;;  %v3979_v4 = vmul.f32 %v18208_v19, %v12279_v57  ;;  %v18209_v10 = vunpack.c.h.bf16 %v13669_v25 }
 0x29f   : > { %v3225_v38 = vpop.permute.xlu0 %3224  ;;  %v4062_v53 = vshrl.u32 %v4008_v45, 16  ;;  %v3978_v5 = vmul.f32 %v18207_v63, %v12274_v55  ;;  %v3775_v42 = vrot.slane %v3773_v32, 5  ;;  %v4058_v31 = vor.u32 %v4056_v34, %v4055_v50 }
 0x2a0   : > { %v3227_v28 = vpop.permute.xlu1 %3226  ;;  %3833 = vrot.lane.b32.xlu2 %v3746_v26, %s11904_s15  ;;  %3305 = vst.msk [vmem:[#allocation3 + $0x40] sm:$0xf] %vm3288_vm12, %v3225_v38  ;;  %v4047_v26 = vshll.u32 %v4006_v15, 16  ;;  %v4071_v15 = vshrl.u32 %v4009_v23, 16  ;;  %v3980_v0 = vmul.f32 %v18209_v10, %v12365_v9  ;;  %v4060_v8 = vrot.slane %v4055_v50, 4 }
 0x2a1   : > { %3306 = vst.msk [vmem:[#allocation3 + $0x44] sm:$0xf] %vm3288_vm12, %v3227_v28  ;;  %v4039_v28 = vshrl.u32 %v4005_v13, 16  ;;  %v3776_v38 = vsel %vm13013_vm9, %v3771_v29, %v3775_v42  ;;  %v13969_v47 = vrot.slane %v4062_v53, 7  ;;  %v4011_v48 = vpack.c.bf16 %v3978_v5, %v3978_v5 }
 0x2a2   : > { %v3247_v3 = vpop.permute.xlu2 %3246  ;;  %v4049_v32 = vor.u32 %v4047_v26, %v4046_v37  ;;  %v4080_v46 = vshrl.u32 %v4010_v27, 16  ;;  %v18210_v29 = vunpack.c.l.bf16 %v13671_v35  ;;  %v4059_v25 = vsel %vm12283_vm4, %v4051_v59, %v4058_v31 }
 0x2a3   : > { %3316 = vst.msk [vmem:[#allocation3 + $0x6c] sm:$0xf] %vm3288_vm12, %v3247_v3  ;;  %v4065_v3 = vshll.u32 %v4008_v45, 16  ;;  %v10474_v63 = vrot.slane %v4039_v28, 11  ;;  %v4073_v42 = vrot.slane %v4071_v15, 7  ;;  %v4013_v37 = vpack.c.bf16 %v3980_v0, %v3980_v0 }
 0x2a4   : > { %v3981_v53 = vmul.f32 %v18210_v29, %v12327_v16  ;;  %v4082_v50 = vrot.slane %v4080_v46, 7  ;;  %v4083_v34 = vshll.u32 %v4010_v27, 16  ;;  %v4074_v28 = vshll.u32 %v4009_v23, 16 }
 0x2a5   : > { %3835 = vrot.lane.b32.xlu0 %v3756_v12, %s11904_s15  ;;  %v4067_v5 = vor.u32 %v4065_v3, %v13969_v47  ;;  %v4012_v12 = vpack.c.bf16 %v3979_v4, %v3979_v4  ;;  %v4050_v45 = vsel %vm12283_vm4, %v10474_v63, %v4049_v32  ;;  %v4078_v15 = vrot.slane %v4073_v42, 4 }
 0x2a6   : > { %3837 = vrot.lane.b32.xlu1 %v3766_v33, %s11904_s15  ;;  %v4089_v33 = vshrl.u32 %v4011_v48, 16  ;;  %v4014_v26 = vpack.c.bf16 %v3981_v53, %v3981_v53  ;;  %v4107_v27 = vshrl.u32 %v4013_v37, 16  ;;  %v18212_v23 = vunpack.c.l.bf16 %v13679_v30 }
 0x2a7   : > { %v3231_v7 = vpop.permute.xlu0 %3230  ;;  %v4098_v4 = vshrl.u32 %v4012_v12, 16  ;;  %v4069_v0 = vrot.slane %v13969_v47, 4  ;;  %v4076_v32 = vor.u32 %v4074_v28, %v4073_v42  ;;  %v4092_v3 = vshll.u32 %v4011_v48, 16 }
 0x2a8   : > { %v3233_v18 = vpop.permute.xlu1 %3232  ;;  %3839 = vrot.lane.b32.xlu2 %v3776_v38, %s11904_s15  ;;  %3308 = vst.msk [vmem:[#allocation3 + $0x4c] sm:$0xf] %vm3288_vm12, %v3231_v7  ;;  %v4068_v38 = vsel %vm12283_vm4, %v4060_v8, %v4067_v5  ;;  %v4091_v19 = vrot.slane %v4089_v33, 7  ;;  %v18211_v7 = vunpack.c.h.bf16 %v13671_v35  ;;  %v3983_v10 = vmul.f32 %v18212_v23, %v12381_v20  ;;  %s11912_s15 = smov 15  }
 0x2a9   : > { %3309 = vst.msk [vmem:[#allocation3 + $0x50] sm:$0xf] %vm3288_vm12, %v3233_v18  ;;  %v4116_v8 = vshrl.u32 %v4014_v26, 16  ;;  %v18213_v46 = vunpack.c.h.bf16 %v13679_v30  ;;  %v4100_v63 = vrot.slane %v4098_v4, 7  ;;  %v4077_v47 = vsel %vm12283_vm4, %v4069_v0, %v4076_v32 }
 0x2aa   : > { %v3253_v13 = vpop.permute.xlu2 %3252  ;;  %v3982_v59 = vmul.f32 %v18211_v7, %v12330_v24  ;;  %v4094_v53 = vor.u32 %v4092_v3, %v4091_v19  ;;  %v4087_v48 = vrot.slane %v4082_v50, 4  ;;  %v4110_v30 = vshll.u32 %v4013_v37, 16 }
 0x2ab   : > { %3319 = vst.msk [vmem:[#allocation3 + $0x78] sm:$0xf] %vm3288_vm12, %v3253_v13  ;;  %v4085_v13 = vor.u32 %v4083_v34, %v4082_v50  ;;  %v3984_v29 = vmul.f32 %v18213_v46, %v18123_v51  ;;  %v4101_v42 = vshll.u32 %v4012_v12, 16  ;;  %v14013_v34 = vrot.slane %v4116_v8, 7  ;;  %v14306_v51 = vld [vmem:[#allocation2 + $0x60] sm:$0xff]  }
 0x2ac   : > { %v4015_v5 = vpack.c.bf16 %v3982_v59, %v3982_v59  ;;  %v4105_v4 = vrot.slane %v4100_v63, 4  ;;  %v4119_v7 = vshll.u32 %v4014_v26, 16  ;;  %v18214_v12 = vunpack.c.l.bf16 %v13720_v17 }
 0x2ad   : > { %4330 = vrot.lane.b32.xlu0 %v4050_v45, %s11905_s16  ;;  %v4086_v33 = vsel %vm12283_vm4, %v4078_v15, %v4085_v13  ;;  %v4016_v45 = vpack.c.bf16 %v3983_v10, %v3983_v10  ;;  %v4017_v28 = vpack.c.bf16 %v3984_v29, %v3984_v29  ;;  %v4096_v10 = vrot.slane %v4091_v19, 4 }
 0x2ae   : > { %4332 = vrot.lane.b32.xlu1 %v4059_v25, %s11905_s16  ;;  %v4109_v25 = vrot.slane %v4107_v27, 7  ;;  %v4125_v59 = vshrl.u32 %v4015_v5, 16  ;;  %v3985_v37 = vmul.f32 %v18214_v12, %v18125_v21  ;;  %v18215_v27 = vunpack.c.h.bf16 %v13720_v17 }
 0x2af   : > { %v3237_v31 = vpop.permute.xlu0 %3236  ;;  %v4134_v15 = vshrl.u32 %v4016_v45, 16  ;;  %v4103_v26 = vor.u32 %v4101_v42, %v4100_v63  ;;  %v4121_v32 = vor.u32 %v4119_v7, %v14013_v34  ;;  %v4143_v3 = vshrl.u32 %v4017_v28, 16 }
 0x2b0   : > { %v3239_v18 = vpop.permute.xlu1 %3238  ;;  %4334 = vrot.lane.b32.xlu2 %v4068_v38, %s11905_s16  ;;  %3311 = vst.msk [vmem:[#allocation3 + $0x58] sm:$0xf] %vm3288_vm12, %v3237_v31  ;;  %v4095_v38 = vsel %vm12283_vm4, %v4087_v48, %v4094_v53  ;;  %v4112_v50 = vor.u32 %v4110_v30, %v4109_v25  ;;  %v3986_v23 = vmul.f32 %v18215_v27, %v18127_v22  ;;  %v4127_v13 = vrot.slane %v4125_v59, 7 }
 0x2b1   : > { %3312 = vst.msk [vmem:[#allocation3 + $0x5c] sm:$0xf] %vm3288_vm12, %v3239_v18  ;;  %v18216_v8 = vunpack.c.l.bf16 %v13735_v54  ;;  %v4136_v29 = vrot.slane %v4134_v15, 7  ;;  %v4018_v53 = vpack.c.bf16 %v3985_v37, %v3985_v37  ;;  %v4104_v19 = vsel %vm12283_vm4, %v4096_v10, %v4103_v26 }
 0x2b2   : > { %v3780_v35 = vpop.permute.xlu2 %3779  ;;  %v4113_v17 = vsel %vm12283_vm4, %v4105_v4, %v4112_v50  ;;  %v4145_v48 = vrot.slane %v4143_v3, 7  ;;  %v4132_v42 = vrot.slane %v4127_v13, 4  ;;  %v18217_v4 = vld [vmem:[#allocation19_spill] sm:$0xff]  ;;  %v18218_v7 = vunpack.c.h.bf16 %v13735_v54 }
 0x2b3   : > { %3875 = vst.msk [vmem:[#allocation3 + $0x4] sm:$0xf] %vm3873_vm13, %v3780_v35  ;;  %v4114_v35 = vrot.slane %v4109_v25, 4  ;;  %v3987_v46 = vmul.f32 %v18216_v8, %v18129_v52  ;;  %v4137_v25 = vshll.u32 %v4016_v45, 16  ;;  %v4152_v15 = vshrl.u32 %v4018_v53, 16 }
 0x2b4   : > { %v3988_v59 = vmul.f32 %v18218_v7, %v18217_v4  ;;  %v11053_v16 = vunpack.c.l.bf16 %v14306_v51 }
 0x2b5   : > { %4336 = vrot.lane.b32.xlu0 %v4077_v47, %s11905_s16  ;;  %v4122_v63 = vsel %vm12283_vm4, %v4114_v35, %v4121_v32  ;;  %v4128_v47 = vshll.u32 %v4015_v5, 16  ;;  %v4139_v50 = vor.u32 %v4137_v25, %v4136_v29  ;;  %v18219_v5 = vunpack.c.l.bf16 %v13760_v14 }
 0x2b6   : > { %4338 = vrot.lane.b32.xlu1 %v4086_v33, %s11905_s16  ;;  %v4019_v33 = vpack.c.bf16 %v3986_v23, %v3986_v23  ;;  %v4141_v23 = vrot.slane %v4136_v29, 4  ;;  %v4021_v26 = vpack.c.bf16 %v3988_v59, %v3988_v59  ;;  %v18221_v32 = vunpack.c.h.bf16 %v13760_v14 }
 0x2b7   : > { %v3243_v31 = vpop.permute.xlu0 %3242  ;;  %v3989_v45 = vmul.f32 %v18219_v5, %v18133_v43  ;;  %v4130_v37 = vor.u32 %v4128_v47, %v4127_v13  ;;  %v4140_v35 = vsel %vm12283_vm4, %v4132_v42, %v4139_v50  ;;  %v4154_v8 = vrot.slane %v4152_v15, 7  ;;  %v18223_v42 = vld [vmem:[#allocation69_spill] sm:$0xff] }
 0x2b8   : > { %v3245_v18 = vpop.permute.xlu1 %3244  ;;  %4340 = vrot.lane.b32.xlu2 %v4095_v38, %s11905_s16  ;;  %3314 = vst.msk [vmem:[#allocation3 + $0x64] sm:$0xf] %vm3288_vm12, %v3243_v31  ;;  %v4020_v38 = vpack.c.bf16 %v3987_v46, %v3987_v46  ;;  %v4161_v12 = vshrl.u32 %v4019_v33, 16  ;;  %v4164_v29 = vshll.u32 %v4019_v33, 16  ;;  %v4179_v25 = vshrl.u32 %v4021_v26, 16 }
 0x2b9   : > { %3315 = vst.msk [vmem:[#allocation3 + $0x68] sm:$0xf] %vm3288_vm12, %v3245_v18  ;;  %v4146_v18 = vshll.u32 %v4017_v28, 16  ;;  %v4123_v28 = vrot.slane %v14013_v34, 4  ;;  %v18226_v33 = vunpack.c.h.bf16 %v18223_v42  ;;  %v4150_v5 = vrot.slane %v4145_v48, 4 }
 0x2ba   : > { %v3786_v0 = vpop.permute.xlu2 %3785  ;;  %v4170_v10 = vshrl.u32 %v4020_v38, 16  ;;  %v4163_v46 = vrot.slane %v4161_v12, 7  ;;  %v18225_v12 = vld [vmem:[#allocation27_spill] sm:$0xff] }
 0x2bb   : > { %3878 = vst.msk [vmem:[#allocation3 + $0x10] sm:$0xf] %vm3873_vm13, %v3786_v0  ;;  %v4148_v54 = vor.u32 %v4146_v18, %v4145_v48  ;;  %v18220_v0 = vld [vmem:[#allocation21_spill] sm:$0xff]  ;;  %v4131_v34 = vsel %vm12283_vm4, %v4123_v28, %v4130_v37  ;;  %v18224_v18 = vunpack.c.l.bf16 %v18223_v42  ;;  %v4173_v28 = vshll.u32 %v4020_v38, 16  ;;  %v18231_v42 = vld [vmem:[#allocation28_spill] sm:$0xff] }
 0x2bc   : > { %v3990_v3 = vmul.f32 %v18221_v32, %v18220_v0  ;;  %v4166_v50 = vor.u32 %v4164_v29, %v4163_v46  ;;  %v18228_v32 = vunpack.c.l.bf16 %v13790_v6  ;;  %v4168_v38 = vrot.slane %v4163_v46, 4 }
 0x2bd   : > { %4342 = vrot.lane.b32.xlu0 %v4104_v19, %s11905_s16  ;;  %v4149_v13 = vsel %vm12283_vm4, %v4141_v23, %v4148_v54  ;;  %v4155_v19 = vshll.u32 %v4018_v53, 16  ;;  %v3992_v53 = vmul.f32 %v18226_v33, %v18225_v12  ;;  %v4181_v54 = vrot.slane %v4179_v25, 7 }
 0x2be   : > { %4344 = vrot.lane.b32.xlu1 %v4113_v17, %s11905_s16  ;;  %v4022_v17 = vpack.c.bf16 %v3989_v45, %v3989_v45  ;;  %v4023_v47 = vpack.c.bf16 %v3990_v3, %v3990_v3 }
 0x2bf   : > { %v3249_v31 = vpop.permute.xlu0 %3248  ;;  %v4157_v45 = vor.u32 %v4155_v19, %v4154_v8  ;;  %v4025_v29 = vpack.c.bf16 %v3992_v53, %v3992_v53  ;;  %v18229_v19 = vld [vmem:[#allocation24_spill] sm:$0xff]  ;;  %v4186_v46 = vrot.slane %v4181_v54, 4 }
 0x2c0   : > { %v3251_v30 = vpop.permute.xlu1 %3250  ;;  %4346 = vrot.lane.b32.xlu2 %v4122_v63, %s11905_s16  ;;  %3317 = vst.msk [vmem:[#allocation3 + $0x70] sm:$0xf] %vm3288_vm12, %v3249_v31  ;;  %v4172_v63 = vrot.slane %v4170_v10, 7  ;;  %v4159_v31 = vrot.slane %v4154_v8, 4  ;;  %v4188_v15 = vshrl.u32 %v4022_v17, 16  ;;  %v4197_v23 = vshrl.u32 %v4023_v47, 16 }
 0x2c1   : > { %3318 = vst.msk [vmem:[#allocation3 + $0x74] sm:$0xf] %vm3288_vm12, %v3251_v30  ;;  %v18222_v30 = vld [vmem:[#allocation22_spill] sm:$0xff]  ;;  %v18227_v10 = vld [vmem:[#allocation23_spill] sm:$0xff]  ;;  %v4158_v48 = vsel %vm12283_vm4, %v4150_v5, %v4157_v45  ;;  %v4191_v8 = vshll.u32 %v4022_v17, 16  ;;  %v4215_v5 = vshrl.u32 %v4025_v29, 16 }
 0x2c2   : > { %v3792_v27 = vpop.permute.xlu2 %3791  ;;  %v3991_v7 = vmul.f32 %v18224_v18, %v18222_v30  ;;  %v3993_v3 = vmul.f32 %v18228_v32, %v18227_v10  ;;  %v18232_v18 = vunpack.c.l.bf16 %v13806_v40  ;;  %v4177_v45 = vrot.slane %v4172_v63, 4  ;;  %v11550_v30 = vld [vmem:[#allocation2 + $0x50] sm:$0xff]  }
 0x2c3   : > { %3881 = vst.msk [vmem:[#allocation3 + $0x1c] sm:$0xf] %vm3873_vm13, %v3792_v27  ;;  %v4175_v27 = vor.u32 %v4173_v28, %v4172_v63  ;;  %v11046_v43 = vunpack.c.h.bf16 %v11550_v30 }
 0x2c4   : > { %v4026_v33 = vpack.c.bf16 %v3993_v3, %v3993_v3  ;;  %v18233_v3 = vld [vmem:[#allocation25_spill] sm:$0xff] }
 0x2c5   : > { %4348 = vrot.lane.b32.xlu0 %v4131_v34, %s11905_s16  ;;  %v4190_v34 = vrot.slane %v4188_v15, 7  ;;  %v4199_v15 = vrot.slane %v4197_v23, 7 }
 0x2c6   : > { %4350 = vrot.lane.b32.xlu1 %v4140_v35, %s11905_s16  ;;  %v4167_v35 = vsel %vm12283_vm4, %v4159_v31, %v4166_v50  ;;  %v4182_v50 = vshll.u32 %v4021_v26, 16  ;;  %v4224_v23 = vshrl.u32 %v4026_v33, 16 }
 0x2c7   : > { %v3255_v59 = vpop.permute.xlu0 %3254  ;;  %v4193_v17 = vor.u32 %v4191_v8, %v4190_v34 }
 0x2c8   : > { %v3778_v14 = vpop.permute.xlu1 %3777  ;;  %4352 = vrot.lane.b32.xlu2 %v4149_v13, %s11905_s16  ;;  %3320 = vst.msk [vmem:[#allocation3 + $0x7c] sm:$0xf] %vm3288_vm12, %v3255_v59  ;;  %v4024_v13 = vpack.c.bf16 %v3991_v7, %v3991_v7  ;;  %v3995_v59 = vmul.f32 %v18232_v18, %v18231_v42  ;;  %v4176_v7 = vsel %vm12283_vm4, %v4168_v38, %v4175_v27  ;;  %v4217_v18 = vrot.slane %v4215_v5, 7  ;;  %v18237_v5 = vld [vmem:[#allocation34_spill] sm:$0xff]  ;;  %v11548_v42 = vld [vmem:[#allocation2 + $0x40] sm:$0xff]  }
 0x2c9   : > { %3874 = vst.msk [vmem:[#allocation3] sm:$0xf] %vm3873_vm13, %v3778_v14  ;;  %v18230_v14 = vunpack.c.h.bf16 %v13790_v6  ;;  %v4184_v28 = vor.u32 %v4182_v50, %v4181_v54  ;;  %v4194_v8 = vsel %vm12283_vm4, %v4186_v46, %v4193_v17  ;;  %v4226_v17 = vrot.slane %v4224_v23, 7 }
 0x2ca   : > { %v3798_v37 = vpop.permute.xlu2 %3797  ;;  %v4206_v6 = vshrl.u32 %v4024_v13, 16  ;;  %v4028_v26 = vpack.c.bf16 %v3995_v59, %v3995_v59  ;;  %v4209_v54 = vshll.u32 %v4024_v13, 16  ;;  %vm10008_vm12 = vcmask 1044480  }
 0x2cb   : > { %3884 = vst.msk [vmem:[#allocation3 + $0x28] sm:$0xf] %vm3873_vm13, %v3798_v37  ;;  %v3994_v25 = vmul.f32 %v18230_v14, %v18229_v19  ;;  %v4200_v37 = vshll.u32 %v4023_v47, 16  ;;  %v4185_v63 = vsel %vm12283_vm4, %v4177_v45, %v4184_v28  ;;  %v4195_v47 = vrot.slane %v4190_v34, 4  ;;  %v18258_v19 = vld [vmem:[#allocation46_spill] sm:$0xff] }
 0x2cc   : > { %v4208_v14 = vrot.slane %v4206_v6, 7  ;;  %v18238_v34 = vunpack.c.h.bf16 %v13844_v36 }
 0x2cd   : > { %4354 = vrot.lane.b32.xlu0 %v4158_v48, %s11905_s16  ;;  %v4202_v27 = vor.u32 %v4200_v37, %v4199_v15  ;;  %v18234_v48 = vunpack.c.h.bf16 %v13806_v40  ;;  %v18235_v40 = vld [vmem:[#allocation26_spill] sm:$0xff]  ;;  %v4204_v37 = vrot.slane %v4199_v15, 4  ;;  %v4245_v15 = vshll.u32 %v4028_v26, 16 }
 0x2ce   : > { %4356 = vrot.lane.b32.xlu1 %v4167_v35, %s11905_s16  ;;  %v14091_v35 = vpack.c.bf16 %v3994_v25, %v3994_v25  ;;  %v4218_v25 = vshll.u32 %v4025_v29, 16  ;;  %v3998_v13 = vmul.f32 %v18238_v34, %v18237_v5  ;;  %v4213_v29 = vrot.slane %v4208_v14, 4 }
 0x2cf   : > { %v3782_v53 = vpop.permute.xlu0 %3781  ;;  %v3996_v38 = vmul.f32 %v18234_v48, %v18233_v3  ;;  %v4203_v46 = vsel %vm12283_vm4, %v4195_v47, %v4202_v27  ;;  %v4227_v48 = vshll.u32 %v4026_v33, 16 }
 0x2d0   : > { %v3784_v31 = vpop.permute.xlu1 %3783  ;;  %4358 = vrot.lane.b32.xlu2 %v4176_v7, %s11905_s16  ;;  %3876 = vst.msk [vmem:[#allocation3 + $0x8] sm:$0xf] %vm3873_vm13, %v3782_v53  ;;  %v4233_v59 = vshrl.u32 %v14091_v35, 16  ;;  %v18236_v7 = vunpack.c.l.bf16 %v13844_v36  ;;  %v4220_v28 = vor.u32 %v4218_v25, %v4217_v18  ;;  %v4031_v47 = vpack.c.bf16 %v3998_v13, %v3998_v13 }
 0x2d1   : > { %3877 = vst.msk [vmem:[#allocation3 + $0xc] sm:$0xf] %vm3873_vm13, %v3784_v31  ;;  %v4242_v31 = vshrl.u32 %v4028_v26, 16  ;;  %v4029_v6 = vpack.c.bf16 %v3996_v38, %v3996_v38  ;;  %v4229_v36 = vor.u32 %v4227_v48, %v4226_v17  ;;  %v18244_v48 = vunpack.c.l.bf16 %v13884_v56 }
 0x2d2   : > { %v3804_v32 = vpop.permute.xlu2 %3803  ;;  %v3997_v50 = vmul.f32 %v18236_v7, %v18235_v40  ;;  %v4235_v27 = vrot.slane %v4233_v59, 7  ;;  %v18239_v7 = vld [vmem:[#allocation29_spill] sm:$0xff]  ;;  %v4221_v25 = vsel %vm12283_vm4, %v4213_v29, %v4220_v28  ;;  %v4269_v26 = vshrl.u32 %v4031_v47, 16 }
 0x2d3   : > { %3887 = vst.msk [vmem:[#allocation3 + $0x34] sm:$0xf] %vm3873_vm13, %v3804_v32  ;;  %v4211_v32 = vor.u32 %v4209_v54, %v4208_v14  ;;  %v4244_v23 = vrot.slane %v4242_v31, 7  ;;  %v4222_v14 = vrot.slane %v4217_v18, 4  ;;  %v4236_v54 = vshll.u32 %v14091_v35, 16  ;;  %v18241_v18 = vld [vmem:[#allocation30_spill] sm:$0xff] }
 0x2d4   : > { %v14115_v38 = vpack.c.bf16 %v3997_v50, %v3997_v50  ;;  %v4240_v59 = vrot.slane %v4235_v27, 4 }
 0x2d5   : > { %4360 = vrot.lane.b32.xlu0 %v4185_v63, %s11905_s16  ;;  %v4251_v63 = vshrl.u32 %v4029_v6, 16  ;;  %v4212_v33 = vsel %vm12283_vm4, %v4204_v37, %v4211_v32  ;;  %v4247_v31 = vor.u32 %v4245_v15, %v4244_v23  ;;  %v4230_v13 = vsel %vm12283_vm4, %v4222_v14, %v4229_v36  ;;  %v18243_v32 = vld [vmem:[#allocation35_spill] sm:$0xff] }
 0x2d6   : > { %4362 = vrot.lane.b32.xlu1 %v4194_v8, %s11905_s16  ;;  %v4260_v50 = vshrl.u32 %v14115_v38, 16  ;;  %v18242_v37 = vunpack.c.h.bf16 %v13859_v49  ;;  %v4238_v36 = vor.u32 %v4236_v54, %v4235_v27  ;;  %v4249_v54 = vrot.slane %v4244_v23, 4 }
 0x2d7   : > { %v3788_v45 = vpop.permute.xlu0 %3787  ;;  %v4248_v15 = vsel %vm12283_vm4, %v4240_v59, %v4247_v31  ;;  %v4272_v59 = vshll.u32 %v4031_v47, 16  ;;  %v4263_v31 = vshll.u32 %v14115_v38, 16  ;;  %v18247_v47 = vld [vmem:[#allocation33_spill] sm:$0xff] }
 0x2d8   : > { %v3790_v53 = vpop.permute.xlu1 %3789  ;;  %4364 = vrot.lane.b32.xlu2 %v4203_v46, %s11905_s16  ;;  %3879 = vst.msk [vmem:[#allocation3 + $0x14] sm:$0xf] %vm3873_vm13, %v3788_v45  ;;  %v4253_v45 = vrot.slane %v4251_v63, 7  ;;  %v4000_v35 = vmul.f32 %v18242_v37, %v18241_v18  ;;  %v4254_v63 = vshll.u32 %v4029_v6, 16  ;;  %v18246_v37 = vunpack.c.h.bf16 %v13884_v56 }
 0x2d9   : > { %3880 = vst.msk [vmem:[#allocation3 + $0x18] sm:$0xf] %vm3873_vm13, %v3790_v53  ;;  %v18240_v53 = vunpack.c.l.bf16 %v13859_v49  ;;  %v4271_v49 = vrot.slane %v4269_v26, 7 }
 0x2da   : > { %v3810_v8 = vpop.permute.xlu2 %3809  ;;  %v4256_v14 = vor.u32 %v4254_v63, %v4253_v45  ;;  %v4258_v38 = vrot.slane %v4253_v45, 4 }
 0x2db   : > { %3890 = vst.msk [vmem:[#allocation3 + $0x40] sm:$0xf] %vm3873_vm13, %v3810_v8  ;;  %v3999_v46 = vmul.f32 %v18240_v53, %v18239_v7  ;;  %v4001_v8 = vmul.f32 %v18244_v48, %v18243_v32  ;;  %v4231_v53 = vrot.slane %v4226_v17, 4  ;;  %v4033_v7 = vpack.c.bf16 %v4000_v35, %v4000_v35 }
 0x2dc   : > { %v4257_v56 = vsel %vm12283_vm4, %v4249_v54, %v4256_v14  ;;  %v4274_v35 = vor.u32 %v4272_v59, %v4271_v49  ;;  %v4276_v45 = vrot.slane %v4271_v49, 4 }
 0x2dd   : > { %4366 = vrot.lane.b32.xlu0 %v4212_v33, %s11905_s16  ;;  %v4032_v29 = vpack.c.bf16 %v3999_v46, %v3999_v46  ;;  %v4262_v33 = vrot.slane %v4260_v50, 7  ;;  %v4239_v6 = vsel %vm12283_vm4, %v4231_v53, %v4238_v36  ;;  %v4287_v53 = vshrl.u32 %v4033_v7, 16 }
 0x2de   : > { %4368 = vrot.lane.b32.xlu1 %v4221_v25, %s11905_s16  ;;  %v11542_v25 = vld [vmem:[#allocation2 + $0x90] sm:$0xff]  }
 0x2df   : > { %v3794_v28 = vpop.permute.xlu0 %3793  ;;  %v11013_v17 = vunpack.c.l.bf16 %v11542_v25  ;;  %v11014_v27 = vunpack.c.h.bf16 %v11542_v25  ;;  %v4267_v50 = vrot.slane %v4262_v33, 4  ;;  %v4289_v59 = vrot.slane %v4287_v53, 7 }
 0x2e0   : > { %v3796_v34 = vpop.permute.xlu1 %3795  ;;  %4370 = vrot.lane.b32.xlu2 %v4230_v13, %s11905_s16  ;;  %3882 = vst.msk [vmem:[#allocation3 + $0x20] sm:$0xf] %vm3873_vm13, %v3794_v28  ;;  %v18245_v13 = vld [vmem:[#allocation32_spill] sm:$0xff]  ;;  %v4034_v28 = vpack.c.bf16 %v4001_v8, %v4001_v8 }
 0x2e1   : > { %3883 = vst.msk [vmem:[#allocation3 + $0x24] sm:$0xf] %vm3873_vm13, %v3796_v34  ;;  %v4278_v34 = vshrl.u32 %v4032_v29, 16  ;;  %v4002_v48 = vmul.f32 %v18246_v37, %v18245_v13  ;;  %v4003_v36 = vmul.f32 %v11013_v17, %v18247_v47  ;;  %v4265_v37 = vor.u32 %v4263_v31, %v4262_v33 }
 0x2e2   : > { %v3816_v46 = vpop.permute.xlu2 %3815  ;;  %v4296_v23 = vshrl.u32 %v4034_v28, 16  ;;  %v4290_v31 = vshll.u32 %v4033_v7, 16 }
 0x2e3   : > { %3893 = vst.msk [vmem:[#allocation3 + $0x4c] sm:$0xf] %vm3873_vm13, %v3816_v46  ;;  %v4280_v8 = vrot.slane %v4278_v34, 7  ;;  %v4035_v63 = vpack.c.bf16 %v4002_v48, %v4002_v48  ;;  %v18248_v46 = vld [vmem:[#allocation31_spill] sm:$0xff]  ;;  %v4275_v34 = vsel %vm12283_vm4, %v4267_v50, %v4274_v35  ;;  %v4266_v17 = vsel %vm12283_vm4, %v4258_v38, %v4265_v37 }
 0x2e5   : > { %4372 = vrot.lane.b32.xlu0 %v4239_v6, %s11905_s16  ;;  %v4281_v6 = vshll.u32 %v4032_v29, 16  ;;  %v4305_v54 = vshrl.u32 %v4035_v63, 16  ;;  %v4299_v29 = vshll.u32 %v4034_v28, 16  ;;  %v4285_v49 = vrot.slane %v4280_v8, 4 }
 0x2e6   : > { %4374 = vrot.lane.b32.xlu1 %v4248_v15, %s11905_s16  ;;  %v4004_v15 = vmul.f32 %v11014_v27, %v18248_v46  ;;  %v4308_v28 = vshll.u32 %v4035_v63, 16  ;;  %v18255_v46 = vld [vmem:[#allocation43_spill] sm:$0xff] }
 0x2e7   : > { %v3800_v25 = vpop.permute.xlu0 %3799  ;;  %v4283_v48 = vor.u32 %v4281_v6, %v4280_v8  ;;  %v4307_v50 = vrot.slane %v4305_v54, 7 }
 0x2e8   : > { %v3802_v26 = vpop.permute.xlu1 %3801  ;;  %4376 = vrot.lane.b32.xlu2 %v4257_v56, %s11905_s16  ;;  %3885 = vst.msk [vmem:[#allocation3 + $0x2c] sm:$0xf] %vm3873_vm13, %v3800_v25  ;;  %v4036_v56 = vpack.c.bf16 %v4003_v36, %v4003_v36  ;;  %v4037_v13 = vpack.c.bf16 %v4004_v15, %v4004_v15  ;;  %v4294_v25 = vrot.slane %v4289_v59, 4  ;;  %v4292_v15 = vor.u32 %v4290_v31, %v4289_v59  ;;  %v4459_v31 = vld [vmem:[#allocation2 + $0x18] sm:$0xf] }
 0x2e9   : > { %3886 = vst.msk [vmem:[#allocation3 + $0x30] sm:$0xf] %vm3873_vm13, %v3802_v26  ;;  %v4298_v26 = vrot.slane %v4296_v23, 7  ;;  %v4284_v27 = vsel %vm12283_vm4, %v4276_v45, %v4283_v48  ;;  %v4310_v37 = vor.u32 %v4308_v28, %v4307_v50 }
 0x2ea   : > { %v3822_v14 = vpop.permute.xlu2 %3821  ;;  %v4314_v23 = vshrl.u32 %v4036_v56, 16  ;;  %v4323_v36 = vshrl.u32 %v4037_v13, 16  ;;  %v4326_v8 = vshll.u32 %v4037_v13, 16  ;;  %v4317_v59 = vshll.u32 %v4036_v56, 16 }
 0x2eb   : > { %3896 = vst.msk [vmem:[#allocation3 + $0x58] sm:$0xf] %vm3873_vm13, %v3822_v14  ;;  %v4301_v53 = vor.u32 %v4299_v29, %v4298_v26  ;;  %v4303_v48 = vrot.slane %v4298_v26, 4 }
 0x2ec   : > { %v4316_v6 = vrot.slane %v4314_v23, 7  ;;  %v4325_v14 = vrot.slane %v4323_v36, 7  ;;  %v4460_v23 = vld [vmem:[#allocation2 + $0x1c] sm:$0xf]  ;;  %v4462_v36 = vld [vmem:[#allocation2 + $0x24] sm:$0xf] }
 0x2ed   : > { %4378 = vrot.lane.b32.xlu0 %v4266_v17, %s11905_s16  ;;  %v4302_v7 = vsel %vm12283_vm4, %v4294_v25, %v4301_v53  ;;  %v4311_v63 = vsel %vm12283_vm4, %v4303_v48, %v4310_v37  ;;  %v4461_v53 = vld [vmem:[#allocation2 + $0x20] sm:$0xf]  ;;  %v4463_v37 = vld [vmem:[#allocation2 + $0x28] sm:$0xf]  ;;  %v4467_v48 = vld [vmem:[#allocation2 + $0x38] sm:$0xf] }
 0x2ee   : > { %4380 = vrot.lane.b32.xlu1 %v4275_v34, %s11905_s16  ;;  %v4293_v34 = vsel %vm12283_vm4, %v4285_v49, %v4292_v15  ;;  %v4321_v45 = vrot.slane %v4316_v6, 4  ;;  %v4328_v29 = vor.u32 %v4326_v8, %v4325_v14  ;;  %v4466_v8 = vld [vmem:[#allocation2 + $0x34] sm:$0xf] }
 0x2ef   : > { %v3806_v35 = vpop.permute.xlu0 %3805 }
 0x2f0   : > { %v3808_v33 = vpop.permute.xlu1 %3807  ;;  %4382 = vrot.lane.b32.xlu2 %v4284_v27, %s11905_s16  ;;  %3888 = vst.msk [vmem:[#allocation3 + $0x38] sm:$0xf] %vm3873_vm13, %v3806_v35  ;;  %v4319_v27 = vor.u32 %v4317_v59, %v4316_v6  ;;  %v4329_v13 = vsel %vm12283_vm4, %v4321_v45, %v4328_v29  ;;  %v4470_v45 = vld [vmem:[#allocation2 + $0x44] sm:$0xf]  ;;  %v4469_v29 = vld [vmem:[#allocation2 + $0x40] sm:$0xf] }
 0x2f1   : > { %3889 = vst.msk [vmem:[#allocation3 + $0x3c] sm:$0xf] %vm3873_vm13, %v3808_v33  ;;  %v4312_v33 = vrot.slane %v4307_v50, 4 }
 0x2f2   : > { %v3828_v38 = vpop.permute.xlu2 %3827 }
 0x2f3   : > { %3899 = vst.msk [vmem:[#allocation3 + $0x64] sm:$0xf] %vm3873_vm13, %v3828_v38  ;;  %v4320_v56 = vsel %vm12283_vm4, %v4312_v33, %v4319_v27  ;;  %v4464_v38 = vld [vmem:[#allocation2 + $0x2c] sm:$0xf]  ;;  %v4471_v33 = vld [vmem:[#allocation2 + $0x48] sm:$0xf] }
 0x2f5   : > { %4384 = vrot.lane.b32.xlu0 %v4293_v34, %s11905_s16 }
 0x2f6   : > { %4386 = vrot.lane.b32.xlu1 %v4302_v7, %s11905_s16  ;;  %v4465_v7 = vld [vmem:[#allocation2 + $0x30] sm:$0xf] }
 0x2f7   : > { %v3812_v17 = vpop.permute.xlu0 %3811 }
 0x2f8   : > { %v3814_v54 = vpop.permute.xlu1 %3813  ;;  %4388 = vrot.lane.b32.xlu2 %v4311_v63, %s11905_s16  ;;  %3891 = vst.msk [vmem:[#allocation3 + $0x44] sm:$0xf] %vm3873_vm13, %v3812_v17 }
 0x2f9   : > { %3892 = vst.msk [vmem:[#allocation3 + $0x48] sm:$0xf] %vm3873_vm13, %v3814_v54  ;;  %v4468_v54 = vld [vmem:[#allocation2 + $0x3c] sm:$0xf] }
 0x2fa   : > { %v3834_v26 = vpop.permute.xlu2 %3833 }
 0x2fb   : > { %3902 = vst.msk [vmem:[#allocation3 + $0x70] sm:$0xf] %vm3873_vm13, %v3834_v26 }
 0x2fd   : > { %4390 = vrot.lane.b32.xlu0 %v4320_v56, %s11905_s16  ;;  %v4473_v56 = vld [vmem:[#allocation2 + $0x50] sm:$0xf] }
 0x2fe   : > { %4392 = vrot.lane.b32.xlu1 %v4329_v13, %s11905_s16 }
 0x2ff   : > { %v3818_v25 = vpop.permute.xlu0 %3817 }
 0x300   : > { %v3820_v35 = vpop.permute.xlu1 %3819  ;;  %4523 = vrot.lane.b32.xlu2 %v4459_v31, %s11906_s17  ;;  %3894 = vst.msk [vmem:[#allocation3 + $0x50] sm:$0xf] %vm3873_vm13, %v3818_v25  ;;  %v4472_v31 = vld [vmem:[#allocation2 + $0x4c] sm:$0xf] }
 0x301   : > { %3895 = vst.msk [vmem:[#allocation3 + $0x54] sm:$0xf] %vm3873_vm13, %v3820_v35  ;;  %v4474_v35 = vld [vmem:[#allocation2 + $0x54] sm:$0xf] }
 0x302   : > { %v3840_v50 = vpop.permute.xlu2 %3839 }
 0x303   : > { %3905 = vst.msk [vmem:[#allocation3 + $0x7c] sm:$0xf] %vm3873_vm13, %v3840_v50 }
 0x305   : > { %4525 = vrot.lane.b32.xlu0 %v4460_v23, %s11906_s17  ;;  %v4476_v23 = vld [vmem:[#allocation2 + $0x5c] sm:$0xf] }
 0x306   : > { %4527 = vrot.lane.b32.xlu1 %v4461_v53, %s11906_s17 }
 0x307   : > { %v3824_v15 = vpop.permute.xlu0 %3823 }
 0x308   : > { %v3826_v49 = vpop.permute.xlu1 %3825  ;;  %4529 = vrot.lane.b32.xlu2 %v4462_v36, %s11906_s17  ;;  %3897 = vst.msk [vmem:[#allocation3 + $0x5c] sm:$0xf] %vm3873_vm13, %v3824_v15  ;;  %v4475_v36 = vld [vmem:[#allocation2 + $0x58] sm:$0xf] }
 0x309   : > { %3898 = vst.msk [vmem:[#allocation3 + $0x60] sm:$0xf] %vm3873_vm13, %v3826_v49  ;;  %v4477_v49 = vld [vmem:[#allocation2 + $0x60] sm:$0xf] }
 0x30a   : > { %v4335_v28 = vpop.permute.xlu2 %4334 }
 0x30b   : > { %4429 = vst.msk [vmem:[#allocation3 + $0x8] sm:$0xf] %vm4426_vm14, %v4335_v28 }
 0x30d   : > { %4531 = vrot.lane.b32.xlu0 %v4463_v37, %s11906_s17  ;;  %v4479_v37 = vld [vmem:[#allocation2 + $0x68] sm:$0xf] }
 0x30e   : > { %4533 = vrot.lane.b32.xlu1 %v4464_v38, %s11906_s17 }
 0x30f   : > { %v3830_v14 = vpop.permute.xlu0 %3829 }
 0x310   : > { %v3832_v6 = vpop.permute.xlu1 %3831  ;;  %4535 = vrot.lane.b32.xlu2 %v4465_v7, %s11906_s17  ;;  %3900 = vst.msk [vmem:[#allocation3 + $0x68] sm:$0xf] %vm3873_vm13, %v3830_v14  ;;  %v4478_v7 = vld [vmem:[#allocation2 + $0x64] sm:$0xf]  ;;  %v11543_v14 = vld [vmem:[#allocation2 + $0x18] sm:$0xff]  }
 0x311   : > { %3901 = vst.msk [vmem:[#allocation3 + $0x6c] sm:$0xf] %vm3873_vm13, %v3832_v6  ;;  %v4480_v6 = vld [vmem:[#allocation2 + $0x6c] sm:$0xf] }
 0x312   : > { %v4341_v34 = vpop.permute.xlu2 %4340 }
 0x313   : > { %4432 = vst.msk [vmem:[#allocation3 + $0x14] sm:$0xf] %vm4426_vm14, %v4341_v34 }
 0x315   : > { %4537 = vrot.lane.b32.xlu0 %v4466_v8, %s11906_s17  ;;  %v11017_v8 = vunpack.c.l.bf16 %v11543_v14 }
 0x316   : > { %4539 = vrot.lane.b32.xlu1 %v4467_v48, %s11906_s17 }
 0x317   : > { %v3836_v59 = vpop.permute.xlu0 %3835 }
 0x318   : > { %v3838_v63 = vpop.permute.xlu1 %3837  ;;  %4541 = vrot.lane.b32.xlu2 %v4468_v54, %s11906_s17  ;;  %3903 = vst.msk [vmem:[#allocation3 + $0x74] sm:$0xf] %vm3873_vm13, %v3836_v59  ;;  %v11018_v59 = vunpack.c.h.bf16 %v11543_v14 }
 0x319   : > { %3904 = vst.msk [vmem:[#allocation3 + $0x78] sm:$0xf] %vm3873_vm13, %v3838_v63  ;;  %v4482_v63 = vld [vmem:[#allocation2 + $0x74] sm:$0xf]  ;;  %vm10009_vm13 = vcmask 1045504  }
 0x31a   : > { %v4347_v17 = vpop.permute.xlu2 %4346 }
 0x31b   : > { %4435 = vst.msk [vmem:[#allocation3 + $0x20] sm:$0xf] %vm4426_vm14, %v4347_v17  ;;  %v4481_v17 = vld [vmem:[#allocation2 + $0x70] sm:$0xf] }
 0x31d   : > { %4543 = vrot.lane.b32.xlu0 %v4469_v29, %s11906_s17  ;;  %v18249_v29 = vld [vmem:[#allocation36_spill] sm:$0xff] }
 0x31e   : > { %4545 = vrot.lane.b32.xlu1 %v4470_v45, %s11906_s17  ;;  %v11544_v45 = vld [vmem:[#allocation2 + $0x20] sm:$0xff]  }
 0x31f   : > { %v4331_v26 = vpop.permute.xlu0 %4330 }
 0x320   : > { %v4333_v27 = vpop.permute.xlu1 %4332  ;;  %4547 = vrot.lane.b32.xlu2 %v4471_v33, %s11906_s17  ;;  %4427 = vst.msk [vmem:[#allocation3] sm:$0xf] %vm4426_vm14, %v4331_v26  ;;  %v4718_v33 = vmul.f32 %v11017_v8, %v18249_v29  ;;  %v18250_v26 = vld [vmem:[#allocation37_spill] sm:$0xff]  ;;  %v4486_v8 = vld [vmem:[#allocation2 + $0x84] sm:$0xf] }
 0x321   : > { %4428 = vst.msk [vmem:[#allocation3 + $0x4] sm:$0xf] %vm4426_vm14, %v4333_v27  ;;  %v4483_v27 = vld [vmem:[#allocation2 + $0x78] sm:$0xf] }
 0x322   : > { %v4353_v13 = vpop.permute.xlu2 %4352 }
 0x323   : > { %4438 = vst.msk [vmem:[#allocation3 + $0x2c] sm:$0xf] %vm4426_vm14, %v4353_v13  ;;  %v4719_v13 = vmul.f32 %v11018_v59, %v18250_v26 }
 0x325   : > { %4549 = vrot.lane.b32.xlu0 %v4472_v31, %s11906_s17  ;;  %v11545_v31 = vld [vmem:[#allocation2 + $0x28] sm:$0xff]  }
 0x326   : > { %4551 = vrot.lane.b32.xlu1 %v4473_v56, %s11906_s17  ;;  %v11021_v56 = vunpack.c.l.bf16 %v11544_v45  ;;  %v11026_v59 = vunpack.c.h.bf16 %v11545_v31 }
 0x327   : > { %v4337_v50 = vpop.permute.xlu0 %4336 }
 0x328   : > { %v4339_v25 = vpop.permute.xlu1 %4338  ;;  %4553 = vrot.lane.b32.xlu2 %v4474_v35, %s11906_s17  ;;  %4430 = vst.msk [vmem:[#allocation3 + $0xc] sm:$0xf] %vm4426_vm14, %v4337_v50  ;;  %v4751_v50 = vpack.c.bf16 %v4718_v33, %v4718_v33 }
 0x329   : > { %4431 = vst.msk [vmem:[#allocation3 + $0x10] sm:$0xf] %vm4426_vm14, %v4339_v25 }
 0x32a   : > { %v4359_v53 = vpop.permute.xlu2 %4358  ;;  %v4788_v14 = vshll.u32 %v4751_v50, 16 }
 0x32b   : > { %4441 = vst.msk [vmem:[#allocation3 + $0x38] sm:$0xf] %vm4426_vm14, %v4359_v53  ;;  %v11022_v53 = vunpack.c.h.bf16 %v11544_v45 }
 0x32d   : > { %4555 = vrot.lane.b32.xlu0 %v4475_v36, %s11906_s17 }
 0x32e   : > { %4557 = vrot.lane.b32.xlu1 %v4476_v23, %s11906_s17  ;;  %v11025_v23 = vunpack.c.l.bf16 %v11545_v31 }
 0x32f   : > { %v4343_v28 = vpop.permute.xlu0 %4342 }
 0x330   : > { %v4345_v15 = vpop.permute.xlu1 %4344  ;;  %4559 = vrot.lane.b32.xlu2 %v4477_v49, %s11906_s17  ;;  %4433 = vst.msk [vmem:[#allocation3 + $0x18] sm:$0xf] %vm4426_vm14, %v4343_v28  ;;  %v4485_v49 = vld [vmem:[#allocation2 + $0x80] sm:$0xf]  ;;  %v18251_v28 = vld [vmem:[#allocation38_spill] sm:$0xff] }
 0x331   : > { %4434 = vst.msk [vmem:[#allocation3 + $0x1c] sm:$0xf] %vm4426_vm14, %v4345_v15  ;;  %v4752_v15 = vpack.c.bf16 %v4719_v13, %v4719_v13 }
 0x332   : > { %v4365_v38 = vpop.permute.xlu2 %4364 }
 0x333   : > { %4444 = vst.msk [vmem:[#allocation3 + $0x44] sm:$0xf] %vm4426_vm14, %v4365_v38  ;;  %v4720_v38 = vmul.f32 %v11021_v56, %v18251_v28  ;;  %v4798_v33 = vshrl.u32 %v4752_v15, 16 }
 0x335   : > { %4561 = vrot.lane.b32.xlu0 %v4478_v7, %s11906_s17  ;;  %v11546_v7 = vld [vmem:[#allocation2 + $0x30] sm:$0xff]   ;;  %v4753_v45 = vpack.c.bf16 %v4720_v38, %v4720_v38  ;;  %v4800_v38 = vrot.slane %v4798_v33, 4 }
 0x336   : > { %4563 = vrot.lane.b32.xlu1 %v4479_v37, %s11906_s17  ;;  %v4484_v37 = vld [vmem:[#allocation2 + $0x7c] sm:$0xf] }
 0x337   : > { %v4349_v48 = vpop.permute.xlu0 %4348  ;;  %v4808_v32 = vshrl.u32 %v4753_v45, 16 }
 0x338   : > { %v4351_v34 = vpop.permute.xlu1 %4350  ;;  %4565 = vrot.lane.b32.xlu2 %v4480_v6, %s11906_s17  ;;  %4436 = vst.msk [vmem:[#allocation3 + $0x24] sm:$0xf] %vm4426_vm14, %v4349_v48  ;;  %v4785_v6 = vshrl.u32 %v4751_v50, 16 }
 0x339   : > { %4437 = vst.msk [vmem:[#allocation3 + $0x28] sm:$0xf] %vm4426_vm14, %v4351_v34  ;;  %v18252_v34 = vld [vmem:[#allocation39_spill] sm:$0xff]  ;;  %v4810_v40 = vrot.slane %v4808_v32, 4 }
 0x33a   : > { %v4371_v54 = vpop.permute.xlu2 %4370  ;;  %v4721_v48 = vmul.f32 %v11022_v53, %v18252_v34 }
 0x33b   : > { %4447 = vst.msk [vmem:[#allocation3 + $0x50] sm:$0xf] %vm4426_vm14, %v4371_v54  ;;  %v18253_v54 = vld [vmem:[#allocation40_spill] sm:$0xff] }
 0x33c   : > { %v4754_v50 = vpack.c.bf16 %v4721_v48, %v4721_v48 }
 0x33d   : > { %4567 = vrot.lane.b32.xlu0 %v4481_v17, %s11906_s17  ;;  %v4794_v17 = vshll.u32 %v4752_v15, 16  ;;  %v4804_v15 = vshll.u32 %v4753_v45, 16  ;;  %v18256_v45 = vld [vmem:[#allocation41_spill] sm:$0xff] }
 0x33e   : > { %4569 = vrot.lane.b32.xlu1 %v4482_v63, %s11906_s17  ;;  %v4722_v63 = vmul.f32 %v11025_v23, %v18253_v54  ;;  %v18254_v23 = vld [vmem:[#allocation42_spill] sm:$0xff]  ;;  %v4814_v48 = vshll.u32 %v4754_v50, 16  ;;  %v4818_v18 = vshrl.u32 %v4754_v50, 16 }
 0x33f   : > { %v4355_v25 = vpop.permute.xlu0 %4354  ;;  %v4723_v31 = vmul.f32 %v11026_v59, %v18254_v23 }
 0x340   : > { %v4357_v35 = vpop.permute.xlu1 %4356  ;;  %4571 = vrot.lane.b32.xlu2 %v4483_v27, %s11906_s17  ;;  %4439 = vst.msk [vmem:[#allocation3 + $0x30] sm:$0xf] %vm4426_vm14, %v4355_v25  ;;  %v11029_v27 = vunpack.c.l.bf16 %v11546_v7  ;;  %v4790_v25 = vrot.slane %v4788_v14, 5  ;;  %v4755_v53 = vpack.c.bf16 %v4722_v63, %v4722_v63  ;;  %v4489_v63 = vld [vmem:[#allocation2 + $0x90] sm:$0xf]  ;;  %v14259_v50 = vrot.slane %v4814_v48, 5 }
 0x341   : > { %4440 = vst.msk [vmem:[#allocation3 + $0x34] sm:$0xf] %vm4426_vm14, %v4357_v35  ;;  %v4787_v35 = vrot.slane %v4785_v6, 4  ;;  %v11547_v6 = vld [vmem:[#allocation2 + $0x38] sm:$0xff]  }
 0x342   : > { %v4377_v36 = vpop.permute.xlu2 %4376  ;;  %v4724_v47 = vmul.f32 %v11029_v27, %v18255_v46  ;;  %v4824_v59 = vshll.u32 %v4755_v53, 16  ;;  %v4828_v3 = vshrl.u32 %v4755_v53, 16  ;;  %v11033_v27 = vunpack.c.l.bf16 %v11547_v6 }
 0x343   : > { %4450 = vst.msk [vmem:[#allocation3 + $0x5c] sm:$0xf] %vm4426_vm14, %v4377_v36  ;;  %v4791_v14 = vor.u32 %v4790_v25, %v4787_v35  ;;  %v11034_v10 = vunpack.c.h.bf16 %v11547_v6  ;;  %v4820_v53 = vrot.slane %v4818_v18, 4 }
 0x344   : > { %v4757_v33 = vpack.c.bf16 %v4724_v47, %v4724_v47  ;;  %v4830_v47 = vrot.slane %v4828_v3, 4 }
 0x345   : > { %4573 = vrot.lane.b32.xlu0 %v4484_v37, %s11906_s17  ;;  %v4796_v37 = vrot.slane %v4794_v17, 5  ;;  %v4792_v25 = vrot.slane %v4791_v14, 4  ;;  %v4727_v18 = vmul.f32 %v11034_v10, %v18258_v19  ;;  %v4821_v3 = vor.u32 %v4820_v53, %v14259_v50 }
 0x346   : > { %4575 = vrot.lane.b32.xlu1 %v4485_v49, %s11906_s17  ;;  %v4488_v49 = vld [vmem:[#allocation2 + $0x8c] sm:$0xf]  ;;  %v4844_v32 = vshll.u32 %v4757_v33, 16 }
 0x347   : > { %v4361_v56 = vpop.permute.xlu0 %4360  ;;  %v4801_v17 = vor.u32 %v4800_v38, %v4796_v37  ;;  %v4760_v12 = vpack.c.bf16 %v4727_v18, %v4727_v18 }
 0x348   : > { %v4363_v13 = vpop.permute.xlu1 %4362  ;;  %4577 = vrot.lane.b32.xlu2 %v4486_v8, %s11906_s17  ;;  %4442 = vst.msk [vmem:[#allocation3 + $0x3c] sm:$0xf] %vm4426_vm14, %v4361_v56  ;;  %v11030_v8 = vunpack.c.h.bf16 %v11546_v7  ;;  %v4756_v56 = vpack.c.bf16 %v4723_v31, %v4723_v31  ;;  %v4826_v31 = vrot.slane %v4824_v59, 5  ;;  %v4797_v59 = vsel %vm13013_vm9, %v4792_v25, %v4796_v37 }
 0x349   : > { %4443 = vst.msk [vmem:[#allocation3 + $0x40] sm:$0xf] %vm4426_vm14, %v4363_v13  ;;  %v4487_v13 = vld [vmem:[#allocation2 + $0x88] sm:$0xf] }
 0x34a   : > { %v4383_v36 = vpop.permute.xlu2 %4382  ;;  %v4725_v7 = vmul.f32 %v11030_v8, %v18256_v45  ;;  %v18257_v8 = vld [vmem:[#allocation45_spill] sm:$0xff] }
 0x34b   : > { %4453 = vst.msk [vmem:[#allocation3 + $0x68] sm:$0xf] %vm4426_vm14, %v4383_v36  ;;  %v4806_v36 = vrot.slane %v4804_v15, 5  ;;  %v4838_v15 = vshrl.u32 %v4756_v56, 16  ;;  %v4726_v6 = vmul.f32 %v11033_v27, %v18257_v8 }
 0x34c   : > { %v4758_v48 = vpack.c.bf16 %v4725_v7, %v4725_v7 }
 0x34d   : > { %4579 = vrot.lane.b32.xlu0 %v4487_v13, %s11906_s17  ;;  %v4848_v13 = vshrl.u32 %v4757_v33, 16  ;;  %v4811_v14 = vor.u32 %v4810_v40, %v4806_v36  ;;  %v4831_v33 = vor.u32 %v4830_v47, %v4826_v31  ;;  %v4840_v40 = vrot.slane %v4838_v15, 4 }
 0x34e   : > { %4581 = vrot.lane.b32.xlu1 %v4488_v49, %s11906_s17  ;;  %v4834_v49 = vshll.u32 %v4756_v56, 16  ;;  %v4759_v7 = vpack.c.bf16 %v4726_v6, %v4726_v6  ;;  %v4854_v53 = vshll.u32 %v4758_v48, 16  ;;  %v4858_v0 = vshrl.u32 %v4758_v48, 16 }
 0x34f   : > { %v4367_v35 = vpop.permute.xlu0 %4366  ;;  %v4850_v10 = vrot.slane %v4848_v13, 4  ;;  %v4812_v25 = vrot.slane %v4811_v14, 4  ;;  %v11038_v47 = vunpack.c.h.bf16 %v11548_v42  ;;  %v4832_v15 = vrot.slane %v4831_v33, 4 }
 0x350   : > { %v4369_v5 = vpop.permute.xlu1 %4368  ;;  %4583 = vrot.lane.b32.xlu2 %v4489_v63, %s11906_s17  ;;  %4445 = vst.msk [vmem:[#allocation3 + $0x48] sm:$0xf] %vm4426_vm14, %v4367_v35  ;;  %v4802_v63 = vrot.slane %v4801_v17, 4  ;;  %v4836_v27 = vrot.slane %v4834_v49, 5  ;;  %v11037_v35 = vunpack.c.l.bf16 %v11548_v42  ;;  %v14272_v17 = vrot.slane %v4844_v32, 5  ;;  %v18259_v32 = vld [vmem:[#allocation44_spill] sm:$0xff] }
 0x351   : > { %4446 = vst.msk [vmem:[#allocation3 + $0x4c] sm:$0xf] %vm4426_vm14, %v4369_v5  ;;  %v4490_v5 = vld [vmem:[#allocation2 + $0x94] sm:$0xf]  ;;  %v4864_v48 = vshll.u32 %v4759_v7, 16  ;;  %v4868_v18 = vshrl.u32 %v4759_v7, 16  ;;  %v4817_v33 = vsel %vm13013_vm9, %v4812_v25, %v14259_v50 }
 0x352   : > { %v4389_v38 = vpop.permute.xlu2 %4388  ;;  %v4807_v56 = vsel %vm13013_vm9, %v4802_v63, %v4806_v36  ;;  %v4822_v36 = vrot.slane %v4821_v3, 4  ;;  %v4728_v13 = vmul.f32 %v11037_v35, %v18259_v32  ;;  %v4841_v63 = vor.u32 %v4840_v40, %v4836_v27 }
 0x353   : > { %4456 = vst.msk [vmem:[#allocation3 + $0x74] sm:$0xf] %vm4426_vm14, %v4389_v38  ;;  %v11549_v38 = vld [vmem:[#allocation2 + $0x48] sm:$0xff]   ;;  %v4851_v14 = vor.u32 %v4850_v10, %v14272_v17  ;;  %v4874_v3 = vshll.u32 %v4760_v12, 16  ;;  %v4878_v42 = vshrl.u32 %v4760_v12, 16  ;;  %v4837_v7 = vsel %vm13013_vm9, %v4832_v15, %v4836_v27 }
 0x354   : > { %v11041_v49 = vunpack.c.l.bf16 %v11549_v38  ;;  %v11042_v6 = vunpack.c.h.bf16 %v11549_v38  ;;  %v4827_v35 = vsel %vm13013_vm9, %v4822_v36, %v4826_v31  ;;  %v18260_v38 = vld [vmem:[#allocation48_spill] sm:$0xff]  ;;  %v11045_v12 = vunpack.c.l.bf16 %v11550_v30  ;;  %v18263_v30 = vld [vmem:[#allocation51_spill] sm:$0xff] }
 0x355   : > { %4585 = vrot.lane.b32.xlu0 %v4490_v5, %s11906_s17  ;;  %v4729_v40 = vmul.f32 %v11038_v47, %v18260_v38  ;;  %v4842_v52 = vrot.slane %v4841_v63, 4  ;;  %v4866_v50 = vrot.slane %v4864_v48, 5  ;;  %v4870_v25 = vrot.slane %v4868_v18, 4  ;;  %s11914_s17 = smov 21  }
 0x356   : > { %5108 = vrot.lane.b32.xlu1 %v4797_v59, %s11907_s19  ;;  %v4852_v36 = vrot.slane %v4851_v14, 4  ;;  %v14292_v4 = vrot.slane %v4874_v3, 5  ;;  %v4732_v18 = vmul.f32 %v11045_v12, %v18263_v30 }
 0x357   : > { %v4373_v59 = vpop.permute.xlu0 %4372  ;;  %v4762_v27 = vpack.c.bf16 %v4729_v40, %v4729_v40  ;;  %v4871_v3 = vor.u32 %v4870_v25, %v4866_v50 }
 0x358   : > { %v4375_v37 = vpop.permute.xlu1 %4374  ;;  %5110 = vrot.lane.b32.xlu2 %v4807_v56, %s11907_s19  ;;  %4448 = vst.msk [vmem:[#allocation3 + $0x54] sm:$0xf] %vm4426_vm14, %v4373_v59  ;;  %v4856_v56 = vrot.slane %v4854_v53, 5  ;;  %v18261_v59 = vld [vmem:[#allocation49_spill] sm:$0xff]  ;;  %v4761_v53 = vpack.c.bf16 %v4728_v13, %v4728_v13  ;;  %v11551_v13 = vld [vmem:[#allocation2 + $0x58] sm:$0xff]   ;;  %v4765_v25 = vpack.c.bf16 %v4732_v18, %v4732_v18 }
 0x359   : > { %4449 = vst.msk [vmem:[#allocation3 + $0x58] sm:$0xf] %vm4426_vm14, %v4375_v37  ;;  %v4860_v37 = vrot.slane %v4858_v0, 4  ;;  %v4730_v10 = vmul.f32 %v11041_v49, %v18261_v59  ;;  %v18262_v0 = vld [vmem:[#allocation47_spill] sm:$0xff]  ;;  %v4880_v49 = vrot.slane %v4878_v42, 4  ;;  %v18264_v42 = vld [vmem:[#allocation52_spill] sm:$0xff] }
 0x35a   : > { %v4524_v5 = vpop.permute.xlu2 %4523  ;;  %v4888_v63 = vshrl.u32 %v4761_v53, 16  ;;  %v4857_v40 = vsel %vm13013_vm9, %v4852_v36, %v4856_v56 }
 0x35b   : > { %4620 = vst.msk [vmem:[#allocation3] sm:$0xf] %vm4619_vm15, %v4524_v5  ;;  %v4731_v5 = vmul.f32 %v11042_v6, %v18262_v0  ;;  %v4861_v47 = vor.u32 %v4860_v37, %v4856_v56  ;;  %v4763_v15 = vpack.c.bf16 %v4730_v10, %v4730_v10  ;;  %v4884_v6 = vshll.u32 %v4761_v53, 16 }
 0x35c   : > { %v4847_v37 = vsel %vm13013_vm9, %v4842_v52, %v14272_v17  ;;  %v11049_v53 = vunpack.c.l.bf16 %v11551_v13  ;;  %v4890_v17 = vrot.slane %v4888_v63, 4 }
 0x35d   : > { %5112 = vrot.lane.b32.xlu0 %v4817_v33, %s11907_s19  ;;  %v4764_v48 = vpack.c.bf16 %v4731_v5, %v4731_v5  ;;  %v4733_v33 = vmul.f32 %v11046_v43, %v18264_v42  ;;  %v4862_v10 = vrot.slane %v4861_v47, 4  ;;  %v4894_v5 = vshll.u32 %v4762_v27, 16 }
 0x35e   : > { %5114 = vrot.lane.b32.xlu1 %v4827_v35, %s11907_s19  ;;  %v4904_v12 = vshll.u32 %v4763_v15, 16  ;;  %v4886_v52 = vrot.slane %v4884_v6, 5  ;;  %v11050_v47 = vunpack.c.h.bf16 %v11551_v13 }
 0x35f   : > { %v4379_v35 = vpop.permute.xlu0 %4378  ;;  %v4914_v43 = vshll.u32 %v4764_v48, 16  ;;  %v4918_v56 = vshrl.u32 %v4764_v48, 16  ;;  %v4766_v36 = vpack.c.bf16 %v4733_v33, %v4733_v33  ;;  %v4896_v6 = vrot.slane %v4894_v5, 5 }
 0x360   : > { %v4381_v31 = vpop.permute.xlu1 %4380  ;;  %5116 = vrot.lane.b32.xlu2 %v4837_v7, %s11907_s19  ;;  %4451 = vst.msk [vmem:[#allocation3 + $0x60] sm:$0xf] %vm4426_vm14, %v4379_v35  ;;  %v4881_v7 = vor.u32 %v4880_v49, %v14292_v4  ;;  %v4908_v35 = vshrl.u32 %v4763_v15, 16  ;;  %v18265_v15 = vld [vmem:[#allocation50_spill] sm:$0xff]  ;;  %v14316_v18 = vrot.slane %v4904_v12, 5  ;;  %v4891_v13 = vor.u32 %v4890_v17, %v4886_v52  ;;  %v18267_v12 = vld [vmem:[#allocation55_spill] sm:$0xff] }
 0x361   : > { %4452 = vst.msk [vmem:[#allocation3 + $0x64] sm:$0xf] %vm4426_vm14, %v4381_v31  ;;  %v4898_v31 = vshrl.u32 %v4762_v27, 16  ;;  %v4867_v27 = vsel %vm13013_vm9, %v4862_v10, %v4866_v50  ;;  %v4734_v38 = vmul.f32 %v11049_v53, %v18265_v15  ;;  %v4924_v50 = vshll.u32 %v4765_v25, 16  ;;  %v18266_v15 = vld [vmem:[#allocation54_spill] sm:$0xff] }
 0x362   : > { %v4530_v14 = vpop.permute.xlu2 %4529  ;;  %v4882_v30 = vrot.slane %v4881_v7, 4  ;;  %v4910_v48 = vrot.slane %v4908_v35, 4  ;;  %v4920_v10 = vrot.slane %v4918_v56, 4  ;;  %v4934_v7 = vshll.u32 %v4766_v36, 16 }
 0x363   : > { %4623 = vst.msk [vmem:[#allocation3 + $0xc] sm:$0xf] %vm4619_vm15, %v4530_v14  ;;  %v4872_v14 = vrot.slane %v4871_v3, 4  ;;  %v4900_v63 = vrot.slane %v4898_v31, 4  ;;  %v4928_v3 = vshrl.u32 %v4765_v25, 16  ;;  %v4938_v53 = vshrl.u32 %v4766_v36, 16 }
 0x364   : > { %v4735_v42 = vmul.f32 %v11050_v47, %v18266_v15  ;;  %v4767_v31 = vpack.c.bf16 %v4734_v38, %v4734_v38  ;;  %v4736_v35 = vmul.f32 %v11053_v16, %v18267_v12  ;;  %v4887_v17 = vsel %vm13013_vm9, %v4882_v30, %v4886_v52 }
 0x365   : > { %5118 = vrot.lane.b32.xlu0 %v4847_v37, %s11907_s19  ;;  %v4916_v37 = vrot.slane %v4914_v43, 5  ;;  %v4877_v5 = vsel %vm13013_vm9, %v4872_v14, %v14292_v4  ;;  %v4901_v43 = vor.u32 %v4900_v63, %v4896_v6  ;;  %v4911_v25 = vor.u32 %v4910_v48, %v14316_v18 }
 0x366   : > { %5120 = vrot.lane.b32.xlu1 %v4857_v40, %s11907_s19  ;;  %v11054_v56 = vunpack.c.h.bf16 %v14306_v51  ;;  %v4892_v36 = vrot.slane %v4891_v13, 4  ;;  %v4926_v47 = vrot.slane %v4924_v50, 5  ;;  %v14331_v38 = vrot.slane %v4934_v7, 5 }
 0x367   : > { %v4385_v40 = vpop.permute.xlu0 %4384  ;;  %v4921_v4 = vor.u32 %v4920_v10, %v4916_v37  ;;  %v4940_v16 = vrot.slane %v4938_v53, 4  ;;  %v4768_v14 = vpack.c.bf16 %v4735_v42, %v4735_v42  ;;  %v4944_v63 = vshll.u32 %v4767_v31, 16  ;;  %v18269_v53 = vld [vmem:[#allocation58_spill] sm:$0xff] }
 0x368   : > { %v4387_v49 = vpop.permute.xlu1 %4386  ;;  %5122 = vrot.lane.b32.xlu2 %v4867_v27, %s11907_s19  ;;  %4454 = vst.msk [vmem:[#allocation3 + $0x6c] sm:$0xf] %vm4426_vm14, %v4385_v40  ;;  %v4930_v27 = vrot.slane %v4928_v3, 4  ;;  %v4897_v52 = vsel %vm13013_vm9, %v4892_v36, %v4896_v6  ;;  %v4948_v51 = vshrl.u32 %v4767_v31, 16  ;;  %v4769_v48 = vpack.c.bf16 %v4736_v35, %v4736_v35  ;;  %v18268_v3 = vld [vmem:[#allocation53_spill] sm:$0xff] }
 0x369   : > { %4455 = vst.msk [vmem:[#allocation3 + $0x70] sm:$0xf] %vm4426_vm14, %v4387_v49  ;;  %v11553_v49 = vld [vmem:[#allocation2 + $0x68] sm:$0xff]   ;;  %v4902_v13 = vrot.slane %v4901_v43, 4  ;;  %v4912_v50 = vrot.slane %v4911_v25, 4  ;;  %v4737_v10 = vmul.f32 %v11054_v56, %v18268_v3  ;;  %v4922_v36 = vrot.slane %v4921_v4, 4 }
 0x36a   : > { %v4536_v33 = vpop.permute.xlu2 %4535  ;;  %v11058_v40 = vunpack.c.h.bf16 %v11553_v49  ;;  %v11057_v7 = vunpack.c.l.bf16 %v11553_v49  ;;  %v4931_v42 = vor.u32 %v4930_v27, %v4926_v47  ;;  %v4941_v31 = vor.u32 %v4940_v16, %v14331_v38  ;;  %v11556_v3 = vld [vmem:[#allocation2 + $0x80] sm:$0xff]  }
 0x36b   : > { %4626 = vst.msk [vmem:[#allocation3 + $0x18] sm:$0xf] %vm4619_vm15, %v4536_v33  ;;  %v11554_v33 = vld [vmem:[#allocation2 + $0x70] sm:$0xff]   ;;  %v4954_v35 = vshll.u32 %v4768_v14, 16  ;;  %v4958_v12 = vshrl.u32 %v4768_v14, 16  ;;  %v4950_v43 = vrot.slane %v4948_v51, 4  ;;  %v4907_v49 = vsel %vm13013_vm9, %v4902_v13, %v14316_v18 }
 0x36c   : > { %v11061_v15 = vunpack.c.l.bf16 %v11554_v33  ;;  %v4964_v25 = vshll.u32 %v4769_v48, 16  ;;  %v4917_v56 = vsel %vm13013_vm9, %v4912_v50, %v4916_v37  ;;  %v4770_v27 = vpack.c.bf16 %v4737_v10, %v4737_v10  ;;  %v18271_v51 = vld [vmem:[#allocation56_spill] sm:$0xff] }
 0x36d   : > { %5124 = vrot.lane.b32.xlu0 %v4877_v5, %s11907_s19  ;;  %v4739_v5 = vmul.f32 %v11058_v40, %v18269_v53  ;;  %v18270_v40 = vld [vmem:[#allocation57_spill] sm:$0xff]  ;;  %v4927_v16 = vsel %vm13013_vm9, %v4922_v36, %v4926_v47  ;;  %v4932_v14 = vrot.slane %v4931_v42, 4  ;;  %v4956_v18 = vrot.slane %v4954_v35, 5 }
 0x36e   : > { %5126 = vrot.lane.b32.xlu1 %v4887_v17, %s11907_s19  ;;  %v4738_v4 = vmul.f32 %v11057_v7, %v18270_v40  ;;  %v4960_v13 = vrot.slane %v4958_v12, 4  ;;  %v11062_v53 = vunpack.c.h.bf16 %v11554_v33  ;;  %v14353_v10 = vrot.slane %v4964_v25, 5 }
 0x36f   : > { %v4391_v17 = vpop.permute.xlu0 %4390  ;;  %v4974_v47 = vshll.u32 %v4770_v27, 16 }
 0x370   : > { %v4393_v30 = vpop.permute.xlu1 %4392  ;;  %5128 = vrot.lane.b32.xlu2 %v4897_v52, %s11907_s19  ;;  %4457 = vst.msk [vmem:[#allocation3 + $0x78] sm:$0xf] %vm4426_vm14, %v4391_v17  ;;  %v4968_v52 = vshrl.u32 %v4769_v48, 16  ;;  %v11555_v17 = vld [vmem:[#allocation2 + $0x78] sm:$0xff]   ;;  %v4740_v48 = vmul.f32 %v11061_v15, %v18271_v51  ;;  %v4771_v42 = vpack.c.bf16 %v4738_v4, %v4738_v4  ;;  %v4978_v15 = vshrl.u32 %v4770_v27, 16 }
 0x371   : > { %4458 = vst.msk [vmem:[#allocation3 + $0x7c] sm:$0xf] %vm4426_vm14, %v4393_v30  ;;  %v4946_v30 = vrot.slane %v4944_v63, 5  ;;  %v4772_v63 = vpack.c.bf16 %v4739_v5, %v4739_v5  ;;  %v11065_v40 = vunpack.c.l.bf16 %v11555_v17  ;;  %v4961_v35 = vor.u32 %v4960_v13, %v4956_v18 }
 0x372   : > { %v4542_v6 = vpop.permute.xlu2 %4541  ;;  %v4970_v7 = vrot.slane %v4968_v52, 4  ;;  %v4773_v36 = vpack.c.bf16 %v4740_v48, %v4740_v48  ;;  %v11066_v52 = vunpack.c.h.bf16 %v11555_v17  ;;  %v4988_v51 = vshrl.u32 %v4771_v42, 16 }
 0x373   : > { %4629 = vst.msk [vmem:[#allocation3 + $0x24] sm:$0xf] %vm4619_vm15, %v4542_v6  ;;  %v4942_v6 = vrot.slane %v4941_v31, 4  ;;  %v4951_v50 = vor.u32 %v4950_v43, %v4946_v30  ;;  %v4994_v5 = vshll.u32 %v4772_v63, 16  ;;  %v4998_v12 = vshrl.u32 %v4772_v63, 16  ;;  %v18272_v43 = vld [vmem:[#allocation60_spill] sm:$0xff] }
 0x374   : > { %v4937_v31 = vsel %vm13013_vm9, %v4932_v14, %v14331_v38  ;;  %v4741_v25 = vmul.f32 %v11062_v53, %v18272_v43  ;;  %v4971_v4 = vor.u32 %v4970_v7, %v14353_v10  ;;  %v4976_v63 = vrot.slane %v4974_v47, 5  ;;  %v11557_v43 = vld [vmem:[#allocation2 + $0x88] sm:$0xff]  }
 0x375   : > { %5130 = vrot.lane.b32.xlu0 %v4907_v49, %s11907_s19  ;;  %v4947_v49 = vsel %vm13013_vm9, %v4942_v6, %v4946_v30  ;;  %v4952_v27 = vrot.slane %v4951_v50, 4  ;;  %v14368_v38 = vrot.slane %v4994_v5, 5  ;;  %v5000_v53 = vrot.slane %v4998_v12, 4  ;;  %v18274_v6 = vld [vmem:[#allocation59_spill] sm:$0xff] }
 0x376   : > { %5132 = vrot.lane.b32.xlu1 %v4917_v56, %s11907_s19  ;;  %v5004_v17 = vshll.u32 %v4773_v36, 16  ;;  %v5008_v14 = vshrl.u32 %v4773_v36, 16  ;;  %v4774_v30 = vpack.c.bf16 %v4741_v25, %v4741_v25  ;;  %v4743_v13 = vmul.f32 %v11066_v52, %v18274_v6 }
 0x377   : > { %v4526_v56 = vpop.permute.xlu0 %4525  ;;  %v4962_v7 = vrot.slane %v4961_v35, 4  ;;  %v4972_v5 = vrot.slane %v4971_v4, 4  ;;  %v5001_v25 = vor.u32 %v5000_v53, %v14368_v38  ;;  %vm9210_vm14 = vcmask 191656  }
 0x378   : > { %v4528_v37 = vpop.permute.xlu1 %4527  ;;  %5134 = vrot.lane.b32.xlu2 %v4927_v16, %s11907_s19  ;;  %4621 = vst.msk [vmem:[#allocation3 + $0x4] sm:$0xf] %vm4619_vm15, %v4526_v56  ;;  %v18273_v16 = vld [vmem:[#allocation61_spill] sm:$0xff]  ;;  %v4984_v56 = vshll.u32 %v4771_v42, 16  ;;  %v11069_v42 = vunpack.c.l.bf16 %v11556_v3  ;;  %v5006_v52 = vrot.slane %v5004_v17, 5  ;;  %v5014_v35 = vshll.u32 %v4774_v30, 16 }
 0x379   : > { %4622 = vst.msk [vmem:[#allocation3 + $0x8] sm:$0xf] %vm4619_vm15, %v4528_v37  ;;  %v4742_v48 = vmul.f32 %v11065_v40, %v18273_v16  ;;  %v4980_v37 = vrot.slane %v4978_v15, 4  ;;  %v4957_v40 = vsel %vm13013_vm9, %v4952_v27, %v4956_v18  ;;  %v5018_v27 = vshrl.u32 %v4774_v30, 16 }
 0x37a   : > { %v4548_v33 = vpop.permute.xlu2 %4547  ;;  %v4986_v36 = vrot.slane %v4984_v56, 5  ;;  %v4744_v4 = vmul.f32 %v11069_v42, %v18197_v44  ;;  %v18275_v56 = vld [vmem:[#allocation64_spill] sm:$0xff] }
 0x37b   : > { %4632 = vst.msk [vmem:[#allocation3 + $0x30] sm:$0xf] %vm4619_vm15, %v4548_v33  ;;  %v4775_v47 = vpack.c.bf16 %v4742_v48, %v4742_v48  ;;  %v4981_v12 = vor.u32 %v4980_v37, %v4976_v63  ;;  %v11070_v33 = vunpack.c.h.bf16 %v11556_v3  ;;  %v4776_v48 = vpack.c.bf16 %v4743_v13, %v4743_v13 }
 0x37c   : > { %v4967_v3 = vsel %vm13013_vm9, %v4962_v7, %v14353_v10  ;;  %v11073_v13 = vunpack.c.l.bf16 %v11557_v43  ;;  %v5020_v42 = vrot.slane %v5018_v27, 4 }
 0x37d   : > { %5136 = vrot.lane.b32.xlu0 %v4937_v31, %s11907_s19  ;;  %v4990_v31 = vrot.slane %v4988_v51, 4  ;;  %v4977_v51 = vsel %vm13013_vm9, %v4972_v5, %v4976_v63  ;;  %v4982_v37 = vrot.slane %v4981_v12, 4  ;;  %v4745_v53 = vmul.f32 %v11070_v33, %v18275_v56 }
 0x37e   : > { %5138 = vrot.lane.b32.xlu1 %v4947_v49, %s11907_s19  ;;  %v5010_v49 = vrot.slane %v5008_v14, 4  ;;  %v5002_v14 = vrot.slane %v5001_v25, 4  ;;  %v5038_v44 = vshrl.u32 %v4776_v48, 16  ;;  %v4777_v12 = vpack.c.bf16 %v4744_v4, %v4744_v4 }
 0x37f   : > { %v4532_v15 = vpop.permute.xlu0 %4531  ;;  %v4991_v17 = vor.u32 %v4990_v31, %v4986_v36  ;;  %v4987_v63 = vsel %vm13013_vm9, %v4982_v37, %v4986_v36  ;;  %v4778_v31 = vpack.c.bf16 %v4745_v53, %v4745_v53  ;;  %v11074_v25 = vunpack.c.h.bf16 %v11557_v43 }
 0x380   : > { %v4534_v50 = vpop.permute.xlu1 %4533  ;;  %5140 = vrot.lane.b32.xlu2 %v4957_v40, %s11907_s19  ;;  %4624 = vst.msk [vmem:[#allocation3 + $0x10] sm:$0xf] %vm4619_vm15, %v4532_v15  ;;  %v5028_v40 = vshrl.u32 %v4775_v47, 16  ;;  %v5011_v30 = vor.u32 %v5010_v49, %v5006_v52  ;;  %v11558_v15 = vld [vmem:[#allocation2 + $0x90] sm:$0xff]   ;;  %v5007_v27 = vsel %vm13013_vm9, %v5002_v14, %v5006_v52  ;;  %v4746_v36 = vmul.f32 %v11073_v13, %v13260_v58 }
 0x381   : > { %4625 = vst.msk [vmem:[#allocation3 + $0x14] sm:$0xf] %vm4619_vm15, %v4534_v50  ;;  %v5024_v50 = vshll.u32 %v4775_v47, 16  ;;  %v5016_v47 = vrot.slane %v5014_v35, 5  ;;  %v11077_v49 = vunpack.c.l.bf16 %v11558_v15  ;;  %v4992_v35 = vrot.slane %v4991_v17, 4 }
 0x382   : > { %v4554_v18 = vpop.permute.xlu2 %4553  ;;  %v5030_v5 = vrot.slane %v5028_v40, 4  ;;  %v5044_v37 = vshll.u32 %v4777_v12, 16  ;;  %v5048_v43 = vshrl.u32 %v4777_v12, 16  ;;  %v11078_v53 = vunpack.c.h.bf16 %v11558_v15 }
 0x383   : > { %4635 = vst.msk [vmem:[#allocation3 + $0x3c] sm:$0xf] %vm4619_vm15, %v4554_v18  ;;  %v5034_v18 = vshll.u32 %v4776_v48, 16  ;;  %v14390_v7 = vrot.slane %v5024_v50, 5  ;;  %v5012_v50 = vrot.slane %v5011_v30, 4  ;;  %v5021_v40 = vor.u32 %v5020_v42, %v5016_v47 }
 0x384   : > { %v4747_v17 = vmul.f32 %v11074_v25, %v13293_v2  ;;  %v4997_v14 = vsel %vm13013_vm9, %v4992_v35, %v14368_v38  ;;  %v5050_v12 = vrot.slane %v5048_v43, 4 }
 0x385   : > { %5142 = vrot.lane.b32.xlu0 %v4967_v3, %s11907_s19  ;;  %v5036_v4 = vrot.slane %v5034_v18, 5  ;;  %v5040_v3 = vrot.slane %v5038_v44, 4  ;;  %v4779_v44 = vpack.c.bf16 %v4746_v36, %v4746_v36  ;;  %v5017_v30 = vsel %vm13013_vm9, %v5012_v50, %v5016_v47 }
 0x386   : > { %5144 = vrot.lane.b32.xlu1 %v4977_v51, %s11907_s19  ;;  %v5031_v51 = vor.u32 %v5030_v5, %v14390_v7  ;;  %v5022_v13 = vrot.slane %v5021_v40, 4  ;;  %v5046_v5 = vrot.slane %v5044_v37, 5 }
 0x387   : > { %v4538_v33 = vpop.permute.xlu0 %4537  ;;  %v5041_v15 = vor.u32 %v5040_v3, %v5036_v4  ;;  %v5064_v47 = vshll.u32 %v4779_v44, 16  ;;  %v4684_v3 = vld [vmem:[#allocation2 + $0x98] sm:$0x1] }
 0x388   : > { %v4540_v10 = vpop.permute.xlu1 %4539  ;;  %5146 = vrot.lane.b32.xlu2 %v4987_v63, %s11907_s19  ;;  %4627 = vst.msk [vmem:[#allocation3 + $0x1c] sm:$0xf] %vm4619_vm15, %v4538_v33  ;;  %v5058_v63 = vshrl.u32 %v4778_v31, 16  ;;  %v18276_v33 = vld [vmem:[#allocation67_spill] sm:$0xff]  ;;  %v5032_v18 = vrot.slane %v5031_v51, 4  ;;  %v5027_v40 = vsel %vm13013_vm9, %v5022_v13, %v14390_v7  ;;  %v5051_v43 = vor.u32 %v5050_v12, %v5046_v5 }
 0x389   : > { %4628 = vst.msk [vmem:[#allocation3 + $0x20] sm:$0xf] %vm4619_vm15, %v4540_v10  ;;  %v5054_v10 = vshll.u32 %v4778_v31, 16  ;;  %v4748_v52 = vmul.f32 %v11077_v49, %v18276_v33  ;;  %v18277_v31 = vld [vmem:[#allocation68_spill] sm:$0xff]  ;;  %v5042_v37 = vrot.slane %v5041_v15, 4 }
 0x38a   : > { %v4560_v48 = vpop.permute.xlu2 %4559  ;;  %v4749_v25 = vmul.f32 %v11078_v53, %v18277_v31  ;;  %v5060_v35 = vrot.slane %v5058_v63, 4  ;;  %v5037_v51 = vsel %vm13013_vm9, %v5032_v18, %v5036_v4  ;;  %v5052_v12 = vrot.slane %v5051_v43, 4 }
 0x38b   : > { %4638 = vst.msk [vmem:[#allocation3 + $0x48] sm:$0xf] %vm4619_vm15, %v4560_v48  ;;  %v5056_v38 = vrot.slane %v5054_v10, 5  ;;  %v4781_v36 = vpack.c.bf16 %v4748_v52, %v4748_v52  ;;  %v5068_v48 = vshrl.u32 %v4779_v44, 16  ;;  %v5047_v13 = vsel %vm13013_vm9, %v5042_v37, %v5046_v5 }
 0x38c   : > { %v4782_v53 = vpack.c.bf16 %v4749_v25, %v4749_v25 }
 0x38d   : > { %5148 = vrot.lane.b32.xlu0 %v4997_v14, %s11907_s19  ;;  %v5061_v10 = vor.u32 %v5060_v35, %v5056_v38  ;;  %v5088_v52 = vshrl.u32 %v4781_v36, 16  ;;  %v5066_v14 = vrot.slane %v5064_v47, 5  ;;  %v5070_v44 = vrot.slane %v5068_v48, 4 }
 0x38e   : > { %5150 = vrot.lane.b32.xlu1 %v5007_v27, %s11907_s19  ;;  %v4780_v27 = vpack.c.bf16 %v4747_v17, %v4747_v17  ;;  %v5084_v17 = vshll.u32 %v4781_v36, 16  ;;  %v5094_v4 = vshll.u32 %v4782_v53, 16  ;;  %v5098_v15 = vshrl.u32 %v4782_v53, 16 }
 0x38f   : > { %v4544_v49 = vpop.permute.xlu0 %4543  ;;  %v5062_v25 = vrot.slane %v5061_v10, 4  ;;  %v5090_v35 = vrot.slane %v5088_v52, 4  ;;  %v5057_v37 = vsel %vm13013_vm9, %v5052_v12, %v5056_v38 }
 0x390   : > { %v4546_v42 = vpop.permute.xlu1 %4545  ;;  %5152 = vrot.lane.b32.xlu2 %v5017_v30, %s11907_s19  ;;  %4630 = vst.msk [vmem:[#allocation3 + $0x28] sm:$0xf] %vm4619_vm15, %v4544_v49  ;;  %v5074_v63 = vshll.u32 %v4780_v27, 16  ;;  %v5078_v30 = vshrl.u32 %v4780_v27, 16  ;;  %v5086_v49 = vrot.slane %v5084_v17, 5  ;;  %v5071_v27 = vor.u32 %v5070_v44, %v5066_v14 }
 0x391   : > { %4631 = vst.msk [vmem:[#allocation3 + $0x2c] sm:$0xf] %vm4619_vm15, %v4546_v42  ;;  %v4717_v42 = vunpack.c.l.bf16 %v4684_v3  ;;  %v5096_v5 = vrot.slane %v5094_v4, 5  ;;  %v5067_v3 = vsel %vm13013_vm9, %v5062_v25, %v5066_v14 }
 0x392   : > { %v4566_v50 = vpop.permute.xlu2 %4565  ;;  %v5076_v36 = vrot.slane %v5074_v63, 5  ;;  %v5080_v47 = vrot.slane %v5078_v30, 4  ;;  %v5072_v43 = vrot.slane %v5071_v27, 4 }
 0x393   : > { %4641 = vst.msk [vmem:[#allocation3 + $0x54] sm:$0xf] %vm4619_vm15, %v4566_v50  ;;  %v4750_v48 = vmul.f32 %v4717_v42, %v13290_v39 }
 0x394   : > { %v5081_v53 = vor.u32 %v5080_v47, %v5076_v36  ;;  %v5077_v17 = vsel %vm13013_vm9, %v5072_v43, %v5076_v36 }
 0x395   : > { %5154 = vrot.lane.b32.xlu0 %v5027_v40, %s11907_s19  ;;  %v5100_v40 = vrot.slane %v5098_v15, 4  ;;  %v4783_v10 = vpack.c.bf16 %v4750_v48, %v4750_v48 }
 0x396   : > { %5156 = vrot.lane.b32.xlu1 %v5037_v51, %s11907_s19  ;;  %v5091_v51 = vor.u32 %v5090_v35, %v5086_v49  ;;  %v5082_v38 = vrot.slane %v5081_v53, 4 }
 0x397   : > { %v4550_v18 = vpop.permute.xlu0 %4549  ;;  %v5101_v52 = vor.u32 %v5100_v40, %v5096_v5  ;;  %v5104_v30 = vshll.u32 %v4783_v10, 16  ;;  %v5900_v10 = vld [vmem:[#allocation2 + $0x4] sm:$0x8] }
 0x398   : > { %v4552_v7 = vpop.permute.xlu1 %4551  ;;  %5158 = vrot.lane.b32.xlu2 %v5047_v13, %s11907_s19  ;;  %4633 = vst.msk [vmem:[#allocation3 + $0x34] sm:$0xf] %vm4619_vm15, %v4550_v18  ;;  %v5092_v14 = vrot.slane %v5091_v51, 4  ;;  %v5273_v13 = vld [vmem:[%s17714_s3 + $0x10] sm:$0x3]  ;;  %v5087_v18 = vsel %vm13013_vm9, %v5082_v38, %v5086_v49 }
 0x399   : > { %4634 = vst.msk [vmem:[#allocation3 + $0x38] sm:$0xf] %vm4619_vm15, %v4552_v7  ;;  %v5102_v7 = vrot.slane %v5101_v52, 4  ;;  %v5367_v15 = vunpack.c.l.b16 %v5273_v13  ;;  %v5106_v12 = vrot.slane %v5104_v30, 5  ;;  %v5933_v52 = vunpack.c.l.bf16 %v5900_v10 }
 0x39a   : > { %v4572_v50 = vpop.permute.xlu2 %4571  ;;  %v5097_v4 = vsel %vm13013_vm9, %v5092_v14, %v5096_v5  ;;  %v10676_v5 = vld [vmem:[%s17714_s3 + $0x8] sm:$0xff] }
 0x39b   : > { %4644 = vst.msk [vmem:[#allocation3 + $0x60] sm:$0xf] %vm4619_vm15, %v4572_v50  ;;  %v5370_v25 = vpack.c.b16 %v5367_v15, %v5367_v15  ;;  %v5107_v27 = vsel %vm13013_vm9, %v5102_v7, %v5106_v12  ;;  %v5966_v38 = vmul.f32 %v5933_v52, %v12182_v11  ;;  %v5516_v15 = vld [vmem:[%s14469_s30 + $0x8] sm:$0xff]  ;;  %v5525_v52 = vld [vmem:[%s14469_s30 + $0x50] sm:$0xff] }
 0x39d   : > { %5160 = vrot.lane.b32.xlu0 %v5057_v37, %s11907_s19  ;;  %v5424_v47 = vsel %vm5422_vm0, %v5370_v25, 0  ;;  %v18279_v25 = vld [vmem:[#allocation9_spill] sm:$0xff]  ;;  %vm9959_vm0 = vcmask 220160  }
 0x39e   : > { %5162 = vrot.lane.b32.xlu1 %v5067_v3, %s11907_s19  ;;  %5431 = vmatpush.bf16.msra.mxu0 %v5424_v47  ;;  %v10675_v3 = vld [vmem:[%s17714_s3] sm:$0xff] }
 0x39f   : > { %v4556_v44 = vpop.permute.xlu0 %4555  ;;  %11655 = vmatpush.bf16.msra.mxu2 %v5424_v47 }
 0x3a0   : > { %v4558_v63 = vpop.permute.xlu1 %4557  ;;  %5164 = vrot.lane.b32.xlu2 %v5077_v17, %s11907_s19  ;;  %4636 = vst.msk [vmem:[#allocation3 + $0x40] sm:$0xf] %vm4619_vm15, %v4556_v44  ;;  %v5515_v17 = vld [vmem:[%s14469_s30] sm:$0xff] }
 0x3a1   : > { %4637 = vst.msk [vmem:[#allocation3 + $0x44] sm:$0xf] %vm4619_vm15, %v4558_v63  ;;  %v18278_v63 = vld [vmem:[#allocation13_spill] sm:$0xff] }
 0x3a2   : > { %v4578_v42 = vpop.permute.xlu2 %4577  ;;  %5432 = vmatpush.bf16.msra.mxu0 %v10676_v5 }
 0x3a3   : > { %4647 = vst.msk [vmem:[#allocation3 + $0x6c] sm:$0xf] %vm4619_vm15, %v4578_v42  ;;  %11656 = vmatpush.bf16.msra.mxu2 %v10676_v5  ;;  %v5999_v42 = vpack.c.bf16 %v5966_v38, %v5966_v38  ;;  %v5518_v5 = vld [vmem:[%s14469_s30 + $0x18] sm:$0xff] }
 0x3a5   : > { %5166 = vrot.lane.b32.xlu0 %v5087_v18, %s11907_s19 }
 0x3a6   : > { %5168 = vrot.lane.b32.xlu1 %v5097_v4, %s11907_s19  ;;  %5433 = vmatpush.bf16.msra.mxu0 %v10675_v3  ;;  %v6033_v4 = vshrl.u32 %v5999_v42, 16  ;;  %v5528_v42 = vld [vmem:[%s14469_s30 + $0x68] sm:$0xff] }
 0x3a7   : > { %v4562_v36 = vpop.permute.xlu0 %4561  ;;  %11657 = vmatpush.bf16.msra.mxu2 %v10675_v3 }
 0x3a8   : > { %v4564_v35 = vpop.permute.xlu1 %4563  ;;  %5170 = vrot.lane.b32.xlu2 %v5107_v27, %s11907_s19  ;;  %4639 = vst.msk [vmem:[#allocation3 + $0x4c] sm:$0xf] %vm4619_vm15, %v4562_v36  ;;  %v10563_v12 = vrot.slane %v6033_v4, 11 }
 0x3a9   : > { %4640 = vst.msk [vmem:[#allocation3 + $0x50] sm:$0xf] %vm4619_vm15, %v4564_v35 }
 0x3aa   : > { %v4584_v49 = vpop.permute.xlu2 %4583  ;;  %v6044_v35 = vsel %vm12283_vm4, %v10563_v12, %v18279_v25  ;;  %v5527_v25 = vld [vmem:[%s14469_s30 + $0x60] sm:$0xff] }
 0x3ab   : > { %4650 = vst.msk [vmem:[#allocation3 + $0x78] sm:$0xf] %vm4619_vm15, %v4584_v49 }
 0x3ad   : > { %5579 = vrot.lane.b32.xlu0 %v5515_v17, %s11898_s8  ;;  %v5521_v17 = vld [vmem:[%s14469_s30 + $0x30] sm:$0xff] }
 0x3ae   : > { %5581 = vrot.lane.b32.xlu1 %v5516_v15, %s11898_s8 }
 0x3af   : > { %v4568_v50 = vpop.permute.xlu0 %4567 }
 0x3b0   : > { %v4570_v48 = vpop.permute.xlu1 %4569  ;;  %4642 = vst.msk [vmem:[#allocation3 + $0x58] sm:$0xf] %vm4619_vm15, %v4568_v50  ;;  %v5519_v50 = vld [vmem:[%s14469_s30 + $0x20] sm:$0xff] }
 0x3b1   : > { %4643 = vst.msk [vmem:[#allocation3 + $0x5c] sm:$0xf] %vm4619_vm15, %v4570_v48 }
 0x3b2   : > { %v5111_v40 = vpop.permute.xlu2 %5110 }
 0x3b3   : > { %5206 = vst.msk [vmem:[#allocation3 + $0x4] sm:$0xf] %vm5204_vm1, %v5111_v40 }
 0x3b5   : > { %5585 = vrot.lane.b32.xlu0 %v5518_v5, %s11898_s8 }
 0x3b6   : > { %5587 = vrot.lane.b32.xlu1 %v5519_v50, %s11898_s8  ;;  %v5526_v50 = vld [vmem:[%s14469_s30 + $0x58] sm:$0xff] }
 0x3b7   : > { %v4574_v37 = vpop.permute.xlu0 %4573 }
 0x3b8   : > { %v4576_v51 = vpop.permute.xlu1 %4575  ;;  %4645 = vst.msk [vmem:[#allocation3 + $0x64] sm:$0xf] %vm4619_vm15, %v4574_v37  ;;  %v5522_v37 = vld [vmem:[%s14469_s30 + $0x38] sm:$0xff] }
 0x3b9   : > { %4646 = vst.msk [vmem:[#allocation3 + $0x68] sm:$0xf] %vm4619_vm15, %v4576_v51 }
 0x3ba   : > { %v10659_v43 = vld [vmem:[#allocation3] sm:$0xf0]  ;;  %v5117_v53 = vpop.permute.xlu2 %5116 }
 0x3bb   : > { %6357 = vst.msk [vmem:[#allocation3 + $0x4] sm:$0xf] %vm5867_vm2, %v18278_v63 }
 0x3bc   : > { %5209 = vst.msk [vmem:[#allocation3 + $0x10] sm:$0xf] %vm5204_vm1, %v5117_v53 }
 0x3bd   : > { %5591 = vrot.lane.b32.xlu0 %v5521_v17, %s11898_s8 }
 0x3be   : > { %5593 = vrot.lane.b32.xlu1 %v5522_v37, %s11898_s8 }
 0x3bf   : > { %v4580_v14 = vpop.permute.xlu0 %4579 }
 0x3c0   : > { %v4582_v44 = vpop.permute.xlu1 %4581  ;;  %4648 = vst.msk [vmem:[#allocation3 + $0x70] sm:$0xf] %vm4619_vm15, %v4580_v14 }
 0x3c1   : > { %4649 = vst.msk [vmem:[#allocation3 + $0x74] sm:$0xf] %vm4619_vm15, %v4582_v44  ;;  %v5517_v44 = vld [vmem:[%s14469_s30 + $0x10] sm:$0xff] }
 0x3c2   : > { %v5123_v30 = vpop.permute.xlu2 %5122  ;;  %5583 = vrot.lane.b32.xlu2 %v5517_v44, %s11898_s8 }
 0x3c3   : > { %5212 = vst.msk [vmem:[#allocation3 + $0x1c] sm:$0xf] %vm5204_vm1, %v5123_v30  ;;  %v5524_v30 = vld [vmem:[%s14469_s30 + $0x48] sm:$0xff] }
 0x3c5   : > { %5597 = vrot.lane.b32.xlu0 %v5524_v30, %s11898_s8 }
 0x3c6   : > { %5599 = vrot.lane.b32.xlu1 %v5525_v52, %s11898_s8  ;;  %v5532_v52 = vld [vmem:[%s14469_s30 + $0x88] sm:$0xff] }
 0x3c7   : > { %v4586_v13 = vpop.permute.xlu0 %4585 }
 0x3c8   : > { %v5109_v7 = vpop.permute.xlu1 %5108  ;;  %4651 = vst.msk [vmem:[#allocation3 + $0x7c] sm:$0xf] %vm4619_vm15, %v4586_v13  ;;  %v5520_v13 = vld [vmem:[%s14469_s30 + $0x28] sm:$0xff]  ;;  %vm9795_vm15 = vcmask 216256  }
 0x3c9   : > { %5205 = vst.msk [vmem:[#allocation3] sm:$0xf] %vm5204_vm1, %v5109_v7 }
 0x3ca   : > { %v5129_v18 = vpop.permute.xlu2 %5128  ;;  %5589 = vrot.lane.b32.xlu2 %v5520_v13, %s11898_s8 }
 0x3cb   : > { %5215 = vst.msk [vmem:[#allocation3 + $0x28] sm:$0xf] %vm5204_vm1, %v5129_v18 }
 0x3cd   : > { %5603 = vrot.lane.b32.xlu0 %v5527_v25, %s11898_s8  ;;  %v5537_v25 = vld [vmem:[%s14469_s30 + $0xb0] sm:$0xff] }
 0x3ce   : > { %5605 = vrot.lane.b32.xlu1 %v5528_v42, %s11898_s8  ;;  %v5535_v42 = vld [vmem:[%s14469_s30 + $0xa0] sm:$0xff] }
 0x3cf   : > { %v5113_v47 = vpop.permute.xlu0 %5112 }
 0x3d0   : > { %v10477_v27 = vld [vmem:[#allocation3] sm:$0xf]  ;;  %v5115_v36 = vpop.permute.xlu1 %5114  ;;  %5207 = vst.msk [vmem:[#allocation3 + $0x8] sm:$0xf] %vm5204_vm1, %v5113_v47 }
 0x3d1   : > { %6356 = vst.msk [vmem:[#allocation3] sm:$0xf] %vm5867_vm2, %v6044_v35  ;;  %v10478_v49 = vor.u32 %v10659_v43, %v10477_v27  ;;  %v5531_v35 = vld [vmem:[%s14469_s30 + $0x80] sm:$0xff] }
 0x3d2   : > { %5208 = vst.msk [vmem:[#allocation3 + $0xc] sm:$0xf] %vm5204_vm1, %v5115_v36  ;;  %v5135_v48 = vpop.permute.xlu2 %5134  ;;  %v5523_v27 = vld [vmem:[%s14469_s30 + $0x40] sm:$0xff] }
 0x3d3   : > { %10547 = vmatmul.msk.bf16.vlgmr.msra.gmra.mxu0 %vm5373_vm3, %v10478_v49  ;;  %5218 = vst.msk [vmem:[#allocation3 + $0x34] sm:$0xf] %vm5204_vm1, %v5135_v48  ;;  %5595 = vrot.lane.b32.xlu2 %v5523_v27, %s11898_s8  ;;  %v5530_v49 = vld [vmem:[%s14469_s30 + $0x78] sm:$0xff]  ;;  %v5541_v27 = vld [vmem:[%s14469_s30 + $0xd0] sm:$0xff] }
 0x3d5   : > { %5609 = vrot.lane.b32.xlu0 %v5530_v49, %s11898_s8  ;;  %v5544_v49 = vld [vmem:[%s14469_s30 + $0xe8] sm:$0xff] }
 0x3d6   : > { %5611 = vrot.lane.b32.xlu1 %v5531_v35, %s11898_s8  ;;  %v5539_v35 = vld [vmem:[%s14469_s30 + $0xc0] sm:$0xff] }
 0x3d7   : > { %v5119_v3 = vpop.permute.xlu0 %5118 }
 0x3d8   : > { %v5121_v40 = vpop.permute.xlu1 %5120  ;;  %5210 = vst.msk [vmem:[#allocation3 + $0x14] sm:$0xf] %vm5204_vm1, %v5119_v3 }
 0x3d9   : > { %5211 = vst.msk [vmem:[#allocation3 + $0x18] sm:$0xf] %vm5204_vm1, %v5121_v40  ;;  %v10660_v10 = vld [vmem:[#allocation3 + $0x8] sm:$0xff] }
 0x3da   : > { %v5141_v51 = vpop.permute.xlu2 %5140 }
 0x3db   : > { %5221 = vst.msk [vmem:[#allocation3 + $0x40] sm:$0xf] %vm5204_vm1, %v5141_v51  ;;  %5601 = vrot.lane.b32.xlu2 %v5526_v50, %s11898_s8 }
 0x3df   : > { %v5125_v53 = vpop.permute.xlu0 %5124  ;;  %v10661_v18 = vld [vmem:[#allocation3 + $0x10] sm:$0xff] }
 0x3e0   : > { %v5127_v43 = vpop.permute.xlu1 %5126  ;;  %5213 = vst.msk [vmem:[#allocation3 + $0x20] sm:$0xf] %vm5204_vm1, %v5125_v53  ;;  %v10662_v3 = vld [vmem:[#allocation3 + $0x18] sm:$0xff]  ;;  %v5529_v53 = vld [vmem:[%s14469_s30 + $0x70] sm:$0xff] }
 0x3e1   : > { %5214 = vst.msk [vmem:[#allocation3 + $0x24] sm:$0xf] %vm5204_vm1, %v5127_v43  ;;  %v5533_v43 = vld [vmem:[%s14469_s30 + $0x90] sm:$0xff] }
 0x3e2   : > { %v5147_v63 = vpop.permute.xlu2 %5146  ;;  %5615 = vrot.lane.b32.xlu0 %v5533_v43, %s11898_s8  ;;  %v14593_v43 = vld [vmem:[%s17715_s4] ss:$0 sm:$0xff] }
 0x3e3   : > { %10548 = vmatmul.msk.bf16.gmra.mxu0 %vm5373_vm3, %v10660_v10  ;;  %5224 = vst.msk [vmem:[#allocation3 + $0x4c] sm:$0xf] %vm5204_vm1, %v5147_v63  ;;  %v5534_v10 = vld [vmem:[%s14469_s30 + $0x98] sm:$0xff]  ;;  %5607 = vrot.lane.b32.xlu2 %v5529_v53, %s11898_s8 }
 0x3e4   : > { %5617 = vrot.lane.b32.xlu1 %v5534_v10, %s11898_s8 }
 0x3e7   : > { %v5131_v38 = vpop.permute.xlu0 %5130 }
 0x3e8   : > { %v5133_v14 = vpop.permute.xlu1 %5132  ;;  %5216 = vst.msk [vmem:[#allocation3 + $0x2c] sm:$0xf] %vm5204_vm1, %v5131_v38  ;;  %v10663_v38 = vld [vmem:[#allocation3 + $0x20] sm:$0xff] }
 0x3e9   : > { %5217 = vst.msk [vmem:[#allocation3 + $0x30] sm:$0xf] %vm5204_vm1, %v5133_v14 }
 0x3ea   : > { %v5153_v7 = vpop.permute.xlu2 %5152 }
 0x3eb   : > { %5227 = vst.msk [vmem:[#allocation3 + $0x58] sm:$0xf] %vm5204_vm1, %v5153_v7  ;;  %5613 = vrot.lane.b32.xlu2 %v5532_v52, %s11898_s8  ;;  %v5536_v7 = vld [vmem:[%s14469_s30 + $0xa8] sm:$0xff] }
 0x3ec   : > { %5621 = vrot.lane.b32.xlu0 %v5536_v7, %s11898_s8  ;;  %5623 = vrot.lane.b32.xlu1 %v5537_v25, %s11898_s8 }
 0x3ef   : > { %v5137_v15 = vpop.permute.xlu0 %5136 }
 0x3f0   : > { %v5139_v4 = vpop.permute.xlu1 %5138  ;;  %5219 = vst.msk [vmem:[#allocation3 + $0x38] sm:$0xf] %vm5204_vm1, %v5137_v15  ;;  %v5538_v15 = vld [vmem:[%s14469_s30 + $0xb8] sm:$0xff] }
 0x3f1   : > { %5220 = vst.msk [vmem:[#allocation3 + $0x3c] sm:$0xf] %vm5204_vm1, %v5139_v4 }
 0x3f2   : > { %v5159_v12 = vpop.permute.xlu2 %5158 }
 0x3f3   : > { %10549 = vmatmul.msk.bf16.gmra.mxu0 %vm5373_vm3, %v10661_v18  ;;  %5230 = vst.msk [vmem:[#allocation3 + $0x64] sm:$0xf] %vm5204_vm1, %v5159_v12  ;;  %5619 = vrot.lane.b32.xlu2 %v5535_v42, %s11898_s8  ;;  %v10664_v18 = vld [vmem:[#allocation3 + $0x28] sm:$0xff] }
 0x3f4   : > { %5627 = vrot.lane.b32.xlu0 %v5539_v35, %s11898_s8 }
 0x3f7   : > { %v5143_v47 = vpop.permute.xlu0 %5142 }
 0x3f8   : > { %v5145_v36 = vpop.permute.xlu1 %5144  ;;  %5222 = vst.msk [vmem:[#allocation3 + $0x44] sm:$0xf] %vm5204_vm1, %v5143_v47  ;;  %v5540_v47 = vld [vmem:[%s14469_s30 + $0xc8] sm:$0xff] }
 0x3f9   : > { %5223 = vst.msk [vmem:[#allocation3 + $0x48] sm:$0xf] %vm5204_vm1, %v5145_v36  ;;  %v5542_v36 = vld [vmem:[%s14469_s30 + $0xd8] sm:$0xff]  ;;  %5629 = vrot.lane.b32.xlu1 %v5540_v47, %s11898_s8 }
 0x3fa   : > { %v5165_v48 = vpop.permute.xlu2 %5164 }
 0x3fb   : > { %5233 = vst.msk [vmem:[#allocation3 + $0x70] sm:$0xf] %vm5204_vm1, %v5165_v48  ;;  %5625 = vrot.lane.b32.xlu2 %v5538_v15, %s11898_s8  ;;  %v10665_v48 = vld [vmem:[#allocation3 + $0x30] sm:$0xff] }
 0x3fc   : > { %5633 = vrot.lane.b32.xlu0 %v5542_v36, %s11898_s8 }
 0x3ff   : > { %v5149_v40 = vpop.permute.xlu0 %5148  ;;  %v10667_v51 = vld [vmem:[#allocation3 + $0x40] sm:$0xff] }
 0x400   : > { %v5151_v5 = vpop.permute.xlu1 %5150  ;;  %5225 = vst.msk [vmem:[#allocation3 + $0x50] sm:$0xf] %vm5204_vm1, %v5149_v40  ;;  %10555 = vmatmul.msk.bf16.vlgmr.msra.gmra.mxu2 %vm5373_vm3, %v10667_v51  ;;  %v10668_v30 = vld [vmem:[#allocation3 + $0x48] sm:$0xff]  ;;  %v5543_v40 = vld [vmem:[%s14469_s30 + $0xe0] sm:$0xff]  ;;  %v10666_v51 = vld [vmem:[#allocation3 + $0x38] sm:$0xff] }
 0x401   : > { %5226 = vst.msk [vmem:[#allocation3 + $0x54] sm:$0xf] %vm5204_vm1, %v5151_v5  ;;  %v5545_v5 = vld [vmem:[%s14469_s30 + $0xf0] sm:$0xff]  ;;  %5635 = vrot.lane.b32.xlu1 %v5543_v40, %s11898_s8 }
 0x402   : > { %v5171_v37 = vpop.permute.xlu2 %5170 }
 0x403   : > { %10550 = vmatmul.msk.bf16.gmra.mxu0 %vm5373_vm3, %v10662_v3  ;;  %5236 = vst.msk [vmem:[#allocation3 + $0x7c] sm:$0xf] %vm5204_vm1, %v5171_v37  ;;  %5631 = vrot.lane.b32.xlu2 %v5541_v27, %s11898_s8  ;;  %v5546_v3 = vld [vmem:[%s14469_s30 + $0xf8] sm:$0xff] }
 0x404   : > { %5639 = vrot.lane.b32.xlu0 %v5545_v5, %s11898_s8 }
 0x407   : > { %v5155_v17 = vpop.permute.xlu0 %5154 }
 0x408   : > { %v5157_v63 = vpop.permute.xlu1 %5156  ;;  %5228 = vst.msk [vmem:[#allocation3 + $0x5c] sm:$0xf] %vm5204_vm1, %v5155_v17  ;;  %v10669_v12 = vld [vmem:[#allocation3 + $0x50] sm:$0xff] }
 0x409   : > { %5229 = vst.msk [vmem:[#allocation3 + $0x60] sm:$0xf] %vm5204_vm1, %v5157_v63  ;;  %5641 = vrot.lane.b32.xlu1 %v5546_v3, %s11898_s8 }
 0x40b   : > { %5637 = vrot.lane.b32.xlu2 %v5544_v49, %s11898_s8  ;;  %s11908_s8 = smov 124  }
 0x40f   : > { %v5161_v14 = vpop.permute.xlu0 %5160  ;;  %v10670_v50 = vld [vmem:[#allocation3 + $0x58] sm:$0xff] }
 0x410   : > { %v5163_v44 = vpop.permute.xlu1 %5162  ;;  %5231 = vst.msk [vmem:[#allocation3 + $0x68] sm:$0xf] %vm5204_vm1, %v5161_v14  ;;  %10556 = vmatmul.msk.bf16.gmra.mxu2 %vm5373_vm3, %v10668_v30  ;;  %v10671_v37 = vld [vmem:[#allocation3 + $0x60] sm:$0xff] }
 0x411   : > { %5232 = vst.msk [vmem:[#allocation3 + $0x6c] sm:$0xf] %vm5204_vm1, %v5163_v44 }
 0x413   : > { %10551 = vmatmul.msk.bf16.gmra.mxu0 %vm5373_vm3, %v10663_v38 }
 0x417   : > { %v5167_v4 = vpop.permute.xlu0 %5166 }
 0x418   : > { %v5169_v13 = vpop.permute.xlu1 %5168  ;;  %5234 = vst.msk [vmem:[#allocation3 + $0x74] sm:$0xf] %vm5204_vm1, %v5167_v4  ;;  %v10672_v52 = vld [vmem:[#allocation3 + $0x68] sm:$0xff] }
 0x419   : > { %5235 = vst.msk [vmem:[#allocation3 + $0x78] sm:$0xf] %vm5204_vm1, %v5169_v13  ;;  %vm10328_vm1 = vcmask 31744  }
 0x41c   : > { %v5584_v53 = vpop.permute.xlu2 %5583 }
 0x41f   : > { %v5580_v63 = vpop.permute.xlu0 %5579 }
 0x420   : > { %10557 = vmatmul.msk.bf16.gmra.mxu2 %vm5373_vm3, %v10669_v12  ;;  %v5582_v42 = vpop.permute.xlu1 %5581  ;;  %v10673_v12 = vld [vmem:[#allocation3 + $0x70] sm:$0xff] }
 0x423   : > { %10552 = vmatmul.msk.bf16.gmra.mxu0 %vm5373_vm3, %v10664_v18 }
 0x424   : > { %v5590_v38 = vpop.permute.xlu2 %5589 }
 0x427   : > { %v5586_v47 = vpop.permute.xlu0 %5585 }
 0x42d   : > { %v5596_v25 = vpop.permute.xlu2 %5595 }
 0x430   : > { %10558 = vmatmul.msk.bf16.gmra.mxu2 %vm5373_vm3, %v10670_v50 }
 0x433   : > { %10553 = vmatmul.msk.bf16.gmra.mxu0 %vm5373_vm3, %v10665_v48 }
 0x435   : > { %v14630_v50 = vpop.permute.xlu2 %5601 }
 0x440   : > { %10559 = vmatmul.msk.bf16.gmra.mxu2 %vm5373_vm3, %v10671_v37  ;;  %v5588_v37 = vpop.permute.xlu1 %5587 }
 0x443   : > { %10554 = vmatmul.msk.bf16.gmra.mxu0 %vm5373_vm3, %v10666_v51  ;;  %v10674_v51 = vld [vmem:[#allocation3 + $0x78] sm:$0xff] }
 0x450   : > { %v5435_v10 = vpop.f32.mrf.mxu0  ;;  %10560 = vmatmul.msk.bf16.gmra.mxu2 %vm5373_vm3, %v10672_v52 }
 0x451   : > { %v14596_v17 = vadd.f32 %v14593_v43, %v5435_v10 }
 0x453   : > { %18280 = vst [vmem:[#allocation69_spill] sm:$0xff] %v14596_v17  ;;  %v14599_v44 = vadd.f32 %v5580_v63, %v14596_v17  ;;  %v14644_v63 = vpop.permute.xlu2 %5607 }
 0x455   : > { %18281 = vst [vmem:[#allocation13_spill] sm:$0xff] %v14599_v44  ;;  %v5707_v14 = vpack.c.bf16 %v14599_v44, %v14599_v44 }
 0x457   : > { %5771 = vrot.lane.b32.xlu2 %v5707_v14, %s11908_s8 }
 0x458   : > { %v5437_v30 = vpop.f32.mrf.mxu0 }
 0x459   : > { %v14606_v7 = vadd.f32 %v14593_v43, %v5437_v30  ;;  %v5592_v30 = vpop.permute.xlu0 %5591 }
 0x45b   : > { %18282 = vst [vmem:[#allocation9_spill] sm:$0xff] %v14606_v7  ;;  %v14609_v13 = vadd.f32 %v5582_v42, %v14606_v7 }
 0x45d   : > { %18283 = vst [vmem:[#allocation70_spill] sm:$0xff] %v14609_v13  ;;  %v5708_v4 = vpack.c.bf16 %v14609_v13, %v14609_v13 }
 0x45f   : > { %5773 = vrot.lane.b32.xlu0 %v5708_v4, %s11908_s8 }
 0x460   : > { %v5440_v15 = vpop.f32.mrf.mxu0  ;;  %10561 = vmatmul.msk.bf16.gmra.mxu2 %vm5373_vm3, %v10673_v12 }
 0x461   : > { %v14615_v18 = vadd.f32 %v14593_v43, %v5440_v15  ;;  %v14656_v15 = vpop.permute.xlu2 %5613 }
 0x463   : > { %18284 = vst [vmem:[#allocation71_spill] sm:$0xff] %v14615_v18  ;;  %v14618_v35 = vadd.f32 %v5584_v53, %v14615_v18 }
 0x465   : > { %18285 = vst [vmem:[#allocation72_spill] sm:$0xff] %v14618_v35  ;;  %v5709_v27 = vpack.c.bf16 %v14618_v35, %v14618_v35 }
 0x467   : > { %5775 = vrot.lane.b32.xlu1 %v5709_v27, %s11908_s8 }
 0x468   : > { %v5442_v36 = vpop.f32.mrf.mxu0 }
 0x469   : > { %v14625_v49 = vadd.f32 %v14593_v43, %v5442_v36 }
 0x46b   : > { %18286 = vst [vmem:[#allocation73_spill] sm:$0xff] %v14625_v49  ;;  %v14628_v48 = vadd.f32 %v5586_v47, %v14625_v49  ;;  %v5594_v47 = vpop.permute.xlu1 %5593 }
 0x46d   : > { %18287 = vst [vmem:[#allocation74_spill] sm:$0xff] %v14628_v48  ;;  %v5710_v5 = vpack.c.bf16 %v14628_v48, %v14628_v48 }
 0x46f   : > { %5777 = vrot.lane.b32.xlu2 %v5710_v5, %s11908_s8  ;;  %v5598_v5 = vpop.permute.xlu0 %5597 }
 0x470   : > { %v5445_v40 = vpop.f32.mrf.mxu0  ;;  %10562 = vmatmul.msk.bf16.gmra.mxu2 %vm5373_vm3, %v10674_v51 }
 0x471   : > { %v14636_v3 = vadd.f32 %v14593_v43, %v5445_v40 }
 0x473   : > { %18288 = vst [vmem:[#allocation75_spill] sm:$0xff] %v14636_v3  ;;  %v14639_v53 = vadd.f32 %v5588_v37, %v14636_v3 }
 0x475   : > { %18289 = vst [vmem:[#allocation76_spill] sm:$0xff] %v14639_v53  ;;  %v5711_v10 = vpack.c.bf16 %v14639_v53, %v14639_v53 }
 0x477   : > { %5779 = vrot.lane.b32.xlu0 %v5711_v10, %s11908_s8  ;;  %v14670_v10 = vpop.permute.xlu2 %5619 }
 0x478   : > { %v5447_v52 = vpop.f32.mrf.mxu0 }
 0x479   : > { %v14648_v14 = vadd.f32 %v14593_v43, %v5447_v52 }
 0x47b   : > { %18290 = vst [vmem:[#allocation77_spill] sm:$0xff] %v14648_v14  ;;  %v14651_v42 = vadd.f32 %v5590_v38, %v14648_v14 }
 0x47d   : > { %18291 = vst [vmem:[#allocation78_spill] sm:$0xff] %v14651_v42  ;;  %v5712_v4 = vpack.c.bf16 %v14651_v42, %v14651_v42 }
 0x47f   : > { %5781 = vrot.lane.b32.xlu1 %v5712_v4, %s11908_s8  ;;  %v14686_v42 = vpop.permute.xlu2 %5625 }
 0x480   : > { %v5450_v12 = vpop.f32.mrf.mxu0 }
 0x481   : > { %v14659_v27 = vadd.f32 %v14593_v43, %v5450_v12  ;;  %v5600_v12 = vpop.permute.xlu1 %5599 }
 0x483   : > { %18292 = vst [vmem:[#allocation79_spill] sm:$0xff] %v14659_v27  ;;  %v14662_v36 = vadd.f32 %v5592_v30, %v14659_v27  ;;  %v5475_v40 = vpop.f32.mrf.mxu2  ;;  %v5604_v27 = vpop.permute.xlu0 %5603 }
 0x485   : > { %18293 = vst [vmem:[#allocation80_spill] sm:$0xff] %v14662_v36  ;;  %v5713_v38 = vpack.c.bf16 %v14662_v36, %v14662_v36 }
 0x487   : > { %5783 = vrot.lane.b32.xlu2 %v5713_v38, %s11908_s8 }
 0x488   : > { %v5452_v51 = vpop.f32.mrf.mxu0 }
 0x489   : > { %v14668_v37 = vadd.f32 %v14593_v43, %v5452_v51  ;;  %v5606_v14 = vpop.permute.xlu1 %5605 }
 0x48b   : > { %18294 = vst [vmem:[#allocation81_spill] sm:$0xff] %v14668_v37  ;;  %v14673_v52 = vadd.f32 %v5594_v47, %v14668_v37  ;;  %v14677_v4 = vpop.f32.mrf.mxu2  ;;  %v5610_v53 = vpop.permute.xlu0 %5609 }
 0x48d   : > { %18295 = vst [vmem:[#allocation82_spill] sm:$0xff] %v14673_v52  ;;  %v5714_v30 = vpack.c.bf16 %v14673_v52, %v14673_v52 }
 0x48f   : > { %5785 = vrot.lane.b32.xlu0 %v5714_v30, %s11908_s8 }
 0x490   : > { %v5455_v36 = vpop.f32.mrf.mxu0 }
 0x491   : > { %v14681_v38 = vadd.f32 %v14593_v43, %v5455_v36  ;;  %v5612_v48 = vpop.permute.xlu1 %5611 }
 0x493   : > { %18296 = vst [vmem:[#allocation83_spill] sm:$0xff] %v14681_v38  ;;  %v14684_v51 = vadd.f32 %v5596_v25, %v14681_v38  ;;  %v14690_v37 = vpop.f32.mrf.mxu2  ;;  %v14701_v38 = vpop.permute.xlu2 %5631 }
 0x494   : > { %v14707_v49 = vpop.permute.xlu0 %5615 }
 0x495   : > { %18297 = vst [vmem:[#allocation84_spill] sm:$0xff] %v14684_v51  ;;  %v5715_v47 = vpack.c.bf16 %v14684_v51, %v14684_v51 }
 0x497   : > { %5787 = vrot.lane.b32.xlu1 %v5715_v47, %s11908_s8 }
 0x498   : > { %v5457_v52 = vpop.f32.mrf.mxu0 }
 0x499   : > { %v14694_v30 = vadd.f32 %v14593_v43, %v5457_v52 }
 0x49b   : > { %18298 = vst [vmem:[#allocation85_spill] sm:$0xff] %v14694_v30  ;;  %v14697_v36 = vadd.f32 %v5598_v5, %v14694_v30  ;;  %v5482_v3 = vpop.f32.mrf.mxu2 }
 0x49c   : > { %v14724_v13 = vpop.permute.xlu0 %5621 }
 0x49d   : > { %18299 = vst [vmem:[#allocation86_spill] sm:$0xff] %v14697_v36  ;;  %v5716_v25 = vpack.c.bf16 %v14697_v36, %v14697_v36  ;;  %v14715_v36 = vpop.permute.xlu2 %5637 }
 0x49f   : > { %5789 = vrot.lane.b32.xlu2 %v5716_v25, %s11908_s8 }
 0x4a0   : > { %v5460_v51 = vpop.f32.mrf.mxu0 }
 0x4a1   : > { %v14705_v47 = vadd.f32 %v14593_v43, %v5460_v51  ;;  %v5618_v51 = vpop.permute.xlu1 %5617 }
 0x4a3   : > { %18300 = vst [vmem:[#allocation87_spill] sm:$0xff] %v14705_v47  ;;  %v14710_v52 = vadd.f32 %v5600_v12, %v14705_v47  ;;  %v5485_v30 = vpop.f32.mrf.mxu2 }
 0x4a5   : > { %18301 = vst [vmem:[#allocation88_spill] sm:$0xff] %v14710_v52  ;;  %v5717_v5 = vpack.c.bf16 %v14710_v52, %v14710_v52 }
 0x4a7   : > { %5791 = vrot.lane.b32.xlu0 %v5717_v5, %s11908_s8 }
 0x4a8   : > { %v5462_v35 = vpop.f32.mrf.mxu0 }
 0x4a9   : > { %v14718_v25 = vadd.f32 %v14593_v43, %v5462_v35 }
 0x4ab   : > { %18302 = vst [vmem:[#allocation89_spill] sm:$0xff] %v14718_v25  ;;  %v14722_v18 = vadd.f32 %v14630_v50, %v14718_v25  ;;  %v5487_v52 = vpop.f32.mrf.mxu2  ;;  %v5624_v50 = vpop.permute.xlu1 %5623 }
 0x4ac   : > { %v14736_v25 = vpop.permute.xlu0 %5627 }
 0x4ad   : > { %18303 = vst [vmem:[#allocation90_spill] sm:$0xff] %v14722_v18  ;;  %v5718_v12 = vpack.c.bf16 %v14722_v18, %v14722_v18 }
 0x4af   : > { %5793 = vrot.lane.b32.xlu1 %v5718_v12, %s11908_s8 }
 0x4b0   : > { %v5465_v5 = vpop.f32.mrf.mxu0 }
 0x4b1   : > { %v14730_v47 = vadd.f32 %v14593_v43, %v5465_v5  ;;  %v5772_v7 = vpop.permute.xlu2 %5771 }
 0x4b2   : > { %5868 = vst.msk [vmem:[#allocation2 + $0x10] sm:$0xf] %vm5867_vm2, %v5772_v7 }
 0x4b3   : > { %18304 = vst [vmem:[#allocation91_spill] sm:$0xff] %v14730_v47  ;;  %v14734_v35 = vadd.f32 %v5604_v27, %v14730_v47  ;;  %v5490_v18 = vpop.f32.mrf.mxu2  ;;  %v5630_v7 = vpop.permute.xlu1 %5629  ;;  %v14748_v27 = vadd.f32 %v14593_v43, %v5475_v40 }
 0x4b4   : > { %v14752_v39 = vpop.permute.xlu0 %5633 }
 0x4b5   : > { %18305 = vst [vmem:[#allocation92_spill] sm:$0xff] %v14734_v35  ;;  %v5719_v44 = vpack.c.bf16 %v14734_v35, %v14734_v35  ;;  %v14756_v2 = vadd.f32 %v5612_v48, %v14748_v27  ;;  %v14776_v48 = vadd.f32 %v14593_v43, %v14677_v4 }
 0x4b6   : > { %18308 = vst [vmem:[#allocation95_spill] sm:$0xff] %v14748_v27 }
 0x4b7   : > { %5795 = vrot.lane.b32.xlu2 %v5719_v44, %s11908_s8  ;;  %18309 = vst [vmem:[#allocation96_spill] sm:$0xff] %v14756_v2  ;;  %v5723_v40 = vpack.c.bf16 %v14756_v2, %v14756_v2 }
 0x4b8   : > { %v5467_v12 = vpop.f32.mrf.mxu0  ;;  %18313 = vst [vmem:[#allocation100_spill] sm:$0xff] %v14776_v48 }
 0x4b9   : > { %v14742_v17 = vadd.f32 %v14593_v43, %v5467_v12 }
 0x4bb   : > { %18306 = vst [vmem:[#allocation93_spill] sm:$0xff] %v14742_v17  ;;  %v14745_v5 = vadd.f32 %v5606_v14, %v14742_v17  ;;  %v5492_v35 = vpop.f32.mrf.mxu2  ;;  %v14772_v17 = vpop.permute.xlu1 %5635 }
 0x4bd   : > { %18307 = vst [vmem:[#allocation94_spill] sm:$0xff] %v14745_v5  ;;  %v5720_v47 = vpack.c.bf16 %v14745_v5, %v14745_v5  ;;  %v14768_v5 = vadd.f32 %v14593_v43, %v5482_v3 }
 0x4bf   : > { %5797 = vrot.lane.b32.xlu0 %v5720_v47, %s11908_s8  ;;  %18312 = vst [vmem:[#allocation99_spill] sm:$0xff] %v14768_v5  ;;  %v14783_v3 = vadd.f32 %v5618_v51, %v14768_v5 }
 0x4c0   : > { %v5470_v44 = vpop.f32.mrf.mxu0 }
 0x4c1   : > { %v14759_v12 = vadd.f32 %v14593_v43, %v5470_v44  ;;  %18314 = vst [vmem:[#allocation101_spill] sm:$0xff] %v14783_v3  ;;  %v5726_v51 = vpack.c.bf16 %v14783_v3, %v14783_v3 }
 0x4c3   : > { %18310 = vst [vmem:[#allocation97_spill] sm:$0xff] %v14759_v12  ;;  %v14763_v14 = vadd.f32 %v14644_v63, %v14759_v12  ;;  %v5495_v44 = vpop.f32.mrf.mxu2  ;;  %v14780_v63 = vpop.permute.xlu0 %5639  ;;  %v14790_v12 = vadd.f32 %v14656_v15, %v14776_v48 }
 0x4c5   : > { %18311 = vst [vmem:[#allocation98_spill] sm:$0xff] %v14763_v14  ;;  %v5721_v47 = vpack.c.bf16 %v14763_v14, %v14763_v14  ;;  %v5724_v15 = vpack.c.bf16 %v14790_v12, %v14790_v12 }
 0x4c6   : > { %18316 = vst [vmem:[#allocation103_spill] sm:$0xff] %v14790_v12 }
 0x4c7   : > { %5803 = vrot.lane.b32.xlu0 %v5723_v40, %s11908_s8  ;;  %5799 = vrot.lane.b32.xlu1 %v5721_v47, %s11908_s8  ;;  %v14798_v40 = vadd.f32 %v14593_v43, %v14690_v37  ;;  %v14814_v37 = vpop.permute.xlu1 %5641 }
 0x4c8   : > { %v5472_v2 = vpop.f32.mrf.mxu0 }
 0x4c9   : > { %v14786_v27 = vadd.f32 %v14593_v43, %v5472_v2  ;;  %v5778_v14 = vpop.permute.xlu2 %5777  ;;  %18318 = vst [vmem:[#allocation105_spill] sm:$0xff] %v14798_v40  ;;  %v14803_v2 = vadd.f32 %v14593_v43, %v5490_v18  ;;  %v14819_v18 = vadd.f32 %v14707_v49, %v14798_v40 }
 0x4ca   : > { %5871 = vst.msk [vmem:[#allocation2 + $0x1c] sm:$0xf] %vm5867_vm2, %v5778_v14  ;;  %v14810_v14 = vadd.f32 %v14593_v43, %v5485_v30 }
 0x4cb   : > { %18315 = vst [vmem:[#allocation102_spill] sm:$0xff] %v14786_v27  ;;  %v14794_v4 = vadd.f32 %v5610_v53, %v14786_v27  ;;  %v5497_v53 = vpop.f32.mrf.mxu2  ;;  %v14822_v48 = vadd.f32 %v5624_v50, %v14803_v2 }
 0x4cc   : > { %18319 = vst [vmem:[#allocation106_spill] sm:$0xff] %v14803_v2  ;;  %v14826_v30 = vadd.f32 %v14670_v10, %v14810_v14  ;;  %v14842_v10 = vadd.f32 %v14593_v43, %v5492_v35 }
 0x4cd   : > { %18317 = vst [vmem:[#allocation104_spill] sm:$0xff] %v14794_v4  ;;  %v5722_v47 = vpack.c.bf16 %v14794_v4, %v14794_v4  ;;  %v5729_v49 = vpack.c.bf16 %v14822_v48, %v14822_v48 }
 0x4ce   : > { %18320 = vst [vmem:[#allocation107_spill] sm:$0xff] %v14810_v14  ;;  %v5727_v50 = vpack.c.bf16 %v14826_v30, %v14826_v30  ;;  %v14856_v27 = vadd.f32 %v14686_v42, %v14842_v10 }
 0x4cf   : > { %5809 = vrot.lane.b32.xlu0 %v5726_v51, %s11908_s8  ;;  %5801 = vrot.lane.b32.xlu2 %v5722_v47, %s11908_s8  ;;  %18321 = vst [vmem:[#allocation108_spill] sm:$0xff] %v14819_v18  ;;  %v5725_v51 = vpack.c.bf16 %v14819_v18, %v14819_v18  ;;  %v14832_v47 = vadd.f32 %v14593_v43, %v5487_v52 }
 0x4d0   : > { %5805 = vrot.lane.b32.xlu1 %v5724_v15, %s11908_s8  ;;  %18322 = vst [vmem:[#allocation109_spill] sm:$0xff] %v14822_v48  ;;  %v14837_v15 = vadd.f32 %v14593_v43, %v5497_v53 }
 0x4d1   : > { %v5774_v12 = vpop.permute.xlu0 %5773  ;;  %18323 = vst [vmem:[#allocation110_spill] sm:$0xff] %v14826_v30  ;;  %v14849_v52 = vadd.f32 %v14724_v13, %v14832_v47 }
 0x4d2   : > { %5869 = vst.msk [vmem:[#allocation2 + $0x14] sm:$0xf] %vm5867_vm2, %v5774_v12  ;;  %v14852_v12 = vadd.f32 %v5630_v7, %v14837_v15  ;;  %v5730_v7 = vpack.c.bf16 %v14856_v27, %v14856_v27 }
 0x4d3   : > { %18324 = vst [vmem:[#allocation111_spill] sm:$0xff] %v14832_v47  ;;  %v5500_v4 = vpop.f32.mrf.mxu2  ;;  %v5728_v35 = vpack.c.bf16 %v14849_v52, %v14849_v52 }
 0x4d4   : > { %18325 = vst [vmem:[#allocation112_spill] sm:$0xff] %v14837_v15  ;;  %v5732_v13 = vpack.c.bf16 %v14852_v12, %v14852_v12 }
 0x4d5   : > { %18326 = vst [vmem:[#allocation113_spill] sm:$0xff] %v14842_v10 }
 0x4d6   : > { %18327 = vst [vmem:[#allocation114_spill] sm:$0xff] %v14849_v52 }
 0x4d7   : > { %5815 = vrot.lane.b32.xlu0 %v5729_v49, %s11908_s8  ;;  %5807 = vrot.lane.b32.xlu2 %v5725_v51, %s11908_s8  ;;  %18328 = vst [vmem:[#allocation115_spill] sm:$0xff] %v14852_v12  ;;  %v14862_v51 = vadd.f32 %v14593_v43, %v5495_v44  ;;  %v14869_v49 = vadd.f32 %v14593_v43, %v5500_v4 }
 0x4d8   : > { %5811 = vrot.lane.b32.xlu1 %v5727_v50, %s11908_s8  ;;  %18329 = vst [vmem:[#allocation116_spill] sm:$0xff] %v14856_v27 }
 0x4d9   : > { %v5776_v53 = vpop.permute.xlu1 %5775  ;;  %18330 = vst [vmem:[#allocation117_spill] sm:$0xff] %v14862_v51  ;;  %v14876_v42 = vadd.f32 %v14736_v25, %v14862_v51 }
 0x4da   : > { %5870 = vst.msk [vmem:[#allocation2 + $0x18] sm:$0xf] %vm5867_vm2, %v5776_v53  ;;  %v14880_v53 = vadd.f32 %v14701_v38, %v14869_v49 }
 0x4db   : > { %18331 = vst [vmem:[#allocation118_spill] sm:$0xff] %v14869_v49  ;;  %v5502_v50 = vpop.f32.mrf.mxu2  ;;  %v5731_v4 = vpack.c.bf16 %v14876_v42, %v14876_v42 }
 0x4dc   : > { %18332 = vst [vmem:[#allocation119_spill] sm:$0xff] %v14876_v42 }
 0x4dd   : > { %18333 = vst [vmem:[#allocation120_spill] sm:$0xff] %v14880_v53 }
 0x4df   : > { %5821 = vrot.lane.b32.xlu0 %v5732_v13, %s11908_s8  ;;  %5813 = vrot.lane.b32.xlu2 %v5728_v35, %s11908_s8  ;;  %v14886_v13 = vadd.f32 %v14593_v43, %v5502_v50  ;;  %v5733_v35 = vpack.c.bf16 %v14880_v53, %v14880_v53 }
 0x4e0   : > { %5817 = vrot.lane.b32.xlu1 %v5730_v7, %s11908_s8 }
 0x4e1   : > { %v5784_v44 = vpop.permute.xlu2 %5783  ;;  %18334 = vst [vmem:[#allocation121_spill] sm:$0xff] %v14886_v13  ;;  %v14897_v38 = vadd.f32 %v14752_v39, %v14886_v13 }
 0x4e2   : > { %5874 = vst.msk [vmem:[#allocation2 + $0x28] sm:$0xf] %vm5867_vm2, %v5784_v44 }
 0x4e3   : > { %v5505_v7 = vpop.f32.mrf.mxu2  ;;  %18336 = vst [vmem:[#allocation123_spill] sm:$0xff] %v14897_v38 }
 0x4e4   : > { %v14891_v25 = vadd.f32 %v14593_v43, %v5505_v7  ;;  %v5734_v7 = vpack.c.bf16 %v14897_v38, %v14897_v38 }
 0x4e6   : > { %18335 = vst [vmem:[#allocation122_spill] sm:$0xff] %v14891_v25  ;;  %v14901_v44 = vadd.f32 %v14772_v17, %v14891_v25 }
 0x4e7   : > { %5819 = vrot.lane.b32.xlu2 %v5731_v4, %s11908_s8 }
 0x4e8   : > { %5823 = vrot.lane.b32.xlu1 %v5733_v35, %s11908_s8  ;;  %18337 = vst [vmem:[#allocation124_spill] sm:$0xff] %v14901_v44  ;;  %v5735_v53 = vpack.c.bf16 %v14901_v44, %v14901_v44 }
 0x4e9   : > { %v5780_v50 = vpop.permute.xlu0 %5779 }
 0x4ea   : > { %5872 = vst.msk [vmem:[#allocation2 + $0x20] sm:$0xf] %vm5867_vm2, %v5780_v50  ;;  %5827 = vrot.lane.b32.xlu0 %v5735_v53, %s11908_s8 }
 0x4eb   : > { %v5507_v4 = vpop.f32.mrf.mxu2 }
 0x4ec   : > { %v14910_v35 = vadd.f32 %v14593_v43, %v5507_v4 }
 0x4ee   : > { %18338 = vst [vmem:[#allocation125_spill] sm:$0xff] %v14910_v35  ;;  %v14915_v39 = vadd.f32 %v14715_v36, %v14910_v35  ;;  %v6388_v36 = vld [vmem:[#allocation2 + $0x8] sm:$0xf] }
 0x4ef   : > { %5825 = vrot.lane.b32.xlu2 %v5734_v7, %s11908_s8 }
 0x4f0   : > { %18339 = vst [vmem:[#allocation126_spill] sm:$0xff] %v14915_v39  ;;  %v5736_v50 = vpack.c.bf16 %v14915_v39, %v14915_v39 }
 0x4f1   : > { %v5782_v17 = vpop.permute.xlu1 %5781 }
 0x4f2   : > { %5873 = vst.msk [vmem:[#allocation2 + $0x24] sm:$0xf] %vm5867_vm2, %v5782_v17  ;;  %5829 = vrot.lane.b32.xlu1 %v5736_v50, %s11908_s8 }
 0x4f3   : > { %v5510_v44 = vpop.f32.mrf.mxu2 }
 0x4f4   : > { %v14922_v53 = vadd.f32 %v14593_v43, %v5510_v44 }
 0x4f6   : > { %18340 = vst [vmem:[#allocation127_spill] sm:$0xff] %v14922_v53  ;;  %v14926_v4 = vadd.f32 %v14780_v63, %v14922_v53 }
 0x4f8   : > { %18341 = vst [vmem:[#allocation128_spill] sm:$0xff] %v14926_v4  ;;  %v5737_v17 = vpack.c.bf16 %v14926_v4, %v14926_v4 }
 0x4f9   : > { %v5790_v7 = vpop.permute.xlu2 %5789  ;;  %v11578_v48 = vld [vmem:[#allocation2 + $0x20] sm:$0xff]  }
 0x4fa   : > { %5877 = vst.msk [vmem:[#allocation2 + $0x34] sm:$0xf] %vm5867_vm2, %v5790_v7  ;;  %5831 = vrot.lane.b32.xlu2 %v5737_v17, %s11908_s8  ;;  %6452 = vrot.lane.b32.xlu1 %v6388_v36, %s11909_s11  ;;  %v6389_v7 = vld [vmem:[#allocation2 + $0xc] sm:$0xf]  ;;  %v6391_v36 = vld [vmem:[#allocation2 + $0x14] sm:$0xf] }
 0x4fb   : > { %v5512_v50 = vpop.f32.mrf.mxu2  ;;  %v6390_v17 = vld [vmem:[#allocation2 + $0x10] sm:$0xf] }
 0x4fc   : > { %v14934_v44 = vadd.f32 %v14593_v43, %v5512_v50  ;;  %v6394_v50 = vld [vmem:[#allocation2 + $0x20] sm:$0xf] }
 0x4fe   : > { %18342 = vst [vmem:[#allocation129_spill] sm:$0xff] %v14934_v44  ;;  %v14938_v63 = vadd.f32 %v14814_v37, %v14934_v44  ;;  %v6392_v37 = vld [vmem:[#allocation2 + $0x18] sm:$0xf] }
 0x500   : > { %18343 = vst [vmem:[#allocation130_spill] sm:$0xff] %v14938_v63  ;;  %v5738_v4 = vpack.c.bf16 %v14938_v63, %v14938_v63 }
 0x501   : > { %v5786_v53 = vpop.permute.xlu0 %5785 }
 0x502   : > { %5875 = vst.msk [vmem:[#allocation2 + $0x2c] sm:$0xf] %vm5867_vm2, %v5786_v53  ;;  %5833 = vrot.lane.b32.xlu0 %v5738_v4, %s11908_s8  ;;  %6454 = vrot.lane.b32.xlu2 %v6389_v7, %s11909_s11  ;;  %v6393_v4 = vld [vmem:[#allocation2 + $0x1c] sm:$0xf]  ;;  %v6395_v7 = vld [vmem:[#allocation2 + $0x24] sm:$0xf] }
 0x503   : > { %6458 = vrot.lane.b32.xlu1 %v6391_v36, %s11909_s11 }
 0x509   : > { %v5788_v43 = vpop.permute.xlu1 %5787  ;;  %v6397_v36 = vld [vmem:[#allocation2 + $0x2c] sm:$0xf] }
 0x50a   : > { %5876 = vst.msk [vmem:[#allocation2 + $0x30] sm:$0xf] %vm5867_vm2, %v5788_v43  ;;  %6456 = vrot.lane.b32.xlu0 %v6390_v17, %s11909_s11  ;;  %6460 = vrot.lane.b32.xlu2 %v6392_v37, %s11909_s11  ;;  %v6396_v17 = vld [vmem:[#allocation2 + $0x28] sm:$0xf] }
 0x50b   : > { %6464 = vrot.lane.b32.xlu1 %v6394_v50, %s11909_s11 }
 0x511   : > { %v5796_v53 = vpop.permute.xlu2 %5795  ;;  %v6398_v63 = vld [vmem:[#allocation2 + $0x30] sm:$0xf] }
 0x512   : > { %5880 = vst.msk [vmem:[#allocation2 + $0x40] sm:$0xf] %vm5867_vm2, %v5796_v53  ;;  %6462 = vrot.lane.b32.xlu0 %v6393_v4, %s11909_s11  ;;  %6466 = vrot.lane.b32.xlu2 %v6395_v7, %s11909_s11  ;;  %v6399_v53 = vld [vmem:[#allocation2 + $0x34] sm:$0xf] }
 0x513   : > { %6470 = vrot.lane.b32.xlu1 %v6397_v36, %s11909_s11 }
 0x519   : > { %v5792_v43 = vpop.permute.xlu0 %5791  ;;  %v6402_v36 = vld [vmem:[#allocation2 + $0x40] sm:$0xf] }
 0x51a   : > { %5878 = vst.msk [vmem:[#allocation2 + $0x38] sm:$0xf] %vm5867_vm2, %v5792_v43  ;;  %6468 = vrot.lane.b32.xlu0 %v6396_v17, %s11909_s11  ;;  %6472 = vrot.lane.b32.xlu2 %v6398_v63, %s11909_s11  ;;  %v11575_v43 = vld [vmem:[#allocation2 + $0x8] sm:$0xff]  }
 0x521   : > { %v5794_v37 = vpop.permute.xlu1 %5793  ;;  %v6400_v50 = vld [vmem:[#allocation2 + $0x38] sm:$0xf] }
 0x522   : > { %5879 = vst.msk [vmem:[#allocation2 + $0x3c] sm:$0xf] %vm5867_vm2, %v5794_v37  ;;  %6476 = vrot.lane.b32.xlu1 %v6400_v50, %s11909_s11  ;;  %6474 = vrot.lane.b32.xlu0 %v6399_v53, %s11909_s11  ;;  %v11145_v37 = vunpack.c.l.bf16 %v11575_v43  ;;  %v7166_v50 = vld [vmem:[#allocation2 + $0xc] sm:$0x8]  ;;  %v11146_v53 = vunpack.c.h.bf16 %v11575_v43 }
 0x523   : > { %v7199_v39 = vunpack.c.l.bf16 %v7166_v50 }
 0x529   : > { %v5802_v4 = vpop.permute.xlu2 %5801  ;;  %v6401_v7 = vld [vmem:[#allocation2 + $0x3c] sm:$0xf] }
 0x52a   : > { %5883 = vst.msk [vmem:[#allocation2 + $0x4c] sm:$0xf] %vm5867_vm2, %v5802_v4  ;;  %6478 = vrot.lane.b32.xlu2 %v6401_v7, %s11909_s11  ;;  %6480 = vrot.lane.b32.xlu0 %v6402_v36, %s11909_s11  ;;  %v6647_v4 = vmul.f32 %v11145_v37, %v18249_v29 }
 0x52c   : > { %v6680_v38 = vpack.c.bf16 %v6647_v4, %v6647_v4 }
 0x52e   : > { %v6714_v50 = vshrl.u32 %v6680_v38, 16  ;;  %v6717_v13 = vshll.u32 %v6680_v38, 16 }
 0x531   : > { %v5798_v63 = vpop.permute.xlu0 %5797  ;;  %v5808_v17 = vpop.permute.xlu2 %5807  ;;  %v6405_v44 = vld [vmem:[#allocation2 + $0x4c] sm:$0xf] }
 0x532   : > { %5881 = vst.msk [vmem:[#allocation2 + $0x44] sm:$0xf] %vm5867_vm2, %v5798_v63  ;;  %6486 = vrot.lane.b32.xlu0 %v6405_v44, %s11909_s11  ;;  %v6648_v63 = vmul.f32 %v11146_v53, %v18250_v26 }
 0x533   : > { %5886 = vst.msk [vmem:[#allocation2 + $0x58] sm:$0xf] %vm5867_vm2, %v5808_v17  ;;  %v7232_v17 = vmul.f32 %v7199_v39, %v12182_v11 }
 0x534   : > { %v6681_v43 = vpack.c.bf16 %v6648_v63, %v6648_v63  ;;  %v6719_v63 = vrot.slane %v6717_v13, 5 }
 0x535   : > { %v7265_v37 = vpack.c.bf16 %v7232_v17, %v7232_v17  ;;  %v14981_v17 = vld [vmem:[#allocation2 + $0x10] sm:$0xff]  }
 0x536   : > { %v6723_v39 = vshll.u32 %v6681_v43, 16 }
 0x537   : > { %v14976_v53 = vshrl.u32 %v7265_v37, 16 }
 0x538   : > { %v14988_v37 = vrot.slane %v6723_v39, 5 }
 0x539   : > { %v5804_v7 = vpop.permute.xlu0 %5803  ;;  %v5814_v35 = vpop.permute.xlu2 %5813  ;;  %v6403_v25 = vld [vmem:[#allocation2 + $0x44] sm:$0xf] }
 0x53a   : > { %5884 = vst.msk [vmem:[#allocation2 + $0x50] sm:$0xf] %vm5867_vm2, %v5804_v7  ;;  %v5800_v36 = vpop.permute.xlu1 %5799  ;;  %6482 = vrot.lane.b32.xlu1 %v6403_v25, %s11909_s11  ;;  %v6408_v44 = vld [vmem:[#allocation2 + $0x58] sm:$0xf] }
 0x53b   : > { %5889 = vst.msk [vmem:[#allocation2 + $0x64] sm:$0xf] %vm5867_vm2, %v5814_v35  ;;  %6492 = vrot.lane.b32.xlu0 %v6408_v44, %s11909_s11  ;;  %v6727_v35 = vshrl.u32 %v6681_v43, 16  ;;  %v14983_v44 = vld [vmem:[#allocation2 + $0x18] sm:$0xff]  }
 0x53c   : > { %5882 = vst.msk [vmem:[#allocation2 + $0x48] sm:$0xf] %vm5867_vm2, %v5800_v36  ;;  %v6716_v36 = vrot.slane %v6714_v50, 4  ;;  %v11153_v43 = vunpack.c.l.bf16 %v14983_v44 }
 0x53e   : > { %v6651_v50 = vmul.f32 %v11153_v43, %v18253_v54 }
 0x540   : > { %v14995_v10 = vpack.c.bf16 %v6651_v50, %v6651_v50 }
 0x541   : > { %v5810_v7 = vpop.permute.xlu0 %5809  ;;  %v5820_v49 = vpop.permute.xlu2 %5819  ;;  %v6406_v12 = vld [vmem:[#allocation2 + $0x50] sm:$0xf] }
 0x542   : > { %5887 = vst.msk [vmem:[#allocation2 + $0x5c] sm:$0xf] %vm5867_vm2, %v5810_v7  ;;  %v5806_v25 = vpop.permute.xlu1 %5805  ;;  %6488 = vrot.lane.b32.xlu1 %v6406_v12, %s11909_s11  ;;  %v6411_v38 = vld [vmem:[#allocation2 + $0x64] sm:$0xf]  ;;  %v11150_v12 = vunpack.c.h.bf16 %v14981_v17 }
 0x543   : > { %5892 = vst.msk [vmem:[#allocation2 + $0x70] sm:$0xf] %vm5867_vm2, %v5820_v49  ;;  %v6404_v4 = vld [vmem:[#allocation2 + $0x48] sm:$0xf]  ;;  %6498 = vrot.lane.b32.xlu0 %v6411_v38, %s11909_s11  ;;  %v6729_v49 = vrot.slane %v6727_v35, 4 }
 0x544   : > { %5885 = vst.msk [vmem:[#allocation2 + $0x54] sm:$0xf] %vm5867_vm2, %v5806_v25  ;;  %6484 = vrot.lane.b32.xlu2 %v6404_v4, %s11909_s11  ;;  %v6650_v13 = vmul.f32 %v11150_v12, %v18252_v34  ;;  %v5970_v7 = vmul.f32 %v11150_v12, %v12232_v61  ;;  %v5971_v25 = vmul.f32 %v11153_v43, %v12158_v41  ;;  %v11157_v43 = vunpack.c.l.bf16 %v11578_v48 }
 0x545   : > { %v6720_v4 = vor.u32 %v6719_v63, %v6716_v36  ;;  %v11158_v36 = vunpack.c.h.bf16 %v11578_v48  ;;  %v6730_v63 = vor.u32 %v6729_v49, %v14988_v37 }
 0x546   : > { %v6683_v27 = vpack.c.bf16 %v6650_v13, %v6650_v13  ;;  %v14997_v39 = vpack.c.bf16 %v5970_v7, %v5970_v7  ;;  %v6004_v35 = vpack.c.bf16 %v5971_v25, %v5971_v25 }
 0x547   : > { %v15005_v7 = vrot.slane %v6720_v4, 4  ;;  %v15018_v4 = vrot.slane %v6730_v63, 4 }
 0x548   : > { %v6743_v13 = vshll.u32 %v6683_v27, 16  ;;  %v6747_v50 = vshrl.u32 %v6683_v27, 16  ;;  %v6074_v25 = vshrl.u32 %v6004_v35, 16  ;;  %v6654_v27 = vmul.f32 %v11158_v36, %v18256_v45 }
 0x549   : > { %v5816_v42 = vpop.permute.xlu0 %5815  ;;  %v5826_v38 = vpop.permute.xlu2 %5825  ;;  %v6409_v51 = vld [vmem:[#allocation2 + $0x5c] sm:$0xf] }
 0x54a   : > { %5890 = vst.msk [vmem:[#allocation2 + $0x68] sm:$0xf] %vm5867_vm2, %v5816_v42  ;;  %v5812_v2 = vpop.permute.xlu1 %5811  ;;  %6494 = vrot.lane.b32.xlu1 %v6409_v51, %s11909_s11  ;;  %v6414_v12 = vld [vmem:[#allocation2 + $0x70] sm:$0xf]  ;;  %v6753_v42 = vshll.u32 %v14995_v10, 16  ;;  %v6065_v51 = vshrl.u32 %v14997_v39, 16  ;;  %v15021_v14 = vpack.c.bf16 %v6654_v27, %v6654_v27 }
 0x54b   : > { %5895 = vst.msk [vmem:[#allocation2 + $0x7c] sm:$0xf] %vm5867_vm2, %v5826_v38  ;;  %v6407_v15 = vld [vmem:[#allocation2 + $0x54] sm:$0xf]  ;;  %6504 = vrot.lane.b32.xlu0 %v6414_v12, %s11909_s11  ;;  %v15010_v48 = vrot.slane %v6743_v13, 5  ;;  %v6749_v49 = vrot.slane %v6747_v50, 4  ;;  %v6653_v38 = vmul.f32 %v11157_v43, %v18255_v46  ;;  %v5973_v12 = vmul.f32 %v11157_v43, %v12279_v57 }
 0x54c   : > { %5888 = vst.msk [vmem:[#allocation2 + $0x60] sm:$0xf] %vm5867_vm2, %v5812_v2  ;;  %6490 = vrot.lane.b32.xlu2 %v6407_v15, %s11909_s11  ;;  %v15014_v52 = vrot.slane %v6065_v51, 7  ;;  %v15016_v2 = vrot.slane %v6074_v25, 7  ;;  %v6077_v15 = vshll.u32 %v6004_v35, 16  ;;  %v15024_v13 = vrot.slane %v6753_v42, 5 }
 0x54d   : > { %v6750_v47 = vor.u32 %v6749_v49, %v15010_v48  ;;  %v6686_v30 = vpack.c.bf16 %v6653_v38, %v6653_v38  ;;  %v5974_v51 = vmul.f32 %v11158_v36, %v12365_v9  ;;  %v6783_v49 = vshll.u32 %v15021_v14, 16 }
 0x54e   : > { %v6072_v50 = vrot.slane %v15014_v52, 4  ;;  %v6079_v3 = vor.u32 %v6077_v15, %v15016_v2  ;;  %v15036_v42 = vpack.c.bf16 %v5973_v12, %v5973_v12  ;;  %v11149_v36 = vunpack.c.l.bf16 %v14981_v17  ;;  %v15039_v15 = vld [vmem:[#allocation2 + $0x28] sm:$0xff]  }
 0x54f   : > { %v15029_v35 = vrot.slane %v6750_v47, 4  ;;  %v6773_v63 = vshll.u32 %v6686_v30, 16  ;;  %v6777_v18 = vshrl.u32 %v6686_v30, 16  ;;  %v6007_v27 = vpack.c.bf16 %v5974_v51, %v5974_v51  ;;  %v15041_v47 = vld [vmem:[#allocation2 + $0x30] sm:$0xff]  }
 0x550   : > { %v6080_v43 = vsel %vm12283_vm4, %v6072_v50, %v6079_v3  ;;  %v6726_v17 = vsel %vm13013_vm9, %v15005_v7, %v14988_v37  ;;  %v6092_v50 = vshrl.u32 %v15036_v42, 16  ;;  %v15063_v7 = vrot.slane %v6783_v49, 5 }
 0x551   : > { %v5822_v25 = vpop.permute.xlu0 %5821  ;;  %v6412_v5 = vld [vmem:[#allocation2 + $0x68] sm:$0xf]  ;;  %v15044_v40 = vrot.slane %v6773_v63, 5  ;;  %6360 = vst.msk [vmem:[#allocation3 + $0x10] sm:$0xf] %vm5867_vm2, %v6080_v43  ;;  %v6649_v63 = vmul.f32 %v11149_v36, %v18251_v28  ;;  %v6104_v43 = vshll.u32 %v6007_v27, 16  ;;  %v5969_v26 = vmul.f32 %v11149_v36, %v12227_v60 }
 0x552   : > { %5893 = vst.msk [vmem:[#allocation2 + $0x74] sm:$0xf] %vm5867_vm2, %v5822_v25  ;;  %v5818_v38 = vpop.permute.xlu1 %5817  ;;  %6500 = vrot.lane.b32.xlu1 %v6412_v5, %s11909_s11  ;;  %v6779_v25 = vrot.slane %v6777_v18, 4  ;;  %v11162_v5 = vunpack.c.h.bf16 %v15039_v15  ;;  %v6417_v3 = vld [vmem:[#allocation2 + $0x7c] sm:$0xf]  ;;  %v6101_v18 = vshrl.u32 %v6007_v27, 16 }
 0x553   : > { %5891 = vst.msk [vmem:[#allocation2 + $0x6c] sm:$0xf] %vm5867_vm2, %v5818_v38  ;;  %v6410_v30 = vld [vmem:[#allocation2 + $0x60] sm:$0xf]  ;;  %6510 = vrot.lane.b32.xlu0 %v6417_v3, %s11909_s11  ;;  %v11165_v38 = vunpack.c.l.bf16 %v15041_v47  ;;  %v6682_v54 = vpack.c.bf16 %v6649_v63, %v6649_v63  ;;  %v6002_v36 = vpack.c.bf16 %v5969_v26, %v5969_v26 }
 0x554   : > { %6496 = vrot.lane.b32.xlu2 %v6410_v30, %s11909_s11  ;;  %v6780_v51 = vor.u32 %v6779_v25, %v15044_v40  ;;  %v6656_v37 = vmul.f32 %v11162_v5, %v18258_v19  ;;  %v15065_v30 = vrot.slane %v6092_v50, 7  ;;  %v15067_v12 = vrot.slane %v6101_v18, 7  ;;  %v5832_v11 = vpop.permute.xlu2 %5831 }
 0x555   : > { %v6657_v3 = vmul.f32 %v11165_v38, %v18259_v32  ;;  %5898 = vst.msk [vmem:[#allocation2 + $0x88] sm:$0xf] %vm5867_vm2, %v5832_v11  ;;  %v5976_v50 = vmul.f32 %v11162_v5, %v12330_v24  ;;  %v5977_v18 = vmul.f32 %v11165_v38, %v12381_v20  ;;  %v6056_v29 = vshrl.u32 %v6002_v36, 16 }
 0x556   : > { %v15069_v45 = vrot.slane %v6780_v51, 4  ;;  %v6689_v25 = vpack.c.bf16 %v6656_v37, %v6656_v37  ;;  %v6099_v46 = vrot.slane %v15065_v30, 4  ;;  %v6106_v49 = vor.u32 %v6104_v43, %v15067_v12 }
 0x557   : > { %v6733_v51 = vshll.u32 %v6682_v54, 16  ;;  %v15081_v63 = vpack.c.bf16 %v6657_v3, %v6657_v3  ;;  %v15086_v28 = vpack.c.bf16 %v5976_v50, %v5976_v50  ;;  %v6010_v38 = vpack.c.bf16 %v5977_v18, %v5977_v18 }
 0x558   : > { %v6803_v37 = vshll.u32 %v6689_v25, 16  ;;  %v6107_v43 = vsel %vm12283_vm4, %v6099_v46, %v6106_v49  ;;  %v6807_v5 = vshrl.u32 %v6689_v25, 16  ;;  %v6737_v26 = vshrl.u32 %v6682_v54, 16 }
 0x559   : > { %v6415_v19 = vld [vmem:[#allocation2 + $0x74] sm:$0xf]  ;;  %v15089_v34 = vrot.slane %v6733_v51, 5  ;;  %v6813_v3 = vshll.u32 %v15081_v63, 16  ;;  %6363 = vst.msk [vmem:[#allocation3 + $0x1c] sm:$0xf] %vm5867_vm2, %v6107_v43  ;;  %v11154_v43 = vunpack.c.h.bf16 %v14983_v44 }
 0x55a   : > { %v5824_v11 = vpop.permute.xlu1 %5823  ;;  %6506 = vrot.lane.b32.xlu1 %v6415_v19, %s11909_s11  ;;  %v6413_v32 = vld [vmem:[#allocation2 + $0x6c] sm:$0xf]  ;;  %v15091_v27 = vrot.slane %v6803_v37, 5  ;;  %v6809_v19 = vrot.slane %v6807_v5, 4  ;;  %v6119_v46 = vshrl.u32 %v15086_v28, 16  ;;  %v6128_v25 = vshrl.u32 %v6010_v38, 16 }
 0x55b   : > { %5894 = vst.msk [vmem:[#allocation2 + $0x78] sm:$0xf] %vm5867_vm2, %v5824_v11  ;;  %v6131_v49 = vshll.u32 %v6010_v38, 16  ;;  %7037 = vrot.lane.b32.xlu0 %v6726_v17, %s11910_s12  ;;  %v15103_v18 = vrot.slane %v6813_v3, 5  ;;  %v15112_v5 = vld [vmem:[#allocation2 + $0x38] sm:$0xff]   ;;  %v6757_v3 = vshrl.u32 %v14995_v10, 16  ;;  %v6652_v44 = vmul.f32 %v11154_v43, %v18254_v23 }
 0x55c   : > { %6502 = vrot.lane.b32.xlu2 %v6413_v32, %s11909_s11  ;;  %v6068_v32 = vshll.u32 %v14997_v39, 16  ;;  %v6810_v51 = vor.u32 %v6809_v19, %v15091_v27  ;;  %v15107_v37 = vrot.slane %v6119_v46, 7  ;;  %v15109_v11 = vrot.slane %v6128_v25, 7  ;;  %v5828_v17 = vpop.permute.xlu0 %5827  ;;  %v6455_v38 = vpop.permute.xlu2 %6454 }
 0x55d   : > { %5896 = vst.msk [vmem:[#allocation2 + $0x80] sm:$0xf] %vm5867_vm2, %v5828_v17  ;;  %v6058_v25 = vrot.slane %v6056_v29, 7  ;;  %v6759_v20 = vrot.slane %v6757_v3, 4  ;;  %v6739_v24 = vrot.slane %v6737_v26, 4  ;;  %v6059_v23 = vshll.u32 %v6002_v36, 16 }
 0x55e   : > { %v6070_v50 = vor.u32 %v6068_v32, %v15014_v52  ;;  %v15117_v39 = vrot.slane %v6810_v51, 4  ;;  %v6126_v19 = vrot.slane %v15107_v37, 4  ;;  %v6133_v46 = vor.u32 %v6131_v49, %v15109_v11  ;;  %6550 = vst.msk [vmem:[#allocation3 + $0x4] sm:$0xf] %vm6548_vm5, %v6455_v38 }
 0x55f   : > { %v11169_v52 = vunpack.c.l.bf16 %v15112_v5  ;;  %v6685_v51 = vpack.c.bf16 %v6652_v44, %v6652_v44  ;;  %v11170_v49 = vunpack.c.h.bf16 %v15112_v5  ;;  %v6063_v17 = vrot.slane %v6058_v25, 4 }
 0x560   : > { %v6134_v10 = vsel %vm12283_vm4, %v6126_v19, %v6133_v46  ;;  %v6760_v29 = vor.u32 %v6759_v20, %v15024_v13  ;;  %v6740_v38 = vor.u32 %v6739_v24, %v15089_v34  ;;  %v5972_v19 = vmul.f32 %v11154_v43, %v12274_v55 }
 0x561   : > { %6366 = vst.msk [vmem:[#allocation3 + $0x28] sm:$0xf] %vm5867_vm2, %v6134_v10  ;;  %v6659_v3 = vmul.f32 %v11169_v52, %v18261_v59  ;;  %v6763_v26 = vshll.u32 %v6685_v51, 16  ;;  %v6660_v54 = vmul.f32 %v11170_v49, %v18262_v0  ;;  %v18344_v5 = vsel %vm13013_vm9, %v15029_v35, %v15024_v13 }
 0x562   : > { %v6416_v32 = vld [vmem:[#allocation2 + $0x78] sm:$0xf]  ;;  %v6071_v24 = vsel %vm12283_vm4, %v6063_v17, %v6070_v50  ;;  %v15146_v20 = vrot.slane %v6760_v29, 4  ;;  %v15148_v46 = vrot.slane %v6740_v38, 4  ;;  %v15155_v10 = vpack.c.bf16 %v5972_v19, %v5972_v19 }
 0x563   : > { %7043 = vrot.lane.b32.xlu0 %v18344_v5, %s11910_s12  ;;  %v6692_v44 = vpack.c.bf16 %v6659_v3, %v6659_v3  ;;  %6359 = vst.msk [vmem:[#allocation3 + $0xc] sm:$0xf] %vm5867_vm2, %v6071_v24  ;;  %v15151_v36 = vrot.slane %v6763_v26, 5  ;;  %v15153_v43 = vpack.c.bf16 %v6660_v54, %v6660_v54  ;;  %v6095_v38 = vshll.u32 %v15036_v42, 16  ;;  %v18345_v54 = vld [vmem:[#allocation10_spill] sm:$0xff] }
 0x564   : > { %6508 = vrot.lane.b32.xlu2 %v6416_v32, %s11909_s11  ;;  %v6061_v32 = vor.u32 %v6059_v23, %v6058_v25  ;;  %v6461_v0 = vpop.permute.xlu2 %6460  ;;  %v5830_v13 = vpop.permute.xlu1 %5829  ;;  %v6418_v35 = vld [vmem:[#allocation2 + $0x80] sm:$0xf]  ;;  %v18346_v3 = vrot.slane %v18345_v54, 4  ;;  %v6083_v19 = vshrl.u32 %v15155_v10, 16  ;;  %v11161_v24 = vunpack.c.l.bf16 %v15039_v15 }
 0x565   : > { %v6833_v17 = vshll.u32 %v6692_v44, 16  ;;  %v6837_v29 = vshrl.u32 %v6692_v44, 16  ;;  %6553 = vst.msk [vmem:[#allocation3 + $0x10] sm:$0xf] %vm6548_vm5, %v6461_v0  ;;  %6512 = vrot.lane.b32.xlu1 %v6418_v35, %s11909_s11  ;;  %v6843_v25 = vshll.u32 %v15153_v43, 16  ;;  %v6097_v5 = vor.u32 %v6095_v38, %v15065_v30  ;;  %v15179_v44 = vld [vmem:[#allocation2 + $0x40] sm:$0xff]  }
 0x566   : > { %v6062_v26 = vsel %vm12283_vm4, %v18346_v3, %v6061_v32  ;;  %5897 = vst.msk [vmem:[#allocation2 + $0x84] sm:$0xf] %vm5867_vm2, %v5830_v13  ;;  %v6085_v54 = vrot.slane %v6083_v19, 7  ;;  %v6787_v32 = vshrl.u32 %v15021_v14, 16  ;;  %v6767_v3 = vshrl.u32 %v6685_v51, 16 }
 0x567   : > { %v15175_v42 = vrot.slane %v6833_v17, 5  ;;  %v6839_v0 = vrot.slane %v6837_v29, 4  ;;  %v15181_v35 = vrot.slane %v6843_v25, 5  ;;  %6358 = vst.msk [vmem:[#allocation3 + $0x8] sm:$0xf] %vm5867_vm2, %v6062_v26  ;;  %v6655_v13 = vmul.f32 %v11161_v24, %v18257_v8  ;;  %v15189_v29 = vld [vmem:[#allocation2 + $0x48] sm:$0xff]  }
 0x568   : > { %v5979_v17 = vmul.f32 %v11169_v52, %v18125_v21  ;;  %v5980_v30 = vmul.f32 %v11170_v49, %v18127_v22  ;;  %v6090_v15 = vrot.slane %v6085_v54, 4  ;;  %v6789_v38 = vrot.slane %v6787_v32, 4 }
 0x569   : > { %v6840_v50 = vor.u32 %v6839_v0, %v15175_v42  ;;  %v6769_v25 = vrot.slane %v6767_v3, 4  ;;  %v18347_v14 = vsel %vm13013_vm9, %v15069_v45, %v15063_v7  ;;  %v15200_v26 = vpack.c.bf16 %v6655_v13, %v6655_v13 }
 0x56a   : > { %v15202_v52 = vpack.c.bf16 %v5979_v17, %v5979_v17  ;;  %v6013_v49 = vpack.c.bf16 %v5980_v30, %v5980_v30  ;;  %v6098_v19 = vsel %vm12283_vm4, %v6090_v15, %v6097_v5  ;;  %v6790_v0 = vor.u32 %v6789_v38, %v15063_v7  ;;  %v18349_v38 = vld [vmem:[#allocation52_spill] sm:$0xff] }
 0x56b   : > { %7049 = vrot.lane.b32.xlu0 %v18347_v14, %s11910_s12  ;;  %v15198_v51 = vrot.slane %v6840_v50, 4  ;;  %v6770_v32 = vor.u32 %v6769_v25, %v15151_v36  ;;  %v17947_v3 = vunpack.c.l.bf16 %v15189_v29  ;;  %6362 = vst.msk [vmem:[#allocation3 + $0x18] sm:$0xf] %vm5867_vm2, %v6098_v19  ;;  %v6793_v50 = vshll.u32 %v15200_v26, 16  ;;  %v18351_v19 = vld [vmem:[#allocation50_spill] sm:$0xff] }
 0x56c   : > { %v6467_v23 = vpop.permute.xlu2 %6466  ;;  %v6453_v8 = vpop.permute.xlu1 %6452  ;;  %v6146_v13 = vshrl.u32 %v15202_v52, 16  ;;  %v6155_v5 = vshrl.u32 %v6013_v49, 16  ;;  %v18348_v7 = vsel %vm13013_vm9, %v15018_v4, %v15089_v34  ;;  %v15223_v30 = vrot.slane %v6790_v0, 4 }
 0x56d   : > { %6556 = vst.msk [vmem:[#allocation3 + $0x1c] sm:$0xf] %vm6548_vm5, %v6467_v23  ;;  %7039 = vrot.lane.b32.xlu1 %v18348_v7, %s11910_s12  ;;  %v6419_v17 = vld [vmem:[#allocation2 + $0x84] sm:$0xf]  ;;  %v15225_v15 = vrot.slane %v6770_v32, 4  ;;  %v18350_v25 = vunpack.c.h.bf16 %v15179_v44  ;;  %v6663_v23 = vmul.f32 %v17947_v3, %v18351_v19  ;;  %v15235_v45 = vrot.slane %v6793_v50, 5 }
 0x56e   : > { %6549 = vst.msk [vmem:[#allocation3] sm:$0xf] %vm6548_vm5, %v6453_v8  ;;  %6514 = vrot.lane.b32.xlu2 %v6419_v17, %s11909_s11  ;;  %v15237_v34 = vrot.slane %v6146_v13, 7  ;;  %v15239_v4 = vrot.slane %v6155_v5, 7  ;;  %v6158_v0 = vshll.u32 %v6013_v49, 16  ;;  %v6081_v3 = vrot.slane %v15016_v2, 4 }
 0x56f   : > { %v6662_v14 = vmul.f32 %v18350_v25, %v18349_v38  ;;  %v15245_v25 = vpack.c.bf16 %v6663_v23, %v6663_v23  ;;  %v6086_v49 = vshll.u32 %v15155_v10, 16  ;;  %v18353_v2 = vsel %vm13013_vm9, %v15117_v39, %v15103_v18 }
 0x570   : > { %v6153_v50 = vrot.slane %v15237_v34, 4  ;;  %v6160_v13 = vor.u32 %v6158_v0, %v15239_v4  ;;  %v6122_v0 = vshll.u32 %v15086_v28, 16  ;;  %v11166_v10 = vunpack.c.h.bf16 %v15041_v47  ;;  %v18354_v28 = vld [vmem:[#allocation48_spill] sm:$0xff] }
 0x571   : > { %v6695_v7 = vpack.c.bf16 %v6662_v14, %v6662_v14  ;;  %v6873_v32 = vshll.u32 %v15245_v25, 16  ;;  %v18352_v14 = vld [vmem:[#allocation11_spill] sm:$0xff]  ;;  %v6088_v19 = vor.u32 %v6086_v49, %v6085_v54  ;;  %v6817_v49 = vshrl.u32 %v15081_v63, 16 }
 0x572   : > { %v5975_v23 = vmul.f32 %v11161_v24, %v18352_v14  ;;  %v6161_v8 = vsel %vm12283_vm4, %v6153_v50, %v6160_v13  ;;  %v6124_v54 = vor.u32 %v6122_v0, %v15107_v37  ;;  %v6658_v13 = vmul.f32 %v11166_v10, %v18354_v28 }
 0x573   : > { %v6863_v5 = vshll.u32 %v6695_v7, 16  ;;  %v6867_v17 = vshrl.u32 %v6695_v7, 16  ;;  %7055 = vrot.lane.b32.xlu0 %v18353_v2, %s11910_s12  ;;  %v15267_v7 = vld [vmem:[#allocation2 + $0x50] sm:$0xff]   ;;  %6369 = vst.msk [vmem:[#allocation3 + $0x34] sm:$0xf] %vm5867_vm2, %v6161_v8  ;;  %v15272_v59 = vrot.slane %v6873_v32, 5  ;;  %v6089_v50 = vsel %vm12283_vm4, %v6081_v3, %v6088_v19 }
 0x574   : > { %v6008_v14 = vpack.c.bf16 %v5975_v23, %v5975_v23  ;;  %v5834_v39 = vpop.permute.xlu0 %5833  ;;  %v6473_v2 = vpop.permute.xlu2 %6472  ;;  %v18355_v32 = vsel %vm13013_vm9, %v15146_v20, %v15151_v36  ;;  %v6797_v37 = vshrl.u32 %v15200_v26, 16  ;;  %v18356_v63 = vsel %vm13013_vm9, %v15148_v46, %v15010_v48  ;;  %6361 = vst.msk [vmem:[#allocation3 + $0x14] sm:$0xf] %vm5867_vm2, %v6089_v50 }
 0x575   : > { %v15270_v24 = vrot.slane %v6863_v5, 5  ;;  %v6869_v38 = vrot.slane %v6867_v17, 4  ;;  %5899 = vst.msk [vmem:[#allocation2 + $0x8c] sm:$0xf] %vm5867_vm2, %v5834_v39  ;;  %v6459_v8 = vpop.permute.xlu1 %6458  ;;  %7045 = vrot.lane.b32.xlu1 %v18355_v32, %s11910_s12  ;;  %v17950_v5 = vunpack.c.l.bf16 %v15267_v7  ;;  %v6691_v17 = vpack.c.bf16 %v6658_v13, %v6658_v13  ;;  %v18357_v39 = vld [vmem:[#allocation55_spill] sm:$0xff]  ;;  %v18358_v13 = vld [vmem:[#allocation53_spill] sm:$0xff] }
 0x576   : > { %v6110_v19 = vshrl.u32 %v6008_v14, 16  ;;  %6559 = vst.msk [vmem:[#allocation3 + $0x28] sm:$0xf] %vm6548_vm5, %v6473_v2  ;;  %7041 = vrot.lane.b32.xlu2 %v18356_v63, %s11910_s12  ;;  %v6819_v23 = vrot.slane %v6817_v49, 4  ;;  %v17949_v20 = vunpack.c.h.bf16 %v15267_v7  ;;  %v6108_v36 = vrot.slane %v15067_v12, 4 }
 0x577   : > { %v6870_v3 = vor.u32 %v6869_v38, %v15270_v24  ;;  %6552 = vst.msk [vmem:[#allocation3 + $0xc] sm:$0xf] %vm6548_vm5, %v6459_v8  ;;  %v6799_v0 = vrot.slane %v6797_v37, 4  ;;  %v6665_v2 = vmul.f32 %v17950_v5, %v18357_v39  ;;  %v6823_v46 = vshll.u32 %v6691_v17, 16 }
 0x578   : > { %v6112_v38 = vrot.slane %v6110_v19, 7  ;;  %v6820_v48 = vor.u32 %v6819_v23, %v15103_v18  ;;  %v6666_v49 = vmul.f32 %v17949_v20, %v18358_v13  ;;  %v6113_v32 = vshll.u32 %v6008_v14, 16 }
 0x579   : > { %v6871_v26 = vrot.slane %v6870_v3, 4  ;;  %v6800_v3 = vor.u32 %v6799_v0, %v15235_v45  ;;  %v6698_v19 = vpack.c.bf16 %v6665_v2, %v6665_v2  ;;  %v18359_v18 = vsel %vm13013_vm9, %v15198_v51, %v15181_v35 }
 0x57a   : > { %v6117_v8 = vrot.slane %v6112_v38, 4  ;;  %v6821_v50 = vrot.slane %v6820_v48, 4  ;;  %v6825_v37 = vrot.slane %v6823_v46, 5  ;;  %v15319_v63 = vpack.c.bf16 %v6666_v49, %v6666_v49 }
 0x57b   : > { %v6876_v12 = vsel %vm13013_vm9, %v6871_v26, %v15272_v59  ;;  %7061 = vrot.lane.b32.xlu0 %v18359_v18, %s11910_s12  ;;  %v6115_v14 = vor.u32 %v6113_v32, %v6112_v38  ;;  %v6801_v26 = vrot.slane %v6800_v3, 4  ;;  %v6893_v20 = vshll.u32 %v6698_v19, 16  ;;  %v15330_v38 = vld [vmem:[#allocation2 + $0x58] sm:$0xff]  }
 0x57c   : > { %v6125_v23 = vsel %vm12283_vm4, %v6117_v8, %v6124_v54  ;;  %v6897_v5 = vshrl.u32 %v6698_v19, 16  ;;  %v6457_v0 = vpop.permute.xlu0 %6456  ;;  %v6826_v2 = vsel %vm13013_vm9, %v6821_v50, %v6825_v37  ;;  %v6903_v51 = vshll.u32 %v15319_v63, 16  ;;  %v15345_v19 = vld [vmem:[#allocation2 + $0x60] sm:$0xff]   ;;  %v18362_v18 = vld [vmem:[#allocation51_spill] sm:$0xff] }
 0x57d   : > { %6365 = vst.msk [vmem:[#allocation3 + $0x24] sm:$0xf] %vm5867_vm2, %v6125_v23  ;;  %v6116_v48 = vsel %vm12283_vm4, %v6108_v36, %v6115_v14  ;;  %v17954_v46 = vunpack.c.l.bf16 %v15179_v44  ;;  %v6465_v54 = vpop.permute.xlu1 %6464  ;;  %v18360_v49 = vsel %vm13013_vm9, %v15223_v30, %v15235_v45  ;;  %v6806_v32 = vsel %vm13013_vm9, %v6801_v26, %v15091_v27 }
 0x57e   : > { %6551 = vst.msk [vmem:[#allocation3 + $0x8] sm:$0xf] %vm6548_vm5, %v6457_v0  ;;  %7051 = vrot.lane.b32.xlu1 %v18360_v49, %s11910_s12  ;;  %v15342_v8 = vrot.slane %v6893_v20, 5  ;;  %v6899_v36 = vrot.slane %v6897_v5, 4  ;;  %v6847_v3 = vshrl.u32 %v15153_v43, 16  ;;  %v18361_v45 = vsel %vm13013_vm9, %v15225_v15, %v15044_v40  ;;  %v18363_v20 = vld [vmem:[#allocation15_spill] sm:$0xff] }
 0x57f   : > { %6555 = vst.msk [vmem:[#allocation3 + $0x18] sm:$0xf] %vm6548_vm5, %v6465_v54  ;;  %7047 = vrot.lane.b32.xlu2 %v18361_v45, %s11910_s12  ;;  %v15354_v30 = vrot.slane %v6903_v51, 5  ;;  %v6661_v27 = vmul.f32 %v17954_v46, %v18362_v18  ;;  %v6827_v5 = vshrl.u32 %v6691_v17, 16  ;;  %v5978_v43 = vmul.f32 %v11166_v10, %v18363_v20  ;;  %v18364_v10 = vld [vmem:[#allocation58_spill] sm:$0xff]  ;;  %v18365_v45 = vld [vmem:[#allocation56_spill] sm:$0xff] }
 0x580   : > { %v6900_v50 = vor.u32 %v6899_v36, %v15342_v8  ;;  %6364 = vst.msk [vmem:[#allocation3 + $0x20] sm:$0xf] %vm5867_vm2, %v6116_v48  ;;  %v6849_v14 = vrot.slane %v6847_v3, 4  ;;  %v6149_v23 = vshll.u32 %v15202_v52, 16  ;;  %v17952_v40 = vunpack.c.h.bf16 %v15330_v38 }
 0x581   : > { %v6694_v15 = vpack.c.bf16 %v6661_v27, %v6661_v27  ;;  %v6829_v26 = vrot.slane %v6827_v5, 4  ;;  %v6011_v0 = vpack.c.bf16 %v5978_v43, %v5978_v43  ;;  %v17951_v51 = vunpack.c.l.bf16 %v15345_v19 }
 0x582   : > { %v6901_v17 = vrot.slane %v6900_v50, 4  ;;  %v6850_v49 = vor.u32 %v6849_v14, %v15181_v35  ;;  %v6151_v47 = vor.u32 %v6149_v23, %v15237_v34  ;;  %v6668_v48 = vmul.f32 %v17952_v40, %v18364_v10  ;;  %v15475_v10 = vld [vmem:[#allocation2 + $0x78] sm:$0xff]  }
 0x583   : > { %7067 = vrot.lane.b32.xlu0 %v6876_v12, %s11910_s12  ;;  %v6853_v52 = vshll.u32 %v6694_v15, 16  ;;  %v6830_v36 = vor.u32 %v6829_v26, %v6825_v37  ;;  %v6137_v3 = vshrl.u32 %v6011_v0, 16  ;;  %v6669_v27 = vmul.f32 %v17951_v51, %v18365_v45 }
 0x584   : > { %v6479_v54 = vpop.permute.xlu2 %6478  ;;  %v6906_v35 = vsel %vm13013_vm9, %v6901_v17, %v15354_v30  ;;  %v6851_v34 = vrot.slane %v6850_v49, 4  ;;  %v6701_v5 = vpack.c.bf16 %v6668_v48, %v6668_v48  ;;  %v6135_v43 = vrot.slane %v15109_v11, 4  ;;  %v6463_v50 = vpop.permute.xlu0 %6462 }
 0x585   : > { %6562 = vst.msk [vmem:[#allocation3 + $0x34] sm:$0xf] %vm6548_vm5, %v6479_v54  ;;  %v6855_v14 = vrot.slane %v6853_v52, 5  ;;  %v6831_v23 = vrot.slane %v6830_v36, 4  ;;  %v6139_v54 = vrot.slane %v6137_v3, 7  ;;  %v15381_v12 = vpack.c.bf16 %v6669_v27, %v6669_v27  ;;  %v6471_v37 = vpop.permute.xlu1 %6470  ;;  %v18366_v3 = vld [vmem:[#allocation54_spill] sm:$0xff] }
 0x586   : > { %6554 = vst.msk [vmem:[#allocation3 + $0x14] sm:$0xf] %vm6548_vm5, %v6463_v50  ;;  %7057 = vrot.lane.b32.xlu1 %v6826_v2, %s11910_s12  ;;  %v6923_v26 = vshll.u32 %v6701_v5, 16  ;;  %v6927_v51 = vshrl.u32 %v6701_v5, 16  ;;  %v6140_v40 = vshll.u32 %v6011_v0, 16  ;;  %v17953_v17 = vunpack.c.h.bf16 %v15189_v29  ;;  %v15399_v5 = vld [vmem:[#allocation2 + $0x68] sm:$0xff]  }
 0x587   : > { %6558 = vst.msk [vmem:[#allocation3 + $0x24] sm:$0xf] %vm6548_vm5, %v6471_v37  ;;  %7053 = vrot.lane.b32.xlu2 %v6806_v32, %s11910_s12  ;;  %v6856_v11 = vsel %vm13013_vm9, %v6851_v34, %v6855_v14  ;;  %v6836_v49 = vsel %vm13013_vm9, %v6831_v23, %v15175_v42  ;;  %v6144_v48 = vrot.slane %v6139_v54, 4  ;;  %v6933_v52 = vshll.u32 %v15381_v12, 16 }
 0x588   : > { %v15394_v2 = vrot.slane %v6923_v26, 5  ;;  %v6929_v36 = vrot.slane %v6927_v51, 4  ;;  %v6142_v0 = vor.u32 %v6140_v40, %v6139_v54  ;;  %v6664_v27 = vmul.f32 %v17953_v17, %v18366_v3  ;;  %v18367_v54 = vld [vmem:[#allocation19_spill] sm:$0xff] }
 0x589   : > { %v6152_v32 = vsel %vm12283_vm4, %v6144_v48, %v6151_v47  ;;  %v15403_v34 = vrot.slane %v6933_v52, 5  ;;  %v6877_v42 = vshrl.u32 %v15245_v25, 16  ;;  %v6857_v50 = vshrl.u32 %v6694_v15, 16  ;;  %v18369_v25 = vld [vmem:[#allocation20_spill] sm:$0xff] }
 0x58a   : > { %6368 = vst.msk [vmem:[#allocation3 + $0x30] sm:$0xf] %vm5867_vm2, %v6152_v32  ;;  %v6930_v23 = vor.u32 %v6929_v36, %v15394_v2  ;;  %v6143_v40 = vsel %vm12283_vm4, %v6135_v43, %v6142_v0  ;;  %v6697_v51 = vpack.c.bf16 %v6664_v27, %v6664_v27  ;;  %v18368_v37 = vunpack.c.h.bf16 %v15179_v44 }
 0x58b   : > { %7073 = vrot.lane.b32.xlu0 %v6906_v35, %s11910_s12  ;;  %6367 = vst.msk [vmem:[#allocation3 + $0x2c] sm:$0xf] %vm5867_vm2, %v6143_v40  ;;  %v6879_v47 = vrot.slane %v6877_v42, 4  ;;  %v6859_v48 = vrot.slane %v6857_v50, 4  ;;  %v18370_v15 = vunpack.c.l.bf16 %v15189_v29  ;;  %v17955_v36 = vunpack.c.l.bf16 %v15399_v5 }
 0x58c   : > { %v5982_v26 = vmul.f32 %v18368_v37, %v18367_v54  ;;  %v6931_v32 = vrot.slane %v6930_v23, 4  ;;  %v6883_v17 = vshll.u32 %v6697_v51, 16  ;;  %v17956_v0 = vunpack.c.h.bf16 %v15399_v5  ;;  %v6469_v27 = vpop.permute.xlu0 %6468 }
 0x58d   : > { %v5983_v52 = vmul.f32 %v18370_v15, %v18369_v25  ;;  %v6880_v37 = vor.u32 %v6879_v47, %v15272_v59  ;;  %v6860_v35 = vor.u32 %v6859_v48, %v6855_v14  ;;  %v6671_v42 = vmul.f32 %v17955_v36, %v18273_v16  ;;  %6557 = vst.msk [vmem:[#allocation3 + $0x20] sm:$0xf] %vm6548_vm5, %v6469_v27  ;;  %v18371_v27 = vld [vmem:[#allocation18_spill] sm:$0xff] }
 0x58e   : > { %v15419_v43 = vpack.c.bf16 %v5982_v26, %v5982_v26  ;;  %7063 = vrot.lane.b32.xlu1 %v6856_v11, %s11910_s12  ;;  %v6936_v50 = vsel %vm13013_vm9, %v6931_v32, %v15403_v34  ;;  %v6885_v23 = vrot.slane %v6883_v17, 5  ;;  %v6672_v59 = vmul.f32 %v17956_v0, %v18274_v6 }
 0x58f   : > { %v6016_v46 = vpack.c.bf16 %v5983_v52, %v5983_v52  ;;  %7059 = vrot.lane.b32.xlu2 %v6836_v49, %s11910_s12  ;;  %v6881_v14 = vrot.slane %v6880_v37, 4  ;;  %v6861_v26 = vrot.slane %v6860_v35, 4  ;;  %v6704_v11 = vpack.c.bf16 %v6671_v42, %v6671_v42 }
 0x590   : > { %v6173_v40 = vshrl.u32 %v15419_v43, 16  ;;  %v15438_v52 = vpack.c.bf16 %v6672_v59, %v6672_v59  ;;  %v18372_v17 = vunpack.c.l.bf16 %v15179_v44  ;;  %v6887_v3 = vshrl.u32 %v6697_v51, 16 }
 0x591   : > { %v6182_v47 = vshrl.u32 %v6016_v46, 16  ;;  %v6185_v48 = vshll.u32 %v6016_v46, 16  ;;  %v6886_v36 = vsel %vm13013_vm9, %v6881_v14, %v6885_v23  ;;  %v6866_v49 = vsel %vm13013_vm9, %v6861_v26, %v15270_v24 }
 0x592   : > { %v15436_v15 = vrot.slane %v6173_v40, 7  ;;  %v5981_v32 = vmul.f32 %v18372_v17, %v18371_v27  ;;  %v6162_v46 = vrot.slane %v15239_v4, 4  ;;  %v6953_v40 = vshll.u32 %v6704_v11, 16 }
 0x593   : > { %v15448_v37 = vrot.slane %v6182_v47, 7  ;;  %v6957_v59 = vshrl.u32 %v6704_v11, 16  ;;  %v6963_v0 = vshll.u32 %v15438_v52, 16  ;;  %7079 = vrot.lane.b32.xlu0 %v6936_v50, %s11910_s12  ;;  %v17959_v24 = vunpack.c.l.bf16 %v15330_v38  ;;  %v15462_v11 = vld [vmem:[#allocation2 + $0x70] sm:$0xff]  }
 0x594   : > { %v6477_v35 = vpop.permute.xlu1 %6476  ;;  %v6180_v42 = vrot.slane %v15436_v15, 4  ;;  %v6014_v14 = vpack.c.bf16 %v5981_v32, %v5981_v32  ;;  %v6907_v26 = vshrl.u32 %v15319_v63, 16  ;;  %v15458_v47 = vrot.slane %v6953_v40, 5  ;;  %v6475_v6 = vpop.permute.xlu0 %6474  ;;  %v18374_v40 = vld [vmem:[#allocation22_spill] sm:$0xff] }
 0x595   : > { %6561 = vst.msk [vmem:[#allocation3 + $0x30] sm:$0xf] %vm6548_vm5, %v6477_v35  ;;  %v6187_v44 = vor.u32 %v6185_v48, %v15448_v37  ;;  %v6959_v4 = vrot.slane %v6957_v59, 4  ;;  %v15460_v17 = vrot.slane %v6963_v0, 5  ;;  %v18373_v48 = vld [vmem:[#allocation57_spill] sm:$0xff]  ;;  %v6889_v51 = vrot.slane %v6887_v3, 4 }
 0x596   : > { %v6164_v50 = vshrl.u32 %v6014_v14, 16  ;;  %v6167_v16 = vshll.u32 %v6014_v14, 16  ;;  %v6667_v32 = vmul.f32 %v17959_v24, %v18373_v48  ;;  %6560 = vst.msk [vmem:[#allocation3 + $0x2c] sm:$0xf] %vm6548_vm5, %v6475_v6  ;;  %7069 = vrot.lane.b32.xlu1 %v6886_v36, %s11910_s12  ;;  %v6909_v0 = vrot.slane %v6907_v26, 4  ;;  %v18376_v6 = vld [vmem:[#allocation27_spill] sm:$0xff] }
 0x597   : > { %v6188_v35 = vsel %vm12283_vm4, %v6180_v42, %v6187_v44  ;;  %v6960_v63 = vor.u32 %v6959_v4, %v15458_v47  ;;  %v18375_v59 = vunpack.c.l.bf16 %v15267_v7  ;;  %7065 = vrot.lane.b32.xlu2 %v6866_v49, %s11910_s12  ;;  %v18377_v36 = vunpack.c.h.bf16 %v15267_v7 }
 0x598   : > { %6372 = vst.msk [vmem:[#allocation3 + $0x40] sm:$0xf] %vm5867_vm2, %v6188_v35  ;;  %v15479_v42 = vrot.slane %v6164_v50, 7  ;;  %v6700_v44 = vpack.c.bf16 %v6667_v32, %v6667_v32  ;;  %v17961_v26 = vunpack.c.h.bf16 %v15462_v11  ;;  %v6910_v4 = vor.u32 %v6909_v0, %v15354_v30 }
 0x599   : > { %v5985_v45 = vmul.f32 %v18375_v59, %v18374_v40  ;;  %v5986_v14 = vmul.f32 %v18377_v36, %v18376_v6  ;;  %v6961_v3 = vrot.slane %v6960_v63, 4  ;;  %v6890_v24 = vor.u32 %v6889_v51, %v6885_v23 }
 0x59a   : > { %v6169_v48 = vor.u32 %v6167_v16, %v15479_v42  ;;  %v6913_v49 = vshll.u32 %v6700_v44, 16  ;;  %v17960_v35 = vunpack.c.l.bf16 %v15475_v10  ;;  %v6911_v7 = vrot.slane %v6910_v4, 4 }
 0x59b   : > { %v15486_v59 = vpack.c.bf16 %v5985_v45, %v5985_v45  ;;  %v6019_v13 = vpack.c.bf16 %v5986_v14, %v5986_v14  ;;  %v6966_v50 = vsel %vm13013_vm9, %v6961_v3, %v15460_v17  ;;  %v6891_v32 = vrot.slane %v6890_v24, 4  ;;  %v18378_v3 = vld [vmem:[#allocation21_spill] sm:$0xff] }
 0x59c   : > { %7085 = vrot.lane.b32.xlu0 %v6966_v50, %s11910_s12  ;;  %v6170_v30 = vsel %vm12283_vm4, %v6162_v46, %v6169_v48  ;;  %v6915_v45 = vrot.slane %v6913_v49, 5  ;;  %v6674_v24 = vmul.f32 %v17961_v26, %v18275_v56  ;;  %v6675_v46 = vmul.f32 %v17960_v35, %v13260_v58  ;;  %v18381_v56 = vld [vmem:[#allocation24_spill] sm:$0xff] }
 0x59d   : > { %v6200_v36 = vshrl.u32 %v15486_v59, 16  ;;  %v6209_v23 = vshrl.u32 %v6019_v13, 16  ;;  %v6212_v16 = vshll.u32 %v6019_v13, 16  ;;  %6370 = vst.msk [vmem:[#allocation3 + $0x38] sm:$0xf] %vm5867_vm2, %v6170_v30  ;;  %v6896_v0 = vsel %vm13013_vm9, %v6891_v32, %v15342_v8  ;;  %v6481_v13 = vpop.permute.xlu0 %6480 }
 0x59e   : > { %v6485_v63 = vpop.permute.xlu2 %6484  ;;  %v6916_v48 = vsel %vm13013_vm9, %v6911_v7, %v6915_v45  ;;  %v18379_v8 = vunpack.c.h.bf16 %v15189_v29  ;;  %v6189_v49 = vrot.slane %v15448_v37, 4  ;;  %6563 = vst.msk [vmem:[#allocation3 + $0x38] sm:$0xf] %vm6548_vm5, %v6481_v13  ;;  %v6707_v32 = vpack.c.bf16 %v6674_v24, %v6674_v24 }
 0x59f   : > { %v15501_v51 = vrot.slane %v6200_v36, 7  ;;  %6565 = vst.msk [vmem:[#allocation3 + $0x40] sm:$0xf] %vm6548_vm5, %v6485_v63  ;;  %v15512_v14 = vrot.slane %v6209_v23, 7  ;;  %7075 = vrot.lane.b32.xlu1 %v6916_v48, %s11910_s12  ;;  %v15521_v36 = vpack.c.bf16 %v6675_v46, %v6675_v46  ;;  %v17964_v30 = vunpack.c.h.bf16 %v15345_v19  ;;  %7071 = vrot.lane.b32.xlu2 %v6896_v0, %s11910_s12  ;;  %v18380_v48 = vld [vmem:[#allocation60_spill] sm:$0xff] }
 0x5a0   : > { %v5984_v4 = vmul.f32 %v18379_v8, %v18378_v3  ;;  %v6937_v29 = vshrl.u32 %v15381_v12, 16  ;;  %v6917_v63 = vshrl.u32 %v6700_v44, 16  ;;  %v6983_v37 = vshll.u32 %v6707_v32, 16 }
 0x5a1   : > { %v6207_v50 = vrot.slane %v15501_v51, 4  ;;  %v6214_v7 = vor.u32 %v6212_v16, %v15512_v14  ;;  %v6987_v8 = vshrl.u32 %v6707_v32, 16  ;;  %v6993_v13 = vshll.u32 %v15521_v36, 16 }
 0x5a2   : > { %v6017_v23 = vpack.c.bf16 %v5984_v4, %v5984_v4  ;;  %v6670_v24 = vmul.f32 %v17964_v30, %v18380_v48  ;;  %v6939_v0 = vrot.slane %v6937_v29, 4  ;;  %v15534_v16 = vrot.slane %v6983_v37, 5 }
 0x5a3   : > { %v6215_v46 = vsel %vm12283_vm4, %v6207_v50, %v6214_v7  ;;  %v6989_v12 = vrot.slane %v6987_v8, 4  ;;  %v15536_v44 = vrot.slane %v6993_v13, 5  ;;  %v6919_v30 = vrot.slane %v6917_v63, 4 }
 0x5a4   : > { %v6191_v35 = vshrl.u32 %v6017_v23, 16  ;;  %v6194_v26 = vshll.u32 %v6017_v23, 16  ;;  %6375 = vst.msk [vmem:[#allocation3 + $0x4c] sm:$0xf] %vm5867_vm2, %v6215_v46  ;;  %v15538_v4 = vpack.c.bf16 %v6670_v24, %v6670_v24  ;;  %v6940_v58 = vor.u32 %v6939_v0, %v15403_v34  ;;  %v18383_v46 = vld [vmem:[#allocation28_spill] sm:$0xff] }
 0x5a5   : > { %v18382_v50 = vunpack.c.h.bf16 %v15330_v38  ;;  %v6990_v29 = vor.u32 %v6989_v12, %v15534_v16  ;;  %v18384_v8 = vunpack.c.l.bf16 %v15345_v19  ;;  %v6171_v24 = vrot.slane %v15479_v42, 4  ;;  %v6487_v34 = vpop.permute.xlu0 %6486 }
 0x5a6   : > { %v15540_v32 = vrot.slane %v6191_v35, 7  ;;  %v6491_v23 = vpop.permute.xlu2 %6490  ;;  %v6943_v37 = vshll.u32 %v15538_v4, 16  ;;  %v15552_v35 = vld [vmem:[#allocation2 + $0x80] sm:$0xff]   ;;  %v6941_v0 = vrot.slane %v6940_v58, 4  ;;  %v6176_v28 = vshll.u32 %v15419_v43, 16 }
 0x5a7   : > { %v5988_v7 = vmul.f32 %v18382_v50, %v18381_v56  ;;  %v5989_v13 = vmul.f32 %v18384_v8, %v18383_v46  ;;  %6568 = vst.msk [vmem:[#allocation3 + $0x4c] sm:$0xf] %vm6548_vm5, %v6491_v23  ;;  %v6920_v50 = vor.u32 %v6919_v30, %v6915_v45  ;;  %v6991_v12 = vrot.slane %v6990_v29, 4 }
 0x5a8   : > { %v6196_v63 = vor.u32 %v6194_v26, %v15540_v32  ;;  %v15558_v39 = vrot.slane %v6943_v37, 5  ;;  %v15565_v23 = vunpack.c.l.bf16 %v15552_v35  ;;  %v17966_v29 = vunpack.c.h.bf16 %v15552_v35 }
 0x5a9   : > { %v15556_v48 = vpack.c.bf16 %v5988_v7, %v5988_v7  ;;  %v6022_v18 = vpack.c.bf16 %v5989_v13, %v5989_v13  ;;  %v6921_v8 = vrot.slane %v6920_v50, 4  ;;  %v6996_v58 = vsel %vm13013_vm9, %v6991_v12, %v15536_v44 }
 0x5aa   : > { %v6197_v42 = vsel %vm12283_vm4, %v6189_v49, %v6196_v63  ;;  %v6946_v26 = vsel %vm13013_vm9, %v6941_v0, %v15558_v39  ;;  %7091 = vrot.lane.b32.xlu0 %v6996_v58, %s11910_s12  ;;  %v6178_v7 = vor.u32 %v6176_v28, %v15436_v15  ;;  %v6677_v13 = vmul.f32 %v15565_v23, %v18276_v33 }
 0x5ab   : > { %v6227_v3 = vshrl.u32 %v15556_v48, 16  ;;  %6373 = vst.msk [vmem:[#allocation3 + $0x44] sm:$0xf] %vm5867_vm2, %v6197_v42  ;;  %v6236_v43 = vshrl.u32 %v6022_v18, 16  ;;  %v6239_v45 = vshll.u32 %v6022_v18, 16  ;;  %7081 = vrot.lane.b32.xlu1 %v6946_v26, %s11910_s12  ;;  %v6926_v49 = vsel %vm13013_vm9, %v6921_v8, %v15394_v2  ;;  %v18387_v26 = vld [vmem:[#allocation63_spill] sm:$0xff] }
 0x5ac   : > { %6566 = vst.msk [vmem:[#allocation3 + $0x44] sm:$0xf] %vm6548_vm5, %v6487_v34  ;;  %7077 = vrot.lane.b32.xlu2 %v6926_v49, %s11910_s12  ;;  %v6483_v18 = vpop.permute.xlu1 %6482  ;;  %v18385_v34 = vld [vmem:[#allocation23_spill] sm:$0xff]  ;;  %v18386_v63 = vunpack.c.l.bf16 %v15330_v38  ;;  %v6216_v2 = vrot.slane %v15512_v14, 4  ;;  %v6179_v28 = vsel %vm12283_vm4, %v6171_v24, %v6178_v7  ;;  %v6678_v15 = vmul.f32 %v17966_v29, %v18277_v31  ;;  %v18388_v7 = vld [vmem:[#allocation26_spill] sm:$0xff] }
 0x5ad   : > { %v15580_v30 = vrot.slane %v6227_v3, 7  ;;  %v15585_v37 = vrot.slane %v6236_v43, 7  ;;  %v17967_v50 = vunpack.c.l.bf16 %v15462_v11  ;;  %6371 = vst.msk [vmem:[#allocation3 + $0x3c] sm:$0xf] %vm5867_vm2, %v6179_v28  ;;  %v6710_v42 = vpack.c.bf16 %v6677_v13, %v6677_v13  ;;  %v6493_v24 = vpop.permute.xlu0 %6492 }
 0x5ae   : > { %v5987_v0 = vmul.f32 %v18386_v63, %v18385_v34  ;;  %v6967_v8 = vshrl.u32 %v15438_v52, 16  ;;  %v6497_v14 = vpop.permute.xlu2 %6496  ;;  %6564 = vst.msk [vmem:[#allocation3 + $0x3c] sm:$0xf] %vm6548_vm5, %v6483_v18  ;;  %v15604_v58 = vpack.c.bf16 %v6678_v15, %v6678_v15  ;;  %v6947_v49 = vshrl.u32 %v15538_v4, 16 }
 0x5af   : > { %v6234_v3 = vrot.slane %v15580_v30, 4  ;;  %v6241_v12 = vor.u32 %v6239_v45, %v15585_v37  ;;  %v6673_v43 = vmul.f32 %v17967_v50, %v18387_v26  ;;  %v18389_v45 = vunpack.c.l.bf16 %v15399_v5 }
 0x5b0   : > { %v6020_v38 = vpack.c.bf16 %v5987_v0, %v5987_v0  ;;  %v7013_v52 = vshll.u32 %v6710_v42, 16  ;;  %v7017_v0 = vshrl.u32 %v6710_v42, 16  ;;  %v7023_v18 = vshll.u32 %v15604_v58, 16 }
 0x5b1   : > { %v5991_v63 = vmul.f32 %v18389_v45, %v18388_v7  ;;  %v6242_v13 = vsel %vm12283_vm4, %v6234_v3, %v6241_v12  ;;  %v15617_v29 = vpack.c.bf16 %v6673_v43, %v6673_v43  ;;  %v6969_v50 = vrot.slane %v6967_v8, 4 }
 0x5b2   : > { %v6218_v28 = vshrl.u32 %v6020_v38, 16  ;;  %6378 = vst.msk [vmem:[#allocation3 + $0x58] sm:$0xf] %vm5867_vm2, %v6242_v13  ;;  %v6221_v15 = vshll.u32 %v6020_v38, 16  ;;  %v15620_v4 = vrot.slane %v7013_v52, 5  ;;  %v7019_v31 = vrot.slane %v7017_v0, 4 }
 0x5b3   : > { %6571 = vst.msk [vmem:[#allocation3 + $0x58] sm:$0xf] %vm6548_vm5, %v6497_v14  ;;  %v6949_v33 = vrot.slane %v6947_v49, 4  ;;  %v15624_v3 = vrot.slane %v7023_v18, 5  ;;  %v6970_v12 = vor.u32 %v6969_v50, %v15460_v17  ;;  %v6973_v42 = vshll.u32 %v15617_v29, 16  ;;  %v18390_v13 = vld [vmem:[#allocation34_spill] sm:$0xff] }
 0x5b4   : > { %v15622_v45 = vrot.slane %v6218_v28, 7  ;;  %v18391_v38 = vunpack.c.h.bf16 %v15399_v5  ;;  %v7020_v8 = vor.u32 %v7019_v31, %v15620_v4  ;;  %v15634_v0 = vpack.c.bf16 %v5991_v63, %v5991_v63  ;;  %v6489_v28 = vpop.permute.xlu1 %6488  ;;  %v11591_v50 = vld [vmem:[#allocation2 + $0x10] sm:$0xff]  }
 0x5b5   : > { %v6950_v52 = vor.u32 %v6949_v33, %v15558_v39  ;;  %v6971_v49 = vrot.slane %v6970_v12, 4  ;;  %v15636_v18 = vrot.slane %v6973_v42, 5  ;;  %v6198_v17 = vrot.slane %v15540_v32, 4  ;;  %v15647_v12 = vpop.permute.xlu0 %6498 }
 0x5b6   : > { %v5992_v43 = vmul.f32 %v18391_v38, %v18390_v13  ;;  %v6223_v14 = vor.u32 %v6221_v15, %v15622_v45  ;;  %v7021_v34 = vrot.slane %v7020_v8, 4  ;;  %v6254_v31 = vshrl.u32 %v15634_v0, 16 }
 0x5b7   : > { %v6951_v38 = vrot.slane %v6950_v52, 4  ;;  %v6976_v33 = vsel %vm13013_vm9, %v6971_v49, %v15636_v18  ;;  %v6203_v15 = vshll.u32 %v15486_v59, 16  ;;  %v6503_v59 = vpop.permute.xlu2 %6502  ;;  %v11210_v8 = vunpack.c.h.bf16 %v11591_v50 }
 0x5b8   : > { %v6025_v26 = vpack.c.bf16 %v5992_v43, %v5992_v43  ;;  %v6224_v5 = vsel %vm12283_vm4, %v6216_v2, %v6223_v14  ;;  %v7026_v32 = vsel %vm13013_vm9, %v7021_v34, %v15624_v3  ;;  %7087 = vrot.lane.b32.xlu1 %v6976_v33, %s11910_s12  ;;  %v15657_v42 = vrot.slane %v6254_v31, 7 }
 0x5b9   : > { %6376 = vst.msk [vmem:[#allocation3 + $0x50] sm:$0xf] %vm5867_vm2, %v6224_v5  ;;  %v6956_v2 = vsel %vm13013_vm9, %v6951_v38, %v15458_v47  ;;  %v11209_v43 = vunpack.c.l.bf16 %v11591_v50  ;;  %7097 = vrot.lane.b32.xlu0 %v7026_v32, %s11910_s12  ;;  %v6205_v34 = vor.u32 %v6203_v15, %v15501_v51  ;;  %v18393_v14 = vunpack.c.h.bf16 %v15345_v19  ;;  %v18394_v47 = vld [vmem:[#allocation7_spill] sm:$0xff]  ;;  %v18395_v32 = vld [vmem:[#allocation8_spill] sm:$0xff]  ;;  %v18396_v15 = vld [vmem:[#allocation66_spill] sm:$0xff] }
 0x5ba   : > { %v6263_v39 = vshrl.u32 %v6025_v26, 16  ;;  %v6266_v63 = vshll.u32 %v6025_v26, 16  ;;  %6569 = vst.msk [vmem:[#allocation3 + $0x50] sm:$0xf] %vm6548_vm5, %v6493_v24  ;;  %7083 = vrot.lane.b32.xlu2 %v6956_v2, %s11910_s12  ;;  %v18392_v24 = vld [vmem:[#allocation25_spill] sm:$0xff]  ;;  %v6261_v49 = vrot.slane %v15657_v42, 4  ;;  %v17970_v31 = vunpack.c.h.bf16 %v15475_v10 }
 0x5bb   : > { %v5990_v52 = vmul.f32 %v18393_v14, %v18392_v24  ;;  %v7233_v5 = vmul.f32 %v11209_v43, %v18394_v47  ;;  %v6243_v38 = vrot.slane %v15585_v37, 4  ;;  %v7234_v51 = vmul.f32 %v11210_v8, %v18395_v32 }
 0x5bc   : > { %v15661_v26 = vrot.slane %v6263_v39, 7  ;;  %v6206_v39 = vsel %vm12283_vm4, %v6198_v17, %v6205_v34  ;;  %v6676_v2 = vmul.f32 %v17970_v31, %v18396_v15  ;;  %v6997_v37 = vshrl.u32 %v15521_v36, 16  ;;  %v6495_v31 = vpop.permute.xlu1 %6494 }
 0x5bd   : > { %v6023_v50 = vpack.c.bf16 %v5990_v52, %v5990_v52  ;;  %6374 = vst.msk [vmem:[#allocation3 + $0x48] sm:$0xf] %vm5867_vm2, %v6206_v39  ;;  %v15676_v19 = vpack.c.bf16 %v7233_v5, %v7233_v5  ;;  %v6977_v43 = vshrl.u32 %v15617_v29, 16  ;;  %v7267_v17 = vpack.c.bf16 %v7234_v51, %v7234_v51  ;;  %v15696_v51 = vpop.permute.xlu0 %6504 }
 0x5be   : > { %v6268_v33 = vor.u32 %v6266_v63, %v15661_v26  ;;  %6567 = vst.msk [vmem:[#allocation3 + $0x48] sm:$0xf] %vm6548_vm5, %v6489_v28  ;;  %v15688_v52 = vpack.c.bf16 %v6676_v2, %v6676_v2  ;;  %v6999_v5 = vrot.slane %v6997_v37, 4  ;;  %v18398_v28 = vunpack.c.h.bf16 %v15462_v11 }
 0x5bf   : > { %v6245_v34 = vshrl.u32 %v6023_v50, 16  ;;  %v6248_v8 = vshll.u32 %v6023_v50, 16  ;;  %v7304_v14 = vshrl.u32 %v15676_v19, 16  ;;  %v6979_v39 = vrot.slane %v6977_v43, 4 }
 0x5c0   : > { %v6269_v63 = vsel %vm12283_vm4, %v6261_v49, %v6268_v33  ;;  %v7313_v36 = vshrl.u32 %v7267_v17, 16  ;;  %v7316_v29 = vshll.u32 %v7267_v17, 16  ;;  %v18397_v49 = vld [vmem:[#allocation30_spill] sm:$0xff]  ;;  %v7000_v2 = vor.u32 %v6999_v5, %v15536_v44 }
 0x5c1   : > { %6381 = vst.msk [vmem:[#allocation3 + $0x64] sm:$0xf] %vm5867_vm2, %v6269_v63  ;;  %v15691_v15 = vrot.slane %v6245_v34, 7  ;;  %v5994_v33 = vmul.f32 %v18398_v28, %v18397_v49  ;;  %v15698_v50 = vrot.slane %v7304_v14, 7  ;;  %v7003_v37 = vshll.u32 %v15688_v52, 16  ;;  %v18399_v34 = vld [vmem:[#allocation35_spill] sm:$0xff] }
 0x5c2   : > { %6574 = vst.msk [vmem:[#allocation3 + $0x64] sm:$0xf] %vm6548_vm5, %v6503_v59  ;;  %v6980_v43 = vor.u32 %v6979_v39, %v15636_v18  ;;  %v15703_v63 = vrot.slane %v7313_v36, 7  ;;  %v18400_v32 = vunpack.c.l.bf16 %v15475_v10  ;;  %v7001_v14 = vrot.slane %v7000_v2, 4  ;;  %v15720_v49 = vld [vmem:[#allocation2 + $0x20] sm:$0xff]  }
 0x5c3   : > { %v6250_v59 = vor.u32 %v6248_v8, %v15691_v15  ;;  %v15706_v17 = vpack.c.bf16 %v5994_v33, %v5994_v33  ;;  %v7311_v47 = vrot.slane %v15698_v50, 4  ;;  %v15712_v24 = vrot.slane %v7003_v37, 5  ;;  %v6509_v8 = vpop.permute.xlu2 %6508  ;;  %v15718_v33 = vld [vmem:[#allocation2 + $0x18] sm:$0xff]   ;;  %v6613_v37 = vld [vmem:[#allocation2 + $0x88] sm:$0x1] }
 0x5c4   : > { %v5995_v28 = vmul.f32 %v18400_v32, %v18399_v34  ;;  %v6981_v44 = vrot.slane %v6980_v43, 4  ;;  %v7318_v5 = vor.u32 %v7316_v29, %v15703_v63  ;;  %v6230_v2 = vshll.u32 %v15556_v48, 16  ;;  %v6501_v34 = vpop.permute.xlu1 %6500 }
 0x5c5   : > { %v6251_v18 = vsel %vm12283_vm4, %v6243_v38, %v6250_v59  ;;  %v6281_v39 = vshrl.u32 %v15706_v17, 16  ;;  %v7006_v32 = vsel %vm13013_vm9, %v7001_v14, %v15712_v24  ;;  %v6225_v38 = vrot.slane %v15622_v45, 4 }
 0x5c6   : > { %v6028_v36 = vpack.c.bf16 %v5995_v28, %v5995_v28  ;;  %6379 = vst.msk [vmem:[#allocation3 + $0x5c] sm:$0xf] %vm5867_vm2, %v6251_v18  ;;  %v6986_v29 = vsel %vm13013_vm9, %v6981_v44, %v15534_v16  ;;  %v7319_v43 = vsel %vm12283_vm4, %v7311_v47, %v7318_v5  ;;  %7093 = vrot.lane.b32.xlu1 %v7006_v32, %s11910_s12  ;;  %v11214_v16 = vunpack.c.h.bf16 %v15718_v33  ;;  %v18401_v47 = vld [vmem:[#allocation29_spill] sm:$0xff]  ;;  %v15750_v32 = vpop.permute.xlu0 %6510 }
 0x5c7   : > { %6572 = vst.msk [vmem:[#allocation3 + $0x5c] sm:$0xf] %vm6548_vm5, %v15647_v12  ;;  %7089 = vrot.lane.b32.xlu2 %v6986_v29, %s11910_s12  ;;  %v15737_v59 = vrot.slane %v6281_v39, 7  ;;  %7592 = vrot.lane.b32.xlu0 %v7319_v43, %s11911_s14  ;;  %v6232_v48 = vor.u32 %v6230_v2, %v15580_v30  ;;  %v11217_v45 = vunpack.c.l.bf16 %v15720_v49  ;;  %v18402_v12 = vunpack.c.l.bf16 %v15462_v11 }
 0x5c8   : > { %v6290_v28 = vshrl.u32 %v6028_v36, 16  ;;  %v6293_v14 = vshll.u32 %v6028_v36, 16  ;;  %v6270_v39 = vrot.slane %v15661_v26, 4  ;;  %v6646_v36 = vunpack.c.l.bf16 %v6613_v37 }
 0x5c9   : > { %v5993_v44 = vmul.f32 %v18402_v12, %v18401_v47  ;;  %v6288_v5 = vrot.slane %v15737_v59, 4  ;;  %v6233_v30 = vsel %vm12283_vm4, %v6225_v38, %v6232_v48  ;;  %v7236_v29 = vmul.f32 %v11214_v16, %v12232_v61 }
 0x5ca   : > { %v15747_v18 = vrot.slane %v6290_v28, 7  ;;  %v7237_v2 = vmul.f32 %v11217_v45, %v12158_v41  ;;  %6377 = vst.msk [vmem:[#allocation3 + $0x54] sm:$0xf] %vm5867_vm2, %v6233_v30  ;;  %v18403_v28 = vld [vmem:[#allocation65_spill] sm:$0xff]  ;;  %v7027_v26 = vshrl.u32 %v15604_v58, 16  ;;  %v7007_v37 = vshrl.u32 %v15688_v52, 16 }
 0x5cb   : > { %v6026_v43 = vpack.c.bf16 %v5993_v44, %v5993_v44  ;;  %v6679_v12 = vmul.f32 %v6646_v36, %v18403_v28  ;;  %6570 = vst.msk [vmem:[#allocation3 + $0x54] sm:$0xf] %vm6548_vm5, %v6495_v31  ;;  %v15762_v47 = vpack.c.bf16 %v7236_v29, %v7236_v29  ;;  %v11594_v30 = vld [vmem:[#allocation2 + $0x28] sm:$0xff]   ;;  %v15766_v41 = vpop.permute.xlu2 %6514 }
 0x5cc   : > { %v6295_v11 = vor.u32 %v6293_v14, %v15747_v18  ;;  %v7270_v38 = vpack.c.bf16 %v7237_v2, %v7237_v2  ;;  %v7029_v14 = vrot.slane %v7027_v26, 4  ;;  %v7009_v61 = vrot.slane %v7007_v37, 4 }
 0x5cd   : > { %v6272_v48 = vshrl.u32 %v6026_v43, 16  ;;  %v6275_v16 = vshll.u32 %v6026_v43, 16  ;;  %v6712_v44 = vpack.c.bf16 %v6679_v12, %v6679_v12  ;;  %v7331_v58 = vshrl.u32 %v15762_v47, 16 }
 0x5ce   : > { %v6296_v45 = vsel %vm12283_vm4, %v6288_v5, %v6295_v11  ;;  %v7340_v52 = vshrl.u32 %v7270_v38, 16  ;;  %v7343_v31 = vshll.u32 %v7270_v38, 16  ;;  %v7030_v29 = vor.u32 %v7029_v14, %v15624_v3 }
 0x5cf   : > { %6384 = vst.msk [vmem:[#allocation3 + $0x70] sm:$0xf] %vm5867_vm2, %v6296_v45  ;;  %v15770_v36 = vrot.slane %v6272_v48, 7  ;;  %v7033_v2 = vshll.u32 %v6712_v44, 16  ;;  %v7010_v5 = vor.u32 %v7009_v61, %v15712_v24  ;;  %v6252_v43 = vrot.slane %v15691_v15, 4 }
 0x5d0   : > { %6577 = vst.msk [vmem:[#allocation3 + $0x70] sm:$0xf] %vm6548_vm5, %v6509_v8  ;;  %v15776_v11 = vrot.slane %v7331_v58, 7  ;;  %v15778_v12 = vrot.slane %v7340_v52, 7  ;;  %v6257_v37 = vshll.u32 %v15634_v0, 16  ;;  %v7031_v38 = vrot.slane %v7030_v29, 4  ;;  %v7038_v8 = vpop.permute.xlu0 %7037 }
 0x5d1   : > { %v6277_v26 = vor.u32 %v6275_v16, %v15770_v36  ;;  %v7035_v48 = vrot.slane %v7033_v2, 5  ;;  %v7011_v45 = vrot.slane %v7010_v5, 4  ;;  %v11221_v28 = vunpack.c.l.bf16 %v11594_v30  ;;  %7134 = vst.msk [vmem:[#allocation3] sm:$0xf] %vm7133_vm6, %v7038_v8 }
 0x5d2   : > { %v7338_v3 = vrot.slane %v15776_v11, 4  ;;  %v7345_v44 = vor.u32 %v7343_v31, %v15778_v12  ;;  %v6259_v24 = vor.u32 %v6257_v37, %v15657_v42  ;;  %v11222_v16 = vunpack.c.h.bf16 %v11594_v30  ;;  %v15805_v30 = vpop.permute.xlu1 %6506 }
 0x5d3   : > { %v6278_v61 = vsel %vm12283_vm4, %v6270_v39, %v6277_v26  ;;  %v7036_v15 = vsel %vm13013_vm9, %v7031_v38, %v7035_v48  ;;  %v7016_v0 = vsel %vm13013_vm9, %v7011_v45, %v15620_v4  ;;  %v7239_v14 = vmul.f32 %v11221_v28, %v12279_v57  ;;  %v18404_v39 = vld [vmem:[#allocation32_spill] sm:$0xff]  ;;  %v7042_v2 = vpop.permute.xlu2 %7041  ;;  %v18406_v26 = vld [vmem:[#allocation33_spill] sm:$0xff] }
 0x5d4   : > { %6382 = vst.msk [vmem:[#allocation3 + $0x68] sm:$0xf] %vm5867_vm2, %v6278_v61  ;;  %v7346_v58 = vsel %vm12283_vm4, %v7338_v3, %v7345_v44  ;;  %7099 = vrot.lane.b32.xlu1 %v7036_v15, %s11910_s12  ;;  %7095 = vrot.lane.b32.xlu2 %v7016_v0, %s11910_s12  ;;  %v6260_v42 = vsel %vm12283_vm4, %v6252_v43, %v6259_v24  ;;  %v18405_v52 = vunpack.c.h.bf16 %v15475_v10  ;;  %v6297_v31 = vrot.slane %v15747_v18, 4  ;;  %v18407_v3 = vld [vmem:[#allocation31_spill] sm:$0xff] }
 0x5d5   : > { %6575 = vst.msk [vmem:[#allocation3 + $0x68] sm:$0xf] %vm6548_vm5, %v15696_v51  ;;  %7598 = vrot.lane.b32.xlu0 %v7346_v58, %s11911_s14  ;;  %v7240_v51 = vmul.f32 %v11222_v16, %v12365_v9  ;;  %v15810_v28 = vpack.c.bf16 %v7239_v14, %v7239_v14  ;;  %v11213_v29 = vunpack.c.l.bf16 %v15718_v33  ;;  %v7320_v5 = vrot.slane %v15703_v63, 4 }
 0x5d6   : > { %v5996_v4 = vmul.f32 %v18405_v52, %v18404_v39  ;;  %6380 = vst.msk [vmem:[#allocation3 + $0x60] sm:$0xf] %vm5867_vm2, %v6260_v42  ;;  %v7307_v43 = vshll.u32 %v15676_v19, 16  ;;  %v5997_v37 = vmul.f32 %v15565_v23, %v18406_v26  ;;  %v18408_v18 = vunpack.c.h.bf16 %v15552_v35 }
 0x5d7   : > { %6573 = vst.msk [vmem:[#allocation3 + $0x60] sm:$0xf] %vm6548_vm5, %v6501_v34  ;;  %v7273_v38 = vpack.c.bf16 %v7240_v51, %v7240_v51  ;;  %v7358_v48 = vshrl.u32 %v15810_v28, 16  ;;  %v7235_v45 = vmul.f32 %v11213_v29, %v12227_v60  ;;  %v18409_v35 = vrot.slane %v14976_v53, 11  ;;  %v15842_v29 = vld [vmem:[#allocation2 + $0x30] sm:$0xff]  }
 0x5d8   : > { %v6029_v10 = vpack.c.bf16 %v5996_v4, %v5996_v4  ;;  %v5998_v33 = vmul.f32 %v18408_v18, %v18407_v3  ;;  %v7309_v63 = vor.u32 %v7307_v43, %v15698_v50  ;;  %v15826_v61 = vpack.c.bf16 %v5997_v37, %v5997_v37  ;;  %7136 = vst.msk [vmem:[#allocation3 + $0x8] sm:$0xf] %vm7133_vm6, %v7042_v2  ;;  %v7044_v16 = vpop.permute.xlu0 %7043  ;;  %v15848_v37 = vld [vmem:[#allocation2 + $0x38] sm:$0xff]  }
 0x5d9   : > { %v15829_v19 = vrot.slane %v7358_v48, 7  ;;  %v7367_v24 = vshrl.u32 %v7273_v38, 16  ;;  %v7370_v15 = vshll.u32 %v7273_v38, 16  ;;  %v7268_v0 = vpack.c.bf16 %v7235_v45, %v7235_v45  ;;  %7137 = vst.msk [vmem:[#allocation3 + $0xc] sm:$0xf] %vm7133_vm6, %v7044_v16 }
 0x5da   : > { %v6299_v34 = vshrl.u32 %v6029_v10, 16  ;;  %v6302_v44 = vshll.u32 %v6029_v10, 16  ;;  %v7310_v8 = vsel %vm12283_vm4, %v18409_v35, %v7309_v63  ;;  %v6031_v58 = vpack.c.bf16 %v5998_v33, %v5998_v33  ;;  %v15850_v38 = vpop.permute.xlu1 %6512  ;;  %v18410_v35 = vld [vmem:[#allocation12_spill] sm:$0xff] }
 0x5db   : > { %v6308_v50 = vshrl.u32 %v15826_v61, 16  ;;  %v7365_v42 = vrot.slane %v15829_v19, 4  ;;  %v15840_v52 = vrot.slane %v7367_v24, 7  ;;  %v7322_v4 = vshrl.u32 %v7268_v0, 16 }
 0x5dc   : > { %v15831_v14 = vrot.slane %v6299_v34, 7  ;;  %v7325_v51 = vshll.u32 %v7268_v0, 16  ;;  %7590 = vrot.lane.b32.xlu2 %v7310_v8, %s11911_s14  ;;  %v6317_v10 = vshrl.u32 %v6031_v58, 16  ;;  %v6320_v43 = vshll.u32 %v6031_v58, 16  ;;  %v7048_v34 = vpop.permute.xlu2 %7047 }
 0x5dd   : > { %v15846_v53 = vrot.slane %v6308_v50, 7  ;;  %v7372_v48 = vor.u32 %v7370_v15, %v15840_v52  ;;  %v7324_v45 = vrot.slane %v7322_v4, 7  ;;  %v6279_v18 = vrot.slane %v15770_v36, 4  ;;  %7139 = vst.msk [vmem:[#allocation3 + $0x14] sm:$0xf] %vm7133_vm6, %v7048_v34  ;;  %v11597_v50 = vld [vmem:[#allocation2 + $0x40] sm:$0xff]  }
 0x5de   : > { %v6304_v2 = vor.u32 %v6302_v44, %v15831_v14  ;;  %v6284_v33 = vshll.u32 %v15706_v17, 16  ;;  %v6319_v24 = vrot.slane %v6317_v10, 7  ;;  %v11226_v0 = vunpack.c.h.bf16 %v15842_v29 }
 0x5df   : > { %v6315_v63 = vrot.slane %v15846_v53, 4  ;;  %v7373_v16 = vsel %vm12283_vm4, %v7365_v42, %v7372_v48  ;;  %v7327_v15 = vor.u32 %v7325_v51, %v7324_v45  ;;  %v11229_v17 = vunpack.c.l.bf16 %v15848_v37 }
 0x5e0   : > { %v6305_v44 = vsel %vm12283_vm4, %v6297_v31, %v6304_v2  ;;  %v6286_v36 = vor.u32 %v6284_v33, %v15737_v59  ;;  %7604 = vrot.lane.b32.xlu0 %v7373_v16, %s11911_s14  ;;  %v6322_v31 = vor.u32 %v6320_v43, %v6319_v24  ;;  %v7242_v8 = vmul.f32 %v11226_v0, %v18410_v35  ;;  %v18411_v59 = vld [vmem:[#allocation14_spill] sm:$0xff]  ;;  %v7050_v10 = vpop.permute.xlu0 %7049 }
 0x5e1   : > { %6385 = vst.msk [vmem:[#allocation3 + $0x74] sm:$0xf] %vm5867_vm2, %v6305_v44  ;;  %v11218_v58 = vunpack.c.h.bf16 %v15720_v49  ;;  %v7328_v42 = vsel %vm12283_vm4, %v7320_v5, %v7327_v15  ;;  %v7243_v51 = vmul.f32 %v11229_v17, %v18411_v59  ;;  %v7329_v2 = vrot.slane %v7324_v45, 4 }
 0x5e2   : > { %6578 = vst.msk [vmem:[#allocation3 + $0x74] sm:$0xf] %vm6548_vm5, %v15750_v32  ;;  %v6287_v4 = vsel %vm12283_vm4, %v6279_v18, %v6286_v36  ;;  %7594 = vrot.lane.b32.xlu1 %v7328_v42, %s11911_s14  ;;  %v6323_v32 = vsel %vm12283_vm4, %v6315_v63, %v6322_v31  ;;  %v15879_v43 = vpack.c.bf16 %v7242_v8, %v7242_v8  ;;  %v7334_v5 = vshll.u32 %v15762_v47, 16  ;;  %v7040_v24 = vpop.permute.xlu1 %7039  ;;  %v18412_v8 = vld [vmem:[#allocation11_spill] sm:$0xff] }
 0x5e3   : > { %6383 = vst.msk [vmem:[#allocation3 + $0x6c] sm:$0xf] %vm5867_vm2, %v6287_v4  ;;  %v7238_v49 = vmul.f32 %v11218_v58, %v12274_v55  ;;  %v7276_v48 = vpack.c.bf16 %v7243_v51, %v7243_v51  ;;  %v11233_v18 = vunpack.c.l.bf16 %v11597_v50  ;;  %v11234_v33 = vunpack.c.h.bf16 %v11597_v50 }
 0x5e4   : > { %6387 = vst.msk [vmem:[#allocation3 + $0x7c] sm:$0xf] %vm5867_vm2, %v6323_v32  ;;  %v11225_v45 = vunpack.c.l.bf16 %v15842_v29  ;;  %v7385_v34 = vshrl.u32 %v15879_v43, 16  ;;  %v7336_v63 = vor.u32 %v7334_v5, %v15776_v11  ;;  %v7054_v15 = vpop.permute.xlu2 %7053  ;;  %v7347_v50 = vrot.slane %v15778_v12, 4  ;;  %v11598_v12 = vld [vmem:[#allocation2 + $0x48] sm:$0xff]  }
 0x5e5   : > { %6580 = vst.msk [vmem:[#allocation3 + $0x7c] sm:$0xf] %vm6548_vm5, %v15766_v41  ;;  %v7271_v44 = vpack.c.bf16 %v7238_v49, %v7238_v49  ;;  %v7394_v47 = vshrl.u32 %v7276_v48, 16  ;;  %v7245_v0 = vmul.f32 %v11233_v18, %v18125_v21  ;;  %v7246_v16 = vmul.f32 %v11234_v33, %v18127_v22  ;;  %v7747_v21 = vld [vmem:[#allocation2 + $0x80] sm:$0xf] }
 0x5e6   : > { %6576 = vst.msk [vmem:[#allocation3 + $0x6c] sm:$0xf] %vm6548_vm5, %v15805_v30  ;;  %v15893_v36 = vrot.slane %v7385_v34, 7  ;;  %v7397_v29 = vshll.u32 %v7276_v48, 16  ;;  %v7337_v41 = vsel %vm12283_vm4, %v7329_v2, %v7336_v63  ;;  %v7241_v58 = vmul.f32 %v11225_v45, %v18412_v8 }
 0x5e7   : > { %v7349_v17 = vshrl.u32 %v7271_v44, 16  ;;  %7140 = vst.msk [vmem:[#allocation3 + $0x18] sm:$0xf] %vm7133_vm6, %v7050_v10  ;;  %v15898_v11 = vrot.slane %v7394_v47, 7  ;;  %7596 = vrot.lane.b32.xlu2 %v7337_v41, %s11911_s14  ;;  %v15901_v30 = vpack.c.bf16 %v7245_v0, %v7245_v0  ;;  %v7279_v31 = vpack.c.bf16 %v7246_v16, %v7246_v16 }
 0x5e8   : > { %7142 = vst.msk [vmem:[#allocation3 + $0x20] sm:$0xf] %vm7133_vm6, %v7054_v15  ;;  %v7352_v4 = vshll.u32 %v7271_v44, 16  ;;  %v7361_v51 = vshll.u32 %v15810_v28, 16  ;;  %v7392_v2 = vrot.slane %v15893_v36, 4  ;;  %v7056_v5 = vpop.permute.xlu0 %7055  ;;  %v7274_v18 = vpack.c.bf16 %v7241_v58, %v7241_v58 }
 0x5e9   : > { %v7351_v42 = vrot.slane %v7349_v17, 7  ;;  %7135 = vst.msk [vmem:[#allocation3 + $0x4] sm:$0xf] %vm7133_vm6, %v7040_v24  ;;  %v7399_v10 = vor.u32 %v7397_v29, %v15898_v11  ;;  %v7412_v32 = vshrl.u32 %v15901_v30, 16  ;;  %v7421_v49 = vshrl.u32 %v7279_v31, 16  ;;  %v15920_v24 = vld [vmem:[#allocation2 + $0x50] sm:$0xff]  }
 0x5ea   : > { %v7363_v45 = vor.u32 %v7361_v51, %v15829_v19  ;;  %7143 = vst.msk [vmem:[#allocation3 + $0x24] sm:$0xf] %vm7133_vm6, %v7056_v5  ;;  %v6311_v63 = vshll.u32 %v15826_v61, 16  ;;  %v7424_v19 = vshll.u32 %v7279_v31, 16  ;;  %v7376_v0 = vshrl.u32 %v7274_v18, 16  ;;  %v7046_v15 = vpop.permute.xlu1 %7045 }
 0x5eb   : > { %v7354_v48 = vor.u32 %v7352_v4, %v7351_v42  ;;  %v7356_v33 = vrot.slane %v7351_v42, 4  ;;  %v7400_v28 = vsel %vm12283_vm4, %v7392_v2, %v7399_v10  ;;  %v15915_v34 = vrot.slane %v7412_v32, 7  ;;  %7138 = vst.msk [vmem:[#allocation3 + $0x10] sm:$0xf] %vm7133_vm6, %v7046_v15  ;;  %v11600_v4 = vld [vmem:[#allocation2 + $0x58] sm:$0xff]  }
 0x5ec   : > { %v15917_v44 = vrot.slane %v7421_v49, 7  ;;  %7610 = vrot.lane.b32.xlu0 %v7400_v28, %s11911_s14  ;;  %v6306_v16 = vrot.slane %v15831_v14, 4  ;;  %v7379_v29 = vshll.u32 %v7274_v18, 16  ;;  %v6313_v61 = vor.u32 %v6311_v63, %v15846_v53  ;;  %v7060_v58 = vpop.permute.xlu2 %7059 }
 0x5ed   : > { %v7355_v47 = vsel %vm12283_vm4, %v7347_v50, %v7354_v48  ;;  %v7364_v17 = vsel %vm12283_vm4, %v7356_v33, %v7363_v45  ;;  %v11238_v41 = vunpack.c.h.bf16 %v11598_v12  ;;  %v7419_v42 = vrot.slane %v15915_v34, 4  ;;  %7145 = vst.msk [vmem:[#allocation3 + $0x2c] sm:$0xf] %vm7133_vm6, %v7060_v58 }
 0x5ee   : > { %7600 = vrot.lane.b32.xlu1 %v7355_v47, %s11911_s14  ;;  %v7378_v50 = vrot.slane %v7376_v0, 7  ;;  %v11241_v31 = vunpack.c.l.bf16 %v15920_v24  ;;  %v11230_v14 = vunpack.c.h.bf16 %v15848_v37  ;;  %v7426_v51 = vor.u32 %v7424_v19, %v15917_v44 }
 0x5ef   : > { %7602 = vrot.lane.b32.xlu2 %v7364_v17, %s11911_s14  ;;  %v6314_v53 = vsel %vm12283_vm4, %v6306_v16, %v6313_v61  ;;  %v7248_v2 = vmul.f32 %v11238_v41, %v18367_v54  ;;  %v7388_v10 = vshll.u32 %v15879_v43, 16  ;;  %v11245_v33 = vunpack.c.l.bf16 %v11600_v4 }
 0x5f0   : > { %v7381_v32 = vor.u32 %v7379_v29, %v7378_v50  ;;  %6386 = vst.msk [vmem:[#allocation3 + $0x78] sm:$0xf] %vm5867_vm2, %v6314_v53  ;;  %v7249_v49 = vmul.f32 %v11241_v31, %v18369_v25  ;;  %v7244_v37 = vmul.f32 %v11230_v14, %v18363_v20  ;;  %v7383_v5 = vrot.slane %v7378_v50, 4  ;;  %v7062_v28 = vpop.permute.xlu0 %7061  ;;  %v15967_v50 = vld [vmem:[#allocation2 + $0x60] sm:$0xff]  }
 0x5f1   : > { %6579 = vst.msk [vmem:[#allocation3 + $0x78] sm:$0xf] %vm6548_vm5, %v15850_v38  ;;  %v15946_v48 = vpack.c.bf16 %v7248_v2, %v7248_v2  ;;  %v7390_v18 = vor.u32 %v7388_v10, %v15893_v36  ;;  %v11246_v45 = vunpack.c.h.bf16 %v11600_v4  ;;  %v7374_v43 = vrot.slane %v15840_v52, 4 }
 0x5f2   : > { %v7282_v63 = vpack.c.bf16 %v7249_v49, %v7249_v49  ;;  %v7277_v47 = vpack.c.bf16 %v7244_v37, %v7244_v37  ;;  %v11237_v19 = vunpack.c.l.bf16 %v11598_v12  ;;  %7146 = vst.msk [vmem:[#allocation3 + $0x30] sm:$0xf] %vm7133_vm6, %v7062_v28  ;;  %v7427_v0 = vsel %vm12283_vm4, %v7419_v42, %v7426_v51  ;;  %v7052_v17 = vpop.permute.xlu1 %7051 }
 0x5f3   : > { %v7439_v16 = vshrl.u32 %v15946_v48, 16  ;;  %v7251_v38 = vmul.f32 %v11245_v33, %v18374_v40  ;;  %v7252_v15 = vmul.f32 %v11246_v45, %v18376_v6  ;;  %v7382_v36 = vsel %vm12283_vm4, %v7374_v43, %v7381_v32  ;;  %7141 = vst.msk [vmem:[#allocation3 + $0x1c] sm:$0xf] %vm7133_vm6, %v7052_v17  ;;  %v15978_v33 = vld [vmem:[#allocation2 + $0x68] sm:$0xff]  }
 0x5f4   : > { %7616 = vrot.lane.b32.xlu0 %v7427_v0, %s11911_s14  ;;  %v7448_v52 = vshrl.u32 %v7282_v63, 16  ;;  %v7403_v29 = vshrl.u32 %v7277_v47, 16  ;;  %v7391_v12 = vsel %vm12283_vm4, %v7383_v5, %v7390_v18  ;;  %v7247_v42 = vmul.f32 %v11237_v19, %v18371_v27  ;;  %v7066_v31 = vpop.permute.xlu2 %7065  ;;  %v11603_v19 = vld [vmem:[#allocation2 + $0x70] sm:$0xff]  }
 0x5f5   : > { %v15962_v61 = vrot.slane %v7439_v16, 7  ;;  %v15964_v41 = vpack.c.bf16 %v7251_v38, %v7251_v38  ;;  %v7285_v58 = vpack.c.bf16 %v7252_v15, %v7252_v15  ;;  %v7451_v4 = vshll.u32 %v7282_v63, 16  ;;  %7148 = vst.msk [vmem:[#allocation3 + $0x38] sm:$0xf] %vm7133_vm6, %v7066_v31 }
 0x5f6   : > { %7606 = vrot.lane.b32.xlu1 %v7382_v36, %s11911_s14  ;;  %v15970_v14 = vrot.slane %v7448_v52, 7  ;;  %v7405_v51 = vrot.slane %v7403_v29, 7  ;;  %v7406_v53 = vshll.u32 %v7277_v47, 16  ;;  %v7401_v2 = vrot.slane %v15898_v11, 4 }
 0x5f7   : > { %7608 = vrot.lane.b32.xlu2 %v7391_v12, %s11911_s14  ;;  %v7466_v10 = vshrl.u32 %v15964_v41, 16  ;;  %v7475_v32 = vshrl.u32 %v7285_v58, 16  ;;  %v7280_v5 = vpack.c.bf16 %v7247_v42, %v7247_v42  ;;  %v7415_v18 = vshll.u32 %v15901_v30, 16 }
 0x5f8   : > { %v7453_v49 = vor.u32 %v7451_v4, %v15970_v14  ;;  %v7408_v37 = vor.u32 %v7406_v53, %v7405_v51  ;;  %v7446_v45 = vrot.slane %v15962_v61, 4  ;;  %v11250_v28 = vunpack.c.h.bf16 %v15967_v50  ;;  %v7068_v43 = vpop.permute.xlu0 %7067 }
 0x5f9   : > { %v15982_v63 = vrot.slane %v7466_v10, 7  ;;  %v7430_v11 = vshrl.u32 %v7280_v5, 16  ;;  %v7417_v47 = vor.u32 %v7415_v18, %v15915_v34  ;;  %7149 = vst.msk [vmem:[#allocation3 + $0x3c] sm:$0xf] %vm7133_vm6, %v7068_v43  ;;  %v15988_v16 = vrot.slane %v7475_v32, 7  ;;  %v18413_v10 = vld [vmem:[#allocation21_spill] sm:$0xff] }
 0x5fa   : > { %v7454_v0 = vsel %vm12283_vm4, %v7446_v45, %v7453_v49  ;;  %v7410_v30 = vrot.slane %v7405_v51, 4  ;;  %v11253_v38 = vunpack.c.l.bf16 %v15978_v33  ;;  %v7409_v15 = vsel %vm12283_vm4, %v7401_v2, %v7408_v37  ;;  %v7058_v29 = vpop.permute.xlu1 %7057 }
 0x5fb   : > { %v7432_v36 = vrot.slane %v7430_v11, 7  ;;  %v7254_v52 = vmul.f32 %v11250_v28, %v18381_v56  ;;  %v11242_v34 = vunpack.c.h.bf16 %v15920_v24  ;;  %v7478_v12 = vshll.u32 %v7285_v58, 16  ;;  %7144 = vst.msk [vmem:[#allocation3 + $0x28] sm:$0xf] %vm7133_vm6, %v7058_v29 }
 0x5fc   : > { %7622 = vrot.lane.b32.xlu0 %v7454_v0, %s11911_s14  ;;  %v7433_v17 = vshll.u32 %v7280_v5, 16  ;;  %v7255_v42 = vmul.f32 %v11253_v38, %v18383_v46  ;;  %v11257_v31 = vunpack.c.l.bf16 %v11603_v19  ;;  %v7072_v4 = vpop.permute.xlu2 %7071  ;;  %v7473_v51 = vrot.slane %v15982_v63, 4 }
 0x5fd   : > { %v7418_v53 = vsel %vm12283_vm4, %v7410_v30, %v7417_v47  ;;  %v16002_v2 = vpack.c.bf16 %v7254_v52, %v7254_v52  ;;  %v7250_v24 = vmul.f32 %v11242_v34, %v18413_v10  ;;  %7151 = vst.msk [vmem:[#allocation3 + $0x44] sm:$0xf] %vm7133_vm6, %v7072_v4  ;;  %v7480_v58 = vor.u32 %v7478_v12, %v15988_v16  ;;  %v18414_v34 = vld [vmem:[#allocation23_spill] sm:$0xff] }
 0x5fe   : > { %7612 = vrot.lane.b32.xlu1 %v7409_v15, %s11911_s14  ;;  %v7288_v32 = vpack.c.bf16 %v7255_v42, %v7255_v42  ;;  %v11258_v49 = vunpack.c.h.bf16 %v11603_v19  ;;  %v7257_v37 = vmul.f32 %v11257_v31, %v18388_v7  ;;  %v7435_v5 = vor.u32 %v7433_v17, %v7432_v36 }
 0x5ff   : > { %7614 = vrot.lane.b32.xlu2 %v7418_v53, %s11911_s14  ;;  %v7283_v18 = vpack.c.bf16 %v7250_v24, %v7250_v24  ;;  %v7442_v45 = vshll.u32 %v15946_v48, 16  ;;  %v11249_v28 = vunpack.c.l.bf16 %v15967_v50  ;;  %v7428_v43 = vrot.slane %v15917_v44, 4 }
 0x600   : > { %v7493_v11 = vshrl.u32 %v16002_v2, 16  ;;  %v7502_v47 = vshrl.u32 %v7288_v32, 16  ;;  %v7258_v0 = vmul.f32 %v11258_v49, %v18390_v13  ;;  %v7074_v30 = vpop.permute.xlu0 %7073  ;;  %v7437_v15 = vrot.slane %v7432_v36, 4 }
 0x601   : > { %v7457_v38 = vshrl.u32 %v7283_v18, 16  ;;  %v7444_v19 = vor.u32 %v7442_v45, %v15962_v61  ;;  %v16015_v52 = vpack.c.bf16 %v7257_v37, %v7257_v37  ;;  %7152 = vst.msk [vmem:[#allocation3 + $0x48] sm:$0xf] %vm7133_vm6, %v7074_v30  ;;  %v7481_v48 = vsel %vm12283_vm4, %v7473_v51, %v7480_v58  ;;  %v11604_v51 = vld [vmem:[#allocation2 + $0x78] sm:$0xff]  }
 0x602   : > { %v16020_v50 = vrot.slane %v7502_v47, 7  ;;  %v7291_v44 = vpack.c.bf16 %v7258_v0, %v7258_v0  ;;  %v7253_v29 = vmul.f32 %v11249_v28, %v18414_v34  ;;  %v7436_v12 = vsel %vm12283_vm4, %v7428_v43, %v7435_v5  ;;  %v7064_v17 = vpop.permute.xlu1 %7063 }
 0x603   : > { %v7459_v36 = vrot.slane %v7457_v38, 7  ;;  %v7495_v61 = vrot.slane %v7493_v11, 7  ;;  %v7505_v42 = vshll.u32 %v7288_v32, 16  ;;  %v7520_v31 = vshrl.u32 %v16015_v52, 16  ;;  %7147 = vst.msk [vmem:[#allocation3 + $0x34] sm:$0xf] %vm7133_vm6, %v7064_v17 }
 0x604   : > { %7628 = vrot.lane.b32.xlu0 %v7481_v48, %s11911_s14  ;;  %v7286_v4 = vpack.c.bf16 %v7253_v29, %v7253_v29  ;;  %v7460_v53 = vshll.u32 %v7283_v18, 16  ;;  %v7445_v24 = vsel %vm12283_vm4, %v7437_v15, %v7444_v19  ;;  %v7529_v58 = vshrl.u32 %v7291_v44, 16  ;;  %v11606_v11 = vld [vmem:[#allocation2 + $0x88] sm:$0xff]   ;;  %v18415_v18 = vld [vmem:[#allocation35_spill] sm:$0xff] }
 0x605   : > { %v7507_v49 = vor.u32 %v7505_v42, %v16020_v50  ;;  %v7455_v37 = vrot.slane %v15970_v14, 4  ;;  %v7469_v32 = vshll.u32 %v15964_v41, 16  ;;  %v11262_v28 = vunpack.c.h.bf16 %v11604_v51  ;;  %v18416_v41 = vld [vmem:[#allocation30_spill] sm:$0xff]  ;;  %v18417_v42 = vld [vmem:[#allocation25_spill] sm:$0xff] }
 0x606   : > { %7618 = vrot.lane.b32.xlu1 %v7436_v12, %s11911_s14  ;;  %v7462_v5 = vor.u32 %v7460_v53, %v7459_v36  ;;  %v7484_v45 = vshrl.u32 %v7286_v4, 16  ;;  %v7078_v43 = vpop.permute.xlu2 %7077  ;;  %v7500_v47 = vrot.slane %v7495_v61, 4  ;;  %v16035_v0 = vrot.slane %v7520_v31, 7 }
 0x607   : > { %7620 = vrot.lane.b32.xlu2 %v7445_v24, %s11911_s14  ;;  %v7261_v30 = vmul.f32 %v15565_v23, %v18415_v18  ;;  %v11254_v38 = vunpack.c.h.bf16 %v15978_v33  ;;  %7154 = vst.msk [vmem:[#allocation3 + $0x50] sm:$0xf] %vm7133_vm6, %v7078_v43  ;;  %v16041_v15 = vrot.slane %v7529_v58, 7  ;;  %v7464_v19 = vrot.slane %v7459_v36, 4 }
 0x608   : > { %v7080_v14 = vpop.permute.xlu0 %7079  ;;  %v7471_v48 = vor.u32 %v7469_v32, %v15982_v63  ;;  %v7260_v29 = vmul.f32 %v11262_v28, %v18416_v41  ;;  %v7508_v12 = vsel %vm12283_vm4, %v7500_v47, %v7507_v49  ;;  %v11269_v31 = vunpack.c.l.bf16 %v11606_v11 }
 0x609   : > { %7155 = vst.msk [vmem:[#allocation3 + $0x54] sm:$0xf] %vm7133_vm6, %v7080_v14  ;;  %v7294_v17 = vpack.c.bf16 %v7261_v30, %v7261_v30  ;;  %v7256_v23 = vmul.f32 %v11254_v38, %v18417_v42  ;;  %v7463_v33 = vsel %vm12283_vm4, %v7455_v37, %v7462_v5  ;;  %v7532_v53 = vshll.u32 %v7291_v44, 16 }
 0x60a   : > { %v7486_v36 = vrot.slane %v7484_v45, 7  ;;  %v11270_v24 = vunpack.c.h.bf16 %v11606_v11  ;;  %v7070_v63 = vpop.permute.xlu1 %7069  ;;  %v16053_v58 = vpack.c.bf16 %v7260_v29, %v7260_v29  ;;  %v7527_v49 = vrot.slane %v16035_v0, 4  ;;  %v18418_v29 = vld [vmem:[#allocation29_spill] sm:$0xff] }
 0x60b   : > { %v7289_v32 = vpack.c.bf16 %v7256_v23, %v7256_v23  ;;  %7150 = vst.msk [vmem:[#allocation3 + $0x40] sm:$0xf] %vm7133_vm6, %v7070_v63  ;;  %v7534_v28 = vor.u32 %v7532_v53, %v16041_v15  ;;  %v7487_v43 = vshll.u32 %v7286_v4, 16  ;;  %v7472_v47 = vsel %vm12283_vm4, %v7464_v19, %v7471_v48 }
 0x60c   : > { %7634 = vrot.lane.b32.xlu0 %v7508_v12, %s11911_s14  ;;  %v7556_v44 = vshrl.u32 %v7294_v17, 16  ;;  %v7263_v37 = vmul.f32 %v11269_v31, %v18406_v26  ;;  %v7264_v5 = vmul.f32 %v11270_v24, %v18407_v3  ;;  %v11261_v45 = vunpack.c.l.bf16 %v11604_v51  ;;  %v16237_v26 = vld [vmem:[#allocation2 + $0x40] sm:$0xff]  }
 0x60d   : > { %v7489_v11 = vor.u32 %v7487_v43, %v7486_v36  ;;  %v7511_v30 = vshrl.u32 %v7289_v32, 16  ;;  %v7496_v38 = vshll.u32 %v16002_v2, 16  ;;  %v7547_v14 = vshrl.u32 %v16053_v58, 16 }
 0x60e   : > { %7624 = vrot.lane.b32.xlu1 %v7463_v33, %s11911_s14  ;;  %v7259_v12 = vmul.f32 %v11261_v45, %v18418_v29  ;;  %v7482_v23 = vrot.slane %v15988_v16, 4  ;;  %v7491_v19 = vrot.slane %v7486_v36, 4  ;;  %v7535_v31 = vsel %vm12283_vm4, %v7527_v49, %v7534_v28  ;;  %v11854_v16 = vld [vmem:[#allocation2 + $0x80] sm:$0xff]  }
 0x60f   : > { %7626 = vrot.lane.b32.xlu2 %v7472_v47, %s11911_s14  ;;  %v7498_v48 = vor.u32 %v7496_v38, %v7495_v61  ;;  %v16070_v33 = vrot.slane %v7556_v44, 7  ;;  %v16072_v51 = vpack.c.bf16 %v7263_v37, %v7263_v37  ;;  %v7297_v53 = vpack.c.bf16 %v7264_v5, %v7264_v5 }
 0x610   : > { %v7086_v4 = vpop.permute.xlu0 %7085  ;;  %v7490_v2 = vsel %vm12283_vm4, %v7482_v23, %v7489_v11  ;;  %v7513_v24 = vrot.slane %v7511_v30, 7  ;;  %v7292_v63 = vpack.c.bf16 %v7259_v12, %v7259_v12  ;;  %v11266_v36 = vunpack.c.h.bf16 %v11854_v16 }
 0x611   : > { %7158 = vst.msk [vmem:[#allocation3 + $0x60] sm:$0xf] %vm7133_vm6, %v7086_v4  ;;  %v7549_v43 = vrot.slane %v7547_v14, 7  ;;  %v7559_v47 = vshll.u32 %v7294_v17, 16  ;;  %v7514_v28 = vshll.u32 %v7289_v32, 16  ;;  %v7499_v44 = vsel %vm12283_vm4, %v7491_v19, %v7498_v48 }
 0x612   : > { %v7076_v61 = vpop.permute.xlu1 %7075  ;;  %v7509_v5 = vrot.slane %v16020_v50, 4  ;;  %v7574_v45 = vshrl.u32 %v16072_v51, 16  ;;  %v7583_v11 = vshrl.u32 %v7297_v53, 16  ;;  %v7538_v17 = vshrl.u32 %v7292_v63, 16 }
 0x613   : > { %7153 = vst.msk [vmem:[#allocation3 + $0x4c] sm:$0xf] %vm7133_vm6, %v7076_v61  ;;  %v7561_v37 = vor.u32 %v7559_v47, %v16070_v33  ;;  %v7516_v30 = vor.u32 %v7514_v28, %v7513_v24  ;;  %v7523_v38 = vshll.u32 %v16015_v52, 16  ;;  %v7262_v32 = vmul.f32 %v11266_v36, %v18404_v39 }
 0x614   : > { %7640 = vrot.lane.b32.xlu0 %v7535_v31, %s11911_s14  ;;  %v7084_v49 = vpop.permute.xlu2 %7083  ;;  %v7554_v14 = vrot.slane %v7549_v43, 4  ;;  %v7518_v12 = vrot.slane %v7513_v24, 4  ;;  %v7576_v19 = vrot.slane %v7574_v45, 7  ;;  %v7585_v50 = vrot.slane %v7583_v11, 7 }
 0x615   : > { %7157 = vst.msk [vmem:[#allocation3 + $0x5c] sm:$0xf] %vm7133_vm6, %v7084_v49  ;;  %v7525_v4 = vor.u32 %v7523_v38, %v16035_v0  ;;  %v7517_v48 = vsel %vm12283_vm4, %v7509_v5, %v7516_v30  ;;  %v7540_v31 = vrot.slane %v7538_v17, 7  ;;  %v7586_v52 = vshll.u32 %v7297_v53, 16 }
 0x616   : > { %7630 = vrot.lane.b32.xlu1 %v7490_v2, %s11911_s14  ;;  %v7562_v23 = vsel %vm12283_vm4, %v7554_v14, %v7561_v37  ;;  %v7295_v2 = vpack.c.bf16 %v7262_v32, %v7262_v32  ;;  %v7541_v16 = vshll.u32 %v7292_v63, 16  ;;  %v7581_v0 = vrot.slane %v7576_v19, 4  ;;  %v7721_v14 = vld [vmem:[#allocation2 + $0x18] sm:$0xf] }
 0x617   : > { %7632 = vrot.lane.b32.xlu2 %v7499_v44, %s11911_s14  ;;  %v7526_v24 = vsel %vm12283_vm4, %v7518_v12, %v7525_v4  ;;  %v7588_v36 = vor.u32 %v7586_v52, %v7585_v50  ;;  %v7550_v44 = vshll.u32 %v16053_v58, 16  ;;  %v7536_v53 = vrot.slane %v16041_v15, 4 }
 0x618   : > { %v7543_v49 = vor.u32 %v7541_v16, %v7540_v31  ;;  %v7565_v28 = vshrl.u32 %v7295_v2, 16  ;;  %v7545_v63 = vrot.slane %v7540_v31, 4  ;;  %v7568_v30 = vshll.u32 %v7295_v2, 16  ;;  %v7720_v31 = vld [vmem:[#allocation2 + $0x14] sm:$0xf] }
 0x619   : > { %v7552_v5 = vor.u32 %v7550_v44, %v7549_v43  ;;  %v7589_v45 = vsel %vm12283_vm4, %v7581_v0, %v7588_v36  ;;  %v7563_v15 = vrot.slane %v16070_v33, 4  ;;  %v7577_v38 = vshll.u32 %v16072_v51, 16  ;;  %v7724_v51 = vld [vmem:[#allocation2 + $0x24] sm:$0xf]  ;;  %v7722_v0 = vld [vmem:[#allocation2 + $0x1c] sm:$0xf] }
 0x61a   : > { %v7544_v11 = vsel %vm12283_vm4, %v7536_v53, %v7543_v49  ;;  %v7567_v58 = vrot.slane %v7565_v28, 7  ;;  %v7723_v36 = vld [vmem:[#allocation2 + $0x20] sm:$0xf]  ;;  %v7725_v49 = vld [vmem:[#allocation2 + $0x28] sm:$0xf]  ;;  %v11297_v29 = vunpack.c.l.bf16 %v16237_v26  ;;  %vm10361_vm2 = vcmask 56352  }
 0x61b   : > { %v7553_v17 = vsel %vm12283_vm4, %v7545_v63, %v7552_v5  ;;  %v7579_v32 = vor.u32 %v7577_v38, %v7576_v19  ;;  %v7719_v19 = vld [vmem:[#allocation2 + $0x10] sm:$0xf]  ;;  %v7726_v28 = vld [vmem:[#allocation2 + $0x2c] sm:$0xf]  ;;  %v7733_v63 = vld [vmem:[#allocation2 + $0x48] sm:$0xf] }
 0x61c   : > { %7646 = vrot.lane.b32.xlu0 %v7562_v23, %s11911_s14  ;;  %v7092_v61 = vpop.permute.xlu0 %7091  ;;  %v7570_v43 = vor.u32 %v7568_v30, %v7567_v58  ;;  %v7572_v4 = vrot.slane %v7567_v58, 4  ;;  %v7728_v5 = vld [vmem:[#allocation2 + $0x34] sm:$0xf] }
 0x61d   : > { %v7082_v47 = vpop.permute.xlu1 %7081  ;;  %7161 = vst.msk [vmem:[#allocation3 + $0x6c] sm:$0xf] %vm7133_vm6, %v7092_v61  ;;  %v7736_v30 = vld [vmem:[#allocation2 + $0x54] sm:$0xf] }
 0x61e   : > { %7636 = vrot.lane.b32.xlu1 %v7517_v48, %s11911_s14  ;;  %7156 = vst.msk [vmem:[#allocation3 + $0x58] sm:$0xf] %vm7133_vm6, %v7082_v47  ;;  %v7571_v12 = vsel %vm12283_vm4, %v7563_v15, %v7570_v43  ;;  %v7580_v33 = vsel %vm12283_vm4, %v7572_v4, %v7579_v32  ;;  %v7730_v47 = vld [vmem:[#allocation2 + $0x3c] sm:$0xf]  ;;  %v7732_v43 = vld [vmem:[#allocation2 + $0x44] sm:$0xf] }
 0x61f   : > { %7638 = vrot.lane.b32.xlu2 %v7526_v24, %s11911_s14  ;;  %v7727_v24 = vld [vmem:[#allocation2 + $0x30] sm:$0xf] }
 0x620   : > { %v11607_v32 = vld [vmem:[#allocation2 + $0x10] sm:$0xff]  }
 0x621   : > { %v7090_v37 = vpop.permute.xlu2 %7089  ;;  %v11273_v4 = vunpack.c.l.bf16 %v11607_v32 }
 0x622   : > { %7160 = vst.msk [vmem:[#allocation3 + $0x68] sm:$0xf] %vm7133_vm6, %v7090_v37 }
 0x624   : > { %7652 = vrot.lane.b32.xlu0 %v7589_v45, %s11911_s14  ;;  %v7729_v45 = vld [vmem:[#allocation2 + $0x38] sm:$0xf] }
 0x626   : > { %7642 = vrot.lane.b32.xlu1 %v7544_v11, %s11911_s14 }
 0x627   : > { %7644 = vrot.lane.b32.xlu2 %v7553_v17, %s11911_s14  ;;  %v7731_v17 = vld [vmem:[#allocation2 + $0x40] sm:$0xf] }
 0x62a   : > { %v7088_v23 = vpop.permute.xlu1 %7087 }
 0x62b   : > { %v7098_v50 = vpop.permute.xlu0 %7097  ;;  %7159 = vst.msk [vmem:[#allocation3 + $0x64] sm:$0xf] %vm7133_vm6, %v7088_v23 }
 0x62c   : > { %7787 = vrot.lane.b32.xlu0 %v7721_v14, %s11902_s13  ;;  %7164 = vst.msk [vmem:[#allocation3 + $0x78] sm:$0xf] %vm7133_vm6, %v7098_v50  ;;  %v7739_v14 = vld [vmem:[#allocation2 + $0x60] sm:$0xf]  ;;  %v7735_v50 = vld [vmem:[#allocation2 + $0x50] sm:$0xf] }
 0x62e   : > { %7648 = vrot.lane.b32.xlu1 %v7571_v12, %s11911_s14  ;;  %v7096_v48 = vpop.permute.xlu2 %7095  ;;  %v7734_v12 = vld [vmem:[#allocation2 + $0x4c] sm:$0xf] }
 0x62f   : > { %7650 = vrot.lane.b32.xlu2 %v7580_v33, %s11911_s14  ;;  %7163 = vst.msk [vmem:[#allocation3 + $0x74] sm:$0xf] %vm7133_vm6, %v7096_v48  ;;  %v11274_v48 = vunpack.c.h.bf16 %v11607_v32  ;;  %v11609_v32 = vld [vmem:[#allocation2 + $0x20] sm:$0xff]  }
 0x634   : > { %7793 = vrot.lane.b32.xlu0 %v7724_v51, %s11902_s13 }
 0x636   : > { %7783 = vrot.lane.b32.xlu1 %v7719_v19, %s11902_s13  ;;  %v7591_v2 = vpop.permute.xlu2 %7590  ;;  %v18419_v19 = vld [vmem:[#allocation36_spill] sm:$0xff] }
 0x637   : > { %7785 = vrot.lane.b32.xlu2 %v7720_v31, %s11902_s13  ;;  %7687 = vst.msk [vmem:[#allocation3] sm:$0xf] %vm7686_vm7, %v7591_v2  ;;  %v7978_v31 = vmul.f32 %v11273_v4, %v18419_v19  ;;  %v7742_v2 = vld [vmem:[#allocation2 + $0x6c] sm:$0xf] }
 0x638   : > { %v7094_v52 = vpop.permute.xlu1 %7093 }
 0x639   : > { %v7593_v16 = vpop.permute.xlu0 %7592  ;;  %7162 = vst.msk [vmem:[#allocation3 + $0x70] sm:$0xf] %vm7133_vm6, %v7094_v52  ;;  %v11608_v52 = vld [vmem:[#allocation2 + $0x18] sm:$0xff]  }
 0x63a   : > { %7688 = vst.msk [vmem:[#allocation3 + $0x4] sm:$0xf] %vm7686_vm7, %v7593_v16  ;;  %v7737_v16 = vld [vmem:[#allocation2 + $0x58] sm:$0xf] }
 0x63c   : > { %7799 = vrot.lane.b32.xlu0 %v7727_v24, %s11902_s13  ;;  %v18420_v24 = vld [vmem:[#allocation37_spill] sm:$0xff] }
 0x63e   : > { %7789 = vrot.lane.b32.xlu1 %v7722_v0, %s11902_s13  ;;  %v7979_v0 = vmul.f32 %v11274_v48, %v18420_v24  ;;  %v7741_v48 = vld [vmem:[#allocation2 + $0x68] sm:$0xf] }
 0x63f   : > { %7791 = vrot.lane.b32.xlu2 %v7723_v36, %s11902_s13  ;;  %v8011_v36 = vpack.c.bf16 %v7978_v31, %v7978_v31 }
 0x641   : > { %v7597_v61 = vpop.permute.xlu2 %7596 }
 0x642   : > { %7690 = vst.msk [vmem:[#allocation3 + $0xc] sm:$0xf] %vm7686_vm7, %v7597_v61 }
 0x644   : > { %7805 = vrot.lane.b32.xlu0 %v7730_v47, %s11902_s13  ;;  %v7738_v47 = vld [vmem:[#allocation2 + $0x5c] sm:$0xf] }
 0x646   : > { %7795 = vrot.lane.b32.xlu1 %v7725_v49, %s11902_s13  ;;  %v7100_v44 = vpop.permute.xlu1 %7099  ;;  %v16160_v49 = vunpack.c.h.bf16 %v11608_v52 }
 0x647   : > { %v7599_v37 = vpop.permute.xlu0 %7598  ;;  %7797 = vrot.lane.b32.xlu2 %v7726_v28, %s11902_s13  ;;  %7165 = vst.msk [vmem:[#allocation3 + $0x7c] sm:$0xf] %vm7133_vm6, %v7100_v44  ;;  %v16162_v28 = vunpack.c.l.bf16 %v11608_v52  ;;  %v16178_v52 = vunpack.c.l.bf16 %v11609_v32 }
 0x648   : > { %7691 = vst.msk [vmem:[#allocation3 + $0x10] sm:$0xf] %vm7686_vm7, %v7599_v37  ;;  %v8012_v37 = vpack.c.bf16 %v7979_v0, %v7979_v0 }
 0x649   : > { %v7603_v53 = vpop.permute.xlu2 %7602 }
 0x64a   : > { %7693 = vst.msk [vmem:[#allocation3 + $0x18] sm:$0xf] %vm7686_vm7, %v7603_v53  ;;  %v8058_v4 = vshrl.u32 %v8012_v37, 16 }
 0x64c   : > { %7811 = vrot.lane.b32.xlu0 %v7733_v63, %s11902_s13  ;;  %v8045_v63 = vshrl.u32 %v8011_v36, 16  ;;  %v8060_v0 = vrot.slane %v8058_v4, 4 }
 0x64e   : > { %7801 = vrot.lane.b32.xlu1 %v7728_v5, %s11902_s13  ;;  %v8048_v5 = vshll.u32 %v8011_v36, 16  ;;  %v18423_v36 = vld [vmem:[#allocation4_spill] sm:$0xff] }
 0x64f   : > { %7803 = vrot.lane.b32.xlu2 %v7729_v45, %s11902_s13  ;;  %v11610_v45 = vld [vmem:[#allocation2 + $0x28] sm:$0xff]  }
 0x651   : > { %v7609_v11 = vpop.permute.xlu2 %7608 }
 0x652   : > { %v7605_v58 = vpop.permute.xlu0 %7604  ;;  %7696 = vst.msk [vmem:[#allocation3 + $0x24] sm:$0xf] %vm7686_vm7, %v7609_v11  ;;  %v18421_v11 = vld [vmem:[#allocation39_spill] sm:$0xff] }
 0x653   : > { %7694 = vst.msk [vmem:[#allocation3 + $0x1c] sm:$0xf] %vm7686_vm7, %v7605_v58  ;;  %v7981_v58 = vmul.f32 %v16160_v49, %v18421_v11 }
 0x654   : > { %7817 = vrot.lane.b32.xlu0 %v7736_v30, %s11902_s13  ;;  %v7595_v15 = vpop.permute.xlu1 %7594  ;;  %v18422_v30 = vld [vmem:[#allocation38_spill] sm:$0xff] }
 0x655   : > { %7689 = vst.msk [vmem:[#allocation3 + $0x8] sm:$0xf] %vm7686_vm7, %v7595_v15  ;;  %v7745_v15 = vld [vmem:[#allocation2 + $0x78] sm:$0xf] }
 0x656   : > { %7807 = vrot.lane.b32.xlu1 %v7731_v17, %s11902_s13  ;;  %v7980_v17 = vmul.f32 %v16162_v28, %v18422_v30 }
 0x657   : > { %7809 = vrot.lane.b32.xlu2 %v7732_v43, %s11902_s13  ;;  %v7740_v43 = vld [vmem:[#allocation2 + $0x64] sm:$0xf] }
 0x658   : > { %v8013_v31 = vpack.c.bf16 %v7980_v17, %v7980_v17  ;;  %v7748_v17 = vld [vmem:[#allocation2 + $0x84] sm:$0xf] }
 0x659   : > { %v7615_v38 = vpop.permute.xlu2 %7614 }
 0x65a   : > { %7699 = vst.msk [vmem:[#allocation3 + $0x30] sm:$0xf] %vm7686_vm7, %v7615_v38  ;;  %v8054_v38 = vshll.u32 %v8012_v37, 16  ;;  %v8068_v4 = vshrl.u32 %v8013_v31, 16 }
 0x65c   : > { %7823 = vrot.lane.b32.xlu0 %v7739_v14, %s11902_s13  ;;  %v11285_v14 = vunpack.c.l.bf16 %v11610_v45 }
 0x65e   : > { %7813 = vrot.lane.b32.xlu1 %v7734_v12, %s11902_s13  ;;  %v7611_v23 = vpop.permute.xlu0 %7610  ;;  %v16173_v12 = vunpack.c.h.bf16 %v11610_v45 }
 0x65f   : > { %7697 = vst.msk [vmem:[#allocation3 + $0x28] sm:$0xf] %vm7686_vm7, %v7611_v23  ;;  %7815 = vrot.lane.b32.xlu2 %v7735_v50, %s11902_s13  ;;  %v8047_v23 = vrot.slane %v8045_v63, 4  ;;  %v8050_v50 = vrot.slane %v8048_v5, 5 }
 0x660   : > { %v7601_v33 = vpop.permute.xlu1 %7600 }
 0x661   : > { %7692 = vst.msk [vmem:[#allocation3 + $0x14] sm:$0xf] %vm7686_vm7, %v7601_v33  ;;  %v7621_v51 = vpop.permute.xlu2 %7620  ;;  %v8051_v37 = vor.u32 %v8050_v50, %v8047_v23 }
 0x662   : > { %7702 = vst.msk [vmem:[#allocation3 + $0x3c] sm:$0xf] %vm7686_vm7, %v7621_v51  ;;  %v8014_v51 = vpack.c.bf16 %v7981_v58, %v7981_v58  ;;  %v8064_v58 = vshll.u32 %v8013_v31, 16  ;;  %v16199_v31 = vld [vmem:[#allocation2 + $0x30] sm:$0xff]  }
 0x663   : > { %v18430_v39 = vunpack.c.h.bf16 %v16199_v31  ;;  %v11289_v41 = vunpack.c.l.bf16 %v16199_v31 }
 0x664   : > { %7829 = vrot.lane.b32.xlu0 %v7742_v2, %s11902_s13  ;;  %v8074_v5 = vshll.u32 %v8014_v51, 16  ;;  %v8078_v45 = vshrl.u32 %v8014_v51, 16  ;;  %v8052_v51 = vrot.slane %v8051_v37, 4  ;;  %v16197_v3 = vrot.slane %v8064_v58, 5 }
 0x665   : > { %v8070_v37 = vrot.slane %v8068_v4, 4 }
 0x666   : > { %7819 = vrot.lane.b32.xlu1 %v7737_v16, %s11902_s13  ;;  %v7617_v61 = vpop.permute.xlu0 %7616  ;;  %v8056_v16 = vrot.slane %v8054_v38, 5  ;;  %v16188_v38 = vunpack.c.h.bf16 %v11609_v32  ;;  %v16195_v25 = vrot.slane %v8074_v5, 5  ;;  %v8080_v32 = vrot.slane %v8078_v45, 4 }
 0x667   : > { %7700 = vst.msk [vmem:[#allocation3 + $0x34] sm:$0xf] %vm7686_vm7, %v7617_v61  ;;  %7821 = vrot.lane.b32.xlu2 %v7738_v47, %s11902_s13  ;;  %v8568_v61 = vmul.f32 %v11285_v14, %v18423_v36  ;;  %v8569_v47 = vmul.f32 %v16173_v12, %v12274_v55  ;;  %v7743_v55 = vld [vmem:[#allocation2 + $0x70] sm:$0xf] }
 0x668   : > { %v7607_v44 = vpop.permute.xlu1 %7606  ;;  %v8061_v23 = vor.u32 %v8060_v0, %v8056_v16  ;;  %v18426_v0 = vld [vmem:[#allocation42_spill] sm:$0xff]  ;;  %v8057_v4 = vsel %vm13013_vm9, %v8052_v51, %v8056_v16  ;;  %v8071_v16 = vor.u32 %v8070_v37, %v16197_v3 }
 0x669   : > { %7695 = vst.msk [vmem:[#allocation3 + $0x20] sm:$0xf] %vm7686_vm7, %v7607_v44  ;;  %v7627_v53 = vpop.permute.xlu2 %7626 }
 0x66a   : > { %7705 = vst.msk [vmem:[#allocation3 + $0x48] sm:$0xf] %vm7686_vm7, %v7627_v53  ;;  %v18424_v53 = vld [vmem:[#allocation43_spill] sm:$0xff]  ;;  %v16209_v5 = vrot.slane %v8061_v23, 4 }
 0x66b   : > { %v7984_v63 = vmul.f32 %v11285_v14, %v18424_v53  ;;  %v9315_v13 = vmul.f32 %v11289_v41, %v18424_v53 }
 0x66c   : > { %7835 = vrot.lane.b32.xlu0 %v7745_v15, %s11902_s13  ;;  %v18425_v15 = vld [vmem:[#allocation40_spill] sm:$0xff] }
 0x66d   : > { %v9313_v50 = vmul.f32 %v11285_v14, %v18425_v15 }
 0x66e   : > { %7825 = vrot.lane.b32.xlu1 %v7740_v43, %s11902_s13  ;;  %v7623_v33 = vpop.permute.xlu0 %7622  ;;  %v7982_v43 = vmul.f32 %v16178_v52, %v18425_v15 }
 0x66f   : > { %7703 = vst.msk [vmem:[#allocation3 + $0x40] sm:$0xf] %vm7686_vm7, %v7623_v33  ;;  %7827 = vrot.lane.b32.xlu2 %v7741_v48, %s11902_s13  ;;  %v16190_v33 = vpack.c.bf16 %v8568_v61, %v8568_v61  ;;  %v8602_v48 = vpack.c.bf16 %v8569_v47, %v8569_v47  ;;  %v7983_v47 = vmul.f32 %v16188_v38, %v18426_v0 }
 0x670   : > { %v7613_v2 = vpop.permute.xlu1 %7612  ;;  %v16203_v14 = vpack.c.bf16 %v7982_v43, %v7982_v43  ;;  %v9346_v45 = vpack.c.bf16 %v9313_v50, %v9313_v50  ;;  %v9314_v50 = vmul.f32 %v16173_v12, %v18426_v0 }
 0x671   : > { %7698 = vst.msk [vmem:[#allocation3 + $0x2c] sm:$0xf] %vm7686_vm7, %v7613_v2  ;;  %v7633_v44 = vpop.permute.xlu2 %7632  ;;  %v8017_v2 = vpack.c.bf16 %v7984_v63, %v7984_v63  ;;  %v8671_v63 = vshrl.u32 %v16190_v33, 16  ;;  %v8680_v58 = vshrl.u32 %v8602_v48, 16  ;;  %v8683_v27 = vshll.u32 %v8602_v48, 16 }
 0x672   : > { %7708 = vst.msk [vmem:[#allocation3 + $0x54] sm:$0xf] %vm7686_vm7, %v7633_v44  ;;  %v7744_v44 = vld [vmem:[#allocation2 + $0x74] sm:$0xf]  ;;  %v9415_v0 = vshll.u32 %v9346_v45, 16  ;;  %v9347_v48 = vpack.c.bf16 %v9314_v50, %v9314_v50 }
 0x673   : > { %v8104_v15 = vshll.u32 %v8017_v2, 16  ;;  %v16232_v51 = vrot.slane %v8671_v63, 7  ;;  %v16239_v54 = vrot.slane %v8680_v58, 7  ;;  %v18429_v63 = vld [vmem:[#allocation46_spill] sm:$0xff] }
 0x674   : > { %7841 = vrot.lane.b32.xlu0 %v7748_v17, %s11902_s13  ;;  %v7987_v18 = vmul.f32 %v18430_v39, %v18429_v63  ;;  %v16255_v39 = vrot.slane %v8071_v16, 4  ;;  %v16261_v59 = vrot.slane %v9415_v0, 5  ;;  %v9425_v16 = vshll.u32 %v9347_v48, 16  ;;  %v18431_v63 = vld [vmem:[#allocation44_spill] sm:$0xff] }
 0x675   : > { %v8685_v58 = vor.u32 %v8683_v27, %v16239_v54 }
 0x676   : > { %7831 = vrot.lane.b32.xlu1 %v7743_v55, %s11902_s13  ;;  %v7629_v36 = vpop.permute.xlu0 %7628  ;;  %v8108_v55 = vshrl.u32 %v8017_v2, 16  ;;  %v8084_v2 = vshll.u32 %v16203_v14, 16 }
 0x677   : > { %7706 = vst.msk [vmem:[#allocation3 + $0x4c] sm:$0xf] %vm7686_vm7, %v7629_v36  ;;  %7833 = vrot.lane.b32.xlu2 %v7744_v44, %s11902_s13  ;;  %v18427_v44 = vld [vmem:[#allocation7_spill] sm:$0xff] }
 0x678   : > { %v7619_v61 = vpop.permute.xlu1 %7618  ;;  %v16214_v43 = vmul.f32 %v16162_v28, %v18427_v44  ;;  %v16227_v36 = vld [vmem:[#allocation2 + $0x38] sm:$0xff]   ;;  %v16229_v44 = vpack.c.bf16 %v7983_v47, %v7983_v47  ;;  %v16242_v47 = vrot.slane %v8104_v15, 5  ;;  %v8110_v37 = vrot.slane %v8108_v55, 4 }
 0x679   : > { %7701 = vst.msk [vmem:[#allocation3 + $0x38] sm:$0xf] %vm7686_vm7, %v7619_v61  ;;  %v7639_v17 = vpop.permute.xlu2 %7638  ;;  %v8081_v61 = vor.u32 %v8080_v32, %v16195_v25  ;;  %v7746_v32 = vld [vmem:[#allocation2 + $0x7c] sm:$0xf]  ;;  %v16252_v55 = vrot.slane %v8084_v2, 5  ;;  %v8020_v2 = vpack.c.bf16 %v7987_v18, %v7987_v18  ;;  %v9429_v18 = vshrl.u32 %v9347_v48, 16 }
 0x67a   : > { %7711 = vst.msk [vmem:[#allocation3 + $0x60] sm:$0xf] %vm7686_vm7, %v7639_v17  ;;  %v18428_v17 = vld [vmem:[#allocation41_spill] sm:$0xff]  ;;  %v8111_v50 = vor.u32 %v8110_v37, %v16242_v47  ;;  %v16277_v37 = vrot.slane %v9425_v16, 5 }
 0x67b   : > { %v7985_v23 = vmul.f32 %v16173_v12, %v18428_v17  ;;  %v11293_v12 = vunpack.c.l.bf16 %v16227_v36  ;;  %v8134_v7 = vshll.u32 %v8020_v2, 16  ;;  %v9431_v35 = vrot.slane %v9429_v18, 4  ;;  %v7750_v16 = vld [vmem:[#allocation2 + $0x8c] sm:$0xf] }
 0x67c   : > { %8368 = vrot.lane.b32.xlu0 %v8057_v4, %s11912_s15  ;;  %v8678_v4 = vrot.slane %v16232_v51, 4  ;;  %v8112_v53 = vrot.slane %v8111_v50, 4  ;;  %v18433_v48 = vld [vmem:[#allocation45_spill] sm:$0xff] }
 0x67d   : > { %v16259_v20 = vpack.c.bf16 %v7985_v23, %v7985_v23  ;;  %v8094_v23 = vshll.u32 %v16229_v44, 16  ;;  %v9432_v50 = vor.u32 %v9431_v35, %v16277_v37 }
 0x67e   : > { %7837 = vrot.lane.b32.xlu1 %v7746_v32, %s11902_s13  ;;  %v7635_v22 = vpop.permute.xlu0 %7634  ;;  %v8082_v32 = vrot.slane %v8081_v61, 4  ;;  %v16265_v27 = vsel %vm12283_vm4, %v8678_v4, %v8685_v58  ;;  %v18432_v4 = vld [vmem:[#allocation49_spill] sm:$0xff] }
 0x67f   : > { %7709 = vst.msk [vmem:[#allocation3 + $0x58] sm:$0xf] %vm7686_vm7, %v7635_v22  ;;  %7839 = vrot.lane.b32.xlu2 %v7747_v21, %s11902_s13  ;;  %v9419_v22 = vshrl.u32 %v9346_v45, 16  ;;  %v8088_v21 = vshrl.u32 %v16203_v14, 16  ;;  %v7990_v58 = vmul.f32 %v11297_v29, %v18432_v4  ;;  %v7749_v14 = vld [vmem:[#allocation2 + $0x88] sm:$0xf] }
 0x680   : > { %v7625_v15 = vpop.permute.xlu1 %7624  ;;  %v8087_v45 = vsel %vm13013_vm9, %v8082_v32, %v16252_v55  ;;  %v8138_v32 = vshrl.u32 %v8020_v2, 16  ;;  %v18434_v2 = vunpack.c.h.bf16 %v16199_v31  ;;  %v11298_v31 = vunpack.c.h.bf16 %v16237_v26 }
 0x681   : > { %7704 = vst.msk [vmem:[#allocation3 + $0x44] sm:$0xf] %vm7686_vm7, %v7625_v15  ;;  %v7645_v61 = vpop.permute.xlu2 %7644  ;;  %v7988_v15 = vmul.f32 %v11293_v12, %v18431_v63  ;;  %v9421_v0 = vrot.slane %v9419_v22, 4  ;;  %v8098_v12 = vshrl.u32 %v16229_v44, 16  ;;  %v9348_v63 = vpack.c.bf16 %v9315_v13, %v9315_v13 }
 0x682   : > { %7714 = vst.msk [vmem:[#allocation3 + $0x6c] sm:$0xf] %vm7686_vm7, %v7645_v61  ;;  %v8114_v61 = vshll.u32 %v16259_v20, 16  ;;  %v8090_v13 = vrot.slane %v8088_v21, 4  ;;  %v9316_v18 = vmul.f32 %v18434_v2, %v18428_v17  ;;  %v8140_v35 = vrot.slane %v8138_v32, 4 }
 0x683   : > { %v9422_v22 = vor.u32 %v9421_v0, %v16261_v59  ;;  %v16284_v4 = vpack.c.bf16 %v7988_v15, %v7988_v15  ;;  %v9435_v8 = vshll.u32 %v9348_v63, 16  ;;  %v8023_v0 = vpack.c.bf16 %v7990_v58, %v7990_v58 }
 0x684   : > { %8374 = vrot.lane.b32.xlu0 %v8087_v45, %s11912_s15  ;;  %v7986_v45 = vmul.f32 %v11289_v41, %v18433_v48  ;;  %v16296_v15 = vrot.slane %v8114_v61, 5  ;;  %v16298_v41 = vrot.slane %v8094_v23, 5  ;;  %v16306_v58 = vrot.slane %v8134_v7, 5 }
 0x685   : > { %v16287_v42 = vrot.slane %v9422_v22, 4  ;;  %v16304_v22 = vrot.slane %v9435_v8, 5  ;;  %v16309_v17 = vrot.slane %v9432_v50, 4  ;;  %v8144_v61 = vshll.u32 %v16284_v4, 16 }
 0x686   : > { %7843 = vrot.lane.b32.xlu1 %v7749_v14, %s11902_s13  ;;  %v7641_v29 = vpop.permute.xlu0 %7640  ;;  %v8117_v23 = vsel %vm13013_vm9, %v8112_v53, %v16296_v15  ;;  %v8164_v8 = vshll.u32 %v8023_v0, 16  ;;  %v16320_v26 = vpack.c.bf16 %v9316_v18, %v9316_v18  ;;  %v8091_v32 = vor.u32 %v8090_v13, %v16252_v55  ;;  %v18436_v18 = vld [vmem:[#allocation47_spill] sm:$0xff] }
 0x687   : > { %7712 = vst.msk [vmem:[#allocation3 + $0x64] sm:$0xf] %vm7686_vm7, %v7641_v29  ;;  %7845 = vrot.lane.b32.xlu2 %v7750_v16, %s11902_s13  ;;  %v8019_v29 = vpack.c.bf16 %v7986_v45, %v7986_v45  ;;  %v9439_v16 = vshrl.u32 %v9348_v63, 16  ;;  %v8100_v53 = vrot.slane %v8098_v12, 4  ;;  %v11294_v50 = vunpack.c.h.bf16 %v16227_v36  ;;  %s11913_s13 = smov 18  }
 0x688   : > { %v7631_v44 = vpop.permute.xlu1 %7630  ;;  %v18435_v63 = vsel %vm13013_vm9, %v16209_v5, %v16197_v3  ;;  %v8141_v45 = vor.u32 %v8140_v35, %v16306_v58  ;;  %v7991_v55 = vmul.f32 %v11298_v31, %v18436_v18  ;;  %v8118_v12 = vshrl.u32 %v16259_v20, 16 }
 0x689   : > { %7707 = vst.msk [vmem:[#allocation3 + $0x50] sm:$0xf] %vm7686_vm7, %v7631_v44  ;;  %v7651_v21 = vpop.permute.xlu2 %7650  ;;  %v8168_v44 = vshrl.u32 %v8023_v0, 16  ;;  %v9441_v2 = vrot.slane %v9439_v16, 4  ;;  %v8077_v0 = vsel %vm13013_vm9, %v16255_v39, %v16195_v25  ;;  %v16338_v13 = vrot.slane %v8144_v61, 5  ;;  %v16344_v25 = vld [vmem:[#allocation2 + $0x48] sm:$0xff]  }
 0x68a   : > { %7717 = vst.msk [vmem:[#allocation3 + $0x78] sm:$0xf] %vm7686_vm7, %v7651_v21  ;;  %v8124_v21 = vshll.u32 %v8019_v29, 16  ;;  %v8128_v16 = vshrl.u32 %v8019_v29, 16  ;;  %v16342_v5 = vrot.slane %v8164_v8, 5  ;;  %v9445_v39 = vshll.u32 %v16320_v26, 16 }
 0x68b   : > { %v8170_v35 = vrot.slane %v8168_v44, 4  ;;  %v9442_v20 = vor.u32 %v9441_v2, %v16304_v22  ;;  %v8092_v31 = vrot.slane %v8091_v32, 4  ;;  %v8101_v61 = vor.u32 %v8100_v53, %v16298_v41  ;;  %v18437_v29 = vld [vmem:[#allocation48_spill] sm:$0xff] }
 0x68c   : > { %8380 = vrot.lane.b32.xlu0 %v8117_v23, %s11912_s15  ;;  %v8497_v23 = vld [vmem:[#allocation2 + $0x14] sm:$0x8]  ;;  %v16351_v14 = vpack.c.bf16 %v7991_v55, %v7991_v55  ;;  %v8120_v8 = vrot.slane %v8118_v12, 4  ;;  %v8126_v44 = vrot.slane %v8124_v21, 5  ;;  %v8597_v18 = vpack.c.bf16 %v16214_v43, %v16214_v43 }
 0x68d   : > { %v8130_v2 = vrot.slane %v8128_v16, 4  ;;  %v8171_v53 = vor.u32 %v8170_v35, %v16342_v5  ;;  %v8102_v43 = vrot.slane %v8101_v61, 4  ;;  %v8148_v12 = vshrl.u32 %v16284_v4, 16  ;;  %v18438_v16 = vld [vmem:[#allocation5_spill] sm:$0xff]  ;;  %v18439_v4 = vld [vmem:[#allocation51_spill] sm:$0xff] }
 0x68e   : > { %8370 = vrot.lane.b32.xlu1 %v18435_v63, %s11912_s15  ;;  %v7647_v36 = vpop.permute.xlu0 %7646  ;;  %v7989_v63 = vmul.f32 %v11294_v50, %v18437_v29  ;;  %v16361_v50 = vrot.slane %v9445_v39, 5  ;;  %v8174_v21 = vshll.u32 %v16351_v14, 16 }
 0x68f   : > { %7715 = vst.msk [vmem:[#allocation3 + $0x70] sm:$0xf] %vm7686_vm7, %v7647_v36  ;;  %8372 = vrot.lane.b32.xlu2 %v8077_v0, %s11912_s15  ;;  %v8142_v36 = vrot.slane %v8141_v45, 4  ;;  %v8530_v0 = vunpack.c.l.bf16 %v8497_v23  ;;  %v16363_v45 = vrot.slane %v9442_v20, 4  ;;  %v8121_v23 = vor.u32 %v8120_v8, %v16296_v15 }
 0x690   : > { %v7637_v3 = vpop.permute.xlu1 %7636  ;;  %v8022_v55 = vpack.c.bf16 %v7989_v63, %v7989_v63  ;;  %v8635_v15 = vshrl.u32 %v8597_v18, 16  ;;  %v8150_v8 = vrot.slane %v8148_v12, 4 }
 0x691   : > { %7710 = vst.msk [vmem:[#allocation3 + $0x5c] sm:$0xf] %vm7686_vm7, %v7637_v3  ;;  %v7786_v7 = vpop.permute.xlu2 %7785  ;;  %v11301_v3 = vunpack.c.l.bf16 %v16344_v25  ;;  %v8147_v32 = vsel %vm13013_vm9, %v8142_v36, %v16338_v13  ;;  %v8563_v35 = vmul.f32 %v8530_v0, %v18438_v16  ;;  %v8172_v36 = vrot.slane %v8171_v53, 4 }
 0x692   : > { %7881 = vst.msk [vmem:[#allocation3 + $0x4] sm:$0xf] %vm7879_vm8, %v7786_v7  ;;  %v8097_v7 = vsel %vm13013_vm9, %v8092_v31, %v16298_v41  ;;  %v8107_v41 = vsel %vm13013_vm9, %v8102_v43, %v16242_v47  ;;  %v8131_v31 = vor.u32 %v8130_v2, %v8126_v44  ;;  %v8154_v0 = vshll.u32 %v8022_v55, 16 }
 0x693   : > { %v7992_v61 = vmul.f32 %v11301_v3, %v18439_v4  ;;  %v8122_v16 = vrot.slane %v8121_v23, 4  ;;  %v8596_v47 = vpack.c.bf16 %v8563_v35, %v8563_v35  ;;  %v11302_v23 = vunpack.c.h.bf16 %v16344_v25  ;;  %v18440_v25 = vld [vmem:[#allocation8_spill] sm:$0xff] }
 0x694   : > { %8386 = vrot.lane.b32.xlu0 %v8147_v32, %s11912_s15  ;;  %v8158_v32 = vshrl.u32 %v8022_v55, 16  ;;  %v8132_v2 = vrot.slane %v8131_v31, 4  ;;  %v8151_v55 = vor.u32 %v8150_v8, %v16338_v13  ;;  %v8156_v12 = vrot.slane %v8154_v0, 5 }
 0x695   : > { %v8025_v3 = vpack.c.bf16 %v7992_v61, %v7992_v61  ;;  %v8127_v43 = vsel %vm13013_vm9, %v8122_v16, %v8126_v44  ;;  %v8630_v35 = vshrl.u32 %v8596_v47, 16  ;;  %v8178_v44 = vshrl.u32 %v16351_v14, 16  ;;  %v18441_v14 = vld [vmem:[#allocation52_spill] sm:$0xff] }
 0x696   : > { %8376 = vrot.lane.b32.xlu1 %v8097_v7, %s11912_s15  ;;  %v7653_v20 = vpop.permute.xlu0 %7652  ;;  %v16385_v7 = vrot.slane %v8174_v21, 5  ;;  %v8160_v21 = vrot.slane %v8158_v32, 4  ;;  %v8137_v31 = vsel %vm13013_vm9, %v8132_v2, %v16306_v58  ;;  %v8152_v58 = vrot.slane %v8151_v55, 4 }
 0x697   : > { %7718 = vst.msk [vmem:[#allocation3 + $0x7c] sm:$0xf] %vm7686_vm7, %v7653_v20  ;;  %8378 = vrot.lane.b32.xlu2 %v8107_v41, %s11912_s15  ;;  %v16393_v20 = vrot.slane %v8635_v15, 7  ;;  %v8184_v61 = vshll.u32 %v8025_v3, 16  ;;  %v8565_v15 = vmul.f32 %v16160_v49, %v18440_v25  ;;  %v7993_v0 = vmul.f32 %v11302_v23, %v18441_v14 }
 0x698   : > { %v7643_v63 = vpop.permute.xlu1 %7642  ;;  %v8177_v53 = vsel %vm13013_vm9, %v8172_v36, %v16385_v7  ;;  %v8161_v8 = vor.u32 %v8160_v21, %v8156_v12  ;;  %v10565_v32 = vrot.slane %v8630_v35, 11  ;;  %v8180_v47 = vrot.slane %v8178_v44, 4 }
 0x699   : > { %7713 = vst.msk [vmem:[#allocation3 + $0x68] sm:$0xf] %vm7686_vm7, %v7643_v63  ;;  %v7792_v39 = vpop.permute.xlu2 %7791  ;;  %v8188_v63 = vshrl.u32 %v8025_v3, 16  ;;  %v8186_v2 = vrot.slane %v8184_v61, 5  ;;  %v16420_v21 = vpack.c.bf16 %v7993_v0, %v7993_v0  ;;  %v9309_v23 = vmul.f32 %v16162_v28, %v18419_v19 }
 0x69a   : > { %7884 = vst.msk [vmem:[#allocation3 + $0x10] sm:$0xf] %vm7879_vm8, %v7792_v39  ;;  %v8638_v39 = vshll.u32 %v8597_v18, 16  ;;  %v8566_v18 = vmul.f32 %v16178_v52, %v12227_v60  ;;  %v8157_v60 = vsel %vm13013_vm9, %v8152_v58, %v8156_v12  ;;  %v8162_v55 = vrot.slane %v8161_v8, 4  ;;  %v9051_v58 = vld [vmem:[#allocation2 + $0x1c] sm:$0xf] }
 0x69b   : > { %v8190_v3 = vrot.slane %v8188_v63, 4  ;;  %v9310_v35 = vmul.f32 %v16160_v49, %v18420_v24  ;;  %v8181_v44 = vor.u32 %v8180_v47, %v16385_v7  ;;  %v8194_v24 = vshll.u32 %v16420_v21, 16 }
 0x69c   : > { %8392 = vrot.lane.b32.xlu0 %v8177_v53, %s11912_s15  ;;  %v8640_v36 = vor.u32 %v8638_v39, %v16393_v20  ;;  %v8599_v39 = vpack.c.bf16 %v8566_v18, %v8566_v18  ;;  %v8167_v61 = vsel %vm13013_vm9, %v8162_v55, %v16342_v5  ;;  %v9342_v49 = vpack.c.bf16 %v9309_v23, %v9309_v23 }
 0x69d   : > { %v8191_v63 = vor.u32 %v8190_v3, %v8186_v2  ;;  %v9343_v25 = vpack.c.bf16 %v9310_v35, %v9310_v35  ;;  %v9311_v55 = vmul.f32 %v16178_v52, %v18422_v30  ;;  %v8642_v30 = vrot.slane %v16393_v20, 4 }
 0x69e   : > { %8382 = vrot.lane.b32.xlu1 %v8127_v43, %s11912_s15  ;;  %v7788_v41 = vpop.permute.xlu0 %7787  ;;  %v8641_v53 = vsel %vm12283_vm4, %v10565_v32, %v8640_v36  ;;  %v8598_v43 = vpack.c.bf16 %v8565_v15, %v8565_v15  ;;  %v8653_v28 = vshrl.u32 %v8599_v39, 16  ;;  %v8182_v36 = vrot.slane %v8181_v44, 4  ;;  %v18442_v15 = vld [vmem:[#allocation55_spill] sm:$0xff] }
 0x69f   : > { %7882 = vst.msk [vmem:[#allocation3 + $0x8] sm:$0xf] %vm7879_vm8, %v7788_v41  ;;  %8384 = vrot.lane.b32.xlu2 %v8137_v31, %s11912_s15  ;;  %v16415_v41 = vld [vmem:[#allocation2 + $0x58] sm:$0xff]   ;;  %v8192_v5 = vrot.slane %v8191_v63, 4  ;;  %v9376_v47 = vshrl.u32 %v9342_v49, 16  ;;  %v9379_v3 = vshll.u32 %v9342_v49, 16 }
 0x6a0   : > { %v7649_v13 = vpop.permute.xlu1 %7648  ;;  %v11309_v12 = vunpack.c.l.bf16 %v16415_v41  ;;  %v8644_v19 = vshrl.u32 %v8598_v43, 16  ;;  %v16438_v0 = vrot.slane %v8653_v28, 7  ;;  %v8187_v32 = vsel %vm13013_vm9, %v8182_v36, %v8186_v2  ;;  %v11632_v28 = vld [vmem:[#allocation2 + $0x60] sm:$0xff]  }
 0x6a1   : > { %7716 = vst.msk [vmem:[#allocation3 + $0x74] sm:$0xf] %vm7686_vm7, %v7649_v13  ;;  %v7798_v16 = vpop.permute.xlu2 %7797  ;;  %v9378_v52 = vrot.slane %v9376_v47, 4  ;;  %v16464_v20 = vunpack.c.h.bf16 %v11632_v28 }
 0x6a2   : > { %7887 = vst.msk [vmem:[#allocation3 + $0x1c] sm:$0xf] %vm7879_vm8, %v7798_v16  ;;  %v7996_v18 = vmul.f32 %v11309_v12, %v18442_v15  ;;  %v8646_v8 = vrot.slane %v8644_v19, 7  ;;  %v16443_v16 = vrot.slane %v8194_v24, 5  ;;  %v11310_v19 = vunpack.c.h.bf16 %v16415_v41 }
 0x6a4   : > { %8921 = vrot.lane.b32.xlu0 %v8641_v53, %s11913_s13  ;;  %v8656_v53 = vshll.u32 %v8599_v39, 16  ;;  %v8197_v35 = vsel %vm13013_vm9, %v8192_v5, %v16443_v16  ;;  %v8029_v44 = vpack.c.bf16 %v7996_v18, %v7996_v18  ;;  %v8651_v24 = vrot.slane %v8646_v8, 4 }
 0x6a6   : > { %8388 = vrot.lane.b32.xlu1 %v8157_v60, %s11912_s15  ;;  %v7794_v31 = vpop.permute.xlu0 %7793  ;;  %v8647_v60 = vshll.u32 %v8598_v43, 16  ;;  %v8658_v12 = vor.u32 %v8656_v53, %v16438_v0  ;;  %v9389_v43 = vshrl.u32 %v9343_v25, 16  ;;  %v8224_v5 = vshll.u32 %v8029_v44, 16 }
 0x6a7   : > { %7885 = vst.msk [vmem:[#allocation3 + $0x14] sm:$0xf] %vm7879_vm8, %v7794_v31  ;;  %8390 = vrot.lane.b32.xlu2 %v8167_v61, %s11912_s15  ;;  %v9385_v31 = vshll.u32 %v9343_v25, 16  ;;  %v18443_v61 = vld [vmem:[#allocation6_spill] sm:$0xff]  ;;  %v8228_v18 = vshrl.u32 %v8029_v44, 16  ;;  %v16462_v53 = vunpack.c.l.bf16 %v11632_v28 }
 0x6a8   : > { %v7784_v13 = vpop.permute.xlu1 %7783  ;;  %v8567_v2 = vmul.f32 %v16188_v38, %v18443_v61  ;;  %v8649_v39 = vor.u32 %v8647_v60, %v8646_v8  ;;  %v8659_v25 = vsel %vm12283_vm4, %v8651_v24, %v8658_v12 }
 0x6a9   : > { %7880 = vst.msk [vmem:[#allocation3] sm:$0xf] %vm7879_vm8, %v7784_v13  ;;  %v7804_v7 = vpop.permute.xlu2 %7803  ;;  %v9381_v13 = vrot.slane %v9379_v3, 5  ;;  %v9387_v36 = vrot.slane %v9385_v31, 5  ;;  %v18444_v3 = vld [vmem:[#allocation53_spill] sm:$0xff]  ;;  %v16473_v31 = vrot.slane %v8224_v5, 5 }
 0x6aa   : > { %7890 = vst.msk [vmem:[#allocation3 + $0x28] sm:$0xf] %vm7879_vm8, %v7804_v7  ;;  %v9344_v7 = vpack.c.bf16 %v9311_v55, %v9311_v55  ;;  %v8650_v8 = vsel %vm12283_vm4, %v8642_v30, %v8649_v39  ;;  %v7997_v60 = vmul.f32 %v11310_v19, %v18444_v3  ;;  %v8230_v44 = vrot.slane %v8228_v18, 4 }
 0x6ab   : > { %v9382_v47 = vor.u32 %v9381_v13, %v9378_v52  ;;  %v8582_v39 = vmul.f32 %v16462_v53, %v18374_v40 }
 0x6ac   : > { %9116 = vrot.lane.b32.xlu0 %v9051_v58, %s11914_s17  ;;  %v8600_v58 = vpack.c.bf16 %v8567_v2, %v8567_v2  ;;  %v9395_v55 = vshll.u32 %v9344_v7, 16  ;;  %v9312_v2 = vmul.f32 %v16188_v38, %v18421_v11  ;;  %v16484_v52 = vpack.c.bf16 %v7997_v60, %v7997_v60 }
 0x6ad   : > { %v9383_v30 = vrot.slane %v9382_v47, 4  ;;  %v8231_v11 = vor.u32 %v8230_v44, %v16473_v31  ;;  %v16490_v40 = vpack.c.bf16 %v8582_v39, %v8582_v39  ;;  %v9399_v47 = vshrl.u32 %v9344_v7, 16 }
 0x6ae   : > { %8394 = vrot.lane.b32.xlu1 %v8187_v32, %s11912_s15  ;;  %v7800_v23 = vpop.permute.xlu0 %7799  ;;  %v9391_v32 = vrot.slane %v9389_v43, 4  ;;  %v8662_v61 = vshrl.u32 %v8600_v58, 16  ;;  %v8583_v43 = vmul.f32 %v16464_v20, %v18376_v6  ;;  %v9397_v28 = vrot.slane %v9395_v55, 5 }
 0x6af   : > { %7888 = vst.msk [vmem:[#allocation3 + $0x20] sm:$0xf] %vm7879_vm8, %v7800_v23  ;;  %8396 = vrot.lane.b32.xlu2 %v8197_v35, %s11912_s15  ;;  %v9050_v35 = vld [vmem:[#allocation2 + $0x18] sm:$0xf]  ;;  %v9345_v24 = vpack.c.bf16 %v9312_v2, %v9312_v2  ;;  %v9327_v6 = vmul.f32 %v16462_v53, %v18442_v15 }
 0x6b0   : > { %v7790_v63 = vpop.permute.xlu1 %7789  ;;  %v9392_v12 = vor.u32 %v9391_v32, %v9387_v36  ;;  %v16488_v38 = vrot.slane %v8662_v61, 7  ;;  %v8616_v18 = vpack.c.bf16 %v8583_v43, %v8583_v43  ;;  %v8234_v32 = vshll.u32 %v16484_v52, 16 }
 0x6b1   : > { %7883 = vst.msk [vmem:[#allocation3 + $0xc] sm:$0xf] %vm7879_vm8, %v7790_v63  ;;  %v7810_v49 = vpop.permute.xlu2 %7809  ;;  %v9405_v44 = vshll.u32 %v9345_v24, 16 }
 0x6b2   : > { %7893 = vst.msk [vmem:[#allocation3 + $0x34] sm:$0xf] %vm7879_vm8, %v7810_v49  ;;  %v9053_v49 = vld [vmem:[#allocation2 + $0x24] sm:$0xf]  ;;  %v9393_v5 = vrot.slane %v9392_v12, 4  ;;  %v8806_v7 = vshrl.u32 %v8616_v18, 16 }
 0x6b3   : > { %v16507_v2 = vrot.slane %v8234_v32, 5  ;;  %v9409_v12 = vshrl.u32 %v9345_v24, 16 }
 0x6b4   : > { %8925 = vrot.lane.b32.xlu0 %v8659_v25, %s11913_s13  ;;  %v9388_v25 = vsel %vm13013_vm9, %v9383_v30, %v9387_v36  ;;  %v9398_v60 = vsel %vm13013_vm9, %v9393_v5, %v9397_v28  ;;  %v8797_v36 = vshrl.u32 %v16490_v40, 16  ;;  %v9407_v30 = vrot.slane %v9405_v44, 5 }
 0x6b5   : > { %v9411_v24 = vrot.slane %v9409_v12, 4 }
 0x6b6   : > { %8923 = vrot.lane.b32.xlu1 %v8650_v8, %s11913_s13  ;;  %v7806_v23 = vpop.permute.xlu0 %7805  ;;  %v8665_v8 = vshll.u32 %v8600_v58, 16  ;;  %v9360_v58 = vpack.c.bf16 %v9327_v6, %v9327_v6 }
 0x6b7   : > { %7891 = vst.msk [vmem:[#allocation3 + $0x2c] sm:$0xf] %vm7879_vm8, %v7806_v23  ;;  %9114 = vrot.lane.b32.xlu2 %v9050_v35, %s11914_s17  ;;  %v8232_v23 = vrot.slane %v8231_v11, 4  ;;  %v8660_v35 = vrot.slane %v16438_v0, 4  ;;  %v16515_v11 = vrot.slane %v8806_v7, 7 }
 0x6b8   : > { %v7796_v63 = vpop.permute.xlu1 %7795  ;;  %v8667_v15 = vor.u32 %v8665_v8, %v16488_v38  ;;  %v9559_v5 = vshrl.u32 %v9360_v58, 16  ;;  %v8581_v8 = vmul.f32 %v11310_v19, %v18413_v10 }
 0x6b9   : > { %7886 = vst.msk [vmem:[#allocation3 + $0x18] sm:$0xf] %vm7879_vm8, %v7796_v63  ;;  %v7816_v13 = vpop.permute.xlu2 %7815  ;;  %v9401_v63 = vrot.slane %v9399_v47, 4  ;;  %v8237_v0 = vsel %vm13013_vm9, %v8232_v23, %v16507_v2  ;;  %v8809_v47 = vshll.u32 %v8616_v18, 16  ;;  %v9052_v23 = vld [vmem:[#allocation2 + $0x20] sm:$0xf]  ;;  %v9412_v18 = vor.u32 %v9411_v24, %v9407_v30 }
 0x6ba   : > { %7896 = vst.msk [vmem:[#allocation3 + $0x40] sm:$0xf] %vm7879_vm8, %v7816_v13  ;;  %v8668_v43 = vsel %vm12283_vm4, %v8660_v35, %v8667_v15  ;;  %v8799_v13 = vrot.slane %v8797_v36, 7  ;;  %v8238_v35 = vshrl.u32 %v16484_v52, 16  ;;  %v9561_v10 = vrot.slane %v9559_v5, 4 }
 0x6bb   : > { %v9402_v6 = vor.u32 %v9401_v63, %v9397_v28  ;;  %v16535_v44 = vpack.c.bf16 %v8581_v8, %v8581_v8  ;;  %v9413_v12 = vrot.slane %v9412_v18, 4 }
 0x6bc   : > { %9120 = vrot.lane.b32.xlu0 %v9053_v49, %s11914_s17  ;;  %v9555_v49 = vshll.u32 %v9360_v58, 16  ;;  %v8804_v15 = vrot.slane %v8799_v13, 4  ;;  %v8240_v36 = vrot.slane %v8238_v35, 4 }
 0x6bd   : > { %v9403_v19 = vrot.slane %v9402_v6, 4  ;;  %v9418_v6 = vsel %vm13013_vm9, %v9413_v12, %v16261_v59 }
 0x6be   : > { %9699 = vrot.lane.b32.xlu1 %v9388_v25, %s11905_s16  ;;  %v7812_v55 = vpop.permute.xlu0 %7811  ;;  %v18445_v25 = vld [vmem:[#allocation57_spill] sm:$0xff]  ;;  %v16530_v41 = vrot.slane %v9555_v49, 5  ;;  %v8241_v24 = vor.u32 %v8240_v36, %v16507_v2 }
 0x6bf   : > { %7894 = vst.msk [vmem:[#allocation3 + $0x38] sm:$0xf] %vm7879_vm8, %v7812_v55  ;;  %9701 = vrot.lane.b32.xlu2 %v9398_v60, %s11905_s16  ;;  %v7998_v32 = vmul.f32 %v16462_v53, %v18445_v25  ;;  %v9328_v60 = vmul.f32 %v16464_v20, %v18444_v3  ;;  %v8811_v53 = vor.u32 %v8809_v47, %v16515_v11  ;;  %v11649_v49 = vld [vmem:[#allocation2 + $0x68] sm:$0xff]  }
 0x6c0   : > { %v7802_v61 = vpop.permute.xlu1 %7801  ;;  %v9562_v58 = vor.u32 %v9561_v10, %v16530_v41  ;;  %v9408_v63 = vsel %vm13013_vm9, %v9403_v19, %v9407_v30  ;;  %v8242_v35 = vrot.slane %v8241_v24, 4  ;;  %v18446_v10 = vld [vmem:[#allocation58_spill] sm:$0xff] }
 0x6c1   : > { %7889 = vst.msk [vmem:[#allocation3 + $0x24] sm:$0xf] %vm7879_vm8, %v7802_v61  ;;  %v7822_v39 = vpop.permute.xlu2 %7821  ;;  %v16533_v3 = vpack.c.bf16 %v7998_v32, %v7998_v32  ;;  %v9361_v61 = vpack.c.bf16 %v9328_v60, %v9328_v60  ;;  %v8812_v7 = vsel %vm12283_vm4, %v8804_v15, %v8811_v53  ;;  %v8800_v60 = vshll.u32 %v16490_v40, 16 }
 0x6c2   : > { %7899 = vst.msk [vmem:[#allocation3 + $0x4c] sm:$0xf] %vm7879_vm8, %v7822_v39  ;;  %v9563_v30 = vrot.slane %v9562_v58, 4  ;;  %v7999_v19 = vmul.f32 %v16464_v20, %v18446_v10  ;;  %v18447_v20 = vld [vmem:[#allocation56_spill] sm:$0xff] }
 0x6c3   : > { %v8244_v39 = vshll.u32 %v16533_v3, 16  ;;  %v8802_v2 = vor.u32 %v8800_v60, %v8799_v13 }
 0x6c4   : > { %8404 = vrot.lane.b32.xlu0 %v8237_v0, %s11912_s15  ;;  %v8788_v0 = vshrl.u32 %v16535_v44, 16  ;;  %v8032_v58 = vpack.c.bf16 %v7999_v19, %v7999_v19  ;;  %v8669_v19 = vrot.slane %v16488_v38, 4 }
 0x6c5   : > { %v16554_v8 = vrot.slane %v8244_v39, 5 }
 0x6c6   : > { %8927 = vrot.lane.b32.xlu1 %v8668_v43, %s11913_s13  ;;  %v7818_v55 = vpop.permute.xlu0 %7817  ;;  %v9565_v43 = vshll.u32 %v9361_v61, 16  ;;  %v16556_v47 = vrot.slane %v8788_v0, 7  ;;  %v8254_v0 = vshll.u32 %v8032_v58, 16 }
 0x6c7   : > { %7897 = vst.msk [vmem:[#allocation3 + $0x44] sm:$0xf] %vm7879_vm8, %v7818_v55  ;;  %9118 = vrot.lane.b32.xlu2 %v9052_v23, %s11914_s17  ;;  %v16559_v55 = vunpack.c.l.bf16 %v11649_v49  ;;  %v8247_v15 = vsel %vm13013_vm9, %v8242_v35, %v16554_v8 }
 0x6c8   : > { %v7808_v28 = vpop.permute.xlu1 %7807  ;;  %v9567_v23 = vrot.slane %v9565_v43, 5  ;;  %v8795_v53 = vrot.slane %v16556_v47, 4  ;;  %v8258_v43 = vshrl.u32 %v8032_v58, 16 }
 0x6c9   : > { %7892 = vst.msk [vmem:[#allocation3 + $0x30] sm:$0xf] %vm7879_vm8, %v7808_v28  ;;  %v7828_v52 = vpop.permute.xlu2 %7827  ;;  %v9329_v40 = vmul.f32 %v16559_v55, %v18445_v25  ;;  %v8000_v12 = vmul.f32 %v16559_v55, %v18447_v20 }
 0x6ca   : > { %7902 = vst.msk [vmem:[#allocation3 + $0x58] sm:$0xf] %vm7879_vm8, %v7828_v52  ;;  %v9568_v28 = vsel %vm13013_vm9, %v9563_v30, %v9567_v23  ;;  %v8803_v18 = vsel %vm12283_vm4, %v8795_v53, %v8802_v2  ;;  %v9569_v52 = vshrl.u32 %v9361_v61, 16  ;;  %v9068_v61 = vld [vmem:[#allocation2 + $0x60] sm:$0xf]  ;;  %v16590_v30 = vunpack.c.h.bf16 %v11649_v49 }
 0x6cb   : > { %v16592_v60 = vpack.c.bf16 %v8000_v12, %v8000_v12  ;;  %v16598_v2 = vrot.slane %v8254_v0, 5 }
 0x6cc   : > { %8959 = vrot.lane.b32.xlu0 %v8812_v7, %s11913_s13  ;;  %v16579_v7 = vpack.c.bf16 %v9329_v40, %v9329_v40  ;;  %v9330_v53 = vmul.f32 %v16590_v30, %v18446_v10  ;;  %v8585_v12 = vmul.f32 %v16590_v30, %v18381_v56 }
 0x6cd   : > { %v8264_v49 = vshll.u32 %v16592_v60, 16 }
 0x6ce   : > { %9703 = vrot.lane.b32.xlu1 %v9408_v63, %s11905_s16  ;;  %v7824_v5 = vpop.permute.xlu0 %7823  ;;  %v9571_v63 = vrot.slane %v9569_v52, 4  ;;  %v9575_v39 = vshll.u32 %v16579_v7, 16  ;;  %v8248_v52 = vshrl.u32 %v16533_v3, 16  ;;  %v9363_v38 = vpack.c.bf16 %v9330_v53, %v9330_v53  ;;  %v9070_v53 = vld [vmem:[#allocation2 + $0x68] sm:$0xf] }
 0x6cf   : > { %7900 = vst.msk [vmem:[#allocation3 + $0x50] sm:$0xf] %vm7879_vm8, %v7824_v5  ;;  %9705 = vrot.lane.b32.xlu2 %v9418_v6, %s11905_s16  ;;  %v9069_v6 = vld [vmem:[#allocation2 + $0x64] sm:$0xf]  ;;  %v8618_v56 = vpack.c.bf16 %v8585_v12, %v8585_v12 }
 0x6d0   : > { %v7814_v32 = vpop.permute.xlu1 %7813  ;;  %v9572_v24 = vor.u32 %v9571_v63, %v9567_v23  ;;  %v8250_v3 = vrot.slane %v8248_v52, 4  ;;  %v9589_v0 = vshrl.u32 %v9363_v38, 16 }
 0x6d1   : > { %7895 = vst.msk [vmem:[#allocation3 + $0x3c] sm:$0xf] %vm7879_vm8, %v7814_v32  ;;  %v7834_v59 = vpop.permute.xlu2 %7833 }
 0x6d2   : > { %7905 = vst.msk [vmem:[#allocation3 + $0x64] sm:$0xf] %vm7879_vm8, %v7834_v59  ;;  %v8674_v59 = vshll.u32 %v16190_v33, 16  ;;  %v9573_v23 = vrot.slane %v9572_v24, 4  ;;  %v18448_v33 = vsel %vm13013_vm9, %v16287_v42, %v16277_v37  ;;  %v16623_v37 = vrot.slane %v8264_v49, 5 }
 0x6d3   : > { %v8251_v24 = vor.u32 %v8250_v3, %v16554_v8  ;;  %v8824_v8 = vshrl.u32 %v8618_v56, 16 }
 0x6d4   : > { %9735 = vrot.lane.b32.xlu0 %v9568_v28, %s11905_s16  ;;  %v8260_v28 = vrot.slane %v8258_v43, 4 }
 0x6d5   : > { %v8252_v49 = vrot.slane %v8251_v24, 4  ;;  %v9449_v24 = vshrl.u32 %v16320_v26, 16 }
 0x6d6   : > { %8406 = vrot.lane.b32.xlu1 %v8247_v15, %s11912_s15  ;;  %v7830_v13 = vpop.permute.xlu0 %7829  ;;  %v8676_v15 = vor.u32 %v8674_v59, %v16232_v51  ;;  %v8261_v51 = vor.u32 %v8260_v28, %v16598_v2 }
 0x6d7   : > { %7903 = vst.msk [vmem:[#allocation3 + $0x5c] sm:$0xf] %vm7879_vm8, %v7830_v13  ;;  %8957 = vrot.lane.b32.xlu2 %v8803_v18, %s11913_s13  ;;  %v16619_v18 = vld [vmem:[#allocation2 + $0x70] sm:$0xff]  }
 0x6d8   : > { %v7820_v36 = vpop.permute.xlu1 %7819  ;;  %v8677_v10 = vsel %vm12283_vm4, %v8669_v19, %v8676_v15  ;;  %v16630_v63 = vunpack.c.l.bf16 %v16619_v18  ;;  %v16653_v19 = vld [vmem:[#allocation2 + $0x38] sm:$0xff]  }
 0x6d9   : > { %7898 = vst.msk [vmem:[#allocation3 + $0x48] sm:$0xf] %vm7879_vm8, %v7820_v36  ;;  %v7840_v25 = vpop.permute.xlu2 %7839  ;;  %v8584_v36 = vmul.f32 %v16559_v55, %v18414_v34  ;;  %v9054_v34 = vld [vmem:[#allocation2 + $0x28] sm:$0xf] }
 0x6da   : > { %7908 = vst.msk [vmem:[#allocation3 + $0x70] sm:$0xf] %vm7879_vm8, %v7840_v25  ;;  %v8262_v25 = vrot.slane %v8261_v51, 4  ;;  %v9331_v43 = vmul.f32 %v16630_v63, %v18447_v20  ;;  %v11626_v20 = vld [vmem:[#allocation2 + $0x30] sm:$0xff]  }
 0x6db   : > { %v8617_v55 = vpack.c.bf16 %v8584_v36, %v8584_v36  ;;  %v11349_v51 = vunpack.c.l.bf16 %v11626_v20  ;;  %v11350_v52 = vunpack.c.h.bf16 %v11626_v20  ;;  %v8586_v20 = vmul.f32 %v16630_v63, %v18383_v46 }
 0x6dc   : > { %8931 = vrot.lane.b32.xlu0 %v16265_v27, %s11913_s13  ;;  %v16595_v27 = vrot.slane %v9575_v39, 5  ;;  %v9585_v39 = vshll.u32 %v9363_v38, 16  ;;  %v16648_v15 = vpack.c.bf16 %v9331_v43, %v9331_v43  ;;  %v8257_v38 = vsel %vm13013_vm9, %v8252_v49, %v16598_v2 }
 0x6dd   : > { %v8815_v28 = vshrl.u32 %v8617_v55, 16  ;;  %v8818_v36 = vshll.u32 %v8617_v55, 16 }
 0x6de   : > { %9150 = vrot.lane.b32.xlu1 %v9068_v61, %s11914_s17  ;;  %v7836_v5 = vpop.permute.xlu0 %7835  ;;  %v9578_v40 = vsel %vm13013_vm9, %v9573_v23, %v16595_v27  ;;  %v8267_v61 = vsel %vm13013_vm9, %v8262_v25, %v16623_v37  ;;  %v16645_v59 = vrot.slane %v9585_v39, 5  ;;  %v16665_v25 = vrot.slane %v8824_v8, 7 }
 0x6df   : > { %7906 = vst.msk [vmem:[#allocation3 + $0x68] sm:$0xf] %vm7879_vm8, %v7836_v5  ;;  %9152 = vrot.lane.b32.xlu2 %v9069_v6, %s11914_s17  ;;  %v9055_v6 = vld [vmem:[#allocation2 + $0x2c] sm:$0xf]  ;;  %v8570_v39 = vmul.f32 %v11349_v51, %v12279_v57  ;;  %v9451_v8 = vrot.slane %v9449_v24, 4  ;;  %v8619_v51 = vpack.c.bf16 %v8586_v20, %v8586_v20 }
 0x6e0   : > { %v7826_v32 = vpop.permute.xlu1 %7825 }
 0x6e1   : > { %7901 = vst.msk [vmem:[#allocation3 + $0x54] sm:$0xf] %vm7879_vm8, %v7826_v32  ;;  %v7846_v35 = vpop.permute.xlu2 %7845  ;;  %v9452_v46 = vor.u32 %v9451_v8, %v16361_v50 }
 0x6e2   : > { %7911 = vst.msk [vmem:[#allocation3 + $0x7c] sm:$0xf] %vm7879_vm8, %v7846_v35  ;;  %v9591_v35 = vrot.slane %v9589_v0, 4 }
 0x6e4   : > { %9707 = vrot.lane.b32.xlu0 %v18448_v33, %s11905_s16  ;;  %v9592_v33 = vor.u32 %v9591_v35, %v16645_v59 }
 0x6e6   : > { %9737 = vrot.lane.b32.xlu1 %v9578_v40, %s11905_s16  ;;  %v7842_v13 = vpop.permute.xlu0 %7841  ;;  %v8817_v40 = vrot.slane %v8815_v28, 7  ;;  %v9593_v12 = vrot.slane %v9592_v33, 4  ;;  %v9056_v33 = vld [vmem:[#allocation2 + $0x30] sm:$0xf] }
 0x6e7   : > { %7909 = vst.msk [vmem:[#allocation3 + $0x74] sm:$0xf] %vm7879_vm8, %v7842_v13  ;;  %8929 = vrot.lane.b32.xlu2 %v8677_v10, %s11913_s13  ;;  %v18449_v13 = vsel %vm13013_vm9, %v16309_v17, %v16304_v22  ;;  %v9595_v10 = vshll.u32 %v16648_v15, 16  ;;  %v11417_v22 = vunpack.c.l.bf16 %v16653_v19 }
 0x6e8   : > { %v7832_v42 = vpop.permute.xlu1 %7831  ;;  %v8820_v17 = vor.u32 %v8818_v36, %v8817_v40  ;;  %v8822_v55 = vrot.slane %v8817_v40, 4 }
 0x6e9   : > { %7904 = vst.msk [vmem:[#allocation3 + $0x60] sm:$0xf] %vm7879_vm8, %v7832_v42  ;;  %v8373_v58 = vpop.permute.xlu2 %8372  ;;  %v16673_v2 = vrot.slane %v9595_v10, 5  ;;  %v9317_v57 = vmul.f32 %v11417_v22, %v18433_v48 }
 0x6ea   : > { %8467 = vst.msk [vmem:[#allocation3 + $0x8] sm:$0xf] %vm8464_vm10, %v8373_v58  ;;  %v9579_v58 = vshrl.u32 %v16579_v7, 16  ;;  %v8813_v7 = vrot.slane %v16515_v11, 4  ;;  %v8603_v11 = vpack.c.bf16 %v8570_v39, %v8570_v39 }
 0x6ec   : > { %8410 = vrot.lane.b32.xlu0 %v8267_v61, %s11912_s15  ;;  %v8827_v61 = vshll.u32 %v8618_v56, 16  ;;  %v8689_v26 = vshrl.u32 %v8603_v11, 16 }
 0x6ee   : > { %9122 = vrot.lane.b32.xlu1 %v9054_v34, %s11914_s17  ;;  %v8369_v5 = vpop.permute.xlu0 %8368  ;;  %v8571_v34 = vmul.f32 %v11350_v52, %v12365_v9  ;;  %v8829_v43 = vor.u32 %v8827_v61, %v16665_v25  ;;  %v8821_v9 = vsel %vm12283_vm4, %v8813_v7, %v8820_v17  ;;  %v8691_v10 = vrot.slane %v8689_v26, 7  ;;  %v18452_v26 = vld [vmem:[#allocation61_spill] sm:$0xff] }
 0x6ef   : > { %8465 = vst.msk [vmem:[#allocation3] sm:$0xf] %vm8464_vm10, %v8369_v5  ;;  %9124 = vrot.lane.b32.xlu2 %v9055_v6, %s11914_s17  ;;  %v9581_v5 = vrot.slane %v9579_v58, 4  ;;  %v9598_v6 = vsel %vm13013_vm9, %v9593_v12, %v16673_v2  ;;  %v18450_v58 = vld [vmem:[#allocation60_spill] sm:$0xff]  ;;  %v8833_v61 = vshrl.u32 %v8619_v51, 16  ;;  %v8687_v7 = vrot.slane %v16239_v54, 4 }
 0x6f0   : > { %v7838_v32 = vpop.permute.xlu1 %7837  ;;  %v8604_v28 = vpack.c.bf16 %v8571_v34, %v8571_v34  ;;  %v9453_v34 = vrot.slane %v9452_v46, 4  ;;  %v16730_v54 = vunpack.c.h.bf16 %v16619_v18 }
 0x6f1   : > { %7907 = vst.msk [vmem:[#allocation3 + $0x6c] sm:$0xf] %vm7879_vm8, %v7838_v32  ;;  %v8379_v23 = vpop.permute.xlu2 %8378  ;;  %v8830_v32 = vsel %vm12283_vm4, %v8822_v55, %v8829_v43  ;;  %v9582_v35 = vor.u32 %v9581_v5, %v16595_v27  ;;  %v8696_v55 = vrot.slane %v8691_v10, 4 }
 0x6f2   : > { %8470 = vst.msk [vmem:[#allocation3 + $0x14] sm:$0xf] %vm8464_vm10, %v8379_v23  ;;  %v16695_v23 = vpack.c.bf16 %v9317_v57, %v9317_v57  ;;  %v8698_v27 = vshrl.u32 %v8604_v28, 16 }
 0x6f4   : > { %9154 = vrot.lane.b32.xlu0 %v9070_v53, %s11914_s17  ;;  %v9583_v53 = vrot.slane %v9582_v35, 4  ;;  %v9455_v40 = vshll.u32 %v16695_v23, 16  ;;  %v16708_v36 = vrot.slane %v8698_v27, 7 }
 0x6f6   : > { %9709 = vrot.lane.b32.xlu1 %v18449_v13, %s11905_s16  ;;  %v8375_v42 = vpop.permute.xlu0 %8374  ;;  %v9071_v13 = vld [vmem:[#allocation2 + $0x6c] sm:$0xf]  ;;  %v16713_v17 = vrot.slane %v9455_v40, 5 }
 0x6f7   : > { %8468 = vst.msk [vmem:[#allocation3 + $0xc] sm:$0xf] %vm8464_vm10, %v8375_v42  ;;  %8408 = vrot.lane.b32.xlu2 %v8257_v38, %s11912_s15  ;;  %v9588_v42 = vsel %vm13013_vm9, %v9583_v53, %v16645_v59  ;;  %v8692_v38 = vshll.u32 %v8603_v11, 16  ;;  %v8836_v11 = vshll.u32 %v8619_v51, 16  ;;  %v18453_v53 = vld [vmem:[#allocation25_spill] sm:$0xff] }
 0x6f8   : > { %v7844_v3 = vpop.permute.xlu1 %7843  ;;  %v9458_v5 = vsel %vm13013_vm9, %v9453_v34, %v16713_v17  ;;  %v8587_v27 = vmul.f32 %v16730_v54, %v18453_v53 }
 0x6f9   : > { %7910 = vst.msk [vmem:[#allocation3 + $0x78] sm:$0xf] %vm7879_vm8, %v7844_v3  ;;  %v8385_v0 = vpop.permute.xlu2 %8384  ;;  %v8001_v3 = vmul.f32 %v16590_v30, %v18450_v58  ;;  %v8694_v39 = vor.u32 %v8692_v38, %v8691_v10 }
 0x6fa   : > { %8473 = vst.msk [vmem:[#allocation3 + $0x20] sm:$0xf] %vm8464_vm10, %v8385_v0  ;;  %v8701_v0 = vshll.u32 %v8604_v28, 16 }
 0x6fb   : > { %v8034_v43 = vpack.c.bf16 %v8001_v3, %v8001_v3  ;;  %v8695_v57 = vsel %vm12283_vm4, %v8687_v7, %v8694_v39 }
 0x6fc   : > { %9741 = vrot.lane.b32.xlu0 %v9598_v6, %s11905_s16  ;;  %v8703_v30 = vor.u32 %v8701_v0, %v16708_v36  ;;  %v16723_v6 = vrot.slane %v8833_v61, 7  ;;  %v11915_v61 = vmov 65535   ;;  %v18454_v0 = vsel %vm13013_vm9, %v16363_v45, %v16361_v50  ;;  %v10693_v45 = vld [vmem:[%s17716_s5] sm:$0xff] }
 0x6fd   : > { %v8278_v35 = vshrl.u32 %v8034_v43, 16  ;;  %v10010_v39 = vsel %vm10008_vm12, 4294967295, %v11915_v61 }
 0x6fe   : > { %8961 = vrot.lane.b32.xlu1 %v8821_v9, %s11913_s13  ;;  %v8381_v56 = vpop.permute.xlu0 %8380  ;;  %v8268_v9 = vshrl.u32 %v16592_v60, 16  ;;  %v8838_v20 = vor.u32 %v8836_v11, %v16723_v6  ;;  %v18451_v60 = vld [vmem:[#allocation11_spill] sm:$0xff]  ;;  %v10011_v7 = vsel %vm10009_vm13, %v10010_v39, 0 }
 0x6ff   : > { %8471 = vst.msk [vmem:[#allocation3 + $0x18] sm:$0xf] %vm8464_vm10, %v8381_v56  ;;  %8963 = vrot.lane.b32.xlu2 %v8830_v32, %s11913_s13  ;;  %v8704_v56 = vsel %vm12283_vm4, %v8696_v55, %v8703_v30  ;;  %v8274_v32 = vshll.u32 %v8034_v43, 16  ;;  %v8572_v18 = vmul.f32 %v11417_v22, %v18451_v60  ;;  %v8620_v22 = vpack.c.bf16 %v8587_v27, %v8587_v27  ;;  %v11651_v55 = vld [vmem:[#allocation2 + $0x78] sm:$0xff]  }
 0x700   : > { %v8371_v48 = vpop.permute.xlu1 %8370  ;;  %v8270_v8 = vrot.slane %v8268_v9, 4  ;;  %v16774_v50 = vunpack.c.l.bf16 %v11651_v55  ;;  %v8840_v27 = vrot.slane %v16723_v6, 4  ;;  %v18456_v39 = vld [vmem:[#allocation59_spill] sm:$0xff] }
 0x701   : > { %8466 = vst.msk [vmem:[#allocation3 + $0x4] sm:$0xf] %vm8464_vm10, %v8371_v48  ;;  %v8391_v49 = vpop.permute.xlu2 %8390  ;;  %v8831_v48 = vrot.slane %v16665_v25, 4  ;;  %v8276_v40 = vrot.slane %v8274_v32, 5  ;;  %v8280_v25 = vrot.slane %v8278_v35, 4  ;;  %v8605_v10 = vpack.c.bf16 %v8572_v18, %v8572_v18 }
 0x702   : > { %8476 = vst.msk [vmem:[#allocation3 + $0x2c] sm:$0xf] %vm8464_vm10, %v8391_v49  ;;  %v8002_v49 = vmul.f32 %v16630_v63, %v18452_v26  ;;  %v8271_v63 = vor.u32 %v8270_v8, %v16623_v37  ;;  %v8842_v43 = vshrl.u32 %v8620_v22, 16  ;;  %v9599_v32 = vshrl.u32 %v16648_v15, 16 }
 0x703   : > { %v8839_v51 = vsel %vm12283_vm4, %v8831_v48, %v8838_v20  ;;  %v8707_v34 = vshrl.u32 %v8605_v10, 16  ;;  %v8710_v60 = vshll.u32 %v8605_v10, 16 }
 0x704   : > { %9126 = vrot.lane.b32.xlu0 %v9056_v33, %s11914_s17  ;;  %v16749_v46 = vpack.c.bf16 %v8002_v49, %v8002_v49  ;;  %v8272_v30 = vrot.slane %v8271_v63, 4  ;;  %v16788_v48 = vrot.slane %v8842_v43, 7  ;;  %v8845_v49 = vshll.u32 %v8620_v22, 16 }
 0x706   : > { %9156 = vrot.lane.b32.xlu1 %v9071_v13, %s11914_s17  ;;  %v8387_v52 = vpop.permute.xlu0 %8386  ;;  %v9057_v13 = vld [vmem:[#allocation2 + $0x34] sm:$0xf]  ;;  %v8277_v35 = vsel %vm13013_vm9, %v8272_v30, %v8276_v40 }
 0x707   : > { %8474 = vst.msk [vmem:[#allocation3 + $0x24] sm:$0xf] %vm8464_vm10, %v8387_v52  ;;  %9739 = vrot.lane.b32.xlu2 %v9588_v42, %s11905_s16  ;;  %v10636_v52 = vld [vmem:[%s17716_s5 + $0x8] sm:$0xf]  ;;  %v10694_v42 = vld [vmem:[%s17716_s5 + $0x8] sm:$0x30] }
 0x708   : > { %v8377_v12 = vpop.permute.xlu1 %8376  ;;  %v10637_v38 = vor.u32 %v10694_v42, %v10636_v52  ;;  %v8288_v42 = vshrl.u32 %v16749_v46, 16  ;;  %v18458_v30 = vld [vmem:[#allocation34_spill] sm:$0xff] }
 0x709   : > { %8469 = vst.msk [vmem:[#allocation3 + $0x10] sm:$0xf] %vm8464_vm10, %v8377_v12  ;;  %v8397_v59 = vpop.permute.xlu2 %8396  ;;  %v8281_v12 = vor.u32 %v8280_v25, %v8276_v40  ;;  %v8847_v25 = vor.u32 %v8845_v49, %v16788_v48 }
 0x70a   : > { %8479 = vst.msk [vmem:[#allocation3 + $0x38] sm:$0xf] %vm8464_vm10, %v8397_v59  ;;  %v8284_v59 = vshll.u32 %v16749_v46, 16 }
 0x70b   : > { %v8282_v11 = vrot.slane %v8281_v12, 4 }
 0x70c   : > { %9713 = vrot.lane.b32.xlu0 %v9458_v5, %s11905_s16  ;;  %v9332_v5 = vmul.f32 %v16730_v54, %v18450_v58  ;;  %v11354_v58 = vunpack.c.h.bf16 %v16653_v19  ;;  %v9333_v19 = vmul.f32 %v16774_v50, %v18452_v26  ;;  %v8705_v26 = vrot.slane %v16708_v36, 4 }
 0x70e   : > { %8933 = vrot.lane.b32.xlu1 %v8695_v57, %s11913_s13  ;;  %v8393_v24 = vpop.permute.xlu0 %8392  ;;  %v10013_v57 = vand.u32 %v10637_v38, %v10011_v7  ;;  %v9365_v20 = vpack.c.bf16 %v9332_v5, %v9332_v5  ;;  %v16803_v22 = vpack.c.bf16 %v9333_v19, %v9333_v19  ;;  %v16808_v38 = vunpack.c.h.bf16 %v11651_v55  ;;  %v18457_v55 = vld [vmem:[#allocation26_spill] sm:$0xff] }
 0x70f   : > { %8477 = vst.msk [vmem:[#allocation3 + $0x30] sm:$0xf] %vm8464_vm10, %v8393_v24  ;;  %8935 = vrot.lane.b32.xlu2 %v8704_v56, %s11913_s13  ;;  %v9073_v24 = vld [vmem:[#allocation2 + $0x74] sm:$0xf]  ;;  %v16779_v56 = vrot.slane %v8707_v34, 7  ;;  %v8290_v7 = vrot.slane %v8288_v42, 4 }
 0x710   : > { %v8383_v28 = vpop.permute.xlu1 %8382  ;;  %10021 = vmatpush.bf16.msra.mxu1 %v10013_v57  ;;  %11658 = vmatpush.bf16.msra.mxu3 %v10013_v57  ;;  %v9609_v10 = vshrl.u32 %v9365_v20, 16  ;;  %v9072_v34 = vld [vmem:[#allocation2 + $0x70] sm:$0xf]  ;;  %v9615_v46 = vshll.u32 %v16803_v22, 16  ;;  %v8589_v43 = vmul.f32 %v16808_v38, %v18458_v30  ;;  %v18461_v30 = vld [vmem:[#allocation63_spill] sm:$0xff] }
 0x711   : > { %8472 = vst.msk [vmem:[#allocation3 + $0x1c] sm:$0xf] %vm8464_vm10, %v8383_v28  ;;  %v9115_v33 = vpop.permute.xlu2 %9114  ;;  %v16786_v28 = vrot.slane %v8284_v59, 5  ;;  %v8712_v53 = vor.u32 %v8710_v60, %v16779_v56  ;;  %v18459_v5 = vld [vmem:[#allocation46_spill] sm:$0xff]  ;;  %v8714_v42 = vrot.slane %v16779_v56, 4 }
 0x712   : > { %v9611_v36 = vrot.slane %v9609_v10, 4  ;;  %v9318_v57 = vmul.f32 %v11354_v58, %v18459_v5 }
 0x713   : > { %v8287_v15 = vsel %vm13013_vm9, %v8282_v11, %v16786_v28  ;;  %v8713_v52 = vsel %vm12283_vm4, %v8705_v26, %v8712_v53  ;;  %v16825_v11 = vld [vmem:[#allocation2 + $0x40] sm:$0xff]   ;;  %v8291_v49 = vor.u32 %v8290_v7, %v16786_v28  ;;  %v9619_v7 = vshrl.u32 %v16803_v22, 16 }
 0x714   : > { %8965 = vrot.lane.b32.xlu0 %v8839_v51, %s11913_s13  ;;  %10022 = vmatpush.bf16.msra.mxu1 %v10693_v45  ;;  %v9601_v51 = vrot.slane %v9599_v32, 4  ;;  %v11421_v60 = vunpack.c.l.bf16 %v16825_v11 }
 0x715   : > { %11659 = vmatpush.bf16.msra.mxu3 %v10693_v45  ;;  %v8292_v26 = vrot.slane %v8291_v49, 4 }
 0x716   : > { %9128 = vrot.lane.b32.xlu1 %v9057_v13, %s11914_s17  ;;  %v8922_v3 = vpop.permute.xlu0 %8921  ;;  %v9605_v13 = vshll.u32 %v9365_v20, 16  ;;  %v9602_v12 = vor.u32 %v9601_v51, %v16673_v2  ;;  %v8588_v2 = vmul.f32 %v16774_v50, %v18457_v55  ;;  %v16834_v20 = vrot.slane %v9615_v46, 5  ;;  %v18460_v51 = vld [vmem:[#allocation44_spill] sm:$0xff] }
 0x717   : > { %9018 = vst.msk [vmem:[#allocation3] sm:$0xf] %vm9017_vm11, %v8922_v3  ;;  %9711 = vrot.lane.b32.xlu2 %v18454_v0, %s11905_s16  ;;  %v8848_v3 = vsel %vm12283_vm4, %v8840_v27, %v8847_v25 }
 0x718   : > { %v8389_v37 = vpop.permute.xlu1 %8388  ;;  %9211 = vst.msk [vmem:[#allocation3] sm:$0xf] %vm9210_vm14, %v9115_v33  ;;  %v18455_v33 = vld [vmem:[#allocation12_spill] sm:$0xff]  ;;  %v9607_v61 = vrot.slane %v9605_v13, 5  ;;  %v16841_v19 = vpack.c.bf16 %v8588_v2, %v8588_v2  ;;  %v9319_v13 = vmul.f32 %v11421_v60, %v18460_v51 }
 0x719   : > { %8475 = vst.msk [vmem:[#allocation3 + $0x28] sm:$0xf] %vm8464_vm10, %v8389_v37  ;;  %v16772_v9 = vpop.permute.xlu2 %9701  ;;  %v8573_v40 = vmul.f32 %v11354_v58, %v18455_v33  ;;  %v8003_v37 = vmul.f32 %v16730_v54, %v18456_v39  ;;  %v9603_v54 = vrot.slane %v9602_v12, 4  ;;  %v9459_v58 = vshrl.u32 %v16695_v23, 16 }
 0x71a   : > { %v9612_v45 = vor.u32 %v9611_v36, %v9607_v61  ;;  %v9351_v23 = vpack.c.bf16 %v9318_v57, %v9318_v57  ;;  %v9334_v57 = vmul.f32 %v16808_v38, %v18456_v39  ;;  %v9621_v39 = vrot.slane %v9619_v7, 4 }
 0x71b   : > { %v8606_v6 = vpack.c.bf16 %v8573_v40, %v8573_v40  ;;  %v9461_v25 = vrot.slane %v9459_v58, 4  ;;  %v18462_v58 = vld [vmem:[#allocation14_spill] sm:$0xff] }
 0x71c   : > { %9160 = vrot.lane.b32.xlu0 %v9073_v24, %s11914_s17  ;;  %v9613_v53 = vrot.slane %v9612_v45, 4  ;;  %v9465_v12 = vshll.u32 %v9351_v23, 16  ;;  %v9058_v45 = vld [vmem:[#allocation2 + $0x38] sm:$0xf] }
 0x71d   : > { %v8716_v24 = vshrl.u32 %v8606_v6, 16  ;;  %v8719_v40 = vshll.u32 %v8606_v6, 16 }
 0x71e   : > { %8412 = vrot.lane.b32.xlu1 %v8277_v35, %s11912_s15  ;;  %v9117_v18 = vpop.permute.xlu0 %9116  ;;  %v16831_v35 = vpack.c.bf16 %v8003_v37, %v8003_v37  ;;  %v9618_v28 = vsel %vm13013_vm9, %v9613_v53, %v16834_v20  ;;  %v9462_v37 = vor.u32 %v9461_v25, %v16713_v17  ;;  %v9467_v17 = vrot.slane %v9465_v12, 5  ;;  %v18463_v53 = vld [vmem:[#allocation15_spill] sm:$0xff] }
 0x71f   : > { %8414 = vrot.lane.b32.xlu2 %v8287_v15, %s11912_s15  ;;  %v9059_v15 = vld [vmem:[#allocation2 + $0x3c] sm:$0xf]  ;;  %v16846_v27 = vrot.slane %v8716_v24, 7 }
 0x720   : > { %v8395_v8 = vpop.permute.xlu1 %8394  ;;  %v8294_v33 = vshll.u32 %v16831_v35, 16  ;;  %v8298_v24 = vshrl.u32 %v16831_v35, 16  ;;  %v9463_v35 = vrot.slane %v9462_v37, 4 }
 0x721   : > { %8478 = vst.msk [vmem:[#allocation3 + $0x34] sm:$0xf] %vm8464_vm10, %v8395_v8  ;;  %v9119_v63 = vpop.permute.xlu2 %9118  ;;  %v8622_v8 = vpack.c.bf16 %v8589_v43, %v8589_v43  ;;  %v8004_v43 = vmul.f32 %v16774_v50, %v18461_v30 }
 0x722   : > { %v16859_v36 = vrot.slane %v8294_v33, 5  ;;  %v8300_v51 = vrot.slane %v8298_v24, 4 }
 0x723   : > { %v8863_v5 = vshll.u32 %v8622_v8, 16 }
 0x724   : > { %8937 = vrot.lane.b32.xlu0 %v8713_v52, %s11913_s13  ;;  %v8860_v52 = vshrl.u32 %v8622_v8, 16  ;;  %v8297_v46 = vsel %vm13013_vm9, %v8292_v26, %v16859_v36 }
 0x726   : > { %8967 = vrot.lane.b32.xlu1 %v8848_v3, %s11913_s13  ;;  %v8926_v0 = vpop.permute.xlu0 %8925  ;;  %v8721_v3 = vor.u32 %v8719_v40, %v16846_v27  ;;  %v16870_v56 = vrot.slane %v8860_v52, 7  ;;  %v9367_v40 = vpack.c.bf16 %v9334_v57, %v9334_v57  ;;  %v9468_v52 = vsel %vm13013_vm9, %v9463_v35, %v9467_v17 }
 0x727   : > { %9020 = vst.msk [vmem:[#allocation3 + $0x8] sm:$0xf] %vm9017_vm11, %v8926_v0  ;;  %9158 = vrot.lane.b32.xlu2 %v9072_v34, %s11914_s17  ;;  %v16862_v0 = vpack.c.bf16 %v9319_v13, %v9319_v13  ;;  %v11358_v34 = vunpack.c.h.bf16 %v16825_v11 }
 0x728   : > { %v8924_v59 = vpop.permute.xlu1 %8923  ;;  %9213 = vst.msk [vmem:[#allocation3 + $0x8] sm:$0xf] %vm9210_vm14, %v9119_v63  ;;  %v8851_v63 = vshrl.u32 %v16841_v19, 16  ;;  %v8722_v55 = vsel %vm12283_vm4, %v8714_v42, %v8721_v3  ;;  %v9625_v3 = vshll.u32 %v9367_v40, 16 }
 0x729   : > { %9019 = vst.msk [vmem:[#allocation3 + $0x4] sm:$0xf] %vm9017_vm11, %v8924_v59  ;;  %v16829_v32 = vpop.permute.xlu2 %9705  ;;  %v9475_v22 = vshll.u32 %v16862_v0, 16 }
 0x72a   : > { %9212 = vst.msk [vmem:[#allocation3 + $0x4] sm:$0xf] %vm9210_vm14, %v9117_v18  ;;  %v9608_v18 = vsel %vm13013_vm9, %v9603_v54, %v9607_v61  ;;  %v9469_v61 = vshrl.u32 %v9351_v23, 16  ;;  %v16868_v59 = vrot.slane %v8851_v63, 7  ;;  %v8575_v23 = vmul.f32 %v11358_v34, %v18463_v53 }
 0x72b   : > { %9797 = vst.msk [vmem:[#allocation3 + $0x4] sm:$0xf] %vm9795_vm15, %v16772_v9  ;;  %v16897_v25 = vrot.slane %v9475_v22, 5 }
 0x72c   : > { %9132 = vrot.lane.b32.xlu0 %v9059_v15, %s11914_s17  ;;  %v9471_v2 = vrot.slane %v9469_v61, 4  ;;  %v8574_v15 = vmul.f32 %v11421_v60, %v18462_v58  ;;  %v8858_v50 = vrot.slane %v16868_v59, 4  ;;  %v16892_v60 = vpack.c.bf16 %v8004_v43, %v8004_v43 }
 0x72d   : > { %v8608_v63 = vpack.c.bf16 %v8575_v23, %v8575_v23  ;;  %v8301_v61 = vor.u32 %v8300_v51, %v16859_v36  ;;  %v16926_v43 = vrot.slane %v9625_v3, 5  ;;  %v8849_v58 = vrot.slane %v16788_v48, 4 }
 0x72e   : > { %9743 = vrot.lane.b32.xlu1 %v9608_v18, %s11905_s16  ;;  %v9121_v9 = vpop.permute.xlu0 %9120  ;;  %v8865_v18 = vor.u32 %v8863_v5, %v16870_v56  ;;  %v9472_v33 = vor.u32 %v9471_v2, %v9467_v17  ;;  %v16904_v26 = vpack.c.bf16 %v8574_v15, %v8574_v15  ;;  %v8304_v42 = vshll.u32 %v16892_v60, 16 }
 0x72f   : > { %9745 = vrot.lane.b32.xlu2 %v9618_v28, %s11905_s16  ;;  %v8734_v7 = vshrl.u32 %v8608_v63, 16  ;;  %v8854_v17 = vshll.u32 %v16841_v19, 16  ;;  %v8302_v36 = vrot.slane %v8301_v61, 4  ;;  %v9479_v19 = vshrl.u32 %v16862_v0, 16 }
 0x730   : > { %v9700_v10 = vpop.permute.xlu1 %9699  ;;  %v8866_v13 = vsel %vm12283_vm4, %v8858_v50, %v8865_v18  ;;  %v8737_v15 = vshll.u32 %v8608_v63, 16  ;;  %v18464_v50 = vld [vmem:[#allocation64_spill] sm:$0xff]  ;;  %v9074_v63 = vld [vmem:[#allocation2 + $0x78] sm:$0xf] }
 0x731   : > { %9796 = vst.msk [vmem:[#allocation3] sm:$0xf] %vm9795_vm15, %v9700_v10  ;;  %v8958_v6 = vpop.permute.xlu2 %8957  ;;  %v9622_v10 = vor.u32 %v9621_v39, %v16834_v20  ;;  %v8856_v57 = vor.u32 %v8854_v17, %v16868_v59  ;;  %v16933_v22 = vrot.slane %v8734_v7, 7  ;;  %v8005_v0 = vmul.f32 %v16808_v38, %v18464_v50 }
 0x732   : > { %v9629_v39 = vshrl.u32 %v9367_v40, 16  ;;  %v9481_v35 = vrot.slane %v9479_v19, 4  ;;  %v8728_v7 = vshll.u32 %v16904_v26, 16 }
 0x733   : > { %v9623_v37 = vrot.slane %v9622_v10, 4  ;;  %v8739_v23 = vor.u32 %v8737_v15, %v16933_v22  ;;  %v18466_v15 = vld [vmem:[#allocation49_spill] sm:$0xff] }
 0x734   : > { %8416 = vrot.lane.b32.xlu0 %v8297_v46, %s11912_s15  ;;  %v8725_v46 = vshrl.u32 %v16904_v26, 16  ;;  %v9482_v51 = vor.u32 %v9481_v35, %v16897_v25 }
 0x736   : > { %8939 = vrot.lane.b32.xlu1 %v8722_v55, %s11913_s13  ;;  %v8405_v54 = vpop.permute.xlu0 %8404  ;;  %v16920_v55 = vrot.slane %v8304_v42, 5 }
 0x737   : > { %8483 = vst.msk [vmem:[#allocation3 + $0x48] sm:$0xf] %vm8464_vm10, %v8405_v54  ;;  %9130 = vrot.lane.b32.xlu2 %v9058_v45, %s11914_s17  ;;  %v9628_v54 = vsel %vm13013_vm9, %v9623_v37, %v16926_v43  ;;  %v8727_v45 = vrot.slane %v8725_v46, 7 }
 0x738   : > { %v8928_v49 = vpop.permute.xlu1 %8927  ;;  %v10677_v8 = vld [vmem:[#allocation3] sm:$0xff]  ;;  %9036 = vst.msk [vmem:[#allocation3 + $0x48] sm:$0xf] %vm9017_vm11, %v8958_v6  ;;  %v8307_v24 = vsel %vm13013_vm9, %v8302_v36, %v16920_v55 }
 0x739   : > { %9021 = vst.msk [vmem:[#allocation3 + $0xc] sm:$0xf] %vm9017_vm11, %v8928_v49  ;;  %10638 = vmatmul.msk.bf16.vlgmr.msra.gmra.mxu1 %vm9959_vm0, %v10677_v8  ;;  %v9153_v28 = vpop.permute.xlu2 %9152  ;;  %v9320_v49 = vmul.f32 %v11358_v34, %v18437_v29  ;;  %v8857_v8 = vsel %vm12283_vm4, %v8849_v58, %v8856_v57  ;;  %v8732_v48 = vrot.slane %v8727_v45, 4  ;;  %v8038_v34 = vpack.c.bf16 %v8005_v0, %v8005_v0 }
 0x73a   : > { %9214 = vst.msk [vmem:[#allocation3 + $0xc] sm:$0xf] %vm9210_vm14, %v9121_v9  ;;  %v9473_v9 = vrot.slane %v9472_v33, 4  ;;  %v9631_v33 = vrot.slane %v9629_v39, 4 }
 0x73b   : > { %9799 = vst.msk [vmem:[#allocation3 + $0xc] sm:$0xf] %vm9795_vm15, %v16829_v32  ;;  %v16911_v32 = vld [vmem:[#allocation2 + $0x80] sm:$0xff]   ;;  %v9353_v38 = vpack.c.bf16 %v9320_v49, %v9320_v49  ;;  %v8740_v40 = vsel %vm12283_vm4, %v8732_v48, %v8739_v23  ;;  %v8314_v42 = vshll.u32 %v8038_v34, 16  ;;  %v8318_v3 = vshrl.u32 %v8038_v34, 16  ;;  %v17001_v49 = vld [vmem:[#allocation2 + $0x88] sm:$0xff]  }
 0x73c   : > { %8971 = vrot.lane.b32.xlu0 %v8866_v13, %s11913_s13  ;;  %v9478_v20 = vsel %vm13013_vm9, %v9473_v9, %v16897_v25  ;;  %v16924_v2 = vunpack.c.l.bf16 %v16911_v32  ;;  %v18465_v13 = vld [vmem:[#allocation62_spill] sm:$0xff]  ;;  %v9632_v61 = vor.u32 %v9631_v33, %v16926_v43  ;;  %v16983_v43 = vunpack.c.h.bf16 %v16911_v32 }
 0x73d   : > { %v9485_v9 = vshll.u32 %v9353_v38, 16  ;;  %v16985_v57 = vrot.slane %v8314_v42, 5 }
 0x73e   : > { %9715 = vrot.lane.b32.xlu1 %v9468_v52, %s11905_s16  ;;  %v8960_v12 = vpop.permute.xlu0 %8959  ;;  %v9335_v59 = vmul.f32 %v16924_v2, %v18461_v30  ;;  %v8006_v10 = vmul.f32 %v16924_v2, %v18465_v13  ;;  %v9633_v19 = vrot.slane %v9632_v61, 4  ;;  %v9061_v61 = vld [vmem:[#allocation2 + $0x44] sm:$0xf] }
 0x73f   : > { %9717 = vrot.lane.b32.xlu2 %v9478_v20, %s11905_s16  ;;  %v9075_v20 = vld [vmem:[#allocation2 + $0x7c] sm:$0xf] }
 0x740   : > { %v9704_v6 = vpop.permute.xlu1 %9703  ;;  %v16954_v11 = vpack.c.bf16 %v9335_v59, %v9335_v59  ;;  %v16972_v37 = vpack.c.bf16 %v8006_v10, %v8006_v10  ;;  %v8723_v59 = vrot.slane %v16846_v27, 4  ;;  %v8308_v27 = vshrl.u32 %v16892_v60, 16 }
 0x741   : > { %9798 = vst.msk [vmem:[#allocation3 + $0x8] sm:$0xf] %vm9795_vm15, %v9704_v6  ;;  %v8930_v5 = vpop.permute.xlu2 %8929  ;;  %v9483_v6 = vrot.slane %v9482_v51, 4  ;;  %v18468_v51 = vld [vmem:[#allocation30_spill] sm:$0xff] }
 0x742   : > { %9022 = vst.msk [vmem:[#allocation3 + $0x10] sm:$0xf] %vm9017_vm11, %v8930_v5  ;;  %v9635_v52 = vshll.u32 %v16954_v11, 16  ;;  %v16980_v5 = vrot.slane %v9485_v9, 5  ;;  %v8324_v58 = vshll.u32 %v16972_v37, 16  ;;  %v8310_v60 = vrot.slane %v8308_v27, 4 }
 0x743   : > { %v8591_v10 = vmul.f32 %v16983_v43, %v18468_v51  ;;  %v9060_v9 = vld [vmem:[#allocation2 + $0x40] sm:$0xf] }
 0x744   : > { %9747 = vrot.lane.b32.xlu0 %v9628_v54, %s11905_s16  ;;  %v16975_v46 = vrot.slane %v9635_v52, 5  ;;  %v8320_v54 = vrot.slane %v8318_v3, 4  ;;  %v9488_v26 = vsel %vm13013_vm9, %v9483_v6, %v16980_v5  ;;  %v17010_v23 = vrot.slane %v8324_v58, 5 }
 0x745   : > { %v8311_v6 = vor.u32 %v8310_v60, %v16920_v55 }
 0x746   : > { %8418 = vrot.lane.b32.xlu1 %v8307_v24, %s11912_s15  ;;  %v9736_v18 = vpop.permute.xlu0 %9735  ;;  %v8730_v24 = vor.u32 %v8728_v7, %v8727_v45  ;;  %v9638_v32 = vsel %vm13013_vm9, %v9633_v19, %v16975_v46  ;;  %v8321_v0 = vor.u32 %v8320_v54, %v16985_v57  ;;  %v8624_v7 = vpack.c.bf16 %v8591_v10, %v8591_v10 }
 0x747   : > { %8969 = vrot.lane.b32.xlu2 %v8857_v8, %s11913_s13 }
 0x748   : > { %v8407_v53 = vpop.permute.xlu1 %8406  ;;  %v10678_v30 = vld [vmem:[#allocation3 + $0x8] sm:$0xff]  ;;  %v8731_v39 = vsel %vm12283_vm4, %v8723_v59, %v8730_v24  ;;  %v8322_v34 = vrot.slane %v8321_v0, 4  ;;  %v8312_v59 = vrot.slane %v8311_v6, 4 }
 0x749   : > { %8484 = vst.msk [vmem:[#allocation3 + $0x4c] sm:$0xf] %vm8464_vm10, %v8407_v53  ;;  %10639 = vmatmul.msk.bf16.gmra.mxu1 %vm9959_vm0, %v10678_v30  ;;  %v9125_v29 = vpop.permute.xlu2 %9124  ;;  %v9489_v53 = vshrl.u32 %v9353_v38, 16  ;;  %v17014_v30 = vunpack.c.l.bf16 %v17001_v49 }
 0x74a   : > { %9037 = vst.msk [vmem:[#allocation3 + $0x4c] sm:$0xf] %vm9017_vm11, %v8960_v12 }
 0x74b   : > { %9230 = vst.msk [vmem:[#allocation3 + $0x4c] sm:$0xf] %vm9210_vm14, %v9153_v28  ;;  %v16967_v28 = vld [vmem:[#allocation2 + $0x48] sm:$0xff]   ;;  %v9337_v52 = vmul.f32 %v17014_v30, %v18465_v13 }
 0x74c   : > { %8943 = vrot.lane.b32.xlu0 %v8740_v40, %s11913_s13  ;;  %v11425_v17 = vunpack.c.l.bf16 %v16967_v28  ;;  %v9491_v40 = vrot.slane %v9489_v53, 4  ;;  %v11426_v55 = vunpack.c.h.bf16 %v16967_v28  ;;  %v17051_v53 = vld [vmem:[#allocation2 + $0x50] sm:$0xff]  }
 0x74d   : > { %v17035_v54 = vpack.c.bf16 %v9337_v52, %v9337_v52  ;;  %v17066_v51 = vunpack.c.l.bf16 %v17051_v53  ;;  %v18470_v52 = vld [vmem:[#allocation16_spill] sm:$0xff] }
 0x74e   : > { %9162 = vrot.lane.b32.xlu1 %v9074_v63, %s11914_s17  ;;  %v8932_v12 = vpop.permute.xlu0 %8931  ;;  %v9321_v45 = vmul.f32 %v11425_v17, %v18466_v15  ;;  %v8327_v63 = vsel %vm13013_vm9, %v8322_v34, %v17010_v23  ;;  %v8878_v15 = vshrl.u32 %v8624_v7, 16 }
 0x74f   : > { %9023 = vst.msk [vmem:[#allocation3 + $0x14] sm:$0xf] %vm9017_vm11, %v8932_v12  ;;  %9164 = vrot.lane.b32.xlu2 %v9075_v20, %s11914_s17  ;;  %v9655_v0 = vshll.u32 %v17035_v54, 16  ;;  %v9323_v28 = vmul.f32 %v17066_v51, %v18439_v4 }
 0x750   : > { %v9151_v25 = vpop.permute.xlu1 %9150  ;;  %9216 = vst.msk [vmem:[#allocation3 + $0x14] sm:$0xf] %vm9210_vm14, %v9125_v29  ;;  %v17017_v35 = vpack.c.bf16 %v9321_v45, %v9321_v45  ;;  %v9076_v45 = vld [vmem:[#allocation2 + $0x80] sm:$0xf] }
 0x751   : > { %9229 = vst.msk [vmem:[#allocation3 + $0x48] sm:$0xf] %vm9210_vm14, %v9151_v25  ;;  %v8409_v36 = vpop.permute.xlu2 %8408  ;;  %v9492_v25 = vor.u32 %v9491_v40, %v16980_v5  ;;  %v17062_v60 = vrot.slane %v9655_v0, 5  ;;  %v17089_v4 = vpack.c.bf16 %v9323_v28, %v9323_v28 }
 0x752   : > { %9814 = vst.msk [vmem:[#allocation3 + $0x48] sm:$0xf] %vm9795_vm15, %v9736_v18  ;;  %v9336_v18 = vmul.f32 %v16983_v43, %v18464_v50  ;;  %v18467_v50 = vld [vmem:[#allocation29_spill] sm:$0xff] }
 0x753   : > { %8485 = vst.msk [vmem:[#allocation3 + $0x50] sm:$0xf] %vm8464_vm10, %v8409_v36  ;;  %v8590_v29 = vmul.f32 %v16924_v2, %v18467_v50  ;;  %v9495_v2 = vshll.u32 %v17017_v35, 16 }
 0x754   : > { %9719 = vrot.lane.b32.xlu0 %v9488_v26, %s11905_s16  ;;  %v9369_v38 = vpack.c.bf16 %v9336_v18, %v9336_v18 }
 0x755   : > { %v8623_v42 = vpack.c.bf16 %v8590_v29, %v8590_v29  ;;  %v17038_v19 = vrot.slane %v9495_v2, 5  ;;  %v8317_v29 = vsel %vm13013_vm9, %v8312_v59, %v16985_v57  ;;  %v8576_v57 = vmul.f32 %v11425_v17, %v18470_v52 }
 0x756   : > { %9749 = vrot.lane.b32.xlu1 %v9638_v32, %s11905_s16  ;;  %v9708_v8 = vpop.permute.xlu0 %9707  ;;  %v9645_v3 = vshll.u32 %v9369_v38, 16  ;;  %v9649_v12 = vshrl.u32 %v9369_v38, 16  ;;  %v9493_v32 = vrot.slane %v9492_v25, 4  ;;  %v9639_v38 = vshrl.u32 %v16954_v11, 16 }
 0x757   : > { %8941 = vrot.lane.b32.xlu2 %v8731_v39, %s11913_s13  ;;  %v8869_v24 = vshrl.u32 %v8623_v42, 16  ;;  %v8872_v34 = vshll.u32 %v8623_v42, 16  ;;  %v8867_v2 = vrot.slane %v16870_v56, 4  ;;  %v8609_v17 = vpack.c.bf16 %v8576_v57, %v8576_v57 }
 0x758   : > { %v9738_v48 = vpop.permute.xlu1 %9737  ;;  %v17043_v26 = vrot.slane %v9645_v3, 5  ;;  %v9651_v58 = vrot.slane %v9649_v12, 4  ;;  %v9498_v18 = vsel %vm13013_vm9, %v9493_v32, %v17038_v19  ;;  %v9499_v57 = vshrl.u32 %v17017_v35, 16 }
 0x759   : > { %9815 = vst.msk [vmem:[#allocation3 + $0x4c] sm:$0xf] %vm9795_vm15, %v9738_v48  ;;  %v8964_v33 = vpop.permute.xlu2 %8963  ;;  %v8871_v39 = vrot.slane %v8869_v24, 7  ;;  %v8743_v0 = vshrl.u32 %v8609_v17, 16 }
 0x75a   : > { %v9652_v27 = vor.u32 %v9651_v58, %v17043_v26  ;;  %v9501_v28 = vrot.slane %v9499_v57, 4 }
 0x75b   : > { %v8874_v10 = vor.u32 %v8872_v34, %v8871_v39  ;;  %v8876_v3 = vrot.slane %v8871_v39, 4 }
 0x75c   : > { %8422 = vrot.lane.b32.xlu0 %v8327_v63, %s11912_s15  ;;  %v8881_v63 = vshll.u32 %v8624_v7, 16 }
 0x75d   : > { %v8875_v56 = vsel %vm12283_vm4, %v8867_v2, %v8874_v10 }
 0x75e   : > { %9134 = vrot.lane.b32.xlu1 %v9060_v9, %s11914_s17  ;;  %v8411_v20 = vpop.permute.xlu0 %8410  ;;  %v9653_v9 = vrot.slane %v9652_v27, 4 }
 0x75f   : > { %8486 = vst.msk [vmem:[#allocation3 + $0x54] sm:$0xf] %vm8464_vm10, %v8411_v20  ;;  %9136 = vrot.lane.b32.xlu2 %v9061_v61, %s11914_s17  ;;  %v9641_v20 = vrot.slane %v9639_v38, 4  ;;  %v18471_v61 = vld [vmem:[#allocation17_spill] sm:$0xff]  ;;  %v9077_v38 = vld [vmem:[#allocation2 + $0x84] sm:$0xf] }
 0x760   : > { %v9123_v13 = vpop.permute.xlu1 %9122  ;;  %v10686_v36 = vld [vmem:[#allocation3 + $0x48] sm:$0xff]  ;;  %9039 = vst.msk [vmem:[#allocation3 + $0x54] sm:$0xf] %vm9017_vm11, %v8964_v33  ;;  %v17059_v33 = vrot.slane %v8878_v15, 7  ;;  %v8577_v25 = vmul.f32 %v11426_v55, %v18471_v61  ;;  %v9658_v6 = vsel %vm13013_vm9, %v9653_v9, %v17062_v60  ;;  %v18472_v15 = vld [vmem:[#allocation35_spill] sm:$0xff] }
 0x761   : > { %9215 = vst.msk [vmem:[#allocation3 + $0x10] sm:$0xf] %vm9210_vm14, %v9123_v13  ;;  %10647 = vmatmul.msk.bf16.vlgmr.msra.gmra.mxu3 %vm9959_vm0, %v10686_v36  ;;  %v9740_v5 = vpop.permute.xlu2 %9739 }
 0x762   : > { %9800 = vst.msk [vmem:[#allocation3 + $0x10] sm:$0xf] %vm9795_vm15, %v9708_v8  ;;  %v18469_v8 = vld [vmem:[#allocation47_spill] sm:$0xff]  ;;  %v8883_v12 = vor.u32 %v8881_v63, %v17059_v33  ;;  %v8610_v58 = vpack.c.bf16 %v8577_v25, %v8577_v25  ;;  %v8741_v25 = vrot.slane %v16933_v22, 4  ;;  %v8328_v22 = vshrl.u32 %v16972_v37, 16 }
 0x763   : > { %v9322_v48 = vmul.f32 %v11426_v55, %v18469_v8  ;;  %v9642_v55 = vor.u32 %v9641_v20, %v16975_v46 }
 0x764   : > { %9166 = vrot.lane.b32.xlu0 %v9076_v45, %s11914_s17  ;;  %v8884_v24 = vsel %vm12283_vm4, %v8876_v3, %v8883_v12  ;;  %v8592_v45 = vmul.f32 %v17014_v30, %v18472_v15  ;;  %v8752_v8 = vshrl.u32 %v8610_v58, 16  ;;  %v8755_v3 = vshll.u32 %v8610_v58, 16  ;;  %v18473_v12 = vld [vmem:[#allocation66_spill] sm:$0xff] }
 0x765   : > { %v9355_v42 = vpack.c.bf16 %v9322_v48, %v9322_v48  ;;  %v9643_v27 = vrot.slane %v9642_v55, 4  ;;  %v9062_v48 = vld [vmem:[#allocation2 + $0x48] sm:$0xf]  ;;  %v8007_v20 = vmul.f32 %v16983_v43, %v18473_v12  ;;  %v9502_v58 = vor.u32 %v9501_v28, %v17038_v19 }
 0x766   : > { %9721 = vrot.lane.b32.xlu1 %v9498_v18, %s11905_s16  ;;  %v9155_v50 = vpop.permute.xlu0 %9154  ;;  %v8625_v34 = vpack.c.bf16 %v8592_v45, %v8592_v45  ;;  %v17106_v52 = vrot.slane %v8752_v8, 7  ;;  %v8885_v19 = vrot.slane %v17059_v33, 4 }
 0x767   : > { %8420 = vrot.lane.b32.xlu2 %v8317_v29, %s11912_s15  ;;  %v9505_v7 = vshll.u32 %v9355_v42, 16  ;;  %v9509_v13 = vshrl.u32 %v9355_v42, 16  ;;  %v9515_v29 = vshll.u32 %v17089_v4, 16  ;;  %v9648_v63 = vsel %vm13013_vm9, %v9643_v27, %v17043_v26  ;;  %v18475_v27 = vld [vmem:[#allocation32_spill] sm:$0xff] }
 0x768   : > { %v9710_v40 = vpop.permute.xlu1 %9709 }
 0x769   : > { %9801 = vst.msk [vmem:[#allocation3 + $0x14] sm:$0xf] %vm9795_vm15, %v9710_v40  ;;  %v8936_v11 = vpop.permute.xlu2 %8935  ;;  %v17096_v39 = vrot.slane %v9505_v7, 5  ;;  %v9511_v46 = vrot.slane %v9509_v13, 4  ;;  %v8745_v40 = vrot.slane %v8743_v0, 7  ;;  %v17109_v2 = vrot.slane %v9515_v29, 5 }
 0x76a   : > { %9025 = vst.msk [vmem:[#allocation3 + $0x1c] sm:$0xf] %vm9017_vm11, %v8936_v11  ;;  %v8887_v11 = vshrl.u32 %v8625_v34, 16  ;;  %v8040_v7 = vpack.c.bf16 %v8007_v20, %v8007_v20  ;;  %v17129_v13 = vunpack.c.h.bf16 %v17001_v49  ;;  %v8330_v49 = vrot.slane %v8328_v22, 4 }
 0x76b   : > { %v8750_v35 = vrot.slane %v8745_v40, 4 }
 0x76c   : > { %9753 = vrot.lane.b32.xlu0 %v9658_v6, %s11905_s16  ;;  %v8757_v6 = vor.u32 %v8755_v3, %v17106_v52  ;;  %v8334_v0 = vshll.u32 %v8040_v7, 16  ;;  %v8593_v8 = vmul.f32 %v17129_v13, %v18475_v27  ;;  %v8331_v33 = vor.u32 %v8330_v49, %v17010_v23 }
 0x76d   : > { %v17165_v3 = vunpack.c.h.bf16 %v17051_v53  ;;  %v17176_v53 = vld [vmem:[#allocation2 + $0x90] sm:$0xff]  }
 0x76e   : > { %8973 = vrot.lane.b32.xlu1 %v8875_v56, %s11913_s13  ;;  %v9742_v36 = vpop.permute.xlu0 %9741  ;;  %v8758_v55 = vsel %vm12283_vm4, %v8750_v35, %v8757_v6  ;;  %v9079_v6 = vld [vmem:[#allocation2 + $0x8c] sm:$0xf] }
 0x76f   : > { %8975 = vrot.lane.b32.xlu2 %v8884_v24, %s11913_s13 }
 0x770   : > { %v8962_v32 = vpop.permute.xlu1 %8961  ;;  %v10679_v59 = vld [vmem:[#allocation3 + $0x10] sm:$0xff] }
 0x771   : > { %9038 = vst.msk [vmem:[#allocation3 + $0x50] sm:$0xf] %vm9017_vm11, %v8962_v32  ;;  %10640 = vmatmul.msk.bf16.gmra.mxu1 %vm9959_vm0, %v10679_v59  ;;  %v9712_v18 = vpop.permute.xlu2 %9711  ;;  %v18474_v32 = vld [vmem:[#allocation67_spill] sm:$0xff] }
 0x772   : > { %9231 = vst.msk [vmem:[#allocation3 + $0x50] sm:$0xf] %vm9210_vm14, %v9155_v50  ;;  %v9512_v50 = vor.u32 %v9511_v46, %v17096_v39  ;;  %v8008_v59 = vmul.f32 %v17014_v30, %v18474_v32  ;;  %v8338_v46 = vshrl.u32 %v8040_v7, 16  ;;  %v9503_v30 = vrot.slane %v9502_v58, 4 }
 0x773   : > { %9816 = vst.msk [vmem:[#allocation3 + $0x50] sm:$0xf] %vm9795_vm15, %v9740_v5  ;;  %v8746_v5 = vshll.u32 %v8609_v17, 16  ;;  %v17122_v17 = vrot.slane %v8887_v11, 7 }
 0x774   : > { %9138 = vrot.lane.b32.xlu0 %v9062_v48, %s11914_s17  ;;  %v9513_v26 = vrot.slane %v9512_v50, 4  ;;  %v17148_v29 = vpack.c.bf16 %v8008_v59, %v8008_v59  ;;  %v9063_v50 = vld [vmem:[#allocation2 + $0x4c] sm:$0xf] }
 0x775   : > { %v8748_v42 = vor.u32 %v8746_v5, %v8745_v40  ;;  %v8626_v5 = vpack.c.bf16 %v8593_v8, %v8593_v8  ;;  %v8894_v27 = vrot.slane %v17122_v17, 4 }
 0x776   : > { %9168 = vrot.lane.b32.xlu1 %v9077_v38, %s11914_s17  ;;  %v9127_v10 = vpop.permute.xlu0 %9126  ;;  %v9518_v56 = vsel %vm13013_vm9, %v9513_v26, %v17109_v2  ;;  %v18476_v38 = vld [vmem:[#allocation50_spill] sm:$0xff]  ;;  %v8344_v11 = vshll.u32 %v17148_v29, 16 }
 0x777   : > { %9751 = vrot.lane.b32.xlu2 %v9648_v63, %s11905_s16  ;;  %v8749_v43 = vsel %vm12283_vm4, %v8741_v25, %v8748_v42  ;;  %v7994_v40 = vmul.f32 %v17066_v51, %v18476_v38  ;;  %v8340_v63 = vrot.slane %v8338_v46, 4  ;;  %v9338_v42 = vmul.f32 %v17129_v13, %v18473_v12 }
 0x778   : > { %v9157_v9 = vpop.permute.xlu1 %9156  ;;  %v17174_v35 = vrot.slane %v8344_v11, 5  ;;  %v8899_v59 = vshll.u32 %v8626_v5, 16 }
 0x779   : > { %9232 = vst.msk [vmem:[#allocation3 + $0x54] sm:$0xf] %vm9210_vm14, %v9157_v9  ;;  %v8415_v61 = vpop.permute.xlu2 %8414  ;;  %v9508_v9 = vsel %vm13013_vm9, %v9503_v30, %v17096_v39  ;;  %v17168_v20 = vpack.c.bf16 %v7994_v40, %v7994_v40  ;;  %v9371_v12 = vpack.c.bf16 %v9338_v42, %v9338_v42  ;;  %v18477_v30 = vld [vmem:[#allocation18_spill] sm:$0xff] }
 0x77a   : > { %9817 = vst.msk [vmem:[#allocation3 + $0x54] sm:$0xf] %vm9795_vm15, %v9742_v36  ;;  %v8890_v36 = vshll.u32 %v8625_v34, 16 }
 0x77b   : > { %8488 = vst.msk [vmem:[#allocation3 + $0x5c] sm:$0xf] %vm8464_vm10, %v8415_v61  ;;  %v8896_v61 = vshrl.u32 %v8626_v5, 16  ;;  %v8204_v28 = vshll.u32 %v17168_v20, 16 }
 0x77c   : > { %9725 = vrot.lane.b32.xlu0 %v9518_v56, %s11905_s16  ;;  %v8892_v45 = vor.u32 %v8890_v36, %v17122_v17  ;;  %v9324_v56 = vmul.f32 %v17165_v3, %v18441_v14  ;;  %v9659_v36 = vshrl.u32 %v17035_v54, 16  ;;  %v18478_v17 = vld [vmem:[#allocation19_spill] sm:$0xff] }
 0x77d   : > { %v17184_v22 = vrot.slane %v8896_v61, 7 }
 0x77e   : > { %8945 = vrot.lane.b32.xlu1 %v8749_v43, %s11913_s13  ;;  %v9714_v24 = vpop.permute.xlu0 %9713  ;;  %v8893_v34 = vsel %vm12283_vm4, %v8885_v19, %v8892_v45  ;;  %v17193_v45 = vld [vmem:[#allocation2 + $0x58] sm:$0xff]   ;;  %v9357_v54 = vpack.c.bf16 %v9324_v56, %v9324_v56  ;;  %v9661_v19 = vrot.slane %v9659_v36, 4 }
 0x77f   : > { %8947 = vrot.lane.b32.xlu2 %v8758_v55, %s11913_s13  ;;  %v11461_v55 = vunpack.c.l.bf16 %v17176_v53  ;;  %v8901_v8 = vor.u32 %v8899_v59, %v17184_v22  ;;  %v9064_v59 = vld [vmem:[#allocation2 + $0x50] sm:$0xf] }
 0x780   : > { %v8934_v15 = vpop.permute.xlu1 %8933  ;;  %v9525_v5 = vshll.u32 %v9357_v54, 16 }
 0x781   : > { %9024 = vst.msk [vmem:[#allocation3 + $0x18] sm:$0xf] %vm9017_vm11, %v8934_v15  ;;  %v10687_v37 = vld [vmem:[#allocation3 + $0x50] sm:$0xff]  ;;  %v17144_v48 = vpop.permute.xlu2 %9158  ;;  %v9665_v15 = vshll.u32 %v9371_v12, 16 }
 0x782   : > { %9217 = vst.msk [vmem:[#allocation3 + $0x18] sm:$0xf] %vm9210_vm14, %v9127_v10  ;;  %10648 = vmatmul.msk.bf16.gmra.mxu3 %vm9959_vm0, %v10687_v37  ;;  %v8336_v10 = vrot.slane %v8334_v0, 5  ;;  %v9669_v37 = vshrl.u32 %v9371_v12, 16  ;;  %v17195_v0 = vrot.slane %v8204_v28, 5  ;;  %v17224_v12 = vrot.slane %v9525_v5, 5 }
 0x783   : > { %9802 = vst.msk [vmem:[#allocation3 + $0x18] sm:$0xf] %vm9795_vm15, %v9712_v18  ;;  %v8198_v18 = vshrl.u32 %v16420_v21, 16  ;;  %v8332_v21 = vrot.slane %v8331_v33, 4  ;;  %v11433_v33 = vunpack.c.l.bf16 %v17193_v45 }
 0x784   : > { %8977 = vrot.lane.b32.xlu0 %v8893_v34, %s11913_s13  ;;  %v8341_v26 = vor.u32 %v8340_v63, %v8336_v10  ;;  %v8578_v34 = vmul.f32 %v17066_v51, %v18477_v30  ;;  %v8579_v63 = vmul.f32 %v17165_v3, %v18478_v17 }
 0x785   : > { %v8200_v25 = vrot.slane %v8198_v18, 4  ;;  %v8337_v43 = vsel %vm13013_vm9, %v8332_v21, %v8336_v10  ;;  %v9671_v10 = vrot.slane %v9669_v37, 4  ;;  %v9529_v18 = vshrl.u32 %v9357_v54, 16  ;;  %v9078_v21 = vld [vmem:[#allocation2 + $0x88] sm:$0xf] }
 0x786   : > { %9140 = vrot.lane.b32.xlu1 %v9063_v50, %s11914_s17  ;;  %v8966_v57 = vpop.permute.xlu0 %8965  ;;  %v8342_v7 = vrot.slane %v8341_v26, 4  ;;  %v8611_v11 = vpack.c.bf16 %v8578_v34, %v8578_v34  ;;  %v9325_v42 = vmul.f32 %v11433_v33, %v18476_v38  ;;  %v8612_v61 = vpack.c.bf16 %v8579_v63, %v8579_v63  ;;  %v7944_v63 = vld [vmem:[#allocation2 + $0x90] sm:$0x1] }
 0x787   : > { %9723 = vrot.lane.b32.xlu2 %v9508_v9, %s11905_s16 }
 0x788   : > { %v9129_v23 = vpop.permute.xlu1 %9128  ;;  %v8347_v14 = vsel %vm13013_vm9, %v8342_v7, %v17174_v35  ;;  %v8761_v56 = vshrl.u32 %v8611_v11, 16  ;;  %v18479_v7 = vld [vmem:[#allocation33_spill] sm:$0xff]  ;;  %v8773_v33 = vshll.u32 %v8612_v61, 16 }
 0x789   : > { %9218 = vst.msk [vmem:[#allocation3 + $0x1c] sm:$0xf] %vm9210_vm14, %v9129_v23  ;;  %v17172_v39 = vpop.permute.xlu2 %9745  ;;  %v8594_v36 = vmul.f32 %v11461_v55, %v18479_v7 }
 0x78a   : > { %9803 = vst.msk [vmem:[#allocation3 + $0x1c] sm:$0xf] %vm9795_vm15, %v9714_v24  ;;  %v8201_v24 = vor.u32 %v8200_v25, %v16443_v16  ;;  %v9339_v16 = vmul.f32 %v11461_v55, %v18474_v32  ;;  %v9667_v32 = vrot.slane %v9665_v15, 5  ;;  %v8763_v54 = vrot.slane %v8761_v56, 7  ;;  %v18481_v56 = vld [vmem:[#allocation31_spill] sm:$0xff] }
 0x78c   : > { %9172 = vrot.lane.b32.xlu0 %v9079_v6, %s11914_s17  ;;  %v8202_v40 = vrot.slane %v8201_v24, 4  ;;  %v17218_v9 = vpack.c.bf16 %v9339_v16, %v9339_v16  ;;  %v9672_v26 = vor.u32 %v9671_v10, %v9667_v32  ;;  %v9531_v6 = vrot.slane %v9529_v18, 4 }
 0x78d   : > { %v9519_v16 = vshrl.u32 %v17089_v4, 16 }
 0x78e   : > { %8424 = vrot.lane.b32.xlu1 %v8337_v43, %s11912_s15  ;;  %v9161_v58 = vpop.permute.xlu0 %9160  ;;  %v8207_v51 = vsel %vm13013_vm9, %v8202_v40, %v17195_v0  ;;  %v9675_v28 = vshll.u32 %v17218_v9, 16  ;;  %v17231_v43 = vpack.c.bf16 %v9325_v42, %v9325_v42  ;;  %v9673_v24 = vrot.slane %v9672_v26, 4 }
 0x78f   : > { %8426 = vrot.lane.b32.xlu2 %v8347_v14, %s11912_s15  ;;  %v8770_v14 = vshrl.u32 %v8612_v61, 16  ;;  %v9532_v15 = vor.u32 %v9531_v6, %v17224_v12  ;;  %v9521_v18 = vrot.slane %v9519_v16, 4  ;;  %v7977_v42 = vunpack.c.l.bf16 %v7944_v63  ;;  %v11855_v16 = vld [vmem:[#allocation2 + $0x58] sm:$0xff]  }
 0x790   : > { %v8413_v49 = vpop.permute.xlu1 %8412  ;;  %v9535_v55 = vshll.u32 %v17231_v43, 16 }
 0x791   : > { %8487 = vst.msk [vmem:[#allocation3 + $0x58] sm:$0xf] %vm8464_vm10, %v8413_v49  ;;  %v10680_v46 = vld [vmem:[#allocation3 + $0x18] sm:$0xff]  ;;  %v9131_v50 = vpop.permute.xlu2 %9130  ;;  %v17241_v49 = vrot.slane %v9675_v28, 5  ;;  %v9533_v40 = vrot.slane %v9532_v15, 4  ;;  %v9522_v61 = vor.u32 %v9521_v18, %v17109_v2 }
 0x792   : > { %9040 = vst.msk [vmem:[#allocation3 + $0x58] sm:$0xf] %vm9017_vm11, %v8966_v57  ;;  %10641 = vmatmul.msk.bf16.gmra.mxu1 %vm9959_vm0, %v10680_v46  ;;  %v8902_v57 = vsel %vm12283_vm4, %v8894_v27, %v8901_v8  ;;  %v8764_v27 = vshll.u32 %v8611_v11, 16  ;;  %v17249_v8 = vrot.slane %v8770_v14, 7  ;;  %v17255_v4 = vrot.slane %v9535_v55, 5 }
 0x793   : > { %9233 = vst.msk [vmem:[#allocation3 + $0x58] sm:$0xf] %vm9210_vm14, %v17144_v48  ;;  %v9662_v48 = vor.u32 %v9661_v19, %v17062_v60  ;;  %v18480_v19 = vld [vmem:[#allocation68_spill] sm:$0xff]  ;;  %v8208_v55 = vshrl.u32 %v17168_v20, 16 }
 0x794   : > { %8398 = vrot.lane.b32.xlu0 %v8207_v51, %s11912_s15  ;;  %v8009_v30 = vmul.f32 %v17129_v13, %v18480_v19  ;;  %v8768_v51 = vrot.slane %v8763_v54, 4  ;;  %v8775_v5 = vor.u32 %v8773_v33, %v17249_v8 }
 0x795   : > { %v9663_v60 = vrot.slane %v9662_v48, 4  ;;  %v11398_v48 = vunpack.c.h.bf16 %v17176_v53 }
 0x796   : > { %8979 = vrot.lane.b32.xlu1 %v8902_v57, %s11913_s13  ;;  %v8938_v23 = vpop.permute.xlu0 %8937  ;;  %v8042_v13 = vpack.c.bf16 %v8009_v30, %v8009_v30  ;;  %v9538_v57 = vsel %vm13013_vm9, %v9533_v40, %v17255_v4  ;;  %v8776_v26 = vsel %vm12283_vm4, %v8768_v51, %v8775_v5 }
 0x797   : > { %9026 = vst.msk [vmem:[#allocation3 + $0x20] sm:$0xf] %vm9017_vm11, %v8938_v23  ;;  %9170 = vrot.lane.b32.xlu2 %v9078_v21, %s11914_s17  ;;  %v9668_v37 = vsel %vm13013_vm9, %v9663_v60, %v9667_v32  ;;  %v8759_v32 = vrot.slane %v17106_v52, 4  ;;  %v8348_v52 = vshrl.u32 %v17148_v29, 16  ;;  %v8903_v60 = vrot.slane %v17184_v22, 4 }
 0x798   : > { %v8968_v25 = vpop.permute.xlu1 %8967  ;;  %9219 = vst.msk [vmem:[#allocation3 + $0x20] sm:$0xf] %vm9210_vm14, %v9131_v50  ;;  %v8766_v50 = vor.u32 %v8764_v27, %v8763_v54  ;;  %v8358_v53 = vshrl.u32 %v8042_v13, 16  ;;  %v8595_v7 = vmul.f32 %v11398_v48, %v18481_v56  ;;  %v9523_v22 = vrot.slane %v9522_v61, 4  ;;  %v9065_v27 = vld [vmem:[#allocation2 + $0x54] sm:$0xf] }
 0x799   : > { %9041 = vst.msk [vmem:[#allocation3 + $0x5c] sm:$0xf] %vm9017_vm11, %v8968_v25  ;;  %v17229_v38 = vpop.permute.xlu2 %9717  ;;  %v8354_v25 = vshll.u32 %v8042_v13, 16  ;;  %v9340_v33 = vmul.f32 %v11398_v48, %v18480_v19  ;;  %v17308_v48 = vld [vmem:[%s17717_s6] ss:$0 sm:$0xff]  ;;  %v9679_v61 = vshrl.u32 %v17218_v9, 16 }
 0x79a   : > { %9234 = vst.msk [vmem:[#allocation3 + $0x5c] sm:$0xf] %vm9210_vm14, %v9161_v58  ;;  %v8627_v58 = vpack.c.bf16 %v8594_v36, %v8594_v36  ;;  %v8767_v11 = vsel %vm12283_vm4, %v8759_v32, %v8766_v50  ;;  %v8350_v36 = vrot.slane %v8348_v52, 4  ;;  %v9528_v50 = vsel %vm13013_vm9, %v9523_v22, %v17224_v12 }
 0x79b   : > { %9819 = vst.msk [vmem:[#allocation3 + $0x5c] sm:$0xf] %vm9795_vm15, %v17172_v39  ;;  %v9678_v39 = vsel %vm13013_vm9, %v9673_v24, %v17241_v49  ;;  %v18482_v24 = vld [vmem:[#allocation65_spill] sm:$0xff]  ;;  %v8356_v15 = vrot.slane %v8354_v25, 5  ;;  %v9373_v19 = vpack.c.bf16 %v9340_v33, %v9340_v33  ;;  %v8791_v33 = vshll.u32 %v16535_v44, 16 }
 0x79c   : > { %9142 = vrot.lane.b32.xlu0 %v9064_v59, %s11914_s17  ;;  %v8905_v17 = vshrl.u32 %v8627_v58, 16  ;;  %v8908_v28 = vshll.u32 %v8627_v58, 16  ;;  %v8010_v14 = vmul.f32 %v7977_v42, %v18482_v24  ;;  %v8628_v58 = vpack.c.bf16 %v8595_v7, %v8595_v7 }
 0x79d   : > { %v8351_v30 = vor.u32 %v8350_v36, %v17174_v35  ;;  %v18484_v35 = vld [vmem:[#allocation20_spill] sm:$0xff]  ;;  %v9689_v56 = vshrl.u32 %v9373_v19, 16 }
 0x79e   : > { %9755 = vrot.lane.b32.xlu1 %v9668_v37, %s11905_s16  ;;  %v9133_v46 = vpop.permute.xlu0 %9132  ;;  %v17268_v23 = vrot.slane %v8905_v17, 7  ;;  %v8360_v37 = vrot.slane %v8358_v53, 4  ;;  %v8914_v17 = vshrl.u32 %v8628_v58, 16 }
 0x79f   : > { %9757 = vrot.lane.b32.xlu2 %v9678_v39, %s11905_s16  ;;  %v11369_v39 = vunpack.c.l.bf16 %v11855_v16  ;;  %v8352_v51 = vrot.slane %v8351_v30, 4  ;;  %v9691_v30 = vrot.slane %v9689_v56, 4 }
 0x7a0   : > { %v9744_v34 = vpop.permute.xlu1 %9743  ;;  %v8910_v2 = vor.u32 %v8908_v28, %v17268_v23  ;;  %v8361_v20 = vor.u32 %v8360_v37, %v8356_v15  ;;  %v8916_v52 = vrot.slane %v8914_v17, 7  ;;  %v8917_v28 = vshll.u32 %v8628_v58, 16 }
 0x7a1   : > { %9818 = vst.msk [vmem:[#allocation3 + $0x58] sm:$0xf] %vm9795_vm15, %v9744_v34  ;;  %v8970_v10 = vpop.permute.xlu2 %8969  ;;  %v18483_v34 = vld [vmem:[#allocation54_spill] sm:$0xff]  ;;  %v8580_v63 = vmul.f32 %v11369_v39, %v18484_v35  ;;  %v8912_v22 = vrot.slane %v17268_v23, 4  ;;  %v9681_v37 = vrot.slane %v9679_v61, 4  ;;  %v11434_v39 = vunpack.c.h.bf16 %v17193_v45 }
 0x7a2   : > { %v8911_v54 = vsel %vm12283_vm4, %v8903_v60, %v8910_v2  ;;  %v7995_v40 = vmul.f32 %v17165_v3, %v18483_v34  ;;  %v9081_v3 = vld [vmem:[#allocation2 + $0x94] sm:$0xf]  ;;  %v8362_v12 = vrot.slane %v8361_v20, 4 }
 0x7a3   : > { %v17311_v42 = vpack.c.bf16 %v8580_v63, %v8580_v63  ;;  %v9682_v45 = vor.u32 %v9681_v37, %v17241_v49  ;;  %v8793_v49 = vor.u32 %v8791_v33, %v16556_v47 }
 0x7a4   : > { %9729 = vrot.lane.b32.xlu0 %v9538_v57, %s11905_s16  ;;  %v17302_v13 = vpack.c.bf16 %v7995_v40, %v7995_v40  ;;  %v9275_v57 = vld [vmem:[#allocation2 + $0x98] sm:$0x1]  ;;  %v9539_v40 = vshrl.u32 %v17231_v43, 16 }
 0x7a5   : > { %v9308_v25 = vunpack.c.l.bf16 %v9275_v57  ;;  %v8779_v9 = vshrl.u32 %v17311_v42, 16 }
 0x7a6   : > { %8949 = vrot.lane.b32.xlu1 %v8767_v11, %s11913_s13  ;;  %v8417_v21 = vpop.permute.xlu0 %8416  ;;  %v8214_v53 = vshll.u32 %v17302_v13, 16 }
 0x7a7   : > { %8489 = vst.msk [vmem:[#allocation3 + $0x60] sm:$0xf] %vm8464_vm10, %v8417_v21  ;;  %8951 = vrot.lane.b32.xlu2 %v8776_v26, %s11913_s13  ;;  %v8357_v21 = vsel %vm13013_vm9, %v8352_v51, %v8356_v15  ;;  %v8919_v15 = vor.u32 %v8917_v28, %v8916_v52 }
 0x7a8   : > { %v8940_v6 = vpop.permute.xlu1 %8939  ;;  %v10688_v29 = vld [vmem:[#allocation3 + $0x58] sm:$0xff]  ;;  %9042 = vst.msk [vmem:[#allocation3 + $0x60] sm:$0xf] %vm9017_vm11, %v8970_v10  ;;  %v8210_v10 = vrot.slane %v8208_v55, 4  ;;  %v17328_v58 = vrot.slane %v8214_v53, 5 }
 0x7a9   : > { %9027 = vst.msk [vmem:[#allocation3 + $0x24] sm:$0xf] %vm9017_vm11, %v8940_v6  ;;  %10649 = vmatmul.msk.bf16.gmra.mxu3 %vm9959_vm0, %v10688_v29  ;;  %v17282_v59 = vpop.permute.xlu2 %9164  ;;  %v9685_v29 = vshll.u32 %v9373_v19, 16 }
 0x7aa   : > { %9220 = vst.msk [vmem:[#allocation3 + $0x24] sm:$0xf] %vm9210_vm14, %v9133_v46  ;;  %v8043_v46 = vpack.c.bf16 %v8010_v14, %v8010_v14  ;;  %v8211_v11 = vor.u32 %v8210_v10, %v17195_v0 }
 0x7ab   : > { %9805 = vst.msk [vmem:[#allocation3 + $0x24] sm:$0xf] %vm9795_vm15, %v17229_v38 }
 0x7ac   : > { %8981 = vrot.lane.b32.xlu0 %v8911_v54, %s11913_s13  ;;  %v8364_v5 = vshll.u32 %v8043_v46, 16  ;;  %v8212_v14 = vrot.slane %v8211_v11, 4  ;;  %v9341_v54 = vmul.f32 %v9308_v25, %v18482_v24  ;;  %v8781_v46 = vrot.slane %v8779_v9, 7 }
 0x7ad   : > { %v8777_v9 = vrot.slane %v17249_v8, 4 }
 0x7ae   : > { %9144 = vrot.lane.b32.xlu1 %v9065_v27, %s11914_s17  ;;  %v8972_v38 = vpop.permute.xlu0 %8971  ;;  %v8366_v26 = vrot.slane %v8364_v5, 5  ;;  %v9687_v27 = vrot.slane %v9685_v29, 5  ;;  %v8217_v24 = vsel %vm13013_vm9, %v8212_v14, %v17328_v58  ;;  %v9374_v20 = vpack.c.bf16 %v9341_v54, %v9341_v54 }
 0x7af   : > { %9727 = vrot.lane.b32.xlu2 %v9528_v50, %s11905_s16  ;;  %v9080_v50 = vld [vmem:[#allocation2 + $0x90] sm:$0xf]  ;;  %v8786_v51 = vrot.slane %v8781_v46, 4  ;;  %v9541_v5 = vrot.slane %v9539_v40, 4 }
 0x7b0   : > { %v9716_v32 = vpop.permute.xlu1 %9715  ;;  %v8367_v0 = vsel %vm13013_vm9, %v8362_v12, %v8366_v26  ;;  %v9692_v17 = vor.u32 %v9691_v30, %v9687_v27  ;;  %v9695_v44 = vshll.u32 %v9374_v20, 16 }
 0x7b1   : > { %9804 = vst.msk [vmem:[#allocation3 + $0x20] sm:$0xf] %vm9795_vm15, %v9716_v32  ;;  %v8942_v18 = vpop.permute.xlu2 %8941  ;;  %v9326_v32 = vmul.f32 %v11434_v39, %v18483_v34  ;;  %v8794_v47 = vsel %vm12283_vm4, %v8786_v51, %v8793_v49  ;;  %v9542_v52 = vor.u32 %v9541_v5, %v17255_v4  ;;  %v9067_v51 = vld [vmem:[#allocation2 + $0x5c] sm:$0xf]  ;;  %v11857_v5 = vld [vmem:[%s12040_s21 + $0x8] sm:$0xff] }
 0x7b2   : > { %9028 = vst.msk [vmem:[#allocation3 + $0x28] sm:$0xf] %vm9017_vm11, %v8942_v18  ;;  %v9693_v12 = vrot.slane %v9692_v17, 4  ;;  %v9697_v61 = vrot.slane %v9695_v44, 5  ;;  %v18487_v17 = vld [vmem:[#allocation9_spill] sm:$0xff] }
 0x7b3   : > { %v17352_v57 = vpack.c.bf16 %v9326_v32, %v9326_v32  ;;  %v9543_v29 = vrot.slane %v9542_v52, 4 }
 0x7b4   : > { %9176 = vrot.lane.b32.xlu0 %v9081_v3, %s11914_s17  ;;  %v9683_v3 = vrot.slane %v9682_v45, 4  ;;  %v9698_v4 = vsel %vm13013_vm9, %v9693_v12, %v9697_v61  ;;  %v18486_v45 = vld [vmem:[#allocation13_spill] sm:$0xff] }
 0x7b5   : > { %v9545_v53 = vshll.u32 %v17352_v57, 16 }
 0x7b6   : > { %8428 = vrot.lane.b32.xlu1 %v8357_v21, %s11912_s15  ;;  %v9748_v6 = vpop.permute.xlu0 %9747  ;;  %v10024_v60 = vpop.f32.mrf.mxu1  ;;  %v9688_v26 = vsel %vm13013_vm9, %v9683_v3, %v9687_v27 }
 0x7b7   : > { %v10025_v7 = vadd.f32 %v17308_v48, %v10024_v60  ;;  %8430 = vrot.lane.b32.xlu2 %v8367_v0, %s11912_s15  ;;  %v9547_v14 = vrot.slane %v9545_v53, 5 }
 0x7b8   : > { %v8419_v36 = vpop.permute.xlu1 %8418  ;;  %v10681_v2 = vld [vmem:[#allocation3 + $0x20] sm:$0xff] }
 0x7b9   : > { %8490 = vst.msk [vmem:[#allocation3 + $0x64] sm:$0xf] %vm8464_vm10, %v8419_v36  ;;  %v10104_v55 = vsub.f32 0.0, %v10025_v7  ;;  %10642 = vmatmul.msk.bf16.gmra.mxu1 %vm9959_vm0, %v10681_v2  ;;  %v9137_v16 = vpop.permute.xlu2 %9136  ;;  %v8782_v7 = vshll.u32 %v17311_v42, 16  ;;  %v9548_v54 = vsel %vm13013_vm9, %v9543_v29, %v9547_v14 }
 0x7ba   : > { %9043 = vst.msk [vmem:[#allocation3 + $0x64] sm:$0xf] %vm9017_vm11, %v8972_v38  ;;  %v8920_v38 = vsel %vm12283_vm4, %v8912_v22, %v8919_v15 }
 0x7bb   : > { %9236 = vst.msk [vmem:[#allocation3 + $0x64] sm:$0xf] %vm9210_vm14, %v17282_v59  ;;  %v10136_v23 = vmul.f32 1.442695, %v10104_v55  ;;  %v8218_v59 = vshrl.u32 %v17302_v13, 16  ;;  %v8784_v22 = vor.u32 %v8782_v7, %v8781_v46 }
 0x7bc   : > { %8400 = vrot.lane.b32.xlu0 %v8217_v24, %s11912_s15 }
 0x7bd   : > { %11695 = vpow2.f32 %v10136_v23  ;;  %v8220_v18 = vrot.slane %v8218_v59, 4  ;;  %v8785_v30 = vsel %vm12283_vm4, %v8777_v9, %v8784_v22  ;;  %v11856_v23 = vld [vmem:[%s12040_s21] sm:$0xff]  ;;  %v18492_v22 = vld [vmem:[#allocation74_spill] sm:$0xff] }
 0x7be   : > { %8983 = vrot.lane.b32.xlu1 %v8920_v38, %s11913_s13  ;;  %v8944_v10 = vpop.permute.xlu0 %8943  ;;  %v10026_v43 = vpop.f32.mrf.mxu1 }
 0x7bf   : > { %9029 = vst.msk [vmem:[#allocation3 + $0x2c] sm:$0xf] %vm9017_vm11, %v8944_v10  ;;  %v10027_v35 = vadd.f32 %v17308_v48, %v10026_v43  ;;  %9174 = vrot.lane.b32.xlu2 %v9080_v50, %s11914_s17  ;;  %v8221_v25 = vor.u32 %v8220_v18, %v17328_v58  ;;  %v9066_v43 = vld [vmem:[#allocation2 + $0x58] sm:$0xf] }
 0x7c0   : > { %v9163_v63 = vpop.permute.xlu1 %9162  ;;  %9222 = vst.msk [vmem:[#allocation3 + $0x2c] sm:$0xf] %vm9210_vm14, %v9137_v16  ;;  %v18485_v16 = vld [vmem:[#allocation69_spill] sm:$0xff] }
 0x7c1   : > { %v10105_v34 = vsub.f32 0.0, %v10027_v35  ;;  %9235 = vst.msk [vmem:[#allocation3 + $0x60] sm:$0xf] %vm9210_vm14, %v9163_v63  ;;  %v8421_v13 = vpop.permute.xlu2 %8420  ;;  %v8222_v56 = vrot.slane %v8221_v25, 4 }
 0x7c2   : > { %9820 = vst.msk [vmem:[#allocation3 + $0x60] sm:$0xf] %vm9795_vm15, %v9748_v6 }
 0x7c3   : > { %v11696_v19 = vpop.eup %11695  ;;  %v10138_v11 = vmul.f32 1.442695, %v10105_v34  ;;  %8491 = vst.msk [vmem:[#allocation3 + $0x68] sm:$0xf] %vm8464_vm10, %v8421_v13  ;;  %v8227_v42 = vsel %vm13013_vm9, %v8222_v56, %v16473_v31  ;;  %v9549_v31 = vshrl.u32 %v17352_v57, 16  ;;  %v18488_v34 = vld [vmem:[#allocation70_spill] sm:$0xff] }
 0x7c4   : > { %v10200_v21 = vadd.f32 1.0, %v11696_v19  ;;  %8955 = vrot.lane.b32.xlu0 %v8794_v47, %s11913_s13  ;;  %v18489_v47 = vld [vmem:[#allocation71_spill] sm:$0xff] }
 0x7c5   : > { %11697 = vpow2.f32 %v10138_v11  ;;  %v9551_v20 = vrot.slane %v9549_v31, 4  ;;  %v11859_v56 = vld [vmem:[%s12040_s21 + $0x18] sm:$0xff] }
 0x7c6   : > { %9759 = vrot.lane.b32.xlu1 %v9688_v26, %s11905_s16  ;;  %11699 = vrcp.f32 %v10200_v21  ;;  %v9720_v6 = vpop.permute.xlu0 %9719  ;;  %v10029_v60 = vpop.f32.mrf.mxu1  ;;  %v11858_v26 = vld [vmem:[%s12040_s21 + $0x10] sm:$0xff] }
 0x7c7   : > { %v10030_v0 = vadd.f32 %v17308_v48, %v10029_v60  ;;  %9761 = vrot.lane.b32.xlu2 %v9698_v4, %s11905_s16  ;;  %v9552_v49 = vor.u32 %v9551_v20, %v9547_v14  ;;  %v18491_v4 = vld [vmem:[#allocation73_spill] sm:$0xff] }
 0x7c8   : > { %v9750_v28 = vpop.permute.xlu1 %9749 }
 0x7c9   : > { %9821 = vst.msk [vmem:[#allocation3 + $0x64] sm:$0xf] %vm9795_vm15, %v9750_v28  ;;  %v10106_v36 = vsub.f32 0.0, %v10030_v0  ;;  %v8976_v2 = vpop.permute.xlu2 %8975  ;;  %v9553_v13 = vrot.slane %v9552_v49, 4 }
 0x7cb   : > { %v11698_v15 = vpop.eup %11697  ;;  %v10140_v37 = vmul.f32 1.442695, %v10106_v36  ;;  %v9558_v11 = vsel %vm13013_vm9, %v9553_v13, %v16530_v41  ;;  %v18490_v41 = vld [vmem:[#allocation72_spill] sm:$0xff] }
 0x7cc   : > { %v11700_v55 = vpop.eup %11699  ;;  %v10201_v58 = vadd.f32 1.0, %v11698_v15  ;;  %9731 = vrot.lane.b32.xlu0 %v9548_v54, %s11905_s16 }
 0x7cd   : > { %v10264_v39 = vmul.f32 %v11700_v55, %v18485_v16  ;;  %11701 = vpow2.f32 %v10140_v37 }
 0x7ce   : > { %8402 = vrot.lane.b32.xlu1 %v8227_v42, %s11912_s15  ;;  %11703 = vrcp.f32 %v10201_v58  ;;  %v8423_v8 = vpop.permute.xlu0 %8422  ;;  %v10031_v27 = vpop.f32.mrf.mxu1 }
 0x7cf   : > { %v10296_v24 = vadd.f32 %v11856_v23, %v10264_v39  ;;  %8492 = vst.msk [vmem:[#allocation3 + $0x6c] sm:$0xf] %vm8464_vm10, %v8423_v8  ;;  %v10032_v46 = vadd.f32 %v17308_v48, %v10031_v27  ;;  %8953 = vrot.lane.b32.xlu2 %v8785_v30, %s11913_s13 }
 0x7d0   : > { %v9135_v40 = vpop.permute.xlu1 %9134  ;;  %v10689_v38 = vld [vmem:[#allocation3 + $0x60] sm:$0xff]  ;;  %9045 = vst.msk [vmem:[#allocation3 + $0x6c] sm:$0xf] %vm9017_vm11, %v8976_v2 }
 0x7d1   : > { %10329 = vst.msk [vmem:[%s17384_s9] sm:$0xff] %vm10328_vm1, %v10296_v24  ;;  %v10107_v1 = vsub.f32 0.0, %v10032_v46  ;;  %10650 = vmatmul.msk.bf16.gmra.mxu3 %vm9959_vm0, %v10689_v38  ;;  %v9752_v50 = vpop.permute.xlu2 %9751 }
 0x7d2   : > { %10362 = vst.msk [vmem:[%s17384_s9] sm:$0xff] %vm10361_vm2, %v18486_v45 }
 0x7d3   : > { %v11702_v59 = vpop.eup %11701  ;;  %v10142_v33 = vmul.f32 1.442695, %v10107_v1  ;;  %9221 = vst.msk [vmem:[#allocation3 + $0x28] sm:$0xf] %vm9210_vm14, %v9135_v40 }
 0x7d4   : > { %v11704_v32 = vpop.eup %11703  ;;  %v10202_v10 = vadd.f32 1.0, %v11702_v59  ;;  %9806 = vst.msk [vmem:[#allocation3 + $0x28] sm:$0xf] %vm9795_vm15, %v9720_v6 }
 0x7d5   : > { %v10265_v35 = vmul.f32 %v11704_v32, %v18487_v17  ;;  %11705 = vpow2.f32 %v10142_v33 }
 0x7d6   : > { %9146 = vrot.lane.b32.xlu1 %v9066_v43, %s11914_s17  ;;  %11707 = vrcp.f32 %v10202_v10  ;;  %v9167_v63 = vpop.permute.xlu0 %9166  ;;  %v18493_v10 = vld [vmem:[#allocation105_spill] sm:$0xff] }
 0x7d7   : > { %v10297_v3 = vadd.f32 %v11857_v5, %v10265_v35  ;;  %9148 = vrot.lane.b32.xlu2 %v9067_v51, %s11914_s17 }
 0x7d8   : > { %v9722_v44 = vpop.permute.xlu1 %9721 }
 0x7d9   : > { %9807 = vst.msk [vmem:[#allocation3 + $0x2c] sm:$0xf] %vm9795_vm15, %v9722_v44  ;;  %v8948_v18 = vpop.permute.xlu2 %8947 }
 0x7da   : > { %10330 = vst.msk [vmem:[%s17384_s9 + $0x8] sm:$0xff] %vm10328_vm1, %v10297_v3  ;;  %v18494_v3 = vld [vmem:[#allocation108_spill] sm:$0xff] }
 0x7db   : > { %10363 = vst.msk [vmem:[%s17384_s9 + $0x8] sm:$0xff] %vm10361_vm2, %v18488_v34  ;;  %v11706_v57 = vpop.eup %11705 }
 0x7dc   : > { %9031 = vst.msk [vmem:[#allocation3 + $0x34] sm:$0xf] %vm9017_vm11, %v8948_v18  ;;  %v11708_v12 = vpop.eup %11707  ;;  %v10203_v19 = vadd.f32 1.0, %v11706_v57  ;;  %v18495_v57 = vld [vmem:[#allocation99_spill] sm:$0xff] }
 0x7dd   : > { %v10266_v52 = vmul.f32 %v11708_v12, %v18489_v47  ;;  %v11861_v47 = vld [vmem:[%s12040_s21 + $0x98] sm:$0xff] }
 0x7de   : > { %9733 = vrot.lane.b32.xlu1 %v9558_v11, %s11905_s16  ;;  %11709 = vrcp.f32 %v10203_v19  ;;  %v9754_v21 = vpop.permute.xlu0 %9753 }
 0x7df   : > { %v10298_v61 = vadd.f32 %v11858_v26, %v10266_v52 }
 0x7e0   : > { %v8974_v25 = vpop.permute.xlu1 %8973  ;;  %v10682_v53 = vld [vmem:[#allocation3 + $0x28] sm:$0xff] }
 0x7e1   : > { %9044 = vst.msk [vmem:[#allocation3 + $0x68] sm:$0xf] %vm9017_vm11, %v8974_v25  ;;  %10643 = vmatmul.msk.bf16.gmra.mxu1 %vm9959_vm0, %v10682_v53  ;;  %v9724_v62 = vpop.permute.xlu2 %9723 }
 0x7e2   : > { %10331 = vst.msk [vmem:[%s17384_s9 + $0x10] sm:$0xff] %vm10328_vm1, %v10298_v61 }
 0x7e3   : > { %10364 = vst.msk [vmem:[%s17384_s9 + $0x10] sm:$0xff] %vm10361_vm2, %v18490_v41 }
 0x7e4   : > { %9237 = vst.msk [vmem:[#allocation3 + $0x68] sm:$0xf] %vm9210_vm14, %v9167_v63  ;;  %v11710_v6 = vpop.eup %11709  ;;  %v10069_v60 = vpop.f32.mrf.mxu3  ;;  %v11860_v63 = vld [vmem:[%s12040_s21 + $0x90] sm:$0xff] }
 0x7e5   : > { %9822 = vst.msk [vmem:[#allocation3 + $0x68] sm:$0xf] %vm9795_vm15, %v9752_v50  ;;  %v10267_v0 = vmul.f32 %v11710_v6, %v18491_v4  ;;  %v10070_v28 = vadd.f32 %v17308_v48, %v10069_v60  ;;  %v18497_v60 = vld [vmem:[#allocation101_spill] sm:$0xff] }
 0x7e6   : > { %v9139_v29 = vpop.permute.xlu0 %9138 }
 0x7e7   : > { %v10299_v7 = vadd.f32 %v11859_v56, %v10267_v0  ;;  %v10122_v36 = vsub.f32 0.0, %v10070_v28  ;;  %v18498_v28 = vld [vmem:[#allocation76_spill] sm:$0xff] }
 0x7e8   : > { %v9169_v14 = vpop.permute.xlu1 %9168 }
 0x7e9   : > { %9238 = vst.msk [vmem:[#allocation3 + $0x6c] sm:$0xf] %vm9210_vm14, %v9169_v14  ;;  %v10172_v2 = vmul.f32 1.442695, %v10122_v36  ;;  %v8427_v9 = vpop.permute.xlu2 %8426 }
 0x7ea   : > { %10332 = vst.msk [vmem:[%s17384_s9 + $0x18] sm:$0xff] %vm10328_vm1, %v10299_v7  ;;  %v18499_v7 = vld [vmem:[#allocation77_spill] sm:$0xff] }
 0x7eb   : > { %10365 = vst.msk [vmem:[%s17384_s9 + $0x18] sm:$0xff] %vm10361_vm2, %v18492_v22  ;;  %11711 = vpow2.f32 %v10172_v2  ;;  %v11863_v22 = vld [vmem:[%s12040_s21 + $0x28] sm:$0xff] }
 0x7ec   : > { %9823 = vst.msk [vmem:[#allocation3 + $0x6c] sm:$0xf] %vm9795_vm15, %v9754_v21  ;;  %v10071_v15 = vpop.f32.mrf.mxu3  ;;  %v18496_v21 = vld [vmem:[#allocation75_spill] sm:$0xff] }
 0x7ed   : > { %8494 = vst.msk [vmem:[#allocation3 + $0x74] sm:$0xf] %vm8464_vm10, %v8427_v9  ;;  %v10072_v37 = vadd.f32 %v17308_v48, %v10071_v15 }
 0x7ee   : > { %v9726_v54 = vpop.permute.xlu0 %9725  ;;  %v10034_v55 = vpop.f32.mrf.mxu1 }
 0x7ef   : > { %v10123_v58 = vsub.f32 0.0, %v10072_v37  ;;  %v10035_v42 = vadd.f32 %v17308_v48, %v10034_v55 }
 0x7f0   : > { %v8946_v16 = vpop.permute.xlu1 %8945 }
 0x7f1   : > { %9030 = vst.msk [vmem:[#allocation3 + $0x30] sm:$0xf] %vm9017_vm11, %v8946_v16  ;;  %v11712_v39 = vpop.eup %11711  ;;  %v10174_v8 = vmul.f32 1.442695, %v10123_v58  ;;  %v10108_v27 = vsub.f32 0.0, %v10035_v42  ;;  %v9171_v30 = vpop.permute.xlu2 %9170 }
 0x7f2   : > { %9223 = vst.msk [vmem:[#allocation3 + $0x30] sm:$0xf] %vm9210_vm14, %v9139_v29  ;;  %v10218_v31 = vadd.f32 1.0, %v11712_v39  ;;  %v18500_v39 = vld [vmem:[#allocation78_spill] sm:$0xff] }
 0x7f3   : > { %9808 = vst.msk [vmem:[#allocation3 + $0x30] sm:$0xf] %vm9795_vm15, %v9724_v62  ;;  %v10690_v23 = vld [vmem:[#allocation3 + $0x68] sm:$0xff]  ;;  %11713 = vpow2.f32 %v10174_v8  ;;  %v10144_v24 = vmul.f32 1.442695, %v10108_v27  ;;  %v11862_v62 = vld [vmem:[%s12040_s21 + $0x20] sm:$0xff] }
 0x7f4   : > { %11715 = vrcp.f32 %v10218_v31  ;;  %10651 = vmatmul.msk.bf16.gmra.mxu3 %vm9959_vm0, %v10690_v23 }
 0x7f5   : > { %11717 = vpow2.f32 %v10144_v24 }
 0x7f6   : > { %v8978_v46 = vpop.permute.xlu0 %8977  ;;  %v10036_v40 = vpop.f32.mrf.mxu1 }
 0x7f7   : > { %v10037_v38 = vadd.f32 %v17308_v48, %v10036_v40 }
 0x7f8   : > { %v9141_v1 = vpop.permute.xlu1 %9140 }
 0x7f9   : > { %9224 = vst.msk [vmem:[#allocation3 + $0x34] sm:$0xf] %vm9210_vm14, %v9141_v1  ;;  %v11714_v50 = vpop.eup %11713  ;;  %v10109_v45 = vsub.f32 0.0, %v10037_v38  ;;  %v9758_v20 = vpop.permute.xlu2 %9757 }
 0x7fa   : > { %9809 = vst.msk [vmem:[#allocation3 + $0x34] sm:$0xf] %vm9795_vm15, %v9726_v54  ;;  %v11716_v59 = vpop.eup %11715  ;;  %v10219_v33 = vadd.f32 1.0, %v11714_v50 }
 0x7fb   : > { %v11718_v32 = vpop.eup %11717  ;;  %v10282_v43 = vmul.f32 %v11716_v59, %v18493_v10  ;;  %v10146_v17 = vmul.f32 1.442695, %v10109_v45 }
 0x7fc   : > { %11719 = vrcp.f32 %v10219_v33  ;;  %v10204_v35 = vadd.f32 1.0, %v11718_v32  ;;  %v18501_v32 = vld [vmem:[#allocation107_spill] sm:$0xff] }
 0x7fd   : > { %v10314_v51 = vadd.f32 %v11860_v63, %v10282_v43  ;;  %11721 = vpow2.f32 %v10146_v17 }
 0x7fe   : > { %11723 = vrcp.f32 %v10204_v35  ;;  %v9173_v49 = vpop.permute.xlu0 %9172  ;;  %v11864_v35 = vld [vmem:[%s12040_s21 + $0xa0] sm:$0xff] }
 0x7ff   : > { %10347 = vst.msk [vmem:[%s17384_s9 + $0x90] sm:$0xff] %vm10328_vm1, %v10314_v51 }
 0x800   : > { %v8425_v5 = vpop.permute.xlu1 %8424  ;;  %10380 = vst.msk [vmem:[%s17384_s9 + $0x90] sm:$0xff] %vm10361_vm2, %v18494_v3 }
 0x801   : > { %v10683_v44 = vld [vmem:[#allocation3 + $0x30] sm:$0xff]  ;;  %8493 = vst.msk [vmem:[#allocation3 + $0x70] sm:$0xf] %vm8464_vm10, %v8425_v5  ;;  %v8952_v18 = vpop.permute.xlu2 %8951 }
 0x802   : > { %v11720_v34 = vpop.eup %11719  ;;  %9046 = vst.msk [vmem:[#allocation3 + $0x70] sm:$0xf] %vm9017_vm11, %v8978_v46  ;;  %10644 = vmatmul.msk.bf16.gmra.mxu1 %vm9959_vm0, %v10683_v44  ;;  %v18502_v5 = vld [vmem:[#allocation110_spill] sm:$0xff] }
 0x803   : > { %v11722_v13 = vpop.eup %11721  ;;  %v10283_v12 = vmul.f32 %v11720_v34, %v18495_v57  ;;  %9239 = vst.msk [vmem:[#allocation3 + $0x70] sm:$0xf] %vm9210_vm14, %v9171_v30  ;;  %v18503_v34 = vld [vmem:[#allocation111_spill] sm:$0xff] }
 0x804   : > { %v11724_v19 = vpop.eup %11723  ;;  %v10205_v11 = vadd.f32 1.0, %v11722_v13 }
 0x805   : > { %v10315_v52 = vadd.f32 %v11861_v47, %v10283_v12  ;;  %v10268_v26 = vmul.f32 %v11724_v19, %v18496_v21  ;;  %v10074_v61 = vpop.f32.mrf.mxu3  ;;  %v11865_v19 = vld [vmem:[%s12040_s21 + $0xa8] sm:$0xff]  ;;  %v18504_v47 = vld [vmem:[#allocation79_spill] sm:$0xff] }
 0x806   : > { %11725 = vrcp.f32 %v10205_v11  ;;  %v8399_v25 = vpop.permute.xlu0 %8398  ;;  %v10075_v53 = vadd.f32 %v17308_v48, %v10074_v61  ;;  %v11866_v61 = vld [vmem:[%s12040_s21 + $0x30] sm:$0xff] }
 0x807   : > { %10348 = vst.msk [vmem:[%s17384_s9 + $0x98] sm:$0xff] %vm10328_vm1, %v10315_v52  ;;  %v10300_v41 = vadd.f32 %v11862_v62, %v10268_v26 }
 0x808   : > { %v8980_v6 = vpop.permute.xlu1 %8979  ;;  %10381 = vst.msk [vmem:[%s17384_s9 + $0x98] sm:$0xff] %vm10361_vm2, %v18497_v60  ;;  %v10124_v4 = vsub.f32 0.0, %v10075_v53  ;;  %v18505_v53 = vld [vmem:[#allocation114_spill] sm:$0xff] }
 0x809   : > { %10333 = vst.msk [vmem:[%s17384_s9 + $0x20] sm:$0xff] %vm10328_vm1, %v10300_v41  ;;  %v9728_v0 = vpop.permute.xlu2 %9727  ;;  %v18506_v41 = vld [vmem:[#allocation80_spill] sm:$0xff] }
 0x80a   : > { %10366 = vst.msk [vmem:[%s17384_s9 + $0x20] sm:$0xff] %vm10361_vm2, %v18498_v28  ;;  %v10176_v29 = vmul.f32 1.442695, %v10124_v4  ;;  %v18507_v28 = vld [vmem:[#allocation81_spill] sm:$0xff] }
 0x80b   : > { %8480 = vst.msk [vmem:[#allocation3 + $0x3c] sm:$0xf] %vm8464_vm10, %v8399_v25 }
 0x80c   : > { %v11726_v56 = vpop.eup %11725  ;;  %11727 = vpow2.f32 %v10176_v29  ;;  %9033 = vst.msk [vmem:[#allocation3 + $0x3c] sm:$0xf] %vm9017_vm11, %v8952_v18 }
 0x80d   : > { %v10269_v36 = vmul.f32 %v11726_v56, %v18499_v7  ;;  %9047 = vst.msk [vmem:[#allocation3 + $0x74] sm:$0xf] %vm9017_vm11, %v8980_v6  ;;  %v10076_v14 = vpop.f32.mrf.mxu3 }
 0x80e   : > { %9240 = vst.msk [vmem:[#allocation3 + $0x74] sm:$0xf] %vm9210_vm14, %v9173_v49  ;;  %v9143_v2 = vpop.permute.xlu0 %9142  ;;  %v10077_v9 = vadd.f32 %v17308_v48, %v10076_v14  ;;  %v11867_v14 = vld [vmem:[%s12040_s21 + $0x38] sm:$0xff] }
 0x80f   : > { %v10301_v15 = vadd.f32 %v11863_v22, %v10269_v36  ;;  %9825 = vst.msk [vmem:[#allocation3 + $0x74] sm:$0xf] %vm9795_vm15, %v9758_v20  ;;  %v10039_v54 = vpop.f32.mrf.mxu1  ;;  %v18508_v22 = vld [vmem:[#allocation82_spill] sm:$0xff] }
 0x810   : > { %v9756_v37 = vpop.permute.xlu1 %9755  ;;  %v10125_v55 = vsub.f32 0.0, %v10077_v9  ;;  %v10040_v58 = vadd.f32 %v17308_v48, %v10039_v54 }
 0x811   : > { %9824 = vst.msk [vmem:[#allocation3 + $0x70] sm:$0xf] %vm9795_vm15, %v9756_v37  ;;  %v8431_v42 = vpop.permute.xlu2 %8430 }
 0x812   : > { %10334 = vst.msk [vmem:[%s17384_s9 + $0x28] sm:$0xff] %vm10328_vm1, %v10301_v15  ;;  %v11728_v16 = vpop.eup %11727  ;;  %v10178_v8 = vmul.f32 1.442695, %v10125_v55  ;;  %v10110_v27 = vsub.f32 0.0, %v10040_v58 }
 0x813   : > { %10367 = vst.msk [vmem:[%s17384_s9 + $0x28] sm:$0xff] %vm10361_vm2, %v18500_v39  ;;  %v10220_v30 = vadd.f32 1.0, %v11728_v16 }
 0x814   : > { %8496 = vst.msk [vmem:[#allocation3 + $0x7c] sm:$0xf] %vm8464_vm10, %v8431_v42  ;;  %11729 = vpow2.f32 %v10178_v8  ;;  %v10148_v31 = vmul.f32 1.442695, %v10110_v27 }
 0x815   : > { %11731 = vrcp.f32 %v10220_v30 }
 0x816   : > { %11733 = vpow2.f32 %v10148_v31  ;;  %v9730_v23 = vpop.permute.xlu0 %9729 }
 0x817   : > { %v10041_v46 = vpop.f32.mrf.mxu1 }
 0x818   : > { %v8950_v24 = vpop.permute.xlu1 %8949  ;;  %v10691_v40 = vld [vmem:[#allocation3 + $0x70] sm:$0xff]  ;;  %v10042_v38 = vadd.f32 %v17308_v48, %v10041_v46 }
 0x819   : > { %9032 = vst.msk [vmem:[#allocation3 + $0x38] sm:$0xf] %vm9017_vm11, %v8950_v24  ;;  %10652 = vmatmul.msk.bf16.gmra.mxu3 %vm9959_vm0, %v10691_v40  ;;  %v9175_v1 = vpop.permute.xlu2 %9174 }
 0x81a   : > { %9225 = vst.msk [vmem:[#allocation3 + $0x38] sm:$0xf] %vm9210_vm14, %v9143_v2  ;;  %v11730_v50 = vpop.eup %11729  ;;  %v10111_v45 = vsub.f32 0.0, %v10042_v38 }
 0x81b   : > { %9810 = vst.msk [vmem:[#allocation3 + $0x38] sm:$0xf] %vm9795_vm15, %v9728_v0  ;;  %v11732_v20 = vpop.eup %11731  ;;  %v10221_v59 = vadd.f32 1.0, %v11730_v50 }
 0x81c   : > { %v11734_v33 = vpop.eup %11733  ;;  %v10284_v10 = vmul.f32 %v11732_v20, %v18501_v32  ;;  %v10150_v43 = vmul.f32 1.442695, %v10111_v45 }
 0x81d   : > { %11735 = vrcp.f32 %v10221_v59  ;;  %v10206_v17 = vadd.f32 1.0, %v11734_v33  ;;  %v18509_v33 = vld [vmem:[#allocation106_spill] sm:$0xff] }
 0x81e   : > { %v10316_v63 = vadd.f32 %v11864_v35, %v10284_v10  ;;  %11737 = vpow2.f32 %v10150_v43  ;;  %v8982_v51 = vpop.permute.xlu0 %8981 }
 0x81f   : > { %11739 = vrcp.f32 %v10206_v17  ;;  %v11868_v17 = vld [vmem:[%s12040_s21 + $0xb0] sm:$0xff] }
 0x820   : > { %v9145_v49 = vpop.permute.xlu1 %9144  ;;  %10349 = vst.msk [vmem:[%s17384_s9 + $0xa0] sm:$0xff] %vm10328_vm1, %v10316_v63 }
 0x821   : > { %10382 = vst.msk [vmem:[%s17384_s9 + $0xa0] sm:$0xff] %vm10361_vm2, %v18502_v5  ;;  %v9762_v44 = vpop.permute.xlu2 %9761 }
 0x822   : > { %9226 = vst.msk [vmem:[#allocation3 + $0x3c] sm:$0xf] %vm9210_vm14, %v9145_v49 }
 0x823   : > { %v11736_v3 = vpop.eup %11735  ;;  %9811 = vst.msk [vmem:[#allocation3 + $0x3c] sm:$0xf] %vm9795_vm15, %v9730_v23 }
 0x824   : > { %v11738_v18 = vpop.eup %11737  ;;  %v10285_v13 = vmul.f32 %v11736_v3, %v18503_v34 }
 0x825   : > { %v11740_v57 = vpop.eup %11739  ;;  %v10207_v12 = vadd.f32 1.0, %v11738_v18 }
 0x826   : > { %v10317_v11 = vadd.f32 %v11865_v19, %v10285_v13  ;;  %v10270_v52 = vmul.f32 %v11740_v57, %v18504_v47  ;;  %v9177_v21 = vpop.permute.xlu0 %9176  ;;  %v11869_v57 = vld [vmem:[%s12040_s21 + $0xb8] sm:$0xff]  ;;  %v11870_v47 = vld [vmem:[%s12040_s21 + $0x40] sm:$0xff] }
 0x827   : > { %11741 = vrcp.f32 %v10207_v12  ;;  %v18512_v19 = vld [vmem:[#allocation83_spill] sm:$0xff] }
 0x828   : > { %v8429_v26 = vpop.permute.xlu1 %8428  ;;  %10350 = vst.msk [vmem:[%s17384_s9 + $0xa8] sm:$0xff] %vm10328_vm1, %v10317_v11  ;;  %v10302_v25 = vadd.f32 %v11866_v61, %v10270_v52  ;;  %v18514_v61 = vld [vmem:[#allocation84_spill] sm:$0xff] }
 0x829   : > { %10383 = vst.msk [vmem:[%s17384_s9 + $0xa8] sm:$0xff] %vm10361_vm2, %v18505_v53  ;;  %v8954_v0 = vpop.permute.xlu2 %8953 }
 0x82a   : > { %10335 = vst.msk [vmem:[%s17384_s9 + $0x30] sm:$0xff] %vm10328_vm1, %v10302_v25  ;;  %v10684_v62 = vld [vmem:[#allocation3 + $0x38] sm:$0xff] }
 0x82b   : > { %10368 = vst.msk [vmem:[%s17384_s9 + $0x30] sm:$0xff] %vm10361_vm2, %v18506_v41  ;;  %10645 = vmatmul.msk.bf16.gmra.mxu1 %vm9959_vm0, %v10684_v62  ;;  %v18515_v62 = vld [vmem:[#allocation85_spill] sm:$0xff] }
 0x82c   : > { %8495 = vst.msk [vmem:[#allocation3 + $0x78] sm:$0xf] %vm8464_vm10, %v8429_v26  ;;  %v10079_v6 = vpop.f32.mrf.mxu3 }
 0x82d   : > { %v11742_v60 = vpop.eup %11741  ;;  %9048 = vst.msk [vmem:[#allocation3 + $0x78] sm:$0xf] %vm9017_vm11, %v8982_v51  ;;  %v10080_v4 = vadd.f32 %v17308_v48, %v10079_v6  ;;  %v18510_v51 = vld [vmem:[#allocation109_spill] sm:$0xff] }
 0x82e   : > { %v10271_v29 = vmul.f32 %v11742_v60, %v18507_v28  ;;  %9241 = vst.msk [vmem:[#allocation3 + $0x78] sm:$0xf] %vm9210_vm14, %v9175_v1  ;;  %v8401_v56 = vpop.permute.xlu0 %8400  ;;  %v11871_v60 = vld [vmem:[%s12040_s21 + $0x48] sm:$0xff] }
 0x82f   : > { %8481 = vst.msk [vmem:[#allocation3 + $0x40] sm:$0xf] %vm8464_vm10, %v8401_v56  ;;  %v10126_v7 = vsub.f32 0.0, %v10080_v4 }
 0x830   : > { %v8984_v36 = vpop.permute.xlu1 %8983  ;;  %v10303_v2 = vadd.f32 %v11867_v14, %v10271_v29  ;;  %9034 = vst.msk [vmem:[#allocation3 + $0x40] sm:$0xf] %vm9017_vm11, %v8954_v0  ;;  %v18516_v29 = vld [vmem:[#allocation86_spill] sm:$0xff] }
 0x831   : > { %v10180_v9 = vmul.f32 1.442695, %v10126_v7  ;;  %9049 = vst.msk [vmem:[#allocation3 + $0x7c] sm:$0xf] %vm9017_vm11, %v8984_v36  ;;  %v9149_v1 = vpop.permute.xlu2 %9148 }
 0x832   : > { %10336 = vst.msk [vmem:[%s17384_s9 + $0x38] sm:$0xff] %vm10328_vm1, %v10303_v2 }
 0x833   : > { %10369 = vst.msk [vmem:[%s17384_s9 + $0x38] sm:$0xff] %vm10361_vm2, %v18508_v22  ;;  %11743 = vpow2.f32 %v10180_v9 }
 0x834   : > { %9242 = vst.msk [vmem:[#allocation3 + $0x7c] sm:$0xf] %vm9210_vm14, %v9177_v21  ;;  %v10081_v15 = vpop.f32.mrf.mxu3  ;;  %v18513_v21 = vld [vmem:[#allocation116_spill] sm:$0xff] }
 0x835   : > { %9827 = vst.msk [vmem:[#allocation3 + $0x7c] sm:$0xf] %vm9795_vm15, %v9762_v44  ;;  %v10082_v37 = vadd.f32 %v17308_v48, %v10081_v15  ;;  %v18511_v44 = vld [vmem:[#allocation113_spill] sm:$0xff] }
 0x836   : > { %v10044_v54 = vpop.f32.mrf.mxu1  ;;  %v8956_v23 = vpop.permute.xlu0 %8955 }
 0x837   : > { %v10127_v55 = vsub.f32 0.0, %v10082_v37  ;;  %v10045_v58 = vadd.f32 %v17308_v48, %v10044_v54 }
 0x838   : > { %v9760_v42 = vpop.permute.xlu1 %9759 }
 0x839   : > { %9826 = vst.msk [vmem:[#allocation3 + $0x78] sm:$0xf] %vm9795_vm15, %v9760_v42  ;;  %v11744_v16 = vpop.eup %11743  ;;  %v10182_v39 = vmul.f32 1.442695, %v10127_v55  ;;  %v10112_v8 = vsub.f32 0.0, %v10045_v58 }
 0x83a   : > { %v10222_v27 = vadd.f32 1.0, %v11744_v16 }
 0x83b   : > { %11745 = vpow2.f32 %v10182_v39  ;;  %v10152_v30 = vmul.f32 1.442695, %v10112_v8 }
 0x83c   : > { %11747 = vrcp.f32 %v10222_v27 }
 0x83d   : > { %11749 = vpow2.f32 %v10152_v30 }
 0x83e   : > { %v10046_v31 = vpop.f32.mrf.mxu1  ;;  %v9732_v49 = vpop.permute.xlu0 %9731 }
 0x83f   : > { %v10047_v24 = vadd.f32 %v17308_v48, %v10046_v31  ;;  %v18517_v31 = vld [vmem:[#allocation117_spill] sm:$0xff] }
 0x840   : > { %v8403_v46 = vpop.permute.xlu1 %8402  ;;  %v10692_v40 = vld [vmem:[#allocation3 + $0x78] sm:$0xff] }
 0x841   : > { %8482 = vst.msk [vmem:[#allocation3 + $0x44] sm:$0xf] %vm8464_vm10, %v8403_v46  ;;  %v11746_v38 = vpop.eup %11745  ;;  %v10113_v50 = vsub.f32 0.0, %v10047_v24  ;;  %10653 = vmatmul.msk.bf16.gmra.mxu3 %vm9959_vm0, %v10692_v40  ;;  %v11872_v40 = vld [vmem:[%s12040_s21 + $0xc0] sm:$0xff] }
 0x842   : > { %9035 = vst.msk [vmem:[#allocation3 + $0x44] sm:$0xf] %vm9017_vm11, %v8956_v23  ;;  %v11748_v45 = vpop.eup %11747  ;;  %v10223_v20 = vadd.f32 1.0, %v11746_v38 }
 0x843   : > { %9228 = vst.msk [vmem:[#allocation3 + $0x44] sm:$0xf] %vm9210_vm14, %v9149_v1  ;;  %v11750_v59 = vpop.eup %11749  ;;  %v10286_v32 = vmul.f32 %v11748_v45, %v18509_v33  ;;  %v10154_v10 = vmul.f32 1.442695, %v10113_v50  ;;  %v18518_v1 = vld [vmem:[#allocation119_spill] sm:$0xff] }
 0x844   : > { %11751 = vrcp.f32 %v10223_v20  ;;  %v10208_v43 = vadd.f32 1.0, %v11750_v59  ;;  %v18519_v20 = vld [vmem:[#allocation112_spill] sm:$0xff] }
 0x845   : > { %v10318_v35 = vadd.f32 %v11868_v17, %v10286_v32  ;;  %11753 = vpow2.f32 %v10154_v10  ;;  %v11873_v10 = vld [vmem:[%s12040_s21 + $0xc8] sm:$0xff]  ;;  %v18520_v17 = vld [vmem:[#allocation87_spill] sm:$0xff] }
 0x846   : > { %11755 = vrcp.f32 %v10208_v43 }
 0x847   : > { %10351 = vst.msk [vmem:[%s17384_s9 + $0xb0] sm:$0xff] %vm10328_vm1, %v10318_v35 }
 0x848   : > { %v9147_v63 = vpop.permute.xlu1 %9146  ;;  %10384 = vst.msk [vmem:[%s17384_s9 + $0xb0] sm:$0xff] %vm10361_vm2, %v18510_v51 }
 0x849   : > { %9227 = vst.msk [vmem:[#allocation3 + $0x40] sm:$0xf] %vm9210_vm14, %v9147_v63  ;;  %v11874_v63 = vld [vmem:[%s12040_s21 + $0x50] sm:$0xff] }
 0x84a   : > { %v11752_v5 = vpop.eup %11751  ;;  %9812 = vst.msk [vmem:[#allocation3 + $0x40] sm:$0xf] %vm9795_vm15, %v9732_v49 }
 0x84b   : > { %v11754_v3 = vpop.eup %11753  ;;  %v10287_v18 = vmul.f32 %v11752_v5, %v18511_v44  ;;  %v18521_v5 = vld [vmem:[#allocation115_spill] sm:$0xff]  ;;  %v18522_v44 = vld [vmem:[#allocation88_spill] sm:$0xff] }
 0x84c   : > { %v11756_v34 = vpop.eup %11755  ;;  %v10209_v13 = vadd.f32 1.0, %v11754_v3 }
 0x84d   : > { %v10319_v12 = vadd.f32 %v11869_v57, %v10287_v18  ;;  %v10272_v11 = vmul.f32 %v11756_v34, %v18512_v19  ;;  %v18523_v57 = vld [vmem:[#allocation89_spill] sm:$0xff]  ;;  %v11875_v19 = vld [vmem:[%s12040_s21 + $0x58] sm:$0xff] }
 0x84e   : > { %11757 = vrcp.f32 %v10209_v13 }
 0x84f   : > { %10352 = vst.msk [vmem:[%s17384_s9 + $0xb8] sm:$0xff] %vm10328_vm1, %v10319_v12  ;;  %v10304_v52 = vadd.f32 %v11870_v47, %v10272_v11 }
 0x850   : > { %10385 = vst.msk [vmem:[%s17384_s9 + $0xb8] sm:$0xff] %vm10361_vm2, %v18513_v21  ;;  %v9734_v26 = vpop.permute.xlu1 %9733 }
 0x851   : > { %10337 = vst.msk [vmem:[%s17384_s9 + $0x40] sm:$0xff] %vm10328_vm1, %v10304_v52 }
 0x852   : > { %10370 = vst.msk [vmem:[%s17384_s9 + $0x40] sm:$0xff] %vm10361_vm2, %v18514_v61  ;;  %v18524_v61 = vld [vmem:[#allocation90_spill] sm:$0xff] }
 0x853   : > { %9813 = vst.msk [vmem:[#allocation3 + $0x44] sm:$0xf] %vm9795_vm15, %v9734_v26 }
 0x854   : > { %v11758_v25 = vpop.eup %11757  ;;  %v10084_v53 = vpop.f32.mrf.mxu3 }
 0x855   : > { %v10273_v41 = vmul.f32 %v11758_v25, %v18515_v62  ;;  %v10085_v6 = vadd.f32 %v17308_v48, %v10084_v53 }
 0x857   : > { %v10305_v4 = vadd.f32 %v11871_v60, %v10273_v41  ;;  %v10128_v0 = vsub.f32 0.0, %v10085_v6 }
 0x859   : > { %10338 = vst.msk [vmem:[%s17384_s9 + $0x48] sm:$0xff] %vm10328_vm1, %v10305_v4  ;;  %v10184_v28 = vmul.f32 1.442695, %v10128_v0 }
 0x85a   : > { %10371 = vst.msk [vmem:[%s17384_s9 + $0x48] sm:$0xff] %vm10361_vm2, %v18516_v29  ;;  %v10685_v56 = vld [vmem:[#allocation3 + $0x40] sm:$0xff] }
 0x85b   : > { %11759 = vpow2.f32 %v10184_v28  ;;  %10646 = vmatmul.msk.bf16.gmra.mxu1 %vm9959_vm0, %v10685_v56 }
 0x85c   : > { %v10086_v7 = vpop.f32.mrf.mxu3 }
 0x85d   : > { %v10087_v36 = vadd.f32 %v17308_v48, %v10086_v7 }
 0x85e   : > { %v10049_v14 = vpop.f32.mrf.mxu1 }
 0x85f   : > { %v10129_v2 = vsub.f32 0.0, %v10087_v36  ;;  %v10050_v9 = vadd.f32 %v17308_v48, %v10049_v14 }
 0x861   : > { %v11760_v22 = vpop.eup %11759  ;;  %v10186_v15 = vmul.f32 1.442695, %v10129_v2  ;;  %v10114_v37 = vsub.f32 0.0, %v10050_v9  ;;  %v18525_v2 = vld [vmem:[#allocation118_spill] sm:$0xff] }
 0x862   : > { %v10224_v54 = vadd.f32 1.0, %v11760_v22 }
 0x863   : > { %11761 = vpow2.f32 %v10186_v15  ;;  %v10156_v55 = vmul.f32 1.442695, %v10114_v37  ;;  %v11876_v15 = vld [vmem:[%s12040_s21 + $0xd0] sm:$0xff] }
 0x864   : > { %11763 = vrcp.f32 %v10224_v54 }
 0x865   : > { %11765 = vpow2.f32 %v10156_v55 }
 0x866   : > { %v10051_v58 = vpop.f32.mrf.mxu1 }
 0x867   : > { %v10052_v42 = vadd.f32 %v17308_v48, %v10051_v58 }
 0x869   : > { %v11762_v16 = vpop.eup %11761  ;;  %v10115_v39 = vsub.f32 0.0, %v10052_v42  ;;  %v18527_v42 = vld [vmem:[#allocation121_spill] sm:$0xff] }
 0x86a   : > { %v11764_v8 = vpop.eup %11763  ;;  %v10225_v27 = vadd.f32 1.0, %v11762_v16 }
 0x86b   : > { %v11766_v30 = vpop.eup %11765  ;;  %v10288_v23 = vmul.f32 %v11764_v8, %v18517_v31  ;;  %v10158_v24 = vmul.f32 1.442695, %v10115_v39  ;;  %v11877_v8 = vld [vmem:[%s12040_s21 + $0xd8] sm:$0xff] }
 0x86c   : > { %11767 = vrcp.f32 %v10225_v27  ;;  %v10210_v46 = vadd.f32 1.0, %v11766_v30  ;;  %v18528_v30 = vld [vmem:[#allocation91_spill] sm:$0xff] }
 0x86d   : > { %v10320_v38 = vadd.f32 %v11872_v40, %v10288_v23  ;;  %11769 = vpow2.f32 %v10158_v24  ;;  %v11878_v23 = vld [vmem:[%s12040_s21 + $0x60] sm:$0xff] }
 0x86e   : > { %11771 = vrcp.f32 %v10210_v46  ;;  %v18529_v46 = vld [vmem:[#allocation123_spill] sm:$0xff] }
 0x86f   : > { %10353 = vst.msk [vmem:[%s17384_s9 + $0xc0] sm:$0xff] %vm10328_vm1, %v10320_v38 }
 0x870   : > { %10386 = vst.msk [vmem:[%s17384_s9 + $0xc0] sm:$0xff] %vm10361_vm2, %v18518_v1  ;;  %v18530_v1 = vld [vmem:[#allocation92_spill] sm:$0xff] }
 0x872   : > { %v11768_v50 = vpop.eup %11767 }
 0x873   : > { %v11770_v45 = vpop.eup %11769  ;;  %v10289_v59 = vmul.f32 %v11768_v50, %v18519_v20  ;;  %v17635_v50 = vld [vmem:[%s17717_s6] ss:$0 sm:$0xff]  ;;  %v18531_v20 = vld [vmem:[#allocation93_spill] sm:$0xff] }
 0x874   : > { %v11772_v33 = vpop.eup %11771  ;;  %v10211_v32 = vadd.f32 1.0, %v11770_v45 }
 0x875   : > { %v10321_v43 = vadd.f32 %v11873_v10, %v10289_v59  ;;  %v10274_v35 = vmul.f32 %v11772_v33, %v18520_v17  ;;  %v18532_v17 = vld [vmem:[#allocation94_spill] sm:$0xff] }
 0x876   : > { %11773 = vrcp.f32 %v10211_v32  ;;  %v11880_v32 = vld [vmem:[%s12040_s21 + $0x68] sm:$0xff] }
 0x877   : > { %10354 = vst.msk [vmem:[%s17384_s9 + $0xc8] sm:$0xff] %vm10328_vm1, %v10321_v43  ;;  %v10306_v51 = vadd.f32 %v11874_v63, %v10274_v35  ;;  %v10089_v49 = vpop.f32.mrf.mxu3 }
 0x878   : > { %10387 = vst.msk [vmem:[%s17384_s9 + $0xc8] sm:$0xff] %vm10361_vm2, %v18521_v5  ;;  %v10090_v3 = vadd.f32 %v17308_v48, %v10089_v49 }
 0x879   : > { %10339 = vst.msk [vmem:[%s17384_s9 + $0x50] sm:$0xff] %vm10328_vm1, %v10306_v51 }
 0x87a   : > { %10372 = vst.msk [vmem:[%s17384_s9 + $0x50] sm:$0xff] %vm10361_vm2, %v18522_v44  ;;  %v10130_v18 = vsub.f32 0.0, %v10090_v3 }
 0x87c   : > { %v11774_v34 = vpop.eup %11773  ;;  %v10188_v13 = vmul.f32 1.442695, %v10130_v18 }
 0x87d   : > { %v10275_v12 = vmul.f32 %v11774_v34, %v18523_v57 }
 0x87e   : > { %11775 = vpow2.f32 %v10188_v13 }
 0x87f   : > { %v10307_v11 = vadd.f32 %v11875_v19, %v10275_v12  ;;  %v10091_v47 = vpop.f32.mrf.mxu3  ;;  %v10054_v52 = vpop.f32.mrf.mxu1 }
 0x880   : > { %v10092_v21 = vadd.f32 %v17308_v48, %v10091_v47  ;;  %v10055_v26 = vadd.f32 %v17308_v48, %v10054_v52  ;;  %v18533_v52 = vld [vmem:[#allocation122_spill] sm:$0xff] }
 0x881   : > { %10340 = vst.msk [vmem:[%s17384_s9 + $0x58] sm:$0xff] %vm10328_vm1, %v10307_v11 }
 0x882   : > { %10373 = vst.msk [vmem:[%s17384_s9 + $0x58] sm:$0xff] %vm10361_vm2, %v18524_v61  ;;  %v10131_v25 = vsub.f32 0.0, %v10092_v21  ;;  %v10116_v53 = vsub.f32 0.0, %v10055_v26  ;;  %v11881_v61 = vld [vmem:[%s12040_s21 + $0xe0] sm:$0xff] }
 0x884   : > { %v11776_v62 = vpop.eup %11775  ;;  %v10190_v41 = vmul.f32 1.442695, %v10131_v25  ;;  %v10160_v6 = vmul.f32 1.442695, %v10116_v53 }
 0x885   : > { %v10226_v60 = vadd.f32 1.0, %v11776_v62 }
 0x886   : > { %11777 = vpow2.f32 %v10190_v41 }
 0x887   : > { %11779 = vrcp.f32 %v10226_v60  ;;  %v10056_v4 = vpop.f32.mrf.mxu1 }
 0x888   : > { %11781 = vpow2.f32 %v10160_v6  ;;  %v10057_v0 = vadd.f32 %v17308_v48, %v10056_v4  ;;  %v18526_v48 = vld [vmem:[#allocation120_spill] sm:$0xff]  ;;  %v18535_v4 = vld [vmem:[#allocation125_spill] sm:$0xff] }
 0x889   : > { %v18534_v6 = vld [vmem:[#allocation124_spill] sm:$0xff] }
 0x88a   : > { %v10117_v28 = vsub.f32 0.0, %v10057_v0 }
 0x88c   : > { %v11778_v29 = vpop.eup %11777  ;;  %v10162_v56 = vmul.f32 1.442695, %v10117_v28  ;;  %v11882_v28 = vld [vmem:[%s12040_s21 + $0xe8] sm:$0xff] }
 0x88d   : > { %v11780_v7 = vpop.eup %11779  ;;  %v10227_v36 = vadd.f32 1.0, %v11778_v29 }
 0x88e   : > { %v11782_v14 = vpop.eup %11781  ;;  %v10290_v9 = vmul.f32 %v11780_v7, %v18525_v2  ;;  %11783 = vpow2.f32 %v10162_v56  ;;  %v18537_v2 = vld [vmem:[#allocation97_spill] sm:$0xff] }
 0x88f   : > { %11785 = vrcp.f32 %v10227_v36  ;;  %v10212_v22 = vadd.f32 1.0, %v11782_v14  ;;  %v18536_v14 = vld [vmem:[#allocation126_spill] sm:$0xff] }
 0x890   : > { %v10322_v37 = vadd.f32 %v11876_v15, %v10290_v9 }
 0x891   : > { %11787 = vrcp.f32 %v10212_v22  ;;  %v11883_v22 = vld [vmem:[%s12040_s21 + $0x70] sm:$0xff] }
 0x892   : > { %10355 = vst.msk [vmem:[%s17384_s9 + $0xd0] sm:$0xff] %vm10328_vm1, %v10322_v37 }
 0x893   : > { %10388 = vst.msk [vmem:[%s17384_s9 + $0xd0] sm:$0xff] %vm10361_vm2, %v18526_v48  ;;  %v18538_v48 = vld [vmem:[#allocation98_spill] sm:$0xff] }
 0x894   : > { %v11784_v54 = vpop.eup %11783 }
 0x895   : > { %v11786_v55 = vpop.eup %11785  ;;  %v10213_v58 = vadd.f32 1.0, %v11784_v54 }
 0x896   : > { %v10291_v16 = vmul.f32 %v11786_v55, %v18527_v42  ;;  %v18539_v42 = vld [vmem:[#allocation102_spill] sm:$0xff] }
 0x897   : > { %v11788_v39 = vpop.eup %11787  ;;  %11789 = vrcp.f32 %v10213_v58 }
 0x898   : > { %v10323_v27 = vadd.f32 %v11877_v8, %v10291_v16  ;;  %v10276_v31 = vmul.f32 %v11788_v39, %v18528_v30  ;;  %v11884_v8 = vld [vmem:[%s12040_s21 + $0x78] sm:$0xff] }
 0x89a   : > { %10356 = vst.msk [vmem:[%s17384_s9 + $0xd8] sm:$0xff] %vm10328_vm1, %v10323_v27  ;;  %v10308_v24 = vadd.f32 %v11878_v23, %v10276_v31  ;;  %v18540_v31 = vld [vmem:[#allocation104_spill] sm:$0xff] }
 0x89b   : > { %10389 = vst.msk [vmem:[%s17384_s9 + $0xd8] sm:$0xff] %vm10361_vm2, %v18529_v46 }
 0x89c   : > { %10341 = vst.msk [vmem:[%s17384_s9 + $0x60] sm:$0xff] %vm10328_vm1, %v10308_v24  ;;  %v10094_v40 = vpop.f32.mrf.mxu3 }
 0x89d   : > { %v11790_v38 = vpop.eup %11789  ;;  %10374 = vst.msk [vmem:[%s17384_s9 + $0x60] sm:$0xff] %vm10361_vm2, %v18530_v1  ;;  %v10095_v45 = vadd.f32 %v17635_v50, %v10094_v40 }
 0x89e   : > { %v10277_v59 = vmul.f32 %v11790_v38, %v18531_v20 }
 0x89f   : > { %v10132_v33 = vsub.f32 0.0, %v10095_v45 }
 0x8a0   : > { %v10309_v10 = vadd.f32 %v11880_v32, %v10277_v59  ;;  %v18541_v32 = vld [vmem:[#allocation127_spill] sm:$0xff] }
 0x8a1   : > { %v10192_v43 = vmul.f32 1.442695, %v10132_v33 }
 0x8a2   : > { %10342 = vst.msk [vmem:[%s17384_s9 + $0x68] sm:$0xff] %vm10328_vm1, %v10309_v10 }
 0x8a3   : > { %10375 = vst.msk [vmem:[%s17384_s9 + $0x68] sm:$0xff] %vm10361_vm2, %v18532_v17  ;;  %11791 = vpow2.f32 %v10192_v43  ;;  %v11885_v17 = vld [vmem:[%s12040_s21 + $0xf0] sm:$0xff] }
 0x8a4   : > { %v10096_v35 = vpop.f32.mrf.mxu3 }
 0x8a5   : > { %v10097_v63 = vadd.f32 %v17635_v50, %v10096_v35 }
 0x8a7   : > { %v10133_v51 = vsub.f32 0.0, %v10097_v63 }
 0x8a8   : > { %v10059_v3 = vpop.f32.mrf.mxu1 }
 0x8a9   : > { %v11792_v49 = vpop.eup %11791  ;;  %v10194_v5 = vmul.f32 1.442695, %v10133_v51  ;;  %v10060_v18 = vadd.f32 %v17635_v50, %v10059_v3  ;;  %v18542_v51 = vld [vmem:[#allocation128_spill] sm:$0xff] }
 0x8aa   : > { %v10228_v44 = vadd.f32 1.0, %v11792_v49 }
 0x8ab   : > { %11793 = vpow2.f32 %v10194_v5  ;;  %v10118_v34 = vsub.f32 0.0, %v10060_v18 }
 0x8ac   : > { %11795 = vrcp.f32 %v10228_v44  ;;  %v18543_v44 = vld [vmem:[#allocation129_spill] sm:$0xff] }
 0x8ad   : > { %v10164_v13 = vmul.f32 1.442695, %v10118_v34 }
 0x8af   : > { %11797 = vpow2.f32 %v10164_v13  ;;  %v11886_v13 = vld [vmem:[%s12040_s21 + $0xf8] sm:$0xff] }
 0x8b0   : > { %v10061_v12 = vpop.f32.mrf.mxu1 }
 0x8b1   : > { %v11794_v57 = vpop.eup %11793  ;;  %v10062_v47 = vadd.f32 %v17635_v50, %v10061_v12 }
 0x8b2   : > { %v11796_v19 = vpop.eup %11795  ;;  %v10229_v11 = vadd.f32 1.0, %v11794_v57 }
 0x8b3   : > { %v10292_v21 = vmul.f32 %v11796_v19, %v18533_v52  ;;  %v10119_v26 = vsub.f32 0.0, %v10062_v47  ;;  %v18544_v47 = vld [vmem:[#allocation130_spill] sm:$0xff] }
 0x8b4   : > { %11799 = vrcp.f32 %v10229_v11 }
 0x8b5   : > { %v10324_v25 = vadd.f32 %v11881_v61, %v10292_v21  ;;  %v11798_v53 = vpop.eup %11797  ;;  %v10166_v62 = vmul.f32 1.442695, %v10119_v26  ;;  %v18545_v26 = vld [vmem:[#allocation95_spill] sm:$0xff] }
 0x8b6   : > { %v10214_v41 = vadd.f32 1.0, %v11798_v53 }
 0x8b7   : > { %10357 = vst.msk [vmem:[%s17384_s9 + $0xe0] sm:$0xff] %vm10328_vm1, %v10324_v25  ;;  %11801 = vpow2.f32 %v10166_v62  ;;  %v11887_v25 = vld [vmem:[%s12040_s21 + $0x80] sm:$0xff] }
 0x8b8   : > { %10390 = vst.msk [vmem:[%s17384_s9 + $0xe0] sm:$0xff] %vm10361_vm2, %v18534_v6  ;;  %11803 = vrcp.f32 %v10214_v41  ;;  %v18546_v62 = vld [vmem:[#allocation96_spill] sm:$0xff] }
 0x8b9   : > { %v18547_v6 = vld [vmem:[#allocation100_spill] sm:$0xff] }
 0x8ba   : > { %v11800_v60 = vpop.eup %11799 }
 0x8bb   : > { %v10293_v0 = vmul.f32 %v11800_v60, %v18535_v4  ;;  %v11888_v4 = vld [vmem:[%s12040_s21 + $0x88] sm:$0xff] }
 0x8bd   : > { %v10325_v29 = vadd.f32 %v11882_v28, %v10293_v0  ;;  %v11802_v56 = vpop.eup %11801  ;;  %v18548_v28 = vld [vmem:[#allocation103_spill] sm:$0xff] }
 0x8be   : > { %v11804_v7 = vpop.eup %11803  ;;  %v10215_v36 = vadd.f32 1.0, %v11802_v56 }
 0x8bf   : > { %10358 = vst.msk [vmem:[%s17384_s9 + $0xe8] sm:$0xff] %vm10328_vm1, %v10325_v29  ;;  %v10278_v9 = vmul.f32 %v11804_v7, %v18537_v2 }
 0x8c0   : > { %10391 = vst.msk [vmem:[%s17384_s9 + $0xe8] sm:$0xff] %vm10361_vm2, %v18536_v14  ;;  %11805 = vrcp.f32 %v10215_v36 }
 0x8c1   : > { %v10310_v15 = vadd.f32 %v11883_v22, %v10278_v9 }
 0x8c3   : > { %10343 = vst.msk [vmem:[%s17384_s9 + $0x70] sm:$0xff] %vm10328_vm1, %v10310_v15 }
 0x8c4   : > { %v10099_v37 = vpop.f32.mrf.mxu3  ;;  %10376 = vst.msk [vmem:[%s17384_s9 + $0x70] sm:$0xff] %vm10361_vm2, %v18538_v48 }
 0x8c5   : > { %v10100_v54 = vadd.f32 %v17635_v50, %v10099_v37 }
 0x8c6   : > { %v11806_v55 = vpop.eup %11805 }
 0x8c7   : > { %v10134_v58 = vsub.f32 0.0, %v10100_v54  ;;  %v10279_v16 = vmul.f32 %v11806_v55, %v18539_v42 }
 0x8c9   : > { %v10196_v39 = vmul.f32 1.442695, %v10134_v58  ;;  %v10311_v27 = vadd.f32 %v11884_v8, %v10279_v16 }
 0x8cb   : > { %11807 = vpow2.f32 %v10196_v39  ;;  %10344 = vst.msk [vmem:[%s17384_s9 + $0x78] sm:$0xff] %vm10328_vm1, %v10311_v27 }
 0x8cc   : > { %v10101_v30 = vpop.f32.mrf.mxu3  ;;  %10377 = vst.msk [vmem:[%s17384_s9 + $0x78] sm:$0xff] %vm10361_vm2, %v18540_v31 }
 0x8cd   : > { %v10102_v23 = vadd.f32 %v17635_v50, %v10101_v30 }
 0x8cf   : > { %v10135_v24 = vsub.f32 0.0, %v10102_v23 }
 0x8d1   : > { %v11808_v46 = vpop.eup %11807  ;;  %v10198_v40 = vmul.f32 1.442695, %v10135_v24 }
 0x8d2   : > { %v10230_v38 = vadd.f32 1.0, %v11808_v46 }
 0x8d3   : > { %11809 = vpow2.f32 %v10198_v40 }
 0x8d4   : > { %11811 = vrcp.f32 %v10230_v38 }
 0x8d8   : > { %v10064_v45 = vpop.f32.mrf.mxu1 }
 0x8d9   : > { %v11810_v1 = vpop.eup %11809  ;;  %v10065_v33 = vadd.f32 %v17635_v50, %v10064_v45 }
 0x8da   : > { %v11812_v20 = vpop.eup %11811  ;;  %v10231_v59 = vadd.f32 1.0, %v11810_v1 }
 0x8db   : > { %v10294_v10 = vmul.f32 %v11812_v20, %v18541_v32  ;;  %v10120_v43 = vsub.f32 0.0, %v10065_v33 }
 0x8dc   : > { %11813 = vrcp.f32 %v10231_v59 }
 0x8dd   : > { %v10326_v35 = vadd.f32 %v11885_v17, %v10294_v10  ;;  %v10168_v63 = vmul.f32 1.442695, %v10120_v43 }
 0x8df   : > { %10359 = vst.msk [vmem:[%s17384_s9 + $0xf0] sm:$0xff] %vm10328_vm1, %v10326_v35  ;;  %11815 = vpow2.f32 %v10168_v63 }
 0x8e0   : > { %10392 = vst.msk [vmem:[%s17384_s9 + $0xf0] sm:$0xff] %vm10361_vm2, %v18542_v51  ;;  %v10066_v49 = vpop.f32.mrf.mxu1 }
 0x8e1   : > { %v10067_v3 = vadd.f32 %v17635_v50, %v10066_v49 }
 0x8e2   : > { %v11814_v5 = vpop.eup %11813 }
 0x8e3   : > { %v10295_v18 = vmul.f32 %v11814_v5, %v18543_v44  ;;  %v10121_v34 = vsub.f32 0.0, %v10067_v3 }
 0x8e5   : > { %v10327_v57 = vadd.f32 %v11886_v13, %v10295_v18  ;;  %v11816_v12 = vpop.eup %11815  ;;  %v10170_v19 = vmul.f32 1.442695, %v10121_v34 }
 0x8e6   : > { %v10216_v11 = vadd.f32 1.0, %v11816_v12 }
 0x8e7   : > { %10360 = vst.msk [vmem:[%s17384_s9 + $0xf8] sm:$0xff] %vm10328_vm1, %v10327_v57  ;;  %11817 = vpow2.f32 %v10170_v19 }
 0x8e8   : > { %10393 = vst.msk [vmem:[%s17384_s9 + $0xf8] sm:$0xff] %vm10361_vm2, %v18544_v47  ;;  %11819 = vrcp.f32 %v10216_v11 }
 0x8ed   : > { %v11818_v50 = vpop.eup %11817 }
 0x8ee   : > { %v11820_v52 = vpop.eup %11819  ;;  %v10217_v21 = vadd.f32 1.0, %v11818_v50 }
 0x8ef   : > { %v10280_v61 = vmul.f32 %v11820_v52, %v18545_v26 }
 0x8f0   : > { %11821 = vrcp.f32 %v10217_v21 }
 0x8f1   : > { %v10312_v53 = vadd.f32 %v11887_v25, %v10280_v61 }
 0x8f3   : > { %10345 = vst.msk [vmem:[%s17384_s9 + $0x80] sm:$0xff] %vm10328_vm1, %v10312_v53 }
 0x8f4   : > { %10378 = vst.msk [vmem:[%s17384_s9 + $0x80] sm:$0xff] %vm10361_vm2, %v18546_v62 }
 0x8f6   : > { %v11822_v41 = vpop.eup %11821 }
 0x8f7   : > { %v10281_v60 = vmul.f32 %v11822_v41, %v18547_v6 }
 0x8f9   : > { %v10313_v0 = vadd.f32 %v11888_v4, %v10281_v60 }
 0x8fb   : > { %10346 = vst.msk [vmem:[%s17384_s9 + $0x88] sm:$0xff] %vm10328_vm1, %v10313_v0 }
 0x8fc   : > { %10379 = vst.msk [vmem:[%s17384_s9 + $0x88] sm:$0xff] %vm10361_vm2, %v18548_v28 }
 0x8fd PF: > { %s17_s24 = sadd.s32 1, %s11895_s24  }
 0x8fe   : > { %p14_p4 = scmp.ge.s32.totalorder %s17_s24, 4  }
 0x900   :  { %16 = sbr.rel (!%p14_p4) target bundleno = 1 (0x1), region = 81 }

</bundles_post_ra>
